<compile_context>
chip_gen: v5e
topology: v5e:2x2
jax: 0.10.0
libtpu: 0.0.40
codegen_flags: <defaults>
</compile_context>

<pallas_src>
import jax
import jax.numpy as jnp
from jax.experimental import pallas as pl
from jax.experimental.pallas import tpu as pltpu

# ---- module constants (from the PyTorch file) ----
compression_factor = 4
feature_vector_size = 256
image_dimension = 128
n_counties = 67

downsized = image_dimension // 16                      # 8
first_layer_size = downsized * downsized * 64          # 4096
hidden_size = first_layer_size // compression_factor   # 1024


def encoder_kernel(x_ref, w1q_ref, s1_ref, b1_ref, w2t_ref, b2_ref, o_ref, h_acc):
    """Fused fc1 -> relu -> (dropout=id) -> fc2 -> relu.

    Grid axis 0 reduces over fc1's input dimension K1.  h_acc (N, H) is an f32
    VMEM accumulator resident across the grid holding the *unscaled* int8
    weight dot-product; per-H-column dequant scales and b1 are applied in the
    last-step epilogue, followed by relu -> fc2 -> relu.
    """
    k = pl.program_id(0)

    @pl.when(k == 0)
    def _():
        h_acc[...] = jnp.zeros_like(h_acc)

    # Partial fc1 matmul for this K-tile.  W1 streams as int8 (4 MiB total),
    # is cast to bf16 in VMEM (exact for |q| <= 127, hidden under DMA), and the
    # MXU runs bf16 x bf16 -> f32 on every generation.
    w_tile = w1q_ref[...].astype(jnp.bfloat16)
    h_acc[...] += jnp.dot(x_ref[...], w_tile, preferred_element_type=jnp.float32)

    @pl.when(k == pl.num_programs(0) - 1)
    def _():
        # Per-output-channel dequant + bias, then relu.
        # (dropout(p=0.3) == identity in eval mode)
        h = jnp.maximum(h_acc[...] * s1_ref[...] + b1_ref[...], 0.0)
        # fc2 + bias + relu (W2^T is small and stays resident in VMEM)
        z = jnp.dot(h.astype(jnp.bfloat16), w2t_ref[...],
                    preferred_element_type=jnp.float32)
        o_ref[...] = jnp.maximum(z + b2_ref[...], 0.0).astype(o_ref.dtype)


def prepare_encoder_params(w1, b1, w2, b2):
    """One-time (init-time) conversion from torch layout to the kernel's
    canonical layout:
      * W1: transposed, int8 weight-only quantized with per-output-channel
        (per-H-column) abs-max scales -> (K1, H) int8 + (1, H) f32 scales.
      * W2: transposed bf16 (only 0.5 MiB; stays resident in VMEM).
      * biases: (1, D) f32.
    Run this when the model is created, NOT per forward call."""
    w1t = jnp.transpose(w1).astype(jnp.float32)                 # (K1, H) f32
    absmax = jnp.max(jnp.abs(w1t), axis=0, keepdims=True)       # (1, H)
    scale = jnp.maximum(absmax, 1e-8) / 127.0                   # (1, H) > 0
    w1q = jnp.clip(jnp.round(w1t / scale), -127, 127).astype(jnp.int8)
    s1 = scale.astype(jnp.float32)
    w2t = jnp.transpose(w2).astype(jnp.bfloat16)                # (H, F) bf16
    b1r = b1.astype(jnp.float32).reshape(1, -1)                 # (1, H) f32
    b2r = b2.astype(jnp.float32).reshape(1, -1)                 # (1, F) f32
    return w1q, s1, b1r, w2t, b2r


def encoder_forward(x, w1q, s1, b1r, w2t, b2r, *, tk=1024):
    """x: (N, K1).  Canonical params from prepare_encoder_params:
    w1q: (K1, H) int8, s1/b1r: (1, H) f32, w2t: (H, F) bf16, b2r: (1, F) f32."""
    N, K1 = x.shape
    H = w1q.shape[1]
    Fo = w2t.shape[1]

    # Stream X in bf16 (halves the X tile bytes + VMEM double-buffer).
    x = x.astype(jnp.bfloat16)

    # Keep tk a divisor of K1 so the reduction grid tiles K exactly.
    tk = min(tk, K1)
    while K1 % tk:
        tk //= 2
    n_k = K1 // tk

    cost = pl.CostEstimate(
        flops=2 * N * K1 * H + 2 * N * H * Fo,
        transcendentals=0,
        bytes_accessed=(N * K1 * 2          # X  (bf16)
                        + K1 * H * 1        # W1 (int8)
                        + H * Fo * 2        # W2 (bf16)
                        + (2 * H + Fo) * 4  # scales + biases (f32)
                        + N * Fo * 4),      # output (f32)
    )

    return pl.pallas_call(
        encoder_kernel,
        out_shape=jax.ShapeDtypeStruct((N, Fo), jnp.float32),
        grid_spec=pltpu.PrefetchScalarGridSpec(
            num_scalar_prefetch=0,
            grid=(n_k,),
            in_specs=[
                pl.BlockSpec((N, tk), lambda k: (0, k)),   # X tile  (streamed, bf16)
                pl.BlockSpec((tk, H), lambda k: (k, 0)),   # W1 tile (streamed, int8)
                pl.BlockSpec((1, H),  lambda k: (0, 0)),   # scales  (resident)
                pl.BlockSpec((1, H),  lambda k: (0, 0)),   # b1      (resident)
                pl.BlockSpec((H, Fo), lambda k: (0, 0)),   # W2^T    (resident, bf16)
                pl.BlockSpec((1, Fo), lambda k: (0, 0)),   # b2      (resident)
            ],
            out_specs=pl.BlockSpec((N, Fo), lambda k: (0, 0)),
            scratch_shapes=[pltpu.VMEM((N, H), jnp.float32)],
        ),
        compiler_params=pltpu.CompilerParams(
            # TODO(synk): on v7x, add a CORE_PARALLEL H-split axis (2x512) with
            # a cross-core partial-z combine to use both TensorCores.
            dimension_semantics=("arbitrary",),
            # Actual need at tk=1024 with int8 W1 is ~4 MiB (1 MiB W1 tile
            # double-buffered + residents + acc + out); 16 MiB leaves headroom
            # on every generation incl. v7x's 32 MiB default scoped VMEM.
            vmem_limit_bytes=16 << 20,
        ),
        cost_estimate=cost,
    )(x, w1q, s1, b1r, w2t, b2r)


def encoder_reference(x, w1, b1, w2, b2):
    h = jnp.maximum(x @ w1.T + b1, 0.0)
    return jnp.maximum(h @ w2.T + b2, 0.0)


if __name__ == "__main__":
    key = jax.random.PRNGKey(0)
    k_x, k_w1, k_b1, k_w2, k_b2 = jax.random.split(key, 5)

    # Input stacked over counties: (n_counties, first_layer_size)
    x = jax.random.normal(k_x, (n_counties, first_layer_size), dtype=jnp.float32)

    # Deterministic parameter init (PyTorch Linear-style uniform bounds).
    lim1 = 1.0 / jnp.sqrt(jnp.float32(first_layer_size))
    w1 = jax.random.uniform(k_w1, (hidden_size, first_layer_size),
                            minval=-lim1, maxval=lim1, dtype=jnp.float32)
    b1 = jax.random.uniform(k_b1, (hidden_size,),
                            minval=-lim1, maxval=lim1, dtype=jnp.float32)

    lim2 = 1.0 / jnp.sqrt(jnp.float32(hidden_size))
    w2 = jax.random.uniform(k_w2, (feature_vector_size, hidden_size),
                            minval=-lim2, maxval=lim2, dtype=jnp.float32)
    b2 = jax.random.uniform(k_b2, (feature_vector_size,),
                            minval=-lim2, maxval=lim2, dtype=jnp.float32)

    # One-time parameter layout conversion + quantization (init path).
    params = jax.block_until_ready(prepare_encoder_params(w1, b1, w2, b2))

    out = jax.block_until_ready(encoder_forward(x, *params))
    ref = jax.block_until_ready(encoder_reference(x, w1, b1, w2, b2))

    assert out.shape == (n_counties, feature_vector_size), out.shape
    # bf16 activations + int8 per-channel W1 -> relaxed tolerance vs the pure
    # f32 reference (documented, not a bug; estimated error is a few e-3).
    max_err = float(jnp.max(jnp.abs(out - ref)))
    assert jnp.allclose(out, ref, atol=5e-2, rtol=5e-2), max_err

    print("KERNEL_OK")
</pallas_src>

<mosaic_0001>
module attributes {stable_mosaic.version = 11 : i64} {
  func.func @encoder_kernel(%arg0: i32, %arg1: memref<67x1024xbf16, #tpu.memory_space<vmem>>, %arg2: memref<1024x1024xi8, #tpu.memory_space<vmem>>, %arg3: memref<1x1024xf32, #tpu.memory_space<vmem>>, %arg4: memref<1x1024xf32, #tpu.memory_space<vmem>>, %arg5: memref<1024x256xbf16, #tpu.memory_space<vmem>>, %arg6: memref<1x256xf32, #tpu.memory_space<vmem>>, %arg7: memref<67x256xf32, #tpu.memory_space<vmem>>, %arg8: memref<67x1024xf32, #tpu.memory_space<vmem>>) attributes {dimension_semantics = [#tpu.dimension_semantics<arbitrary>], iteration_bounds = array<i64: 4>, scalar_prefetch = 0 : i64, scratch_operands = 1 : i64, tpu.core_type = #tpu.core_type<tc>, window_params = [{transform_indices = @transform_0, window_bounds = array<i64: 67, 1024>}, {transform_indices = @transform_1, window_bounds = array<i64: 1024, 1024>}, {pipeline_mode = #tpu.pipeline_mode<synchronous>, transform_indices = @transform_2, window_bounds = array<i64: 1, 1024>}, {pipeline_mode = #tpu.pipeline_mode<synchronous>, transform_indices = @transform_3, window_bounds = array<i64: 1, 1024>}, {pipeline_mode = #tpu.pipeline_mode<synchronous>, transform_indices = @transform_4, window_bounds = array<i64: 1024, 256>}, {pipeline_mode = #tpu.pipeline_mode<synchronous>, transform_indices = @transform_5, window_bounds = array<i64: 1, 256>}, {pipeline_mode = #tpu.pipeline_mode<synchronous>, transform_indices = @transform_6, window_bounds = array<i64: 67, 256>}]} {
    %c0_i32 = arith.constant 0 : i32
    %0 = arith.cmpi eq, %arg0, %c0_i32 : i32
    %1 = arith.extui %0 : i1 to i32
    %c0_i32_0 = arith.constant 0 : i32
    %2 = arith.cmpi ne, %1, %c0_i32_0 : i32
    scf.if %2 {
      %cst_9 = arith.constant 0.000000e+00 : f32
      %13 = vector.broadcast %cst_9 : f32 to vector<67x1024xf32>
      %c0_10 = arith.constant 0 : index
      %c0_11 = arith.constant 0 : index
      %14 = vector.load %arg8[%c0_10, %c0_11] : memref<67x1024xf32, #tpu.memory_space<vmem>>, vector<67x1024xf32>
      tpu.vector_store %arg8[%c0_10, %c0_11], %13 {strides = array<i32>} : memref<67x1024xf32, #tpu.memory_space<vmem>>, vector<67x1024xf32>,
    } else {
    }
    %c0 = arith.constant 0 : index
    %c0_1 = arith.constant 0 : index
    %3 = vector.load %arg2[%c0, %c0_1] : memref<1024x1024xi8, #tpu.memory_space<vmem>>, vector<1024x1024xi8>
    %4 = arith.sitofp %3 : vector<1024x1024xi8> to vector<1024x1024xbf16>
    %c0_2 = arith.constant 0 : index
    %c0_3 = arith.constant 0 : index
    %5 = vector.load %arg8[%c0_2, %c0_3] : memref<67x1024xf32, #tpu.memory_space<vmem>>, vector<67x1024xf32>
    %c0_4 = arith.constant 0 : index
    %c0_5 = arith.constant 0 : index
    %6 = vector.load %arg1[%c0_4, %c0_5] : memref<67x1024xbf16, #tpu.memory_space<vmem>>, vector<67x1024xbf16>
    %cst = arith.constant dense<0.000000e+00> : vector<67x1024xf32>
    %7 = tpu.matmul %6, %4, %cst {dimension_numbers = #tpu.dot_dimension_numbers<[1], [0], [0], [1], [0, 0, 1, 1], [], []>} : vector<67x1024xbf16>, vector<1024x1024xbf16>, vector<67x1024xf32> -> vector<67x1024xf32>
    %8 = arith.addf %5, %7 : vector<67x1024xf32>
    %c0_6 = arith.constant 0 : index
    %c0_7 = arith.constant 0 : index
    %9 = vector.load %arg8[%c0_6, %c0_7] : memref<67x1024xf32, #tpu.memory_space<vmem>>, vector<67x1024xf32>
    tpu.vector_store %arg8[%c0_6, %c0_7], %8 {strides = array<i32>} : memref<67x1024xf32, #tpu.memory_space<vmem>>, vector<67x1024xf32>,
    %c3_i32 = arith.constant 3 : i32
    %10 = arith.cmpi eq, %arg0, %c3_i32 : i32
    %11 = arith.extui %10 : i1 to i32
    %c0_i32_8 = arith.constant 0 : i32
    %12 = arith.cmpi ne, %11, %c0_i32_8 : i32
    scf.if %12 {
      %c0_9 = arith.constant 0 : index
      %c0_10 = arith.constant 0 : index
      %13 = vector.load %arg8[%c0_9, %c0_10] : memref<67x1024xf32, #tpu.memory_space<vmem>>, vector<67x1024xf32>
      %c0_11 = arith.constant 0 : index
      %c0_12 = arith.constant 0 : index
      %14 = vector.load %arg3[%c0_11, %c0_12] : memref<1x1024xf32, #tpu.memory_space<vmem>>, vector<1x1024xf32>
      %15 = vector.broadcast %14 : vector<1x1024xf32> to vector<67x1024xf32>
      %16 = arith.mulf %13, %15 : vector<67x1024xf32>
      %c0_13 = arith.constant 0 : index
      %c0_14 = arith.constant 0 : index
      %17 = vector.load %arg4[%c0_13, %c0_14] : memref<1x1024xf32, #tpu.memory_space<vmem>>, vector<1x1024xf32>
      %18 = vector.broadcast %17 : vector<1x1024xf32> to vector<67x1024xf32>
      %19 = arith.addf %16, %18 : vector<67x1024xf32>
      %cst_15 = arith.constant 0.000000e+00 : f32
      %20 = vector.broadcast %cst_15 : f32 to vector<67x1024xf32>
      %21 = arith.maximumf %19, %20 : vector<67x1024xf32>
      %22 = arith.truncf %21 : vector<67x1024xf32> to vector<67x1024xbf16>
      %c0_16 = arith.constant 0 : index
      %c0_17 = arith.constant 0 : index
      %23 = vector.load %arg5[%c0_16, %c0_17] : memref<1024x256xbf16, #tpu.memory_space<vmem>>, vector<1024x256xbf16>
      %cst_18 = arith.constant dense<0.000000e+00> : vector<67x256xf32>
      %24 = tpu.matmul %22, %23, %cst_18 {dimension_numbers = #tpu.dot_dimension_numbers<[1], [0], [0], [1], [0, 0, 1, 1], [], []>} : vector<67x1024xbf16>, vector<1024x256xbf16>, vector<67x256xf32> -> vector<67x256xf32>
      %c0_19 = arith.constant 0 : index
      %c0_20 = arith.constant 0 : index
      %25 = vector.load %arg6[%c0_19, %c0_20] : memref<1x256xf32, #tpu.memory_space<vmem>>, vector<1x256xf32>
      %26 = vector.broadcast %25 : vector<1x256xf32> to vector<67x256xf32>
      %27 = arith.addf %24, %26 : vector<67x256xf32>
      %cst_21 = arith.constant 0.000000e+00 : f32
      %28 = vector.broadcast %cst_21 : f32 to vector<67x256xf32>
      %29 = arith.maximumf %27, %28 : vector<67x256xf32>
      %c0_22 = arith.constant 0 : index
      %c0_23 = arith.constant 0 : index
      %30 = vector.load %arg7[%c0_22, %c0_23] : memref<67x256xf32, #tpu.memory_space<vmem>>, vector<67x256xf32>
      tpu.vector_store %arg7[%c0_22, %c0_23], %29 {strides = array<i32>} : memref<67x256xf32, #tpu.memory_space<vmem>>, vector<67x256xf32>,
    } else {
    }
    return
  }
  func.func @transform_0(%arg0: i32) -> (i32, i32) {
    %c0_i32 = arith.constant 0 : i32
    %c0_i32_0 = arith.constant 0 : i32
    return %c0_i32, %arg0 : i32, i32
  }
  func.func @transform_1(%arg0: i32) -> (i32, i32) {
    %c0_i32 = arith.constant 0 : i32
    %c0_i32_0 = arith.constant 0 : i32
    return %arg0, %c0_i32 : i32, i32
  }
  func.func @transform_2(%arg0: i32) -> (i32, i32) {
    %c0_i32 = arith.constant 0 : i32
    %c0_i32_0 = arith.constant 0 : i32
    %c0_i32_1 = arith.constant 0 : i32
    return %c0_i32, %c0_i32_0 : i32, i32
  }
  func.func @transform_3(%arg0: i32) -> (i32, i32) {
    %c0_i32 = arith.constant 0 : i32
    %c0_i32_0 = arith.constant 0 : i32
    %c0_i32_1 = arith.constant 0 : i32
    return %c0_i32, %c0_i32_0 : i32, i32
  }
  func.func @transform_4(%arg0: i32) -> (i32, i32) {
    %c0_i32 = arith.constant 0 : i32
    %c0_i32_0 = arith.constant 0 : i32
    %c0_i32_1 = arith.constant 0 : i32
    return %c0_i32, %c0_i32_0 : i32, i32
  }
  func.func @transform_5(%arg0: i32) -> (i32, i32) {
    %c0_i32 = arith.constant 0 : i32
    %c0_i32_0 = arith.constant 0 : i32
    %c0_i32_1 = arith.constant 0 : i32
    return %c0_i32, %c0_i32_0 : i32, i32
  }
  func.func @transform_6(%arg0: i32) -> (i32, i32) {
    %c0_i32 = arith.constant 0 : i32
    %c0_i32_0 = arith.constant 0 : i32
    %c0_i32_1 = arith.constant 0 : i32
    return %c0_i32, %c0_i32_0 : i32, i32
  }
}

</mosaic_0001>

<bundles_post_ra>
// kernel: tpu_custom_call.1
= control target key start
LH: loop header
LB: loop body
LE: loop exit
PB: predicated region body
PF: predicated region fallthrough
CT: control target
= control target key end

     0   :  { %s10706_s0 = inlined_call_operand.hbm [shape: bf16[67,4096], index: 0, kind: input, shape index: {}]   ;;  %s10707_s1 = inlined_call_operand.hbm [shape: s8[4096,1024], index: 1, kind: input, shape index: {}]   ;;  %s10708_s2 = inlined_call_operand.hbm [shape: f32[1,1024], index: 2, kind: input, shape index: {}]   ;;  %s10709_s3 = inlined_call_operand.hbm [shape: f32[1,1024], index: 3, kind: input, shape index: {}]   ;;  %s10710_s4 = inlined_call_operand.hbm [shape: bf16[1024,256], index: 4, kind: input, shape index: {}]   ;;  %s10711_s5 = inlined_call_operand.hbm [shape: f32[1,256], index: 5, kind: input, shape index: {}]   ;;  %s10712_s6 = inlined_call_operand.hbm [shape: f32[67,256], index: 6, kind: output, shape index: {}]  }
   0x1   :  { %10758 = sst [smem:[#allocation44_spill]] %s10706_s0 }
   0x2   :  { %10759 = sst [smem:[#allocation45_spill]] %s10708_s2 }
   0x3   :  { %10760 = sst [smem:[#allocation46_spill]] %s10709_s3 }
   0x4   :  { %10761 = sst [smem:[#allocation47_spill]] %s10710_s4 }
   0x5   :  { %11 = vsyncpa [#allocation4], 0 }
   0x6   :  { %13 = vsyncpa [#allocation4 + $0x1], 0 }
   0x7   :  { %14 = vsyncpa [#allocation7], 0 }
   0x8   :  { %16 = vsyncpa [#allocation7 + $0x1], 0 }
   0x9   :  { %17 = vsyncpa [#allocation10], 0 }
   0xa   :  { %18 = vsyncpa [#allocation13], 0 }
   0xb   :  { %19 = vsyncpa [#allocation5], 0  ;;  %s8883_s21 = smov 0   ;;  %s8885_s22 = smov 0  }
   0xc   :  { %s8887_s23 = smov 0   ;;  %s8889_s24 = smov 0  }
   0xd LB: > { %s8902_s25 = sadd.s32 4294967295, %s8831_s24   ;;  %p45_p0 = scmp.ne.s32.totalorder %s8823_s22, %s8819_s21  ;;  %s8831_s24 = sphi %s8889_s24, %s10883_s24   ;;  %s8827_s23 = sphi %s8887_s23, %s10882_s23   ;;  %s8823_s22 = sphi %s8885_s22, %s10881_s22   ;;  %s8819_s21 = sphi %s8883_s21, %s10880_s21  }
   0xe   : > { %p46_p1 = scmp.eq.s32.totalorder %s8902_s25, 0  ;;  %p7638_p2 = scmp.ge.s32.totalorder %s8831_s24, 1 }
   0xf   : > { %p187_p3 = scmp.lt.s32.totalorder %s8831_s24, 5  ;;  %p7639_p4 = scmp.ne.s32.totalorder %s8902_s25, 0 }
  0x10   : > { %p8911_p5 = por %p46_p1, %p45_p0  ;;  %s10763_s2 = sld [smem:[#allocation45_spill]] }
  0x11   : > { %p8918_p6 = pnand %p7638_p2, %p187_p3  ;;  %s8833_s7 = smov [#allocation8]  }
  0x12   : > { %s201_s8 = sshll.u32 %s8833_s7, 4  ;;  %s10765_s3 = sld [smem:[#allocation46_spill]]  ;;  %s202_s8 = int_to_ptr.vmem [resolvable:$true] %s201_s8 }
  0x13   : > { %p8491_p7 = pneg %p8918_p6  ;;  %s10767_s4 = sld [smem:[#allocation47_spill]] }
  0x14   : > { %s8834_s16 = smov [#allocation9]   ;;  %s8835_s18 = smov [#allocation11]  }
  0x15   : > { %p8929_p8 = pnand %p8491_p7, %p46_p1  ;;  %s213_s17 = sshll.u32 %s8834_s16, 4  ;;  %s214_s17 = int_to_ptr.vmem [resolvable:$true] %s213_s17 }
  0x16   : > { %s199_s29 = sshll.u32 %s10763_s2, 4  ;;  %s224_s19 = sshll.u32 %s8835_s18, 4  ;;  %s200_s29 = int_to_ptr.hbm [resolvable:$true] %s199_s29  ;;  %s225_s19 = int_to_ptr.vmem [resolvable:$true] %s224_s19 }
  0x17   : > { %8494 = dma.hbm_to_vmem [thread:$0]  (!%p8929_p8), %s200_s29, 128, %s202_s8, [#allocation7]  }
  0x18   : > { %s211_s11 = sshll.u32 %s10765_s3, 4  ;;  %s237_s27 = sshll.u32 %s10711_s5, 4  ;;  %s212_s11 = int_to_ptr.hbm [resolvable:$true] %s211_s11  ;;  %s238_s27 = int_to_ptr.hbm [resolvable:$true] %s237_s27 }
  0x19   : > { %s222_s15 = sshll.u32 %s10767_s4, 4  ;;  %s8836_s28 = smov 128   ;;  %s223_s15 = int_to_ptr.hbm [resolvable:$true] %s222_s15 }
  0x1a   : > { %8497 = dma.hbm_to_vmem [thread:$0]  (!%p8929_p8), %s212_s11, 128, %s214_s17, [#allocation10]  }
  0x1b   : > { %s8837_s29 = smov 8   ;;  %s8838_s7 = smov [#allocation12]  }
  0x1c   : > { %8500 = dma.hbm_to_vmem [thread:$0]  (!%p8929_p8), %s223_s15, 16384, %s225_s19, [#allocation10], %s8836_s28, %s8836_s28, %s8837_s29  }
  0x1d   : > { %s239_s8 = sshll.u32 %s8838_s7, 4  ;;  %s8948_s9 = sadd.s32 1, %s8831_s24   ;;  %s240_s8 = int_to_ptr.vmem [resolvable:$true] %s239_s8 }
  0x1e   : > { %8503 = dma.hbm_to_vmem [thread:$0]  (!%p8929_p8), %s238_s27, 32, %s240_s8, [#allocation13]  }
  0x1f   : > { %s32_s10 = sadd.s32 1, %s8827_s23  ;;  %s29_s11 = ssub.s32 %s8831_s24, %s8948_s9 }
  0x20   : > { %p39_p9 = scmp.ne.s32.totalorder %s8827_s23, %s8823_s22  ;;  %p30_p10 = scmp.eq.s32.totalorder %s29_s11, 0 }
  0x21   : > { %p40_p11 = scmp.eq.s32.totalorder %s8831_s24, 0  ;;  %p8515_p12 = scmp.lt.s32.totalorder %s8831_s24, 4 }
  0x22   : > { %s8958_s13 = sand.u32 1, %s8827_s23   ;;  %s8302_s12 = sshll.u32 %s8831_s24, 5 }
  0x23   : > { %s8961_s14 = scalar_select %p30_p10, %s8827_s23, %s32_s10  }
  0x24   : > { %p41_p13 = por %p40_p11, %p39_p9  ;;  %s8465_s15 = smul.u32 288, %s8958_s13 }
  0x25   : > { %s10768_s0 = sld [smem:[#allocation44_spill]]  ;;  %s272_s28 = sand.u32 1, %s8831_s24  }
  0x26   : > { %p8968_p0 = pnand %p8515_p12, %p41_p13  ;;  %s254_s21 = scalar_lea.vmem [#allocation3], %s8465_s15 }
  0x27   : > { %s262_s27 = sshll.u32 %s254_s21, 4  ;;  %s251_s29 = scalar_lea.sflag [#allocation4], %s8958_s13  ;;  %s263_s27 = int_to_ptr.vmem [resolvable:$true] %s262_s27 }
  0x28   : > { %p8693_p3 = pneg %p8968_p0 }
  0x2b   : > { %s259_s18 = scalar_lea.hbm %s10768_s0, %s8302_s12  ;;  %s8696_s12 = scalar_lea.hbm %s10768_s0, 1152 }
  0x2c   : > { %s260_s20 = sshll.u32 %s259_s18, 4  ;;  %s261_s20 = int_to_ptr.hbm [resolvable:$true] %s260_s20 }
  0x2d   : > { %s8689_s7 = sshra.s32 %s261_s20, 4  ;;  %s8690_s7 = int_to_ptr.hbm [resolvable:$true] %s8689_s7 }
  0x2e   : > { %s8691_s8 = scalar_lea.hbm %s8690_s7, 288  ;;  %p8697_p9 = scmp.lt.s32.totalorder %s8690_s7, %s10768_s0 }
  0x2f   : > { %p8692_p2 = scmp.ne.s32.totalorder %s8690_s7, %s8691_s8  ;;  %p8698_p10 = scmp.lt.s32.totalorder %s8696_s12, %s8691_s8 }
  0x31   : > { %p8694_p7 = pnand %p8693_p3, %p8692_p2  ;;  %p8699_p11 = por %p8698_p10, %p8697_p9 }
  0x33   : > { %p8695_p8 = pneg %p8694_p7 }
  0x35   : > { %p8700_p12 = pnand %p8699_p11, %p8695_p8 }
  0x37   : > { %8703 = shalt.err (!%p8700_p12)
}
  0x38   : > { %s8839_s17 = smov 2048   ;;  %s8840_s18 = smov 512  }
  0x39   : > { %s8841_s21 = smov 32   ;;  %s7646_s2 = sshll.u32 %s8958_s13, 11 }
  0x3a   : > { %8507 = dma.hbm_to_vmem [thread:$0]  (!%p8968_p0), %s261_s20, 4608, %s263_s27, %s251_s29, %s8839_s17, %s8840_s18, %s8841_s21  }
  0x3b   : > { %s8304_s10 = sshll.u32 %s8831_s24, 11  ;;  %s276_s7 = scalar_lea.vmem [#allocation6], %s7646_s2 }
  0x3c   : > { %s282_s16 = scalar_lea.hbm %s10707_s1, %s8304_s10  ;;  %s285_s8 = sshll.u32 %s276_s7, 4  ;;  %s286_s8 = int_to_ptr.vmem [resolvable:$true] %s285_s8 }
  0x3d   : > { %s283_s12 = sshll.u32 %s282_s16, 4  ;;  %s273_s15 = scalar_lea.sflag [#allocation7], %s272_s28  ;;  %s284_s12 = int_to_ptr.hbm [resolvable:$true] %s283_s12 }
  0x3e   : > { %s8719_s0 = sshra.s32 %s284_s12, 4  ;;  %s8726_s20 = scalar_lea.hbm %s10707_s1, 8192  ;;  %s8720_s0 = int_to_ptr.hbm [resolvable:$true] %s8719_s0 }
  0x3f   : > { %s8721_s4 = scalar_lea.hbm %s8720_s0, 2048  ;;  %p8727_p8 = scmp.lt.s32.totalorder %s8720_s0, %s10707_s1 }
  0x40   : > { %p8722_p13 = scmp.ne.s32.totalorder %s8720_s0, %s8721_s4  ;;  %p8728_p9 = scmp.lt.s32.totalorder %s8726_s20, %s8721_s4 }
  0x42   : > { %p8724_p2 = pnand %p8722_p13, %p8693_p3  ;;  %p8729_p10 = por %p8728_p9, %p8727_p8 }
  0x44   : > { %p8725_p7 = pneg %p8724_p2 }
  0x46   : > { %p8730_p11 = pnand %p8729_p10, %p8725_p7 }
  0x48   : > { %8733 = shalt.err (!%p8730_p11)
}
  0x49   : > { %s8842_s2 = smov 1024   ;;  %s8843_s28 = smov 64  }
  0x4a   : > { %8510 = dma.hbm_to_vmem [thread:$0]  (!%p8968_p0), %s284_s12, 32768, %s286_s8, %s273_s15, %s8842_s2, %s8842_s2, %s8843_s28  }
  0x4b   : > { %297 = sbr.rel (%p8918_p6) target bundleno = 2110 (0x83e), region = 44 }
  0x50   : > { %s299_s29 = sand.u32 1, %s8823_s22  }
  0x51   : > { %s8466_s17 = smul.u32 288, %s299_s29  ;;  %s300_s18 = scalar_lea.sflag [#allocation4], %s299_s29 }
  0x53   : > { %s9006_s21 = scalar_lea.vmem [#allocation3], %s8466_s17 }
  0x54   : > { %8794 = dma.done.wait (%p8911_p5), %s300_s18, 4608  }
  0x55   : > { %8796 = vsyncadd (%p8911_p5), %s300_s18, 4294962688  ;;  %s309_s0 = sand.u32 1, %s8902_s25   ;;  %s7651_s4 = sshll.u32 %s299_s29, 11 }
  0x56   : > { %s310_s19 = scalar_lea.sflag [#allocation7], %s309_s0  ;;  %s9013_s10 = scalar_lea.vmem [#allocation6], %s7651_s4 }
  0x57   : > { %8798 = dma.done.wait (%p8911_p5), %s310_s19, 32768  }
  0x58   : > { %8800 = vsyncadd (%p8911_p5), %s310_s19, 4294934528 }
  0x59   : > { %8802 = dma.done.wait (%p46_p1), [#allocation7], 128  }
  0x5a   : > { %8804 = vsyncadd (%p46_p1), [#allocation7], 4294967168 }
  0x5b   : > { %8806 = dma.done.wait (%p46_p1), [#allocation10], 16512  }
  0x5c   : > { %8808 = vsyncadd (%p46_p1), [#allocation10], 4294950784 }
  0x5d   : > { %8810 = dma.done.wait (%p46_p1), [#allocation13], 32  }
  0x5e   : > { %8812 = vsyncadd (%p46_p1), [#allocation13], 4294967264  ;;  %368 = sbr.rel (%p7639_p4) target bundleno = 172 (0xac), region = 72 }
  0x63   : > { %v8844_v0 = vmov 0.0  }
  0x64   : > { %369 = vst [vmem:[#allocation2 + $0xc8] sm:$0xff] %v8844_v0 }
  0x65   : > { %370 = vst [vmem:[#allocation2 + $0x8] sm:$0xff] %v8844_v0 }
  0x66   : > { %371 = vst [vmem:[#allocation2 + $0x40] sm:$0xff] %v8844_v0 }
  0x67   : > { %372 = vst [vmem:[#allocation2 + $0x28] sm:$0xff] %v8844_v0 }
  0x68   : > { %373 = vst [vmem:[#allocation2 + $0xe8] sm:$0xff] %v8844_v0 }
  0x69   : > { %374 = vst [vmem:[#allocation2 + $0xf0] sm:$0xff] %v8844_v0 }
  0x6a   : > { %375 = vst [vmem:[#allocation2 + $0x70] sm:$0xff] %v8844_v0 }
  0x6b   : > { %376 = vst [vmem:[#allocation2 + $0x120] sm:$0xff] %v8844_v0 }
  0x6c   : > { %377 = vst [vmem:[#allocation2 + $0xd8] sm:$0xff] %v8844_v0 }
  0x6d   : > { %378 = vst [vmem:[#allocation2 + $0x18] sm:$0xff] %v8844_v0 }
  0x6e   : > { %379 = vst [vmem:[#allocation2 + $0xb0] sm:$0xff] %v8844_v0 }
  0x6f   : > { %380 = vst [vmem:[#allocation2 + $0x158] sm:$0xff] %v8844_v0 }
  0x70   : > { %381 = vst [vmem:[#allocation2 + $0x108] sm:$0xff] %v8844_v0 }
  0x71   : > { %382 = vst [vmem:[#allocation2 + $0x110] sm:$0xff] %v8844_v0 }
  0x72   : > { %383 = vst [vmem:[#allocation2 + $0x1f8] sm:$0xff] %v8844_v0 }
  0x73   : > { %384 = vst [vmem:[#allocation2 + $0xb8] sm:$0xff] %v8844_v0 }
  0x74   : > { %385 = vst [vmem:[#allocation2 + $0x180] sm:$0xff] %v8844_v0 }
  0x75   : > { %386 = vst [vmem:[#allocation2 + $0x190] sm:$0xff] %v8844_v0 }
  0x76   : > { %387 = vst [vmem:[#allocation2 + $0x140] sm:$0xff] %v8844_v0 }
  0x77   : > { %388 = vst [vmem:[#allocation2 + $0x1c0] sm:$0xff] %v8844_v0 }
  0x78   : > { %389 = vst [vmem:[#allocation2 + $0xd0] sm:$0xff] %v8844_v0 }
  0x79   : > { %390 = vst [vmem:[#allocation2 + $0x138] sm:$0xff] %v8844_v0 }
  0x7a   : > { %391 = vst [vmem:[#allocation2 + $0x60] sm:$0xff] %v8844_v0 }
  0x7b   : > { %392 = vst [vmem:[#allocation2 + $0x1b8] sm:$0xff] %v8844_v0 }
  0x7c   : > { %393 = vst [vmem:[#allocation2 + $0x88] sm:$0xff] %v8844_v0 }
  0x7d   : > { %394 = vst [vmem:[#allocation2] sm:$0xff] %v8844_v0 }
  0x7e   : > { %395 = vst [vmem:[#allocation2 + $0x188] sm:$0xff] %v8844_v0 }
  0x7f   : > { %396 = vst [vmem:[#allocation2 + $0x38] sm:$0xff] %v8844_v0 }
  0x80   : > { %397 = vst [vmem:[#allocation2 + $0x1a8] sm:$0xff] %v8844_v0 }
  0x81   : > { %398 = vst [vmem:[#allocation2 + $0x220] sm:$0xff] %v8844_v0 }
  0x82   : > { %399 = vst [vmem:[#allocation2 + $0x1e8] sm:$0xff] %v8844_v0 }
  0x83   : > { %400 = vst [vmem:[#allocation2 + $0x1c8] sm:$0xff] %v8844_v0 }
  0x84   : > { %401 = vst [vmem:[#allocation2 + $0x80] sm:$0xff] %v8844_v0 }
  0x85   : > { %402 = vst [vmem:[#allocation2 + $0xf8] sm:$0xff] %v8844_v0 }
  0x86   : > { %403 = vst [vmem:[#allocation2 + $0x78] sm:$0xff] %v8844_v0 }
  0x87   : > { %404 = vst [vmem:[#allocation2 + $0x170] sm:$0xff] %v8844_v0 }
  0x88   : > { %405 = vst [vmem:[#allocation2 + $0x198] sm:$0xff] %v8844_v0 }
  0x89   : > { %406 = vst [vmem:[#allocation2 + $0xe0] sm:$0xff] %v8844_v0 }
  0x8a   : > { %407 = vst [vmem:[#allocation2 + $0x1e0] sm:$0xff] %v8844_v0 }
  0x8b   : > { %408 = vst [vmem:[#allocation2 + $0x1f0] sm:$0xff] %v8844_v0 }
  0x8c   : > { %409 = vst [vmem:[#allocation2 + $0x48] sm:$0xff] %v8844_v0 }
  0x8d   : > { %410 = vst [vmem:[#allocation2 + $0x98] sm:$0xff] %v8844_v0 }
  0x8e   : > { %411 = vst [vmem:[#allocation2 + $0x238] sm:$0xff] %v8844_v0 }
  0x8f   : > { %412 = vst [vmem:[#allocation2 + $0x160] sm:$0xff] %v8844_v0 }
  0x90   : > { %413 = vst [vmem:[#allocation2 + $0x50] sm:$0xff] %v8844_v0 }
  0x91   : > { %414 = vst [vmem:[#allocation2 + $0x100] sm:$0xff] %v8844_v0 }
  0x92   : > { %415 = vst [vmem:[#allocation2 + $0x30] sm:$0xff] %v8844_v0 }
  0x93   : > { %416 = vst [vmem:[#allocation2 + $0x1b0] sm:$0xff] %v8844_v0 }
  0x94   : > { %417 = vst [vmem:[#allocation2 + $0x90] sm:$0xff] %v8844_v0 }
  0x95   : > { %418 = vst [vmem:[#allocation2 + $0x130] sm:$0xff] %v8844_v0 }
  0x96   : > { %419 = vst [vmem:[#allocation2 + $0x68] sm:$0xff] %v8844_v0 }
  0x97   : > { %420 = vst [vmem:[#allocation2 + $0x230] sm:$0xff] %v8844_v0 }
  0x98   : > { %421 = vst [vmem:[#allocation2 + $0x1d8] sm:$0xff] %v8844_v0 }
  0x99   : > { %422 = vst [vmem:[#allocation2 + $0x228] sm:$0xff] %v8844_v0 }
  0x9a   : > { %423 = vst [vmem:[#allocation2 + $0x218] sm:$0xff] %v8844_v0 }
  0x9b   : > { %424 = vst [vmem:[#allocation2 + $0x200] sm:$0xff] %v8844_v0 }
  0x9c   : > { %425 = vst [vmem:[#allocation2 + $0x10] sm:$0xff] %v8844_v0 }
  0x9d   : > { %426 = vst [vmem:[#allocation2 + $0x128] sm:$0xff] %v8844_v0 }
  0x9e   : > { %427 = vst [vmem:[#allocation2 + $0x178] sm:$0xff] %v8844_v0 }
  0x9f   : > { %428 = vst [vmem:[#allocation2 + $0x208] sm:$0xff] %v8844_v0 }
  0xa0   : > { %429 = vst [vmem:[#allocation2 + $0x210] sm:$0xff] %v8844_v0 }
  0xa1   : > { %430 = vst [vmem:[#allocation2 + $0x1d0] sm:$0xff] %v8844_v0 }
  0xa2   : > { %431 = vst [vmem:[#allocation2 + $0x168] sm:$0xff] %v8844_v0 }
  0xa3   : > { %432 = vst [vmem:[#allocation2 + $0xc0] sm:$0xff] %v8844_v0 }
  0xa4   : > { %433 = vst [vmem:[#allocation2 + $0x1a0] sm:$0x7] %v8844_v0 }
  0xa5   : > { %434 = vst [vmem:[#allocation2 + $0x58] sm:$0x7] %v8844_v0 }
  0xa6   : > { %435 = vst [vmem:[#allocation2 + $0x118] sm:$0x7] %v8844_v0 }
  0xa7   : > { %436 = vst [vmem:[#allocation2 + $0x20] sm:$0x7] %v8844_v0 }
  0xa8   : > { %437 = vst [vmem:[#allocation2 + $0x148] sm:$0x7] %v8844_v0 }
  0xa9   : > { %438 = vst [vmem:[#allocation2 + $0xa8] sm:$0x7] %v8844_v0 }
  0xaa   : > { %439 = vst [vmem:[#allocation2 + $0x150] sm:$0x7] %v8844_v0 }
  0xab   : > { %440 = vst [vmem:[#allocation2 + $0xa0] sm:$0x7] %v8844_v0 }
  0xac PF: > { %v465_v1 = vld [vmem:[%s9013_s10 + $0xc0] sm:$0xff]  ;;  %p7785_p1 = scmp.ne.s32.totalorder %s8902_s25, 3 }
  0xad   : > { %v497_v2 = vld [vmem:[%s9013_s10 + $0x1c0] sm:$0xff]  ;;  %v809_v4 = vunpack.c.2.s8 %v465_v1  ;;  %v817_v5 = vunpack.c.3.s8 %v465_v1  ;;  %v793_v23 = vunpack.c.0.s8 %v465_v1  ;;  %v801_v24 = vunpack.c.1.s8 %v465_v1 }
  0xae   : > { %v529_v3 = vld [vmem:[%s9013_s10 + $0x2c0] sm:$0xff]  ;;  %v937_v6 = vunpack.c.2.s8 %v497_v2  ;;  %v945_v7 = vunpack.c.3.s8 %v497_v2  ;;  %v921_v27 = vunpack.c.0.s8 %v497_v2  ;;  %v929_v28 = vunpack.c.1.s8 %v497_v2 }
  0xaf   : > { %v561_v8 = vld [vmem:[%s9013_s10 + $0x3c0] sm:$0xff]  ;;  %v1065_v9 = vunpack.c.2.s8 %v529_v3  ;;  %v1073_v10 = vunpack.c.3.s8 %v529_v3  ;;  %v1833_v13 = vcvt.s32.f32 %v809_v4  ;;  %v1841_v14 = vcvt.s32.f32 %v817_v5 }
  0xb0   : > { %v1193_v11 = vunpack.c.2.s8 %v561_v8  ;;  %v1201_v12 = vunpack.c.3.s8 %v561_v8  ;;  %v1961_v15 = vcvt.s32.f32 %v937_v6  ;;  %v1969_v16 = vcvt.s32.f32 %v945_v7  ;;  %v457_v29 = vld [vmem:[%s9013_s10 + $0x80] sm:$0xff] }
  0xb1   : > { %v2089_v17 = vcvt.s32.f32 %v1065_v9  ;;  %v2097_v18 = vcvt.s32.f32 %v1073_v10  ;;  %v2801_v21 = vpack.c.bf16 %v1841_v14, %v1833_v13  ;;  %v1817_v30 = vcvt.s32.f32 %v793_v23  ;;  %v489_v38 = vld [vmem:[%s9013_s10 + $0x180] sm:$0xff] }
  0xb2   : > { %v2217_v19 = vcvt.s32.f32 %v1193_v11  ;;  %v2225_v20 = vcvt.s32.f32 %v1201_v12  ;;  %v2865_v22 = vpack.c.bf16 %v1969_v16, %v1961_v15  ;;  %v1825_v31 = vcvt.s32.f32 %v801_v24  ;;  %v521_v43 = vld [vmem:[%s9013_s10 + $0x280] sm:$0xff] }
  0xb3   : > { %v2929_v25 = vpack.c.bf16 %v2097_v18, %v2089_v17  ;;  %3553 = vmatpush.bf16.msra.mxu0 %v2801_v21  ;;  %v1049_v32 = vunpack.c.0.s8 %v529_v3  ;;  %v1057_v33 = vunpack.c.1.s8 %v529_v3  ;;  %v1945_v34 = vcvt.s32.f32 %v921_v27  ;;  %v553_v48 = vld [vmem:[%s9013_s10 + $0x380] sm:$0xff] }
  0xb4   : > { %v2993_v26 = vpack.c.bf16 %v2225_v20, %v2217_v19  ;;  %3586 = vmatpush.bf16.msra.mxu1 %v2865_v22  ;;  %v1953_v35 = vcvt.s32.f32 %v929_v28  ;;  %v1177_v36 = vunpack.c.0.s8 %v561_v8  ;;  %v1185_v37 = vunpack.c.1.s8 %v561_v8  ;;  %v449_v9 = vld [vmem:[%s9013_s10 + $0x40] sm:$0xff] }
  0xb5   : > { %3619 = vmatpush.bf16.msra.mxu2 %v2929_v25  ;;  %v2793_v39 = vpack.c.bf16 %v1825_v31, %v1817_v30  ;;  %v2073_v40 = vcvt.s32.f32 %v1049_v32  ;;  %v2081_v41 = vcvt.s32.f32 %v1057_v33  ;;  %v777_v42 = vunpack.c.2.s8 %v457_v29  ;;  %v481_v18 = vld [vmem:[%s9013_s10 + $0x140] sm:$0xff] }
  0xb6   : > { %3652 = vmatpush.bf16.msra.mxu3 %v2993_v26  ;;  %v2857_v44 = vpack.c.bf16 %v1953_v35, %v1945_v34  ;;  %v2201_v45 = vcvt.s32.f32 %v1177_v36  ;;  %v2209_v46 = vcvt.s32.f32 %v1185_v37  ;;  %v785_v47 = vunpack.c.3.s8 %v457_v29  ;;  %v513_v23 = vld [vmem:[%s9013_s10 + $0x240] sm:$0xff] }
  0xb7   : > { %3554 = vmatpush.bf16.msra.mxu0 %v2793_v39  ;;  %v2921_v49 = vpack.c.bf16 %v2081_v41, %v2073_v40  ;;  %v1801_v50 = vcvt.s32.f32 %v777_v42  ;;  %v905_v51 = vunpack.c.2.s8 %v489_v38  ;;  %v913_v52 = vunpack.c.3.s8 %v489_v38  ;;  %v545_v28 = vld [vmem:[%s9013_s10 + $0x340] sm:$0xff] }
  0xb8   : > { %3587 = vmatpush.bf16.msra.mxu1 %v2857_v44  ;;  %v2985_v53 = vpack.c.bf16 %v2209_v46, %v2201_v45  ;;  %v1809_v54 = vcvt.s32.f32 %v785_v47  ;;  %v1033_v55 = vunpack.c.2.s8 %v521_v43  ;;  %v1041_v56 = vunpack.c.3.s8 %v521_v43 }
  0xb9   : > { %3620 = vmatpush.bf16.msra.mxu2 %v2921_v49  ;;  %v1929_v57 = vcvt.s32.f32 %v905_v51  ;;  %v1937_v58 = vcvt.s32.f32 %v913_v52  ;;  %v1161_v59 = vunpack.c.2.s8 %v553_v48  ;;  %v1169_v60 = vunpack.c.3.s8 %v553_v48 }
  0xba   : > { %3653 = vmatpush.bf16.msra.mxu3 %v2985_v53  ;;  %v2785_v61 = vpack.c.bf16 %v1809_v54, %v1801_v50  ;;  %v2057_v62 = vcvt.s32.f32 %v1033_v55  ;;  %v2065_v63 = vcvt.s32.f32 %v1041_v56  ;;  %v761_v0 = vunpack.c.0.s8 %v457_v29  ;;  %v441_v53 = vld [vmem:[%s9013_s10] sm:$0xff] }
  0xbb   : > { %v2849_v1 = vpack.c.bf16 %v1937_v58, %v1929_v57  ;;  %v2185_v2 = vcvt.s32.f32 %v1161_v59  ;;  %v2193_v3 = vcvt.s32.f32 %v1169_v60  ;;  %v769_v4 = vunpack.c.1.s8 %v457_v29 }
  0xbc   : > { %3555 = vmatpush.bf16.msra.mxu0 %v2785_v61  ;;  %v2913_v5 = vpack.c.bf16 %v2065_v63, %v2057_v62  ;;  %v1785_v6 = vcvt.s32.f32 %v761_v0  ;;  %v889_v7 = vunpack.c.0.s8 %v489_v38  ;;  %v897_v8 = vunpack.c.1.s8 %v489_v38  ;;  %v473_v62 = vld [vmem:[%s9013_s10 + $0x100] sm:$0xff] }
  0xbd   : > { %3588 = vmatpush.bf16.msra.mxu1 %v2849_v1  ;;  %v2977_v10 = vpack.c.bf16 %v2193_v3, %v2185_v2  ;;  %v1793_v11 = vcvt.s32.f32 %v769_v4  ;;  %v1017_v12 = vunpack.c.0.s8 %v521_v43  ;;  %v1025_v13 = vunpack.c.1.s8 %v521_v43  ;;  %v505_v3 = vld [vmem:[%s9013_s10 + $0x200] sm:$0xff] }
  0xbe   : > { %3621 = vmatpush.bf16.msra.mxu2 %v2913_v5  ;;  %v1913_v14 = vcvt.s32.f32 %v889_v7  ;;  %v1921_v15 = vcvt.s32.f32 %v897_v8  ;;  %v1145_v16 = vunpack.c.0.s8 %v553_v48  ;;  %v1153_v17 = vunpack.c.1.s8 %v553_v48  ;;  %v537_v8 = vld [vmem:[%s9013_s10 + $0x300] sm:$0xff] }
  0xbf   : > { %3654 = vmatpush.bf16.msra.mxu3 %v2977_v10  ;;  %v2777_v19 = vpack.c.bf16 %v1793_v11, %v1785_v6  ;;  %v2041_v20 = vcvt.s32.f32 %v1017_v12  ;;  %v2049_v21 = vcvt.s32.f32 %v1025_v13  ;;  %v745_v22 = vunpack.c.2.s8 %v449_v9 }
  0xc0   : > { %v2841_v24 = vpack.c.bf16 %v1921_v15, %v1913_v14  ;;  %v2169_v25 = vcvt.s32.f32 %v1145_v16  ;;  %v2177_v26 = vcvt.s32.f32 %v1153_v17  ;;  %v753_v27 = vunpack.c.3.s8 %v449_v9 }
  0xc1   : > { %3556 = vmatpush.bf16.msra.mxu0 %v2777_v19  ;;  %v2905_v29 = vpack.c.bf16 %v2049_v21, %v2041_v20  ;;  %v1769_v30 = vcvt.s32.f32 %v745_v22  ;;  %v873_v31 = vunpack.c.2.s8 %v481_v18  ;;  %v881_v32 = vunpack.c.3.s8 %v481_v18 }
  0xc2   : > { %3589 = vmatpush.bf16.msra.mxu1 %v2841_v24  ;;  %v2969_v33 = vpack.c.bf16 %v2177_v26, %v2169_v25  ;;  %v1777_v34 = vcvt.s32.f32 %v753_v27  ;;  %v1001_v35 = vunpack.c.2.s8 %v513_v23  ;;  %v1009_v36 = vunpack.c.3.s8 %v513_v23 }
  0xc3   : > { %3622 = vmatpush.bf16.msra.mxu2 %v2905_v29  ;;  %v1897_v37 = vcvt.s32.f32 %v873_v31  ;;  %v1905_v38 = vcvt.s32.f32 %v881_v32  ;;  %v1129_v39 = vunpack.c.2.s8 %v545_v28  ;;  %v1137_v40 = vunpack.c.3.s8 %v545_v28 }
  0xc4   : > { %3655 = vmatpush.bf16.msra.mxu3 %v2969_v33  ;;  %v2769_v41 = vpack.c.bf16 %v1777_v34, %v1769_v30  ;;  %v2025_v42 = vcvt.s32.f32 %v1001_v35  ;;  %v2033_v43 = vcvt.s32.f32 %v1009_v36  ;;  %v729_v44 = vunpack.c.0.s8 %v449_v9  ;;  %v7659_v33 = vld [vmem:[%s9006_s21] sm:$0xf]  ;;  %v8305_v35 = vld [vmem:[%s9006_s21 + $0x4] sm:$0xf] }
  0xc5   : > { %v2833_v45 = vpack.c.bf16 %v1905_v38, %v1897_v37  ;;  %v2153_v46 = vcvt.s32.f32 %v1129_v39  ;;  %v2161_v47 = vcvt.s32.f32 %v1137_v40  ;;  %v737_v48 = vunpack.c.1.s8 %v449_v9  ;;  %v8309_v34 = vld [vmem:[%s9006_s21 + $0x1c] sm:$0xf0]  ;;  %v7661_v40 = vld [vmem:[%s9006_s21 + $0x20] sm:$0xf0] }
  0xc6   : > { %3557 = vmatpush.bf16.msra.mxu0 %v2769_v41  ;;  %v2897_v49 = vpack.c.bf16 %v2033_v43, %v2025_v42  ;;  %v1753_v50 = vcvt.s32.f32 %v729_v44  ;;  %v857_v51 = vunpack.c.0.s8 %v481_v18  ;;  %v865_v52 = vunpack.c.1.s8 %v481_v18  ;;  %v7667_v41 = vld [vmem:[%s9006_s21 + $0x8] sm:$0xf] }
  0xc7   : > { %3590 = vmatpush.bf16.msra.mxu1 %v2833_v45  ;;  %v2961_v54 = vpack.c.bf16 %v2161_v47, %v2153_v46  ;;  %v1761_v55 = vcvt.s32.f32 %v737_v48  ;;  %v985_v56 = vunpack.c.0.s8 %v513_v23  ;;  %v993_v57 = vunpack.c.1.s8 %v513_v23  ;;  %v8310_v42 = vld [vmem:[%s9006_s21 + $0x24] sm:$0xf0]  ;;  %v8306_v47 = vld [vmem:[%s9006_s21 + $0xc] sm:$0xf] }
  0xc8   : > { %3623 = vmatpush.bf16.msra.mxu2 %v2897_v49  ;;  %v1881_v58 = vcvt.s32.f32 %v857_v51  ;;  %v1889_v59 = vcvt.s32.f32 %v865_v52  ;;  %v1113_v60 = vunpack.c.0.s8 %v545_v28  ;;  %v1121_v61 = vunpack.c.1.s8 %v545_v28  ;;  %v7669_v48 = vld [vmem:[%s9006_s21 + $0x28] sm:$0xf0]  ;;  %v657_v49 = vld [vmem:[%s9013_s10 + $0x6c0] sm:$0xff] }
  0xc9   : > { %3656 = vmatpush.bf16.msra.mxu3 %v2961_v54  ;;  %v2761_v63 = vpack.c.bf16 %v1761_v55, %v1753_v50  ;;  %v2009_v0 = vcvt.s32.f32 %v985_v56  ;;  %v2017_v1 = vcvt.s32.f32 %v993_v57  ;;  %v713_v2 = vunpack.c.2.s8 %v441_v53  ;;  %v689_v54 = vld [vmem:[%s9013_s10 + $0x7c0] sm:$0xff] }
  0xca   : > { %v2825_v4 = vpack.c.bf16 %v1889_v59, %v1881_v58  ;;  %v2137_v5 = vcvt.s32.f32 %v1113_v60  ;;  %v2145_v6 = vcvt.s32.f32 %v1121_v61  ;;  %v721_v7 = vunpack.c.3.s8 %v441_v53  ;;  %v593_v59 = vld [vmem:[%s9013_s10 + $0x4c0] sm:$0xff] }
  0xcb   : > { %3558 = vmatpush.bf16.msra.mxu0 %v2761_v63  ;;  %v2889_v9 = vpack.c.bf16 %v2017_v1, %v2009_v0  ;;  %v1737_v10 = vcvt.s32.f32 %v713_v2  ;;  %v841_v11 = vunpack.c.2.s8 %v473_v62  ;;  %v849_v12 = vunpack.c.3.s8 %v473_v62  ;;  %v625_v60 = vld [vmem:[%s9013_s10 + $0x5c0] sm:$0xff] }
  0xcc   : > { %3591 = vmatpush.bf16.msra.mxu1 %v2825_v4  ;;  %v2953_v13 = vpack.c.bf16 %v2145_v6, %v2137_v5  ;;  %v1745_v14 = vcvt.s32.f32 %v721_v7  ;;  %v969_v15 = vunpack.c.2.s8 %v505_v3  ;;  %v977_v16 = vunpack.c.3.s8 %v505_v3 }
  0xcd   : > { %3624 = vmatpush.bf16.msra.mxu2 %v2889_v9  ;;  %v1865_v17 = vcvt.s32.f32 %v841_v11  ;;  %v1873_v18 = vcvt.s32.f32 %v849_v12  ;;  %v1097_v19 = vunpack.c.2.s8 %v537_v8  ;;  %v1105_v20 = vunpack.c.3.s8 %v537_v8 }
  0xce   : > { %3657 = vmatpush.bf16.msra.mxu3 %v2953_v13  ;;  %v2753_v21 = vpack.c.bf16 %v1745_v14, %v1737_v10  ;;  %v1993_v22 = vcvt.s32.f32 %v969_v15  ;;  %v2001_v23 = vcvt.s32.f32 %v977_v16  ;;  %v697_v24 = vunpack.c.0.s8 %v441_v53 }
  0xcf   : > { %v2817_v25 = vpack.c.bf16 %v1873_v18, %v1865_v17  ;;  %v2121_v26 = vcvt.s32.f32 %v1097_v19  ;;  %v2129_v27 = vcvt.s32.f32 %v1105_v20  ;;  %v705_v28 = vunpack.c.1.s8 %v441_v53 }
  0xd0   : > { %3559 = vmatpush.bf16.msra.mxu0 %v2753_v21  ;;  %v2881_v29 = vpack.c.bf16 %v2001_v23, %v1993_v22  ;;  %v1721_v30 = vcvt.s32.f32 %v697_v24  ;;  %v825_v31 = vunpack.c.0.s8 %v473_v62  ;;  %v833_v32 = vunpack.c.1.s8 %v473_v62 }
  0xd1   : > { %3592 = vmatpush.bf16.msra.mxu1 %v2817_v25  ;;  %v2945_v36 = vpack.c.bf16 %v2129_v27, %v2121_v26  ;;  %v1729_v37 = vcvt.s32.f32 %v705_v28  ;;  %v953_v38 = vunpack.c.0.s8 %v505_v3  ;;  %v961_v39 = vunpack.c.1.s8 %v505_v3  ;;  %v7691_v25 = vld [vmem:[%s9006_s21 + $0x40] sm:$0xf] }
  0xd2   : > { %3625 = vmatpush.bf16.msra.mxu2 %v2881_v29  ;;  %v1849_v43 = vcvt.s32.f32 %v825_v31  ;;  %v1857_v44 = vcvt.s32.f32 %v833_v32  ;;  %v1081_v45 = vunpack.c.0.s8 %v537_v8  ;;  %v1089_v46 = vunpack.c.1.s8 %v537_v8  ;;  %v8313_v31 = vld [vmem:[%s9006_s21 + $0x44] sm:$0xf] }
  0xd3   : > { %3658 = vmatpush.bf16.msra.mxu3 %v2945_v36  ;;  %v2745_v50 = vpack.c.bf16 %v1729_v37, %v1721_v30  ;;  %v1977_v51 = vcvt.s32.f32 %v953_v38  ;;  %v1985_v52 = vcvt.s32.f32 %v961_v39  ;;  %v9130_v53 = vor.u32 %v8309_v34, %v7659_v33  ;;  %v8317_v30 = vld [vmem:[%s9006_s21 + $0x5c] sm:$0xf0]  ;;  %v7693_v32 = vld [vmem:[%s9006_s21 + $0x60] sm:$0xf0]  ;;  %v7699_v37 = vld [vmem:[%s9006_s21 + $0x48] sm:$0xf] }
  0xd4   : > { %v2809_v55 = vpack.c.bf16 %v1857_v44, %v1849_v43  ;;  %v2105_v56 = vcvt.s32.f32 %v1081_v45  ;;  %v2113_v57 = vcvt.s32.f32 %v1089_v46  ;;  %v9133_v58 = vor.u32 %v8305_v35, %v7661_v40  ;;  %v8318_v38 = vld [vmem:[%s9006_s21 + $0x64] sm:$0xf0]  ;;  %v649_v39 = vld [vmem:[%s9013_s10 + $0x680] sm:$0xff] }
  0xd5   : > { %10770 = vst [vmem:[#allocation21_spill] sm:$0xff] %v9130_v53  ;;  %3560 = vmatpush.bf16.msra.mxu0 %v2745_v50  ;;  %v2873_v61 = vpack.c.bf16 %v1985_v52, %v1977_v51  ;;  %v9137_v62 = vor.u32 %v8310_v42, %v7667_v41  ;;  %v9139_v63 = vor.u32 %v8306_v47, %v7669_v48  ;;  %v1577_v0 = vunpack.c.2.s8 %v657_v49  ;;  %v681_v43 = vld [vmem:[%s9013_s10 + $0x780] sm:$0xff] }
  0xd6   : > { %10771 = vst [vmem:[#allocation22_spill] sm:$0xff] %v9133_v58  ;;  %3593 = vmatpush.bf16.msra.mxu1 %v2809_v55  ;;  %v2937_v1 = vpack.c.bf16 %v2113_v57, %v2105_v56  ;;  %v1585_v2 = vunpack.c.3.s8 %v657_v49  ;;  %v1705_v3 = vunpack.c.2.s8 %v689_v54  ;;  %v1713_v4 = vunpack.c.3.s8 %v689_v54  ;;  %v585_v48 = vld [vmem:[%s9013_s10 + $0x480] sm:$0xff] }
  0xd7   : > { %10772 = vst [vmem:[#allocation23_spill] sm:$0xff] %v9137_v62  ;;  %3626 = vmatpush.bf16.msra.mxu2 %v2873_v61  ;;  %v2601_v5 = vcvt.s32.f32 %v1577_v0  ;;  %v1321_v6 = vunpack.c.2.s8 %v593_v59  ;;  %v1329_v7 = vunpack.c.3.s8 %v593_v59  ;;  %v1449_v8 = vunpack.c.2.s8 %v625_v60 }
  0xd8   : > { %10773 = vst [vmem:[#allocation24_spill] sm:$0xff] %v9139_v63  ;;  %3659 = vmatpush.bf16.msra.mxu3 %v2937_v1  ;;  %3561 = vmatmul.bf16.vlgmr.msra.gmra.mxu0 %v9130_v53  ;;  %v2609_v9 = vcvt.s32.f32 %v1585_v2  ;;  %v2729_v10 = vcvt.s32.f32 %v1705_v3  ;;  %v2737_v11 = vcvt.s32.f32 %v1713_v4  ;;  %v1457_v12 = vunpack.c.3.s8 %v625_v60 }
  0xd9   : > { %3594 = vmatmul.bf16.vlgmr.msra.gmra.mxu1 %v9133_v58  ;;  %v2345_v13 = vcvt.s32.f32 %v1321_v6  ;;  %v2353_v14 = vcvt.s32.f32 %v1329_v7  ;;  %v2473_v15 = vcvt.s32.f32 %v1449_v8  ;;  %v1561_v16 = vunpack.c.0.s8 %v657_v49  ;;  %v8314_v6 = vld [vmem:[%s9006_s21 + $0x4c] sm:$0xf] }
  0xda   : > { %3627 = vmatmul.bf16.vlgmr.msra.gmra.mxu2 %v9137_v62  ;;  %v3185_v17 = vpack.c.bf16 %v2609_v9, %v2601_v5  ;;  %v3249_v18 = vpack.c.bf16 %v2737_v11, %v2729_v10  ;;  %v2481_v19 = vcvt.s32.f32 %v1457_v12  ;;  %v1569_v20 = vunpack.c.1.s8 %v657_v49  ;;  %v9157_v49 = vld [vmem:[%s9013_s10 + $0x580] sm:$0xff]  ;;  %v7701_v7 = vld [vmem:[%s9006_s21 + $0x68] sm:$0xf0] }
  0xdb   : > { %3660 = vmatmul.bf16.vlgmr.msra.gmra.mxu3 %v9139_v63  ;;  %v3057_v21 = vpack.c.bf16 %v2353_v14, %v2345_v13  ;;  %v2585_v22 = vcvt.s32.f32 %v1561_v16  ;;  %v1689_v23 = vunpack.c.0.s8 %v689_v54  ;;  %v1697_v24 = vunpack.c.1.s8 %v689_v54 }
  0xdc   : > { %3751 = vmatpush.bf16.msrb.mxu2 %v3185_v17  ;;  %3784 = vmatpush.bf16.msrb.mxu3 %v3249_v18  ;;  %v3121_v26 = vpack.c.bf16 %v2481_v19, %v2473_v15  ;;  %v2593_v27 = vcvt.s32.f32 %v1569_v20  ;;  %v1305_v28 = vunpack.c.0.s8 %v593_v59  ;;  %v1313_v29 = vunpack.c.1.s8 %v593_v59 }
  0xdd   : > { %3685 = vmatpush.bf16.msrb.mxu0 %v3057_v21  ;;  %v2713_v33 = vcvt.s32.f32 %v1689_v23  ;;  %v2721_v34 = vcvt.s32.f32 %v1697_v24  ;;  %v1433_v35 = vunpack.c.0.s8 %v625_v60  ;;  %v1441_v36 = vunpack.c.1.s8 %v625_v60  ;;  %v9170_v23 = vld [vmem:[%s9013_s10 + $0x640] sm:$0xff] }
  0xde   : > { %3718 = vmatpush.bf16.msrb.mxu1 %v3121_v26  ;;  %v3177_v40 = vpack.c.bf16 %v2593_v27, %v2585_v22  ;;  %v2329_v41 = vcvt.s32.f32 %v1305_v28  ;;  %v2337_v42 = vcvt.s32.f32 %v1313_v29  ;;  %v9153_v47 = vor.u32 %v8317_v30, %v7691_v25  ;;  %v9174_v26 = vld [vmem:[%s9013_s10 + $0x740] sm:$0xff] }
  0xdf   : > { %v3241_v44 = vpack.c.bf16 %v2721_v34, %v2713_v33  ;;  %v2457_v45 = vcvt.s32.f32 %v1433_v35  ;;  %v2465_v46 = vcvt.s32.f32 %v1441_v36  ;;  %v9159_v51 = vor.u32 %v8313_v31, %v7693_v32  ;;  %v577_v35 = vld [vmem:[%s9013_s10 + $0x440] sm:$0xff] }
  0xe0   : > { %10774 = vst [vmem:[#allocation25_spill] sm:$0xff] %v9153_v47  ;;  %3752 = vmatpush.bf16.msrb.mxu2 %v3177_v40  ;;  %v3049_v50 = vpack.c.bf16 %v2337_v42, %v2329_v41  ;;  %v9161_v52 = vor.u32 %v8318_v38, %v7699_v37  ;;  %v1545_v54 = vunpack.c.2.s8 %v649_v39  ;;  %v1553_v56 = vunpack.c.3.s8 %v649_v39  ;;  %v9186_v40 = vld [vmem:[%s9013_s10 + $0x540] sm:$0xff] }
  0xe1   : > { %10775 = vst [vmem:[#allocation26_spill] sm:$0xff] %v9159_v51  ;;  %3785 = vmatpush.bf16.msrb.mxu3 %v3241_v44  ;;  %v3113_v55 = vpack.c.bf16 %v2465_v46, %v2457_v45  ;;  %v1673_v57 = vunpack.c.2.s8 %v681_v43  ;;  %v1681_v59 = vunpack.c.3.s8 %v681_v43  ;;  %v1289_v61 = vunpack.c.2.s8 %v585_v48  ;;  %v7723_v41 = vld [vmem:[%s9006_s21 + $0x80] sm:$0xf] }
  0xe2   : > { %10776 = vst [vmem:[#allocation27_spill] sm:$0xff] %v9161_v52  ;;  %3686 = vmatpush.bf16.msrb.mxu0 %v3049_v50  ;;  %v2569_v60 = vcvt.s32.f32 %v1545_v54  ;;  %v1297_v0 = vunpack.c.3.s8 %v585_v48  ;;  %v1417_v1 = vunpack.c.2.s8 %v9157_v49  ;;  %v2577_v2 = vcvt.s32.f32 %v1553_v56  ;;  %v8325_v42 = vld [vmem:[%s9006_s21 + $0x9c] sm:$0xf0]  ;;  %v7731_v50 = vld [vmem:[%s9006_s21 + $0x88] sm:$0xf] }
  0xe3   : > { %3719 = vmatpush.bf16.msrb.mxu1 %v3113_v55  ;;  %v2697_v3 = vcvt.s32.f32 %v1673_v57  ;;  %v2705_v4 = vcvt.s32.f32 %v1681_v59  ;;  %v1425_v5 = vunpack.c.3.s8 %v9157_v49  ;;  %v2313_v8 = vcvt.s32.f32 %v1289_v61  ;;  %v8326_v54 = vld [vmem:[%s9006_s21 + $0xa4] sm:$0xf0]  ;;  %v7733_v61 = vld [vmem:[%s9006_s21 + $0xa8] sm:$0xf0] }
  0xe4   : > { %v2321_v9 = vcvt.s32.f32 %v1297_v0  ;;  %v2441_v10 = vcvt.s32.f32 %v1417_v1  ;;  %v1529_v11 = vunpack.c.0.s8 %v649_v39  ;;  %v3169_v12 = vpack.c.bf16 %v2577_v2, %v2569_v60  ;;  %v8322_v60 = vld [vmem:[%s9006_s21 + $0x8c] sm:$0xf] }
  0xe5   : > { %v3233_v13 = vpack.c.bf16 %v2705_v4, %v2697_v3  ;;  %v2449_v14 = vcvt.s32.f32 %v1425_v5  ;;  %v1537_v15 = vunpack.c.1.s8 %v649_v39  ;;  %v1657_v18 = vunpack.c.0.s8 %v681_v43 }
  0xe6   : > { %v3041_v16 = vpack.c.bf16 %v2321_v9, %v2313_v8  ;;  %v2553_v17 = vcvt.s32.f32 %v1529_v11  ;;  %v1665_v19 = vunpack.c.1.s8 %v681_v43  ;;  %v9167_v20 = vor.u32 %v8314_v6, %v7701_v7  ;;  %3753 = vmatpush.bf16.msrb.mxu2 %v3169_v12  ;;  %v8321_v43 = vld [vmem:[%s9006_s21 + $0x84] sm:$0xf] }
  0xe7   : > { %3786 = vmatpush.bf16.msrb.mxu3 %v3233_v13  ;;  %v3105_v21 = vpack.c.bf16 %v2449_v14, %v2441_v10  ;;  %v2561_v22 = vcvt.s32.f32 %v1537_v15  ;;  %v2681_v24 = vcvt.s32.f32 %v1657_v18  ;;  %v1273_v28 = vunpack.c.0.s8 %v585_v48 }
  0xe8   : > { %10777 = vst [vmem:[#allocation28_spill] sm:$0xff] %v9167_v20  ;;  %3566 = vmatmul.bf16.gmra.mxu0 %v9153_v47  ;;  %v2689_v25 = vcvt.s32.f32 %v1665_v19  ;;  %v1281_v29 = vunpack.c.1.s8 %v585_v48  ;;  %v1401_v30 = vunpack.c.0.s8 %v9157_v49  ;;  %v1409_v32 = vunpack.c.1.s8 %v9157_v49  ;;  %v7725_v49 = vld [vmem:[%s9006_s21 + $0xa0] sm:$0xf0] }
  0xe9   : > { %3599 = vmatmul.bf16.gmra.mxu1 %v9159_v51  ;;  %3687 = vmatpush.bf16.msrb.mxu0 %v3041_v16  ;;  %v3161_v27 = vpack.c.bf16 %v2561_v22, %v2553_v17  ;;  %v1513_v33 = vunpack.c.2.s8 %v9170_v23  ;;  %v1521_v34 = vunpack.c.3.s8 %v9170_v23  ;;  %v2297_v36 = vcvt.s32.f32 %v1273_v28  ;;  %v665_v28 = vld [vmem:[%s9013_s10 + $0x700] sm:$0xff] }
  0xea   : > { %3632 = vmatmul.bf16.gmra.mxu2 %v9161_v52  ;;  %3720 = vmatpush.bf16.msrb.mxu1 %v3105_v21  ;;  %v3225_v31 = vpack.c.bf16 %v2689_v25, %v2681_v24  ;;  %v2305_v37 = vcvt.s32.f32 %v1281_v29  ;;  %v2425_v38 = vcvt.s32.f32 %v1401_v30  ;;  %v1641_v39 = vunpack.c.2.s8 %v9174_v26  ;;  %v633_v21 = vld [vmem:[%s9013_s10 + $0x600] sm:$0xff] }
  0xeb   : > { %3665 = vmatmul.bf16.gmra.mxu3 %v9167_v20  ;;  %3754 = vmatpush.bf16.msrb.mxu2 %v3161_v27  ;;  %v2433_v44 = vcvt.s32.f32 %v1409_v32  ;;  %v2537_v45 = vcvt.s32.f32 %v1513_v33  ;;  %v2545_v46 = vcvt.s32.f32 %v1521_v34  ;;  %v1649_v48 = vunpack.c.3.s8 %v9174_v26 }
  0xec   : > { %3787 = vmatpush.bf16.msrb.mxu3 %v3225_v31  ;;  %v3033_v55 = vpack.c.bf16 %v2305_v37, %v2297_v36  ;;  %v2665_v56 = vcvt.s32.f32 %v1641_v39  ;;  %v1257_v57 = vunpack.c.2.s8 %v577_v35  ;;  %v1265_v59 = vunpack.c.3.s8 %v577_v35  ;;  %v569_v36 = vld [vmem:[%s9013_s10 + $0x400] sm:$0xff] }
  0xed   : > { %v3097_v0 = vpack.c.bf16 %v2433_v44, %v2425_v38  ;;  %v3153_v1 = vpack.c.bf16 %v2545_v46, %v2537_v45  ;;  %v2673_v2 = vcvt.s32.f32 %v1649_v48  ;;  %v1385_v3 = vunpack.c.2.s8 %v9186_v40 }
  0xee   : > { %v9198_v4 = vor.u32 %v8325_v42, %v7723_v41  ;;  %3688 = vmatpush.bf16.msrb.mxu0 %v3033_v55  ;;  %v2281_v5 = vcvt.s32.f32 %v1257_v57  ;;  %v2289_v6 = vcvt.s32.f32 %v1265_v59  ;;  %v1393_v7 = vunpack.c.3.s8 %v9186_v40  ;;  %v601_v59 = vld [vmem:[%s9013_s10 + $0x500] sm:$0xff] }
  0xef   : > { %v9201_v8 = vor.u32 %v8321_v43, %v7725_v49  ;;  %v9203_v9 = vor.u32 %v8326_v54, %v7731_v50  ;;  %3721 = vmatpush.bf16.msrb.mxu1 %v3097_v0  ;;  %3755 = vmatpush.bf16.msrb.mxu2 %v3153_v1  ;;  %v3217_v10 = vpack.c.bf16 %v2673_v2, %v2665_v56  ;;  %v2409_v11 = vcvt.s32.f32 %v1385_v3 }
  0xf0   : > { %10778 = vst [vmem:[#allocation29_spill] sm:$0xff] %v9198_v4  ;;  %v9205_v12 = vor.u32 %v8322_v60, %v7733_v61  ;;  %v3025_v13 = vpack.c.bf16 %v2289_v6, %v2281_v5  ;;  %v2417_v14 = vcvt.s32.f32 %v1393_v7  ;;  %v1497_v15 = vunpack.c.0.s8 %v9170_v23 }
  0xf1   : > { %10779 = vst [vmem:[#allocation30_spill] sm:$0xff] %v9201_v8  ;;  %3788 = vmatpush.bf16.msrb.mxu3 %v3217_v10  ;;  %v1505_v16 = vunpack.c.1.s8 %v9170_v23  ;;  %v1625_v17 = vunpack.c.0.s8 %v9174_v26  ;;  %v1633_v18 = vunpack.c.1.s8 %v9174_v26  ;;  %v1241_v19 = vunpack.c.0.s8 %v577_v35 }
  0xf2   : > { %10780 = vst [vmem:[#allocation31_spill] sm:$0xff] %v9203_v9  ;;  %3689 = vmatpush.bf16.msrb.mxu0 %v3025_v13  ;;  %v3089_v22 = vpack.c.bf16 %v2417_v14, %v2409_v11  ;;  %v2521_v24 = vcvt.s32.f32 %v1497_v15  ;;  %v1249_v25 = vunpack.c.1.s8 %v577_v35  ;;  %v1369_v27 = vunpack.c.0.s8 %v9186_v40 }
  0xf3   : > { %10781 = vst [vmem:[#allocation32_spill] sm:$0xff] %v9205_v12  ;;  %v2529_v29 = vcvt.s32.f32 %v1505_v16  ;;  %v2649_v30 = vcvt.s32.f32 %v1625_v17  ;;  %v2657_v31 = vcvt.s32.f32 %v1633_v18  ;;  %v2265_v32 = vcvt.s32.f32 %v1241_v19 }
  0xf4   : > { %3722 = vmatpush.bf16.msrb.mxu1 %v3089_v22  ;;  %v2273_v23 = vcvt.s32.f32 %v1249_v25  ;;  %v1377_v33 = vunpack.c.1.s8 %v9186_v40  ;;  %v2393_v34 = vcvt.s32.f32 %v1369_v27  ;;  %v1481_v26 = vunpack.c.2.s8 %v633_v21  ;;  %v8333_v22 = vld [vmem:[%s9006_s21 + $0xdc] sm:$0xf0] }
  0xf5   : > { %v3145_v37 = vpack.c.bf16 %v2529_v29, %v2521_v24  ;;  %v3209_v38 = vpack.c.bf16 %v2657_v31, %v2649_v30  ;;  %v1489_v39 = vunpack.c.3.s8 %v633_v21  ;;  %v1609_v41 = vunpack.c.2.s8 %v665_v28  ;;  %v7757_v29 = vld [vmem:[%s9006_s21 + $0xe0] sm:$0xf0] }
  0xf6   : > { %v3017_v42 = vpack.c.bf16 %v2273_v23, %v2265_v32  ;;  %v2401_v35 = vcvt.s32.f32 %v1377_v33  ;;  %v2505_v43 = vcvt.s32.f32 %v1481_v26  ;;  %v1617_v44 = vunpack.c.3.s8 %v665_v28  ;;  %v7763_v32 = vld [vmem:[%s9006_s21 + $0xc8] sm:$0xf] }
  0xf7   : > { %3756 = vmatpush.bf16.msrb.mxu2 %v3145_v37  ;;  %v2513_v45 = vcvt.s32.f32 %v1489_v39  ;;  %v2633_v46 = vcvt.s32.f32 %v1609_v41  ;;  %v1225_v48 = vunpack.c.2.s8 %v569_v36  ;;  %v1233_v49 = vunpack.c.3.s8 %v569_v36  ;;  %3789 = vmatpush.bf16.msrb.mxu3 %v3209_v38  ;;  %v8334_v23 = vld [vmem:[%s9006_s21 + $0xe4] sm:$0xf0]  ;;  %v7765_v37 = vld [vmem:[%s9006_s21 + $0xe8] sm:$0xf0] }
  0xf8   : > { %3571 = vmatmul.bf16.gmra.mxu0 %v9198_v4  ;;  %v3081_v40 = vpack.c.bf16 %v2401_v35, %v2393_v34  ;;  %v2641_v50 = vcvt.s32.f32 %v1617_v44  ;;  %v1353_v61 = vunpack.c.2.s8 %v601_v59  ;;  %v1361_v0 = vunpack.c.3.s8 %v601_v59  ;;  %v3361_v35 = vld [vmem:[%s9006_s21 + $0x100] sm:$0x33] }
  0xf9   : > { %3604 = vmatmul.bf16.gmra.mxu1 %v9201_v8  ;;  %3690 = vmatpush.bf16.msrb.mxu0 %v3017_v42  ;;  %v3137_v54 = vpack.c.bf16 %v2513_v45, %v2505_v43  ;;  %v2249_v55 = vcvt.s32.f32 %v1225_v48  ;;  %v2257_v56 = vcvt.s32.f32 %v1233_v49  ;;  %v1465_v1 = vunpack.c.0.s8 %v633_v21  ;;  %v3362_v43 = vld [vmem:[%s9006_s21 + $0x108] sm:$0x33] }
  0xfa   : > { %3637 = vmatmul.bf16.gmra.mxu2 %v9203_v9  ;;  %3723 = vmatpush.bf16.msrb.mxu1 %v3081_v40  ;;  %v3201_v57 = vpack.c.bf16 %v2641_v50, %v2633_v46  ;;  %v1473_v2 = vunpack.c.1.s8 %v633_v21  ;;  %v1593_v3 = vunpack.c.0.s8 %v665_v28  ;;  %v2377_v5 = vcvt.s32.f32 %v1353_v61  ;;  %v7755_v21 = vld [vmem:[%s9006_s21 + $0xc0] sm:$0xf]  ;;  %v530_v49 = vld [vmem:[%s9013_s10 + $0x2c8] sm:$0xff] }
  0xfb   : > { %3670 = vmatmul.bf16.gmra.mxu3 %v9205_v12  ;;  %3757 = vmatpush.bf16.msrb.mxu2 %v3137_v54  ;;  %v3009_v60 = vpack.c.bf16 %v2257_v56, %v2249_v55  ;;  %v2385_v6 = vcvt.s32.f32 %v1361_v0  ;;  %v1601_v7 = vunpack.c.1.s8 %v665_v28  ;;  %v1209_v10 = vunpack.c.0.s8 %v569_v36  ;;  %v8329_v28 = vld [vmem:[%s9006_s21 + $0xc4] sm:$0xf]  ;;  %v562_v40 = vld [vmem:[%s9013_s10 + $0x3c8] sm:$0xff] }
  0xfc   : > { %3790 = vmatpush.bf16.msrb.mxu3 %v3201_v57  ;;  %v2489_v11 = vcvt.s32.f32 %v1465_v1  ;;  %v2497_v13 = vcvt.s32.f32 %v1473_v2  ;;  %v2617_v14 = vcvt.s32.f32 %v1593_v3  ;;  %v1217_v15 = vunpack.c.1.s8 %v569_v36  ;;  %v8330_v36 = vld [vmem:[%s9006_s21 + $0xcc] sm:$0xf] }
  0xfd   : > { %3691 = vmatpush.bf16.msrb.mxu0 %v3009_v60  ;;  %v3073_v16 = vpack.c.bf16 %v2385_v6, %v2377_v5  ;;  %v2625_v17 = vcvt.s32.f32 %v1601_v7  ;;  %v2233_v18 = vcvt.s32.f32 %v1209_v10  ;;  %v1337_v19 = vunpack.c.0.s8 %v601_v59  ;;  %v466_v50 = vld [vmem:[%s9013_s10 + $0xc8] sm:$0xff] }
  0xfe   : > { %v3129_v24 = vpack.c.bf16 %v2497_v13, %v2489_v11  ;;  %v2241_v25 = vcvt.s32.f32 %v1217_v15  ;;  %v1345_v27 = vunpack.c.1.s8 %v601_v59  ;;  %v9227_v26 = vor.u32 %v8333_v22, %v7755_v21  ;;  %v498_v59 = vld [vmem:[%s9013_s10 + $0x1c8] sm:$0xff] }
  0xff   : > { %3724 = vmatpush.bf16.msrb.mxu1 %v3073_v16  ;;  %v3193_v30 = vpack.c.bf16 %v2625_v17, %v2617_v14  ;;  %v2361_v31 = vcvt.s32.f32 %v1337_v19  ;;  %v9231_v38 = vor.u32 %v8329_v28, %v7757_v29  ;;  %v9233_v41 = vor.u32 %v8334_v23, %v7763_v32 }
 0x100   : > { %3758 = vmatpush.bf16.msrb.mxu2 %v3129_v24  ;;  %v3001_v33 = vpack.c.bf16 %v2241_v25, %v2233_v18  ;;  %v2369_v34 = vcvt.s32.f32 %v1345_v27  ;;  %v9235_v42 = vor.u32 %v8330_v36, %v7765_v37  ;;  %v3465_v44 = vunpack.c.l.b16 %v3361_v35 }
 0x101   : > { %3791 = vmatpush.bf16.msrb.mxu3 %v3193_v30  ;;  %v3466_v45 = vunpack.c.h.b16 %v3361_v35  ;;  %v3467_v46 = vunpack.c.l.b16 %v3362_v43  ;;  %v3468_v48 = vunpack.c.h.b16 %v3362_v43  ;;  %v1066_v54 = vunpack.c.2.s8 %v530_v49 }
 0x102   : > { %3692 = vmatpush.bf16.msrb.mxu0 %v3001_v33  ;;  %v3065_v39 = vpack.c.bf16 %v2369_v34, %v2361_v31  ;;  %v1074_v55 = vunpack.c.3.s8 %v530_v49  ;;  %v1194_v56 = vunpack.c.2.s8 %v562_v40  ;;  %v1202_v57 = vunpack.c.3.s8 %v562_v40 }
 0x103   : > { %v810_v60 = vunpack.c.2.s8 %v466_v50  ;;  %v818_v61 = vunpack.c.3.s8 %v466_v50  ;;  %v938_v0 = vunpack.c.2.s8 %v498_v59  ;;  %v946_v1 = vunpack.c.3.s8 %v498_v59 }
 0x104   : > { %3725 = vmatpush.bf16.msrb.mxu1 %v3065_v39  ;;  %v2090_v2 = vcvt.s32.f32 %v1066_v54  ;;  %v2098_v3 = vcvt.s32.f32 %v1074_v55  ;;  %v2218_v5 = vcvt.s32.f32 %v1194_v56  ;;  %v2226_v6 = vcvt.s32.f32 %v1202_v57  ;;  %v9262_v54 = vld [vmem:[%s9013_s10 + $0x88] sm:$0xff] }
 0x105   : > { %v1834_v7 = vcvt.s32.f32 %v810_v60  ;;  %v1842_v10 = vcvt.s32.f32 %v818_v61  ;;  %v1962_v11 = vcvt.s32.f32 %v938_v0  ;;  %v1970_v13 = vcvt.s32.f32 %v946_v1 }
 0x106   : > { %v2930_v14 = vpack.c.bf16 %v2098_v3, %v2090_v2  ;;  %v2994_v15 = vpack.c.bf16 %v2226_v6, %v2218_v5  ;;  %v1050_v16 = vunpack.c.0.s8 %v530_v49  ;;  %v1058_v17 = vunpack.c.1.s8 %v530_v49 }
 0x107   : > { %v2802_v18 = vpack.c.bf16 %v1842_v10, %v1834_v7  ;;  %v2866_v19 = vpack.c.bf16 %v1970_v13, %v1962_v11  ;;  %v1178_v21 = vunpack.c.0.s8 %v562_v40  ;;  %v1186_v22 = vunpack.c.1.s8 %v562_v40 }
 0x108   : > { %3576 = vmatmul.bf16.gmra.mxu0 %v9227_v26  ;;  %3883 = vmatpush.bf16.msra.mxu2 %v2930_v14  ;;  %v2074_v24 = vcvt.s32.f32 %v1050_v16  ;;  %v2082_v25 = vcvt.s32.f32 %v1058_v17  ;;  %v794_v27 = vunpack.c.0.s8 %v466_v50  ;;  %v802_v28 = vunpack.c.1.s8 %v466_v50 }
 0x109   : > { %3609 = vmatmul.bf16.gmra.mxu1 %v9231_v38  ;;  %3916 = vmatpush.bf16.msra.mxu3 %v2994_v15  ;;  %v2202_v29 = vcvt.s32.f32 %v1178_v21  ;;  %v2210_v30 = vcvt.s32.f32 %v1186_v22  ;;  %v922_v31 = vunpack.c.0.s8 %v498_v59  ;;  %v930_v32 = vunpack.c.1.s8 %v498_v59  ;;  %v9265_v59 = vld [vmem:[%s9013_s10 + $0x188] sm:$0xff] }
 0x10a   : > { %3642 = vmatmul.bf16.gmra.mxu2 %v9233_v41  ;;  %3817 = vmatpush.bf16.msra.mxu0 %v2802_v18  ;;  %v9247_v23 = vpack.c.b16 %v3465_v44, %v3465_v44  ;;  %v2922_v33 = vpack.c.bf16 %v2082_v25, %v2074_v24  ;;  %v1818_v34 = vcvt.s32.f32 %v794_v27  ;;  %v1826_v36 = vcvt.s32.f32 %v802_v28  ;;  %v7675_v18 = vld [vmem:[%s9006_s21 + $0x10] sm:$0xf]  ;;  %v8307_v27 = vld [vmem:[%s9006_s21 + $0x14] sm:$0xf] }
 0x10b   : > { %3675 = vmatmul.bf16.gmra.mxu3 %v9235_v42  ;;  %3850 = vmatpush.bf16.msra.mxu1 %v2866_v19  ;;  %v9249_v37 = vpack.c.b16 %v3466_v45, %v3466_v45  ;;  %v2986_v39 = vpack.c.bf16 %v2210_v30, %v2202_v29  ;;  %v1946_v35 = vcvt.s32.f32 %v922_v31  ;;  %v1954_v43 = vcvt.s32.f32 %v930_v32  ;;  %v522_v45 = vld [vmem:[%s9013_s10 + $0x288] sm:$0xff]  ;;  %v8311_v19 = vld [vmem:[%s9006_s21 + $0x2c] sm:$0xf0]  ;;  %v7677_v28 = vld [vmem:[%s9006_s21 + $0x30] sm:$0xf0] }
 0x10c   : > { %v9251_v49 = vpack.c.b16 %v3467_v46, %v3467_v46  ;;  %3884 = vmatpush.bf16.msra.mxu2 %v2922_v33  ;;  %v2794_v40 = vpack.c.bf16 %v1826_v36, %v1818_v34  ;;  %v9253_v50 = vpack.c.b16 %v3468_v48, %v3468_v48  ;;  %v554_v46 = vld [vmem:[%s9013_s10 + $0x388] sm:$0xff]  ;;  %v1034_v55 = vunpack.c.2.s8 %v522_v45  ;;  %v7683_v31 = vld [vmem:[%s9006_s21 + $0x18] sm:$0xf] }
 0x10d   : > { %3917 = vmatpush.bf16.msra.mxu3 %v2986_v39  ;;  %v2858_v44 = vpack.c.bf16 %v1954_v43, %v1946_v35  ;;  %v1042_v48 = vunpack.c.3.s8 %v522_v45  ;;  %v1162_v56 = vunpack.c.2.s8 %v554_v46  ;;  %v1170_v57 = vunpack.c.3.s8 %v554_v46  ;;  %v8312_v32 = vld [vmem:[%s9006_s21 + $0x34] sm:$0xf0]  ;;  %v8308_v39 = vld [vmem:[%s9006_s21 + $0x1c] sm:$0xf] }
 0x10e   : > { %3818 = vmatpush.bf16.msra.mxu0 %v2794_v40  ;;  %v778_v60 = vunpack.c.2.s8 %v9262_v54  ;;  %v786_v61 = vunpack.c.3.s8 %v9262_v54  ;;  %v906_v0 = vunpack.c.2.s8 %v9265_v59  ;;  %v914_v1 = vunpack.c.3.s8 %v9265_v59  ;;  %v7685_v35 = vld [vmem:[%s9006_s21 + $0x38] sm:$0xf0] }
 0x10f   : > { %3851 = vmatpush.bf16.msra.mxu1 %v2858_v44  ;;  %v2058_v2 = vcvt.s32.f32 %v1034_v55  ;;  %v2066_v3 = vcvt.s32.f32 %v1042_v48  ;;  %v2186_v5 = vcvt.s32.f32 %v1162_v56  ;;  %v2194_v6 = vcvt.s32.f32 %v1170_v57 }
 0x110   : > { %v1802_v7 = vcvt.s32.f32 %v778_v60  ;;  %v1810_v10 = vcvt.s32.f32 %v786_v61  ;;  %v1930_v11 = vcvt.s32.f32 %v906_v0  ;;  %v1938_v13 = vcvt.s32.f32 %v914_v1  ;;  %v514_v60 = vld [vmem:[%s9013_s10 + $0x248] sm:$0xff] }
 0x111   : > { %v2914_v14 = vpack.c.bf16 %v2066_v3, %v2058_v2  ;;  %v2978_v15 = vpack.c.bf16 %v2194_v6, %v2186_v5  ;;  %v1018_v16 = vunpack.c.0.s8 %v522_v45  ;;  %v1026_v17 = vunpack.c.1.s8 %v522_v45  ;;  %v546_v61 = vld [vmem:[%s9013_s10 + $0x348] sm:$0xff] }
 0x112   : > { %v2786_v21 = vpack.c.bf16 %v1810_v10, %v1802_v7  ;;  %v2850_v22 = vpack.c.bf16 %v1938_v13, %v1930_v11  ;;  %v1146_v24 = vunpack.c.0.s8 %v554_v46  ;;  %v1154_v25 = vunpack.c.1.s8 %v554_v46  ;;  %v9298_v5 = vld [vmem:[%s9013_s10 + $0x48] sm:$0xff] }
 0x113   : > { %3885 = vmatpush.bf16.msra.mxu2 %v2914_v14  ;;  %3918 = vmatpush.bf16.msra.mxu3 %v2978_v15  ;;  %v2042_v29 = vcvt.s32.f32 %v1018_v16  ;;  %v2050_v30 = vcvt.s32.f32 %v1026_v17  ;;  %v9277_v36 = vor.u32 %v8311_v19, %v7675_v18  ;;  %v9281_v40 = vor.u32 %v8307_v27, %v7677_v28  ;;  %v8315_v28 = vld [vmem:[%s9006_s21 + $0x54] sm:$0xf] }
 0x114   : > { %3819 = vmatpush.bf16.msra.mxu0 %v2786_v21  ;;  %3852 = vmatpush.bf16.msra.mxu1 %v2850_v22  ;;  %v2170_v33 = vcvt.s32.f32 %v1146_v24  ;;  %v2178_v34 = vcvt.s32.f32 %v1154_v25  ;;  %v9283_v45 = vor.u32 %v8312_v32, %v7683_v31  ;;  %v9285_v46 = vor.u32 %v8308_v39, %v7685_v35  ;;  %v7707_v22 = vld [vmem:[%s9006_s21 + $0x50] sm:$0xf]  ;;  %v8320_v31 = vld [vmem:[%s9006_s21 + $0x74] sm:$0xf0]  ;;  %v7717_v39 = vld [vmem:[%s9006_s21 + $0x78] sm:$0xf0] }
 0x115   : > { %v2906_v43 = vpack.c.bf16 %v2050_v30, %v2042_v29  ;;  %v762_v55 = vunpack.c.0.s8 %v9262_v54  ;;  %v770_v48 = vunpack.c.1.s8 %v9262_v54  ;;  %v890_v56 = vunpack.c.0.s8 %v9265_v59  ;;  %v8319_v24 = vld [vmem:[%s9006_s21 + $0x6c] sm:$0xf0]  ;;  %v7709_v29 = vld [vmem:[%s9006_s21 + $0x70] sm:$0xf0]  ;;  %v7715_v30 = vld [vmem:[%s9006_s21 + $0x58] sm:$0xf] }
 0x116   : > { %v2970_v44 = vpack.c.bf16 %v2178_v34, %v2170_v33  ;;  %v898_v57 = vunpack.c.1.s8 %v9265_v59  ;;  %v1002_v0 = vunpack.c.2.s8 %v514_v60  ;;  %v1010_v1 = vunpack.c.3.s8 %v514_v60  ;;  %v8316_v34 = vld [vmem:[%s9006_s21 + $0x5c] sm:$0xf] }
 0x117   : > { %3886 = vmatpush.bf16.msra.mxu2 %v2906_v43  ;;  %v1130_v2 = vunpack.c.2.s8 %v546_v61  ;;  %v1138_v3 = vunpack.c.3.s8 %v546_v61  ;;  %v1786_v6 = vcvt.s32.f32 %v762_v55  ;;  %v1794_v7 = vcvt.s32.f32 %v770_v48  ;;  %v482_v55 = vld [vmem:[%s9013_s10 + $0x148] sm:$0xff] }
 0x118   : > { %3581 = vmatmul.bf16.gmra.mxu0 %v9247_v23  ;;  %3919 = vmatpush.bf16.msra.mxu3 %v2970_v44  ;;  %v1914_v10 = vcvt.s32.f32 %v890_v56  ;;  %v1922_v11 = vcvt.s32.f32 %v898_v57  ;;  %v2026_v13 = vcvt.s32.f32 %v1002_v0  ;;  %v2034_v54 = vcvt.s32.f32 %v1010_v1 }
 0x119   : > { %3614 = vmatmul.bf16.gmra.mxu1 %v9249_v37  ;;  %v2154_v14 = vcvt.s32.f32 %v1130_v2  ;;  %v2162_v59 = vcvt.s32.f32 %v1138_v3  ;;  %v2778_v15 = vpack.c.bf16 %v1794_v7, %v1786_v6  ;;  %v746_v17 = vunpack.c.2.s8 %v9298_v5 }
 0x11a   : > { %3647 = vmatmul.bf16.gmra.mxu2 %v9251_v49  ;;  %v2842_v16 = vpack.c.bf16 %v1922_v11, %v1914_v10  ;;  %v754_v18 = vunpack.c.3.s8 %v9298_v5  ;;  %v2898_v19 = vpack.c.bf16 %v2034_v54, %v2026_v13  ;;  %v9308_v33 = vor.u32 %v8319_v24, %v7707_v22 }
 0x11b   : > { %3680 = vmatmul.bf16.gmra.mxu3 %v9253_v50  ;;  %v2962_v21 = vpack.c.bf16 %v2162_v59, %v2154_v14  ;;  %3820 = vmatpush.bf16.msra.mxu0 %v2778_v15  ;;  %v1770_v25 = vcvt.s32.f32 %v746_v17  ;;  %v9312_v35 = vor.u32 %v8315_v28, %v7709_v29  ;;  %v9314_v43 = vor.u32 %v8320_v31, %v7715_v30  ;;  %v7739_v17 = vld [vmem:[%s9006_s21 + $0x90] sm:$0xf]  ;;  %v7747_v28 = vld [vmem:[%s9006_s21 + $0x98] sm:$0xf]  ;;  %v8324_v30 = vld [vmem:[%s9006_s21 + $0x9c] sm:$0xf] }
 0x11c   : > { %3853 = vmatpush.bf16.msra.mxu1 %v2842_v16  ;;  %v1778_v27 = vcvt.s32.f32 %v754_v18  ;;  %3887 = vmatpush.bf16.msra.mxu2 %v2898_v19  ;;  %v9316_v44 = vor.u32 %v8316_v34, %v7717_v39  ;;  %v874_v48 = vunpack.c.2.s8 %v482_v55  ;;  %v882_v56 = vunpack.c.3.s8 %v482_v55  ;;  %v8327_v18 = vld [vmem:[%s9006_s21 + $0xac] sm:$0xf0]  ;;  %v8323_v19 = vld [vmem:[%s9006_s21 + $0x94] sm:$0xf]  ;;  %v8328_v29 = vld [vmem:[%s9006_s21 + $0xb4] sm:$0xf0] }
 0x11d   : > { %3920 = vmatpush.bf16.msra.mxu3 %v2962_v21  ;;  %v986_v1 = vunpack.c.0.s8 %v514_v60  ;;  %v994_v2 = vunpack.c.1.s8 %v514_v60  ;;  %v1114_v3 = vunpack.c.0.s8 %v546_v61  ;;  %v1122_v6 = vunpack.c.1.s8 %v546_v61  ;;  %v7741_v21 = vld [vmem:[%s9006_s21 + $0xb0] sm:$0xf0]  ;;  %v7749_v31 = vld [vmem:[%s9006_s21 + $0xb8] sm:$0xf0] }
 0x11e   : > { %v2770_v32 = vpack.c.bf16 %v1778_v27, %v1770_v25  ;;  %v1898_v57 = vcvt.s32.f32 %v874_v48  ;;  %v1906_v0 = vcvt.s32.f32 %v882_v56  ;;  %v730_v15 = vunpack.c.0.s8 %v9298_v5  ;;  %v506_v56 = vld [vmem:[%s9013_s10 + $0x208] sm:$0xff] }
 0x11f   : > { %v2010_v10 = vcvt.s32.f32 %v986_v1  ;;  %v2018_v11 = vcvt.s32.f32 %v994_v2  ;;  %v2138_v13 = vcvt.s32.f32 %v1114_v3  ;;  %v2146_v54 = vcvt.s32.f32 %v1122_v6 }
 0x120   : > { %3821 = vmatpush.bf16.msra.mxu0 %v2770_v32  ;;  %v2834_v7 = vpack.c.bf16 %v1906_v0, %v1898_v57  ;;  %v738_v16 = vunpack.c.1.s8 %v9298_v5  ;;  %v858_v60 = vunpack.c.0.s8 %v482_v55  ;;  %v866_v61 = vunpack.c.1.s8 %v482_v55  ;;  %v538_v57 = vld [vmem:[%s9013_s10 + $0x308] sm:$0xff] }
 0x121   : > { %v2890_v14 = vpack.c.bf16 %v2018_v11, %v2010_v10  ;;  %v2954_v59 = vpack.c.bf16 %v2146_v54, %v2138_v13  ;;  %v1754_v22 = vcvt.s32.f32 %v730_v15  ;;  %v9331_v5 = vor.u32 %v8327_v18, %v7739_v17  ;;  %v442_v0 = vld [vmem:[%s9013_s10 + $0x8] sm:$0xff] }
 0x122   : > { %3854 = vmatpush.bf16.msra.mxu1 %v2834_v7  ;;  %v1762_v24 = vcvt.s32.f32 %v738_v16  ;;  %v1882_v25 = vcvt.s32.f32 %v858_v60  ;;  %v1890_v27 = vcvt.s32.f32 %v866_v61  ;;  %v9335_v39 = vor.u32 %v8323_v19, %v7741_v21 }
 0x123   : > { %3888 = vmatpush.bf16.msra.mxu2 %v2890_v14  ;;  %3921 = vmatpush.bf16.msra.mxu3 %v2954_v59  ;;  %v9337_v55 = vor.u32 %v8328_v29, %v7747_v28  ;;  %v9339_v48 = vor.u32 %v8324_v30, %v7749_v31  ;;  %v970_v1 = vunpack.c.2.s8 %v506_v56  ;;  %v978_v2 = vunpack.c.3.s8 %v506_v56  ;;  %v474_v59 = vld [vmem:[%s9013_s10 + $0x108] sm:$0xff]  ;;  %v7771_v29 = vld [vmem:[%s9006_s21 + $0xd0] sm:$0xf] }
 0x124   : > { %v2762_v32 = vpack.c.bf16 %v1762_v24, %v1754_v22  ;;  %v2826_v34 = vpack.c.bf16 %v1890_v27, %v1882_v25  ;;  %v1098_v3 = vunpack.c.2.s8 %v538_v57  ;;  %v1106_v6 = vunpack.c.3.s8 %v538_v57  ;;  %v8335_v30 = vld [vmem:[%s9006_s21 + $0xec] sm:$0xf0] }
 0x125   : > { %10782 = vst [vmem:[#allocation33_spill] sm:$0xff] %v9337_v55  ;;  %v714_v7 = vunpack.c.2.s8 %v442_v0  ;;  %v722_v10 = vunpack.c.3.s8 %v442_v0  ;;  %v1994_v11 = vcvt.s32.f32 %v970_v1  ;;  %v2002_v13 = vcvt.s32.f32 %v978_v2  ;;  %v8331_v1 = vld [vmem:[%s9006_s21 + $0xd4] sm:$0xf] }
 0x126   : > { %3822 = vmatpush.bf16.msra.mxu0 %v2762_v32  ;;  %3855 = vmatpush.bf16.msra.mxu1 %v2826_v34  ;;  %10783 = vst [vmem:[#allocation34_spill] sm:$0xff] %v9339_v48  ;;  %v2122_v54 = vcvt.s32.f32 %v1098_v3  ;;  %v2130_v14 = vcvt.s32.f32 %v1106_v6  ;;  %v842_v17 = vunpack.c.2.s8 %v474_v59  ;;  %v850_v18 = vunpack.c.3.s8 %v474_v59  ;;  %v7773_v2 = vld [vmem:[%s9006_s21 + $0xf0] sm:$0xf0] }
 0x127   : > { %v1738_v15 = vcvt.s32.f32 %v714_v7  ;;  %v1746_v16 = vcvt.s32.f32 %v722_v10  ;;  %v2882_v60 = vpack.c.bf16 %v2002_v13, %v1994_v11  ;;  %v954_v24 = vunpack.c.0.s8 %v506_v56  ;;  %v7779_v11 = vld [vmem:[%s9006_s21 + $0xd8] sm:$0xf] }
 0x128   : > { %3693 = vmatmul.bf16.vlgmr.msrb.gmra.mxu0 %v9277_v36  ;;  %v2946_v61 = vpack.c.bf16 %v2130_v14, %v2122_v54  ;;  %v1866_v21 = vcvt.s32.f32 %v842_v17  ;;  %v1874_v22 = vcvt.s32.f32 %v850_v18  ;;  %v962_v25 = vunpack.c.1.s8 %v506_v56  ;;  %v8336_v13 = vld [vmem:[%s9006_s21 + $0xf4] sm:$0xf0] }
 0x129   : > { %3726 = vmatmul.bf16.vlgmr.msrb.gmra.mxu1 %v9281_v40  ;;  %v2754_v19 = vpack.c.bf16 %v1746_v16, %v1738_v15  ;;  %3889 = vmatpush.bf16.msra.mxu2 %v2882_v60  ;;  %v1082_v27 = vunpack.c.0.s8 %v538_v57  ;;  %v1090_v28 = vunpack.c.1.s8 %v538_v57  ;;  %v698_v32 = vunpack.c.0.s8 %v442_v0  ;;  %v8332_v16 = vld [vmem:[%s9006_s21 + $0xdc] sm:$0xf] }
 0x12a   : > { %3759 = vmatmul.bf16.vlgmr.msrb.gmra.mxu2 %v9283_v45  ;;  %3922 = vmatpush.bf16.msra.mxu3 %v2946_v61  ;;  %v2818_v31 = vpack.c.bf16 %v1874_v22, %v1866_v21  ;;  %v706_v34 = vunpack.c.1.s8 %v442_v0  ;;  %v1978_v3 = vcvt.s32.f32 %v954_v24  ;;  %v1986_v6 = vcvt.s32.f32 %v962_v25  ;;  %v7781_v60 = vld [vmem:[%s9006_s21 + $0xf8] sm:$0xf0] }
 0x12b   : > { %3792 = vmatmul.bf16.vlgmr.msrb.gmra.mxu3 %v9285_v46  ;;  %3823 = vmatpush.bf16.msra.mxu0 %v2754_v19  ;;  %v2106_v7 = vcvt.s32.f32 %v1082_v27  ;;  %v2114_v10 = vcvt.s32.f32 %v1090_v28  ;;  %v1722_v54 = vcvt.s32.f32 %v698_v32  ;;  %v826_v14 = vunpack.c.0.s8 %v474_v59  ;;  %v3364_v32 = vld [vmem:[%s9006_s21 + $0x118] sm:$0x33] }
 0x12c   : > { %3856 = vmatpush.bf16.msra.mxu1 %v2818_v31  ;;  %v1730_v56 = vcvt.s32.f32 %v706_v34  ;;  %v834_v57 = vunpack.c.1.s8 %v474_v59  ;;  %v9355_v15 = vor.u32 %v8335_v30, %v7771_v29  ;;  %v2874_v61 = vpack.c.bf16 %v1986_v6, %v1978_v3  ;;  %v3363_v29 = vld [vmem:[%s9006_s21 + $0x110] sm:$0x33]  ;;  %v658_v30 = vld [vmem:[%s9013_s10 + $0x6c8] sm:$0xff] }
 0x12d   : > { %v2938_v0 = vpack.c.bf16 %v2114_v10, %v2106_v7  ;;  %v9359_v18 = vor.u32 %v8331_v1, %v7773_v2  ;;  %v1850_v21 = vcvt.s32.f32 %v826_v14  ;;  %v9361_v25 = vor.u32 %v8336_v13, %v7779_v11  ;;  %v690_v31 = vld [vmem:[%s9013_s10 + $0x7c8] sm:$0xff] }
 0x12e   : > { %10784 = vst [vmem:[#allocation35_spill] sm:$0xff] %v9355_v15  ;;  %v2746_v19 = vpack.c.bf16 %v1730_v56, %v1722_v54  ;;  %v1858_v22 = vcvt.s32.f32 %v834_v57  ;;  %3890 = vmatpush.bf16.msra.mxu2 %v2874_v61  ;;  %v9363_v27 = vor.u32 %v8332_v16, %v7781_v60  ;;  %v1578_v34 = vunpack.c.2.s8 %v658_v30 }
 0x12f   : > { %10785 = vst [vmem:[#allocation36_spill] sm:$0xff] %v9359_v18  ;;  %3923 = vmatpush.bf16.msra.mxu3 %v2938_v0  ;;  %v1586_v1 = vunpack.c.3.s8 %v658_v30  ;;  %v1706_v2 = vunpack.c.2.s8 %v690_v31  ;;  %v1714_v3 = vunpack.c.3.s8 %v690_v31  ;;  %v3469_v10 = vunpack.c.l.b16 %v3363_v29 }
 0x130   : > { %10786 = vst [vmem:[#allocation37_spill] sm:$0xff] %v9361_v25  ;;  %3824 = vmatpush.bf16.msra.mxu0 %v2746_v19  ;;  %v2810_v28 = vpack.c.bf16 %v1858_v22, %v1850_v21  ;;  %v3470_v11 = vunpack.c.h.b16 %v3363_v29  ;;  %v2602_v14 = vcvt.s32.f32 %v1578_v34  ;;  %v3471_v61 = vunpack.c.l.b16 %v3364_v32  ;;  %v594_v22 = vld [vmem:[%s9013_s10 + $0x4c8] sm:$0xff] }
 0x131   : > { %10787 = vst [vmem:[#allocation38_spill] sm:$0xff] %v9363_v27  ;;  %v2610_v57 = vcvt.s32.f32 %v1586_v1  ;;  %v2730_v16 = vcvt.s32.f32 %v1706_v2  ;;  %v3472_v0 = vunpack.c.h.b16 %v3364_v32  ;;  %v1330_v29 = vunpack.c.3.s8 %v594_v22 }
 0x132   : > { %3857 = vmatpush.bf16.msra.mxu1 %v2810_v28  ;;  %v1562_v28 = vunpack.c.0.s8 %v658_v30  ;;  %v1690_v2 = vunpack.c.0.s8 %v690_v31 }
 0x133   : > { %v3186_v21 = vpack.c.bf16 %v2610_v57, %v2602_v14  ;;  %v2354_v32 = vcvt.s32.f32 %v1330_v29 }
 0x134   : > { %v2586_v34 = vcvt.s32.f32 %v1562_v28  ;;  %v2714_v57 = vcvt.s32.f32 %v1690_v2 }
 0x135   : > { %4015 = vmatpush.bf16.msrb.mxu2 %v3186_v21 }
 0x138   : > { %3698 = vmatmul.bf16.gmra.mxu0 %v9308_v33 }
 0x139   : > { %3731 = vmatmul.bf16.gmra.mxu1 %v9312_v35 }
 0x13a   : > { %3764 = vmatmul.bf16.gmra.mxu2 %v9314_v43 }
 0x13b   : > { %3797 = vmatmul.bf16.gmra.mxu3 %v9316_v44 }
 0x148   : > { %3703 = vmatmul.bf16.gmra.mxu0 %v9331_v5 }
 0x149   : > { %3736 = vmatmul.bf16.gmra.mxu1 %v9335_v39 }
 0x14a   : > { %3769 = vmatmul.bf16.gmra.mxu2 %v9337_v55  ;;  %v9381_v55 = vpack.c.b16 %v3471_v61, %v3471_v61 }
 0x14b   : > { %3802 = vmatmul.bf16.gmra.mxu3 %v9339_v48 }
 0x14c   : > { %10790 = vst [vmem:[#allocation41_spill] sm:$0xff] %v9381_v55 }
 0x155   : > { %v3562_v17 = vpop.f32.mrf.mxu0 }
 0x156   : > { %v3595_v24 = vpop.f32.mrf.mxu1 }
 0x157   : > { %v3596_v59 = vadd.f32 %v3595_v24, %v3562_v17  ;;  %v2738_v17 = vcvt.s32.f32 %v1714_v3  ;;  %v626_v24 = vld [vmem:[%s9013_s10 + $0x5c8] sm:$0xff] }
 0x158   : > { %3708 = vmatmul.bf16.gmra.mxu0 %v9355_v15 }
 0x159   : > { %3741 = vmatmul.bf16.gmra.mxu1 %v9359_v18  ;;  %v1322_v18 = vunpack.c.2.s8 %v594_v22 }
 0x15a   : > { %3774 = vmatmul.bf16.gmra.mxu2 %v9361_v25  ;;  %v3250_v25 = vpack.c.bf16 %v2738_v17, %v2730_v16  ;;  %v9379_v17 = vpack.c.b16 %v3470_v11, %v3470_v11  ;;  %v1306_v11 = vunpack.c.0.s8 %v594_v22 }
 0x15b   : > { %3807 = vmatmul.bf16.gmra.mxu3 %v9363_v27  ;;  %v1570_v27 = vunpack.c.1.s8 %v658_v30 }
 0x15c   : > { %4048 = vmatpush.bf16.msrb.mxu3 %v3250_v25  ;;  %10789 = vst [vmem:[#allocation40_spill] sm:$0xff] %v9379_v17  ;;  %v2330_v61 = vcvt.s32.f32 %v1306_v11 }
 0x15d   : > { %v3628_v6 = vpop.f32.mrf.mxu2  ;;  %v3564_v7 = vpop.f32.mrf.mxu0  ;;  %v2594_v1 = vcvt.s32.f32 %v1570_v27 }
 0x15e   : > { %v3629_v13 = vadd.f32 %v3628_v6, %v3596_v59  ;;  %v3661_v54 = vpop.f32.mrf.mxu3  ;;  %v3597_v56 = vpop.f32.mrf.mxu1  ;;  %v1450_v59 = vunpack.c.2.s8 %v626_v24  ;;  %v1458_v6 = vunpack.c.3.s8 %v626_v24 }
 0x15f   : > { %v3598_v60 = vadd.f32 %v3597_v56, %v3564_v7  ;;  %v2346_v7 = vcvt.s32.f32 %v1322_v18  ;;  %v3178_v14 = vpack.c.bf16 %v2594_v1, %v2586_v34 }
 0x160   : > { %v9373_v19 = vadd.f32 %v3661_v54, %v3629_v13  ;;  %v2474_v3 = vcvt.s32.f32 %v1450_v59  ;;  %v1698_v13 = vunpack.c.1.s8 %v690_v31  ;;  %v9377_v54 = vpack.c.b16 %v3469_v10, %v3469_v10 }
 0x161   : > { %v2482_v56 = vcvt.s32.f32 %v1458_v6  ;;  %v3058_v15 = vpack.c.bf16 %v2354_v32, %v2346_v7  ;;  %4016 = vmatpush.bf16.msrb.mxu2 %v3178_v14  ;;  %v9383_v31 = vpack.c.b16 %v3472_v0, %v3472_v0  ;;  %v1314_v59 = vunpack.c.1.s8 %v594_v22  ;;  %v682_v14 = vld [vmem:[%s9013_s10 + $0x788] sm:$0xff] }
 0x162   : > { %10788 = vst [vmem:[#allocation39_spill] sm:$0xff] %v9377_v54  ;;  %v2722_v21 = vcvt.s32.f32 %v1698_v13  ;;  %v1434_v6 = vunpack.c.0.s8 %v626_v24 }
 0x163   : > { %v3122_v18 = vpack.c.bf16 %v2482_v56, %v2474_v3  ;;  %10791 = vst [vmem:[#allocation42_spill] sm:$0xff] %v9383_v31  ;;  %3949 = vmatpush.bf16.msrb.mxu0 %v3058_v15  ;;  %v2338_v0 = vcvt.s32.f32 %v1314_v59  ;;  %v650_v56 = vld [vmem:[%s9013_s10 + $0x688] sm:$0xff] }
 0x164   : > { %v3242_v10 = vpack.c.bf16 %v2722_v21, %v2714_v57  ;;  %v2458_v15 = vcvt.s32.f32 %v1434_v6  ;;  %v586_v57 = vld [vmem:[%s9013_s10 + $0x488] sm:$0xff]  ;;  %v1674_v21 = vunpack.c.2.s8 %v682_v14 }
 0x165   : > { %v3630_v30 = vpop.f32.mrf.mxu2  ;;  %v3567_v16 = vpop.f32.mrf.mxu0  ;;  %3982 = vmatpush.bf16.msrb.mxu1 %v3122_v18  ;;  %v3050_v34 = vpack.c.bf16 %v2338_v0, %v2330_v61  ;;  %v1290_v18 = vunpack.c.2.s8 %v586_v57 }
 0x166   : > { %v3631_v48 = vadd.f32 %v3630_v30, %v3598_v60  ;;  %v3663_v28 = vpop.f32.mrf.mxu3  ;;  %v3600_v27 = vpop.f32.mrf.mxu1  ;;  %4049 = vmatpush.bf16.msrb.mxu3 %v3242_v10  ;;  %v1442_v60 = vunpack.c.1.s8 %v626_v24  ;;  %v1546_v30 = vunpack.c.2.s8 %v650_v56  ;;  %v1298_v10 = vunpack.c.3.s8 %v586_v57 }
 0x167   : > { %v3601_v25 = vadd.f32 %v3600_v27, %v3567_v16  ;;  %3950 = vmatpush.bf16.msrb.mxu0 %v3050_v34  ;;  %v1554_v16 = vunpack.c.3.s8 %v650_v56  ;;  %v9397_v27 = vld [vmem:[%s9013_s10 + $0x588] sm:$0xff]  ;;  %v2314_v0 = vcvt.s32.f32 %v1290_v18  ;;  %v1666_v18 = vunpack.c.1.s8 %v682_v14 }
 0x168   : > { %v9385_v29 = vadd.f32 %v3663_v28, %v3631_v48  ;;  %3713 = vmatmul.bf16.gmra.mxu0 %v9377_v54  ;;  %v2466_v48 = vcvt.s32.f32 %v1442_v60  ;;  %v1682_v28 = vunpack.c.3.s8 %v682_v14  ;;  %v1426_v11 = vunpack.c.3.s8 %v9397_v27 }
 0x169   : > { %3746 = vmatmul.bf16.gmra.mxu1 %v9379_v17  ;;  %v2570_v59 = vcvt.s32.f32 %v1546_v30  ;;  %v2578_v6 = vcvt.s32.f32 %v1554_v16  ;;  %v2698_v60 = vcvt.s32.f32 %v1674_v21  ;;  %v1530_v16 = vunpack.c.0.s8 %v650_v56 }
 0x16a   : > { %3779 = vmatmul.bf16.gmra.mxu2 %v9381_v55  ;;  %v3114_v22 = vpack.c.bf16 %v2466_v48, %v2458_v15  ;;  %v2706_v61 = vcvt.s32.f32 %v1682_v28  ;;  %v2322_v15 = vcvt.s32.f32 %v1298_v10  ;;  %v2450_v34 = vcvt.s32.f32 %v1426_v11 }
 0x16b   : > { %3812 = vmatmul.bf16.gmra.mxu3 %v9383_v31  ;;  %v1538_v21 = vunpack.c.1.s8 %v650_v56  ;;  %v1658_v28 = vunpack.c.0.s8 %v682_v14  ;;  %v1274_v11 = vunpack.c.0.s8 %v586_v57 }
 0x16c   : > { %3983 = vmatpush.bf16.msrb.mxu1 %v3114_v22  ;;  %v3170_v22 = vpack.c.bf16 %v2578_v6, %v2570_v59  ;;  %v3042_v55 = vpack.c.bf16 %v2322_v15, %v2314_v0  ;;  %v1282_v59 = vunpack.c.1.s8 %v586_v57  ;;  %v1410_v57 = vunpack.c.1.s8 %v9397_v27 }
 0x16d   : > { %v3633_v1 = vpop.f32.mrf.mxu2  ;;  %v3569_v2 = vpop.f32.mrf.mxu0  ;;  %v2562_v10 = vcvt.s32.f32 %v1538_v21 }
 0x16e   : > { %v3634_v7 = vadd.f32 %v3633_v1, %v3601_v25  ;;  %v3666_v32 = vpop.f32.mrf.mxu3  ;;  %v3602_v3 = vpop.f32.mrf.mxu1  ;;  %v1418_v25 = vunpack.c.2.s8 %v9397_v27  ;;  %4017 = vmatpush.bf16.msrb.mxu2 %v3170_v22  ;;  %3951 = vmatpush.bf16.msrb.mxu0 %v3042_v55  ;;  %v2306_v0 = vcvt.s32.f32 %v1282_v59  ;;  %v642_v22 = vld [vmem:[%s9013_s10 + $0x648] sm:$0xff] }
 0x16f   : > { %v3603_v24 = vadd.f32 %v3602_v3, %v3569_v2 }
 0x170   : > { %v9391_v13 = vadd.f32 %v3666_v32, %v3634_v7  ;;  %v2442_v48 = vcvt.s32.f32 %v1418_v25  ;;  %v3234_v7 = vpack.c.bf16 %v2706_v61, %v2698_v60  ;;  %v2682_v25 = vcvt.s32.f32 %v1658_v28 }
 0x171   : > { %v2298_v61 = vcvt.s32.f32 %v1274_v11  ;;  %v2434_v28 = vcvt.s32.f32 %v1410_v57 }
 0x172   : > { %v3106_v17 = vpack.c.bf16 %v2450_v34, %v2442_v48  ;;  %4050 = vmatpush.bf16.msrb.mxu3 %v3234_v7  ;;  %v674_v7 = vld [vmem:[%s9013_s10 + $0x748] sm:$0xff] }
 0x173   : > { %v3034_v34 = vpack.c.bf16 %v2306_v0, %v2298_v61  ;;  %v1650_v21 = vunpack.c.3.s8 %v674_v7  ;;  %v578_v61 = vld [vmem:[%s9013_s10 + $0x448] sm:$0xff] }
 0x174   : > { %3984 = vmatpush.bf16.msrb.mxu1 %v3106_v17 }
 0x175   : > { %v3635_v1 = vpop.f32.mrf.mxu2  ;;  %v3572_v2 = vpop.f32.mrf.mxu0  ;;  %3952 = vmatpush.bf16.msrb.mxu0 %v3034_v34  ;;  %v610_v34 = vld [vmem:[%s9013_s10 + $0x548] sm:$0xff] }
 0x176   : > { %v3636_v32 = vadd.f32 %v3635_v1, %v3603_v24  ;;  %v3668_v3 = vpop.f32.mrf.mxu3  ;;  %v3605_v31 = vpop.f32.mrf.mxu1  ;;  %v2554_v24 = vcvt.s32.f32 %v1530_v16  ;;  %v1642_v16 = vunpack.c.2.s8 %v674_v7 }
 0x177   : > { %v3606_v54 = vadd.f32 %v3605_v31, %v3572_v2  ;;  %v2690_v31 = vcvt.s32.f32 %v1666_v18  ;;  %v1402_v2 = vunpack.c.0.s8 %v9397_v27 }
 0x178   : > { %v9401_v30 = vadd.f32 %v3668_v3, %v3636_v32  ;;  %3825 = vmatmul.bf16.vlgmr.msra.gmra.mxu0 %v9130_v53  ;;  %v3162_v6 = vpack.c.bf16 %v2562_v10, %v2554_v24  ;;  %v1514_v32 = vunpack.c.2.s8 %v642_v22  ;;  %v1522_v3 = vunpack.c.3.s8 %v642_v22 }
 0x179   : > { %3858 = vmatmul.bf16.vlgmr.msra.gmra.mxu1 %v9133_v58  ;;  %v3226_v60 = vpack.c.bf16 %v2690_v31, %v2682_v25  ;;  %v2666_v10 = vcvt.s32.f32 %v1642_v16  ;;  %v2674_v25 = vcvt.s32.f32 %v1650_v21 }
 0x17a   : > { %3891 = vmatmul.bf16.vlgmr.msra.gmra.mxu2 %v9137_v62  ;;  %v2538_v18 = vcvt.s32.f32 %v1514_v32  ;;  %v2546_v24 = vcvt.s32.f32 %v1522_v3  ;;  %v1386_v32 = vunpack.c.2.s8 %v610_v34 }
 0x17b   : > { %3924 = vmatmul.bf16.vlgmr.msra.gmra.mxu3 %v9139_v63  ;;  %4018 = vmatpush.bf16.msrb.mxu2 %v3162_v6  ;;  %v3218_v27 = vpack.c.bf16 %v2674_v25, %v2666_v10 }
 0x17c   : > { %4051 = vmatpush.bf16.msrb.mxu3 %v3226_v60  ;;  %v3154_v6 = vpack.c.bf16 %v2546_v24, %v2538_v18  ;;  %v2410_v16 = vcvt.s32.f32 %v1386_v32  ;;  %v1626_v18 = vunpack.c.0.s8 %v674_v7  ;;  %v1634_v24 = vunpack.c.1.s8 %v674_v7 }
 0x17d   : > { %v3638_v17 = vpop.f32.mrf.mxu2  ;;  %v3574_v56 = vpop.f32.mrf.mxu0  ;;  %v1250_v7 = vunpack.c.1.s8 %v578_v61  ;;  %v1370_v32 = vunpack.c.0.s8 %v610_v34 }
 0x17e   : > { %v3639_v55 = vadd.f32 %v3638_v17, %v3606_v54  ;;  %v3671_v14 = vpop.f32.mrf.mxu3  ;;  %v3607_v15 = vpop.f32.mrf.mxu1  ;;  %v2426_v54 = vcvt.s32.f32 %v1402_v2 }
 0x17f   : > { %v3608_v48 = vadd.f32 %v3607_v15, %v3574_v56  ;;  %4019 = vmatpush.bf16.msrb.mxu2 %v3154_v6 }
 0x180   : > { %v9407_v1 = vadd.f32 %v3671_v14, %v3639_v55  ;;  %v3098_v31 = vpack.c.bf16 %v2434_v28, %v2426_v54  ;;  %4052 = vmatpush.bf16.msrb.mxu3 %v3218_v27  ;;  %v1258_v55 = vunpack.c.2.s8 %v578_v61  ;;  %v1266_v14 = vunpack.c.3.s8 %v578_v61 }
 0x181   : > { %v1498_v54 = vunpack.c.0.s8 %v642_v22  ;;  %v1506_v28 = vunpack.c.1.s8 %v642_v22  ;;  %v1242_v22 = vunpack.c.0.s8 %v578_v61 }
 0x182   : > { %3985 = vmatpush.bf16.msrb.mxu1 %v3098_v31  ;;  %v2282_v2 = vcvt.s32.f32 %v1258_v55  ;;  %v2290_v57 = vcvt.s32.f32 %v1266_v14 }
 0x184   : > { %v3026_v3 = vpack.c.bf16 %v2290_v57, %v2282_v2 }
 0x185   : > { %v3640_v11 = vpop.f32.mrf.mxu2  ;;  %v3577_v59 = vpop.f32.mrf.mxu0 }
 0x186   : > { %v3641_v17 = vadd.f32 %v3640_v11, %v3608_v48  ;;  %v3673_v56 = vpop.f32.mrf.mxu3  ;;  %v3610_v60 = vpop.f32.mrf.mxu1  ;;  %v1394_v48 = vunpack.c.3.s8 %v610_v34  ;;  %3953 = vmatpush.bf16.msrb.mxu0 %v3026_v3  ;;  %v2522_v11 = vcvt.s32.f32 %v1498_v54 }
 0x187   : > { %v3611_v0 = vadd.f32 %v3610_v60, %v3577_v59  ;;  %v2658_v60 = vcvt.s32.f32 %v1634_v24  ;;  %v2394_v24 = vcvt.s32.f32 %v1370_v32 }
 0x188   : > { %v9414_v15 = vadd.f32 %v3673_v56, %v3641_v17  ;;  %3830 = vmatmul.bf16.gmra.mxu0 %v9153_v47  ;;  %v2418_v21 = vcvt.s32.f32 %v1394_v48  ;;  %v2530_v17 = vcvt.s32.f32 %v1506_v28  ;;  %v2650_v56 = vcvt.s32.f32 %v1626_v18 }
 0x189   : > { %3863 = vmatmul.bf16.gmra.mxu1 %v9159_v51  ;;  %v1378_v48 = vunpack.c.1.s8 %v610_v34  ;;  %v2266_v28 = vcvt.s32.f32 %v1242_v22  ;;  %v2274_v18 = vcvt.s32.f32 %v1250_v7 }
 0x18a   : > { %3896 = vmatmul.bf16.gmra.mxu2 %v9161_v52  ;;  %v3090_v31 = vpack.c.bf16 %v2418_v21, %v2410_v16  ;;  %v3146_v2 = vpack.c.bf16 %v2530_v17, %v2522_v11  ;;  %v3210_v57 = vpack.c.bf16 %v2658_v60, %v2650_v56  ;;  %v634_v11 = vld [vmem:[%s9013_s10 + $0x608] sm:$0xff] }
 0x18b   : > { %3929 = vmatmul.bf16.gmra.mxu3 %v9167_v20  ;;  %v3018_v61 = vpack.c.bf16 %v2274_v18, %v2266_v28  ;;  %v1482_v56 = vunpack.c.2.s8 %v634_v11  ;;  %v1490_v60 = vunpack.c.3.s8 %v634_v11 }
 0x18c   : > { %3986 = vmatpush.bf16.msrb.mxu1 %v3090_v31  ;;  %4020 = vmatpush.bf16.msrb.mxu2 %v3146_v2 }
 0x18d   : > { %v3643_v10 = vpop.f32.mrf.mxu2  ;;  %v3579_v25 = vpop.f32.mrf.mxu0  ;;  %4053 = vmatpush.bf16.msrb.mxu3 %v3210_v57  ;;  %3954 = vmatpush.bf16.msrb.mxu0 %v3018_v61  ;;  %v602_v57 = vld [vmem:[%s9013_s10 + $0x508] sm:$0xff] }
 0x18e   : > { %v3644_v59 = vadd.f32 %v3643_v10, %v3611_v0  ;;  %v3676_v6 = vpop.f32.mrf.mxu3  ;;  %v3612_v27 = vpop.f32.mrf.mxu1  ;;  %v1362_v61 = vunpack.c.3.s8 %v602_v57 }
 0x18f   : > { %v3613_v55 = vadd.f32 %v3612_v27, %v3579_v25  ;;  %v2402_v25 = vcvt.s32.f32 %v1378_v48 }
 0x190   : > { %v9421_v14 = vadd.f32 %v3676_v6, %v3644_v59  ;;  %v666_v59 = vld [vmem:[%s9013_s10 + $0x708] sm:$0xff] }
 0x191   : > { %v3082_v34 = vpack.c.bf16 %v2402_v25, %v2394_v24  ;;  %v570_v6 = vld [vmem:[%s9013_s10 + $0x408] sm:$0xff]  ;;  %v1618_v2 = vunpack.c.3.s8 %v666_v59 }
 0x192   : > { %v1226_v48 = vunpack.c.2.s8 %v570_v6 }
 0x193   : > { %3987 = vmatpush.bf16.msrb.mxu1 %v3082_v34  ;;  %v2642_v28 = vcvt.s32.f32 %v1618_v2 }
 0x194   : > { %v2250_v24 = vcvt.s32.f32 %v1226_v48 }
 0x195   : > { %v3645_v3 = vpop.f32.mrf.mxu2  ;;  %v3582_v16 = vpop.f32.mrf.mxu0 }
 0x196   : > { %v3646_v0 = vadd.f32 %v3645_v3, %v3613_v55  ;;  %v3678_v21 = vpop.f32.mrf.mxu3  ;;  %v3615_v54 = vpop.f32.mrf.mxu1  ;;  %v1610_v55 = vunpack.c.2.s8 %v666_v59  ;;  %v1234_v3 = vunpack.c.3.s8 %v570_v6 }
 0x197   : > { %v3616_v10 = vadd.f32 %v3615_v54, %v3582_v16  ;;  %v1354_v16 = vunpack.c.2.s8 %v602_v57 }
 0x198   : > { %v9423_v31 = vadd.f32 %v3678_v21, %v3646_v0  ;;  %3835 = vmatmul.bf16.gmra.mxu0 %v9198_v4  ;;  %v2506_v0 = vcvt.s32.f32 %v1482_v56  ;;  %v2514_v21 = vcvt.s32.f32 %v1490_v60  ;;  %v2634_v54 = vcvt.s32.f32 %v1610_v55 }
 0x199   : > { %3868 = vmatmul.bf16.gmra.mxu1 %v9201_v8  ;;  %v2258_v25 = vcvt.s32.f32 %v1234_v3  ;;  %v2386_v8 = vcvt.s32.f32 %v1362_v61  ;;  %v1602_v4 = vunpack.c.1.s8 %v666_v59  ;;  %v1210_v56 = vunpack.c.0.s8 %v570_v6  ;;  %v531_v61 = vld [vmem:[%s9013_s10 + $0x2d0] sm:$0xff] }
 0x19a   : > { %3901 = vmatmul.bf16.gmra.mxu2 %v9203_v9  ;;  %v3138_v34 = vpack.c.bf16 %v2514_v21, %v2506_v0  ;;  %v1218_v60 = vunpack.c.1.s8 %v570_v6 }
 0x19b   : > { %3934 = vmatmul.bf16.gmra.mxu3 %v9205_v12  ;;  %v2378_v12 = vcvt.s32.f32 %v1354_v16  ;;  %v3010_v9 = vpack.c.bf16 %v2258_v25, %v2250_v24  ;;  %v2626_v21 = vcvt.s32.f32 %v1602_v4  ;;  %v2234_v16 = vcvt.s32.f32 %v1210_v56 }
 0x19c   : > { %4021 = vmatpush.bf16.msrb.mxu2 %v3138_v34  ;;  %v1346_v25 = vunpack.c.1.s8 %v602_v57  ;;  %v563_v34 = vld [vmem:[%s9013_s10 + $0x3d0] sm:$0xff] }
 0x19d   : > { %v3648_v27 = vpop.f32.mrf.mxu2  ;;  %v3584_v17 = vpop.f32.mrf.mxu0  ;;  %3955 = vmatpush.bf16.msrb.mxu0 %v3010_v9  ;;  %v3074_v55 = vpack.c.bf16 %v2386_v8, %v2378_v12  ;;  %v1203_v56 = vunpack.c.3.s8 %v563_v34 }
 0x19e   : > { %v3649_v22 = vadd.f32 %v3648_v27, %v3616_v10  ;;  %v3681_v7 = vpop.f32.mrf.mxu3  ;;  %v3617_v32 = vpop.f32.mrf.mxu1  ;;  %v3202_v17 = vpack.c.bf16 %v2642_v28, %v2634_v54  ;;  %v1466_v10 = vunpack.c.0.s8 %v634_v11  ;;  %v1474_v27 = vunpack.c.1.s8 %v634_v11 }
 0x19f   : > { %v1594_v32 = vunpack.c.0.s8 %v666_v59  ;;  %v2242_v54 = vcvt.s32.f32 %v1218_v60  ;;  %3988 = vmatpush.bf16.msrb.mxu1 %v3074_v55  ;;  %v2370_v12 = vcvt.s32.f32 %v1346_v25  ;;  %v467_v25 = vld [vmem:[%s9013_s10 + $0xd0] sm:$0xff] }
 0x1a0   : > { %v9433_v18 = vadd.f32 %v3681_v7, %v3649_v22  ;;  %4054 = vmatpush.bf16.msrb.mxu3 %v3202_v17  ;;  %v2490_v2 = vcvt.s32.f32 %v1466_v10  ;;  %v2498_v22 = vcvt.s32.f32 %v1474_v27  ;;  %v1338_v7 = vunpack.c.0.s8 %v602_v57 }
 0x1a1   : > { %v2618_v0 = vcvt.s32.f32 %v1594_v32  ;;  %v3002_v9 = vpack.c.bf16 %v2242_v54, %v2234_v16  ;;  %v1075_v27 = vunpack.c.3.s8 %v531_v61  ;;  %v1195_v32 = vunpack.c.2.s8 %v563_v34 }
 0x1a2   : > { %v3130_v11 = vpack.c.bf16 %v2498_v22, %v2490_v2  ;;  %v2362_v59 = vcvt.s32.f32 %v1338_v7  ;;  %v3257_v7 = vld [vmem:[#allocation2 + $0xc8] sm:$0xff] }
 0x1a3   : > { %v3194_v6 = vpack.c.bf16 %v2626_v21, %v2618_v0  ;;  %3956 = vmatpush.bf16.msrb.mxu0 %v3002_v9  ;;  %v2219_v0 = vcvt.s32.f32 %v1195_v32  ;;  %v2227_v21 = vcvt.s32.f32 %v1203_v56  ;;  %v1059_v9 = vunpack.c.1.s8 %v531_v61 }
 0x1a4   : > { %4022 = vmatpush.bf16.msrb.mxu2 %v3130_v11  ;;  %v3066_v4 = vpack.c.bf16 %v2370_v12, %v2362_v59  ;;  %v499_v59 = vld [vmem:[%s9013_s10 + $0x1d0] sm:$0xff] }
 0x1a5   : > { %v3650_v48 = vpop.f32.mrf.mxu2  ;;  %v3694_v3 = vpop.f32.mrf.mxu0  ;;  %4055 = vmatpush.bf16.msrb.mxu3 %v3194_v6  ;;  %v1051_v6 = vunpack.c.0.s8 %v531_v61 }
 0x1a6   : > { %v3683_v28 = vpop.f32.mrf.mxu3  ;;  %v3727_v24 = vpop.f32.mrf.mxu1  ;;  %v3695_v8 = vadd.f32 %v3694_v3, %v9373_v19  ;;  %3989 = vmatpush.bf16.msrb.mxu1 %v3066_v4  ;;  %v1067_v19 = vunpack.c.2.s8 %v531_v61  ;;  %v2099_v3 = vcvt.s32.f32 %v1075_v27 }
 0x1a7   : > { %v2995_v28 = vpack.c.bf16 %v2227_v21, %v2219_v0 }
 0x1a8   : > { %3840 = vmatmul.bf16.gmra.mxu0 %v9227_v26  ;;  %v3728_v57 = vadd.f32 %v3727_v24, %v3695_v8  ;;  %v2091_v48 = vcvt.s32.f32 %v1067_v19  ;;  %v1187_v8 = vunpack.c.1.s8 %v563_v34  ;;  %v947_v19 = vunpack.c.3.s8 %v499_v59 }
 0x1a9   : > { %3873 = vmatmul.bf16.gmra.mxu1 %v9231_v38  ;;  %4180 = vmatpush.bf16.msra.mxu3 %v2995_v28 }
 0x1aa   : > { %3906 = vmatmul.bf16.gmra.mxu2 %v9233_v41  ;;  %v2931_v54 = vpack.c.bf16 %v2099_v3, %v2091_v48  ;;  %v1971_v61 = vcvt.s32.f32 %v947_v19  ;;  %v2211_v28 = vcvt.s32.f32 %v1187_v8 }
 0x1ab   : > { %3939 = vmatmul.bf16.gmra.mxu3 %v9235_v42 }
 0x1ac   : > { %4147 = vmatpush.bf16.msra.mxu2 %v2931_v54 }
 0x1ad   : > { %v3760_v17 = vpop.f32.mrf.mxu2  ;;  %v3696_v10 = vpop.f32.mrf.mxu0 }
 0x1ae   : > { %v3761_v60 = vadd.f32 %v3760_v17, %v3728_v57  ;;  %v3793_v55 = vpop.f32.mrf.mxu3  ;;  %v3697_v2 = vadd.f32 %v3696_v10, %v9385_v29  ;;  %v3729_v22 = vpop.f32.mrf.mxu1  ;;  %v1179_v29 = vunpack.c.0.s8 %v563_v34  ;;  %v811_v57 = vunpack.c.2.s8 %v467_v25 }
 0x1af   : > { %v819_v17 = vunpack.c.3.s8 %v467_v25  ;;  %v939_v10 = vunpack.c.2.s8 %v499_v59 }
 0x1b0   : > { %v3794_v16 = vadd.f32 %v3793_v55, %v3761_v60  ;;  %v3730_v11 = vadd.f32 %v3729_v22, %v3697_v2  ;;  %v2075_v55 = vcvt.s32.f32 %v1051_v6  ;;  %v2083_v2 = vcvt.s32.f32 %v1059_v9  ;;  %v3265_v22 = vld [vmem:[#allocation2 + $0xd8] sm:$0xff] }
 0x1b1   : > { %v1843_v48 = vcvt.s32.f32 %v819_v17  ;;  %v1963_v3 = vcvt.s32.f32 %v939_v10  ;;  %v2203_v21 = vcvt.s32.f32 %v1179_v29  ;;  %v795_v6 = vunpack.c.0.s8 %v467_v25 }
 0x1b2   : > { %v5665_v24 = vadd.f32 %v3794_v16, %v3257_v7  ;;  %v1835_v7 = vcvt.s32.f32 %v811_v57  ;;  %v2923_v34 = vpack.c.bf16 %v2083_v2, %v2075_v55  ;;  %v803_v9 = vunpack.c.1.s8 %v467_v25 }
 0x1b3   : > { %v2867_v54 = vpack.c.bf16 %v1971_v61, %v1963_v3  ;;  %v931_v29 = vunpack.c.1.s8 %v499_v59  ;;  %v1819_v19 = vcvt.s32.f32 %v795_v6  ;;  %v555_v3 = vld [vmem:[%s9013_s10 + $0x390] sm:$0xff] }
 0x1b4   : > { %5737 = vst [vmem:[#allocation2 + $0xc8] sm:$0xff] %v5665_v24  ;;  %v2803_v16 = vpack.c.bf16 %v1843_v48, %v1835_v7  ;;  %4148 = vmatpush.bf16.msra.mxu2 %v2923_v34  ;;  %v523_v48 = vld [vmem:[%s9013_s10 + $0x290] sm:$0xff] }
 0x1b5   : > { %v3762_v12 = vpop.f32.mrf.mxu2  ;;  %v3699_v4 = vpop.f32.mrf.mxu0  ;;  %4114 = vmatpush.bf16.msra.mxu1 %v2867_v54  ;;  %v459_v61 = vld [vmem:[%s9013_s10 + $0x90] sm:$0xff]  ;;  %v1163_v54 = vunpack.c.2.s8 %v555_v3 }
 0x1b6   : > { %v3763_v27 = vadd.f32 %v3762_v12, %v3730_v11  ;;  %v3795_v32 = vpop.f32.mrf.mxu3  ;;  %v3700_v56 = vadd.f32 %v3699_v4, %v9391_v13  ;;  %v3732_v60 = vpop.f32.mrf.mxu1  ;;  %4081 = vmatpush.bf16.msra.mxu0 %v2803_v16  ;;  %v2987_v11 = vpack.c.bf16 %v2211_v28, %v2203_v21  ;;  %v923_v12 = vunpack.c.0.s8 %v499_v59 }
 0x1b7   : > { %v1035_v21 = vunpack.c.2.s8 %v523_v48  ;;  %v1043_v16 = vunpack.c.3.s8 %v523_v48  ;;  %v1171_v28 = vunpack.c.3.s8 %v555_v3  ;;  %v779_v6 = vunpack.c.2.s8 %v459_v61 }
 0x1b8   : > { %v3796_v0 = vadd.f32 %v3795_v32, %v3763_v27  ;;  %3845 = vmatmul.bf16.gmra.mxu0 %v9247_v23  ;;  %v3733_v13 = vadd.f32 %v3732_v60, %v3700_v56  ;;  %4181 = vmatpush.bf16.msra.mxu3 %v2987_v11  ;;  %v1827_v27 = vcvt.s32.f32 %v803_v9  ;;  %v3273_v32 = vld [vmem:[#allocation2 + $0x180] sm:$0xff]  ;;  %v1947_v56 = vcvt.s32.f32 %v923_v12  ;;  %v9456_v12 = vld [vmem:[%s9013_s10 + $0x190] sm:$0xff] }
 0x1b9   : > { %3878 = vmatmul.bf16.gmra.mxu1 %v9249_v37  ;;  %v1955_v60 = vcvt.s32.f32 %v931_v29  ;;  %v787_v9 = vunpack.c.3.s8 %v459_v61  ;;  %v3281_v29 = vld [vmem:[#allocation2 + $0x88] sm:$0xff] }
 0x1ba   : > { %v5673_v24 = vadd.f32 %v3796_v0, %v3265_v22  ;;  %3911 = vmatmul.bf16.gmra.mxu2 %v9251_v49  ;;  %v2795_v25 = vpack.c.bf16 %v1827_v27, %v1819_v19  ;;  %v1803_v19 = vcvt.s32.f32 %v779_v6 }
 0x1bb   : > { %3944 = vmatmul.bf16.gmra.mxu3 %v9253_v50  ;;  %v2859_v22 = vpack.c.bf16 %v1955_v60, %v1947_v56  ;;  %v1811_v27 = vcvt.s32.f32 %v787_v9  ;;  %v915_v60 = vunpack.c.3.s8 %v9456_v12 }
 0x1bc   : > { %5745 = vst [vmem:[#allocation2 + $0xd8] sm:$0xff] %v5673_v24  ;;  %4082 = vmatpush.bf16.msra.mxu0 %v2795_v25 }
 0x1bd   : > { %v3765_v4 = vpop.f32.mrf.mxu2  ;;  %v3701_v57 = vpop.f32.mrf.mxu0  ;;  %4115 = vmatpush.bf16.msra.mxu1 %v2859_v22 }
 0x1be   : > { %v3766_v17 = vadd.f32 %v3765_v4, %v3733_v13  ;;  %v3798_v8 = vpop.f32.mrf.mxu3  ;;  %v3734_v10 = vpop.f32.mrf.mxu1  ;;  %v3702_v2 = vadd.f32 %v3701_v57, %v9401_v30  ;;  %v2059_v4 = vcvt.s32.f32 %v1035_v21  ;;  %v2067_v57 = vcvt.s32.f32 %v1043_v16 }
 0x1bf   : > { %v1155_v21 = vunpack.c.1.s8 %v555_v3 }
 0x1c0   : > { %v3799_v55 = vadd.f32 %v3798_v8, %v3766_v17  ;;  %v3735_v7 = vadd.f32 %v3734_v10, %v3702_v2  ;;  %v2187_v17 = vcvt.s32.f32 %v1163_v54  ;;  %v2195_v8 = vcvt.s32.f32 %v1171_v28 }
 0x1c1   : > { %v2787_v2 = vpack.c.bf16 %v1811_v27, %v1803_v19 }
 0x1c2   : > { %v5681_v59 = vadd.f32 %v3799_v55, %v3273_v32  ;;  %v2915_v32 = vpack.c.bf16 %v2067_v57, %v2059_v4  ;;  %v2979_v56 = vpack.c.bf16 %v2195_v8, %v2187_v17  ;;  %v3289_v4 = vld [vmem:[#allocation2 + $0x80] sm:$0xff]  ;;  %v2179_v17 = vcvt.s32.f32 %v1155_v21 }
 0x1c3   : > { %4083 = vmatpush.bf16.msra.mxu0 %v2787_v2  ;;  %v547_v2 = vld [vmem:[%s9013_s10 + $0x350] sm:$0xff] }
 0x1c4   : > { %5753 = vst [vmem:[#allocation2 + $0x180] sm:$0xff] %v5681_v59  ;;  %4149 = vmatpush.bf16.msra.mxu2 %v2915_v32  ;;  %v1939_v59 = vcvt.s32.f32 %v915_v60  ;;  %4182 = vmatpush.bf16.msra.mxu3 %v2979_v56  ;;  %v899_v60 = vunpack.c.1.s8 %v9456_v12 }
 0x1c5   : > { %v3767_v0 = vpop.f32.mrf.mxu2  ;;  %v3704_v34 = vpop.f32.mrf.mxu0 }
 0x1c6   : > { %v3768_v24 = vadd.f32 %v3767_v0, %v3735_v7  ;;  %v3800_v13 = vpop.f32.mrf.mxu3  ;;  %v3705_v30 = vadd.f32 %v3704_v34, %v9407_v1  ;;  %v3737_v11 = vpop.f32.mrf.mxu1  ;;  %v907_v1 = vunpack.c.2.s8 %v9456_v12  ;;  %v1019_v7 = vunpack.c.0.s8 %v523_v48 }
 0x1c7   : > { %v1027_v0 = vunpack.c.1.s8 %v523_v48  ;;  %v1147_v34 = vunpack.c.0.s8 %v555_v3 }
 0x1c8   : > { %v3801_v10 = vadd.f32 %v3800_v13, %v3768_v24  ;;  %3957 = vmatmul.bf16.vlgmr.msrb.gmra.mxu0 %v9277_v36  ;;  %v3738_v25 = vadd.f32 %v3737_v11, %v3705_v30  ;;  %v1931_v22 = vcvt.s32.f32 %v907_v1  ;;  %v763_v24 = vunpack.c.0.s8 %v459_v61 }
 0x1c9   : > { %3990 = vmatmul.bf16.vlgmr.msrb.gmra.mxu1 %v9281_v40  ;;  %v771_v13 = vunpack.c.1.s8 %v459_v61  ;;  %v2043_v11 = vcvt.s32.f32 %v1019_v7  ;;  %v2171_v57 = vcvt.s32.f32 %v1147_v34  ;;  %v891_v1 = vunpack.c.0.s8 %v9456_v12 }
 0x1ca   : > { %v5689_v55 = vadd.f32 %v3801_v10, %v3281_v29  ;;  %4023 = vmatmul.bf16.vlgmr.msrb.gmra.mxu2 %v9283_v45  ;;  %v2851_v28 = vpack.c.bf16 %v1939_v59, %v1931_v22  ;;  %v2051_v29 = vcvt.s32.f32 %v1027_v0  ;;  %v1787_v8 = vcvt.s32.f32 %v763_v24  ;;  %v451_v24 = vld [vmem:[%s9013_s10 + $0x50] sm:$0xff] }
 0x1cb   : > { %4056 = vmatmul.bf16.vlgmr.msrb.gmra.mxu3 %v9285_v46  ;;  %v1795_v48 = vcvt.s32.f32 %v771_v13  ;;  %v2971_v27 = vpack.c.bf16 %v2179_v17, %v2171_v57  ;;  %v1131_v7 = vunpack.c.2.s8 %v547_v2  ;;  %v1139_v0 = vunpack.c.3.s8 %v547_v2  ;;  %v3297_v13 = vld [vmem:[#allocation2 + $0x48] sm:$0xff] }
 0x1cc   : > { %5761 = vst [vmem:[#allocation2 + $0x88] sm:$0xff] %v5689_v55  ;;  %4116 = vmatpush.bf16.msra.mxu1 %v2851_v28  ;;  %v2907_v19 = vpack.c.bf16 %v2051_v29, %v2043_v11  ;;  %v515_v55 = vld [vmem:[%s9013_s10 + $0x250] sm:$0xff]  ;;  %v1923_v28 = vcvt.s32.f32 %v899_v60  ;;  %v747_v17 = vunpack.c.2.s8 %v451_v24 }
 0x1cd   : > { %v3770_v16 = vpop.f32.mrf.mxu2  ;;  %v3706_v54 = vpop.f32.mrf.mxu0  ;;  %v2779_v32 = vpack.c.bf16 %v1795_v48, %v1787_v8  ;;  %4183 = vmatpush.bf16.msra.mxu3 %v2971_v27  ;;  %v1011_v59 = vunpack.c.3.s8 %v515_v55  ;;  %v2163_v12 = vcvt.s32.f32 %v1139_v0  ;;  %v483_v11 = vld [vmem:[%s9013_s10 + $0x150] sm:$0xff] }
 0x1ce   : > { %v3771_v6 = vadd.f32 %v3770_v16, %v3738_v25  ;;  %v3803_v9 = vpop.f32.mrf.mxu3  ;;  %v3739_v30 = vpop.f32.mrf.mxu1  ;;  %v3707_v3 = vadd.f32 %v3706_v54, %v9414_v15  ;;  %4150 = vmatpush.bf16.msra.mxu2 %v2907_v19  ;;  %v1003_v15 = vunpack.c.2.s8 %v515_v55  ;;  %v1915_v54 = vcvt.s32.f32 %v891_v1 }
 0x1cf   : > { %4084 = vmatpush.bf16.msra.mxu0 %v2779_v32  ;;  %v1771_v27 = vcvt.s32.f32 %v747_v17  ;;  %v883_v32 = vunpack.c.3.s8 %v483_v11  ;;  %v995_v1 = vunpack.c.1.s8 %v515_v55  ;;  %v859_v17 = vunpack.c.0.s8 %v483_v11 }
 0x1d0   : > { %v3804_v10 = vadd.f32 %v3803_v9, %v3771_v6  ;;  %v3740_v56 = vadd.f32 %v3739_v30, %v3707_v3  ;;  %v2027_v6 = vcvt.s32.f32 %v1003_v15  ;;  %v2035_v9 = vcvt.s32.f32 %v1011_v59 }
 0x1d1   : > { %v2155_v30 = vcvt.s32.f32 %v1131_v7  ;;  %v2843_v57 = vpack.c.bf16 %v1923_v28, %v1915_v54  ;;  %v875_v3 = vunpack.c.2.s8 %v483_v11  ;;  %v1123_v15 = vunpack.c.1.s8 %v547_v2 }
 0x1d2   : > { %v5697_v61 = vadd.f32 %v3804_v10, %v3289_v4  ;;  %v2899_v8 = vpack.c.bf16 %v2035_v9, %v2027_v6  ;;  %v755_v10 = vunpack.c.3.s8 %v451_v24 }
 0x1d3   : > { %v2963_v48 = vpack.c.bf16 %v2163_v12, %v2155_v30  ;;  %4117 = vmatpush.bf16.msra.mxu1 %v2843_v57  ;;  %v3305_v30 = vld [vmem:[#allocation2 + $0x90] sm:$0xff] }
 0x1d4   : > { %5769 = vst [vmem:[#allocation2 + $0x80] sm:$0xff] %v5697_v61  ;;  %4151 = vmatpush.bf16.msra.mxu2 %v2899_v8  ;;  %v1899_v61 = vcvt.s32.f32 %v875_v3  ;;  %v867_v8 = vunpack.c.1.s8 %v483_v11 }
 0x1d5   : > { %v3772_v25 = vpop.f32.mrf.mxu2  ;;  %v3709_v22 = vpop.f32.mrf.mxu0  ;;  %4184 = vmatpush.bf16.msra.mxu3 %v2963_v48 }
 0x1d6   : > { %v3773_v34 = vadd.f32 %v3772_v25, %v3740_v56  ;;  %v3805_v21 = vpop.f32.mrf.mxu3  ;;  %v3742_v16 = vpop.f32.mrf.mxu1  ;;  %v3710_v4 = vadd.f32 %v3709_v22, %v9421_v14  ;;  %v1779_v14 = vcvt.s32.f32 %v755_v10  ;;  %v987_v56 = vunpack.c.0.s8 %v515_v55 }
 0x1d7   : > { %v1907_v25 = vcvt.s32.f32 %v883_v32  ;;  %v1115_v22 = vunpack.c.0.s8 %v547_v2  ;;  %v2147_v55 = vcvt.s32.f32 %v1123_v15  ;;  %v739_v2 = vunpack.c.1.s8 %v451_v24  ;;  %v507_v15 = vld [vmem:[%s9013_s10 + $0x210] sm:$0xff] }
 0x1d8   : > { %v3806_v29 = vadd.f32 %v3805_v21, %v3773_v34  ;;  %3962 = vmatmul.bf16.gmra.mxu0 %v9308_v33  ;;  %v3743_v60 = vadd.f32 %v3742_v16, %v3710_v4  ;;  %v2771_v0 = vpack.c.bf16 %v1779_v14, %v1771_v27  ;;  %v2011_v34 = vcvt.s32.f32 %v987_v56 }
 0x1d9   : > { %3995 = vmatmul.bf16.gmra.mxu1 %v9312_v35  ;;  %v2019_v21 = vcvt.s32.f32 %v995_v1  ;;  %v2835_v6 = vpack.c.bf16 %v1907_v25, %v1899_v61  ;;  %v2139_v9 = vcvt.s32.f32 %v1115_v22  ;;  %v731_v4 = vunpack.c.0.s8 %v451_v24  ;;  %v3313_v25 = vld [vmem:[#allocation2 + $0x10] sm:$0xff] }
 0x1da   : > { %v5705_v19 = vadd.f32 %v3806_v29, %v3297_v13  ;;  %4028 = vmatmul.bf16.gmra.mxu2 %v9314_v43  ;;  %4085 = vmatpush.bf16.msra.mxu0 %v2771_v0  ;;  %v1763_v3 = vcvt.s32.f32 %v739_v2  ;;  %v1891_v27 = vcvt.s32.f32 %v867_v8  ;;  %v971_v0 = vunpack.c.2.s8 %v507_v15 }
 0x1db   : > { %4061 = vmatmul.bf16.gmra.mxu3 %v9316_v44  ;;  %v2891_v12 = vpack.c.bf16 %v2019_v21, %v2011_v34  ;;  %4118 = vmatpush.bf16.msra.mxu1 %v2835_v6  ;;  %v2955_v57 = vpack.c.bf16 %v2147_v55, %v2139_v9  ;;  %v1755_v10 = vcvt.s32.f32 %v731_v4  ;;  %v979_v34 = vunpack.c.3.s8 %v507_v15  ;;  %v475_v4 = vld [vmem:[%s9013_s10 + $0x110] sm:$0xff] }
 0x1dc   : > { %5777 = vst [vmem:[#allocation2 + $0x48] sm:$0xff] %v5705_v19  ;;  %v1883_v19 = vcvt.s32.f32 %v859_v17  ;;  %v843_v17 = vunpack.c.2.s8 %v475_v4  ;;  %v851_v8 = vunpack.c.3.s8 %v475_v4 }
 0x1dd   : > { %v3775_v59 = vpop.f32.mrf.mxu2  ;;  %v3711_v7 = vpop.f32.mrf.mxu0  ;;  %4152 = vmatpush.bf16.msra.mxu2 %v2891_v12  ;;  %4185 = vmatpush.bf16.msra.mxu3 %v2955_v57  ;;  %v2763_v14 = vpack.c.bf16 %v1763_v3, %v1755_v10  ;;  %v1995_v12 = vcvt.s32.f32 %v971_v0  ;;  %v2003_v55 = vcvt.s32.f32 %v979_v34 }
 0x1de   : > { %v3776_v54 = vadd.f32 %v3775_v59, %v3743_v60  ;;  %v3808_v28 = vpop.f32.mrf.mxu3  ;;  %v3744_v13 = vpop.f32.mrf.mxu1  ;;  %v3712_v16 = vadd.f32 %v3711_v7, %v9423_v31  ;;  %v2827_v56 = vpack.c.bf16 %v1891_v27, %v1883_v19  ;;  %v539_v59 = vld [vmem:[%s9013_s10 + $0x310] sm:$0xff] }
 0x1df   : > { %4086 = vmatpush.bf16.msra.mxu0 %v2763_v14  ;;  %v443_v7 = vld [vmem:[%s9013_s10 + $0x10] sm:$0xff]  ;;  %v1099_v21 = vunpack.c.2.s8 %v539_v59  ;;  %v2883_v3 = vpack.c.bf16 %v2003_v55, %v1995_v12  ;;  %v1091_v0 = vunpack.c.1.s8 %v539_v59 }
 0x1e0   : > { %v3809_v29 = vadd.f32 %v3808_v28, %v3776_v54  ;;  %v3745_v32 = vadd.f32 %v3744_v13, %v3712_v16  ;;  %4119 = vmatpush.bf16.msra.mxu1 %v2827_v56  ;;  %v1107_v54 = vunpack.c.3.s8 %v539_v59  ;;  %v715_v6 = vunpack.c.2.s8 %v443_v7 }
 0x1e1   : > { %v723_v9 = vunpack.c.3.s8 %v443_v7  ;;  %v1875_v56 = vcvt.s32.f32 %v851_v8  ;;  %4153 = vmatpush.bf16.msra.mxu2 %v2883_v3  ;;  %v699_v34 = vunpack.c.0.s8 %v443_v7  ;;  %v2115_v12 = vcvt.s32.f32 %v1091_v0 }
 0x1e2   : > { %v5713_v48 = vadd.f32 %v3809_v29, %v3305_v30  ;;  %v10793_v30 = vld [vmem:[#allocation34_spill] sm:$0xff]  ;;  %v2123_v29 = vcvt.s32.f32 %v1099_v21  ;;  %v2131_v16 = vcvt.s32.f32 %v1107_v54  ;;  %v1739_v2 = vcvt.s32.f32 %v715_v6 }
 0x1e3   : > { %v1747_v57 = vcvt.s32.f32 %v723_v9  ;;  %v707_v21 = vunpack.c.1.s8 %v443_v7  ;;  %v827_v6 = vunpack.c.0.s8 %v475_v4  ;;  %v1723_v55 = vcvt.s32.f32 %v699_v34 }
 0x1e4   : > { %5785 = vst [vmem:[#allocation2 + $0x90] sm:$0xff] %v5713_v48  ;;  %v2947_v19 = vpack.c.bf16 %v2131_v16, %v2123_v29 }
 0x1e5   : > { %v3777_v31 = vpop.f32.mrf.mxu2  ;;  %v3714_v61 = vpop.f32.mrf.mxu0  ;;  %v1731_v29 = vcvt.s32.f32 %v707_v21 }
 0x1e6   : > { %v3778_v24 = vadd.f32 %v3777_v31, %v3745_v32  ;;  %v3810_v1 = vpop.f32.mrf.mxu3  ;;  %v3715_v60 = vadd.f32 %v3714_v61, %v9433_v18  ;;  %v3747_v11 = vpop.f32.mrf.mxu1  ;;  %v10792_v18 = vld [vmem:[#allocation33_spill] sm:$0xff]  ;;  %v2755_v31 = vpack.c.bf16 %v1747_v57, %v1739_v2  ;;  %v1867_v61 = vcvt.s32.f32 %v843_v17  ;;  %4186 = vmatpush.bf16.msra.mxu3 %v2947_v19  ;;  %v10794_v19 = vld [vmem:[#allocation35_spill] sm:$0xff] }
 0x1e7   : > { %v835_v2 = vunpack.c.1.s8 %v475_v4  ;;  %v1851_v57 = vcvt.s32.f32 %v827_v6  ;;  %v10796_v4 = vld [vmem:[#allocation37_spill] sm:$0xff] }
 0x1e8   : > { %v3811_v22 = vadd.f32 %v3810_v1, %v3778_v24  ;;  %3967 = vmatmul.bf16.gmra.mxu0 %v9331_v5  ;;  %v3748_v13 = vadd.f32 %v3747_v11, %v3715_v60  ;;  %v3321_v24 = vld [vmem:[#allocation2 + $0x1a0] sm:$0x7]  ;;  %v2819_v60 = vpack.c.bf16 %v1875_v56, %v1867_v61  ;;  %v955_v11 = vunpack.c.0.s8 %v507_v15  ;;  %v691_v61 = vld [vmem:[%s9013_s10 + $0x7d0] sm:$0xff] }
 0x1e9   : > { %4000 = vmatmul.bf16.gmra.mxu1 %v9335_v39  ;;  %4087 = vmatpush.bf16.msra.mxu0 %v2755_v31  ;;  %v659_v31 = vld [vmem:[%s9013_s10 + $0x6d0] sm:$0xff] }
 0x1ea   : > { %v5721_v28 = vadd.f32 %v3811_v22, %v3313_v25  ;;  %4033 = vmatmul.bf16.gmra.mxu2 %v10792_v18  ;;  %v963_v25 = vunpack.c.1.s8 %v507_v15  ;;  %v1083_v22 = vunpack.c.0.s8 %v539_v59  ;;  %4120 = vmatpush.bf16.msra.mxu1 %v2819_v60  ;;  %v2747_v59 = vpack.c.bf16 %v1731_v29, %v1723_v55  ;;  %v595_v55 = vld [vmem:[%s9013_s10 + $0x4d0] sm:$0xff] }
 0x1eb   : > { %4066 = vmatmul.bf16.gmra.mxu3 %v10793_v30  ;;  %v1579_v56 = vunpack.c.2.s8 %v659_v31  ;;  %v1715_v60 = vunpack.c.3.s8 %v691_v61  ;;  %v627_v29 = vld [vmem:[%s9013_s10 + $0x5d0] sm:$0xff] }
 0x1ec   : > { %5793 = vst [vmem:[#allocation2 + $0x10] sm:$0xff] %v5721_v28  ;;  %v1979_v28 = vcvt.s32.f32 %v955_v11  ;;  %v2107_v9 = vcvt.s32.f32 %v1083_v22 }
 0x1ed   : > { %v3780_v48 = vpop.f32.mrf.mxu2  ;;  %v3716_v10 = vpop.f32.mrf.mxu0  ;;  %4088 = vmatpush.bf16.msra.mxu0 %v2747_v59  ;;  %v2603_v21 = vcvt.s32.f32 %v1579_v56  ;;  %v2739_v6 = vcvt.s32.f32 %v1715_v60  ;;  %v1459_v59 = vunpack.c.3.s8 %v627_v29 }
 0x1ee   : > { %v3781_v27 = vadd.f32 %v3780_v48, %v3748_v13  ;;  %v3813_v32 = vpop.f32.mrf.mxu3  ;;  %v3749_v14 = vpop.f32.mrf.mxu1  ;;  %v1987_v13 = vcvt.s32.f32 %v963_v25  ;;  %v2939_v15 = vpack.c.bf16 %v2115_v12, %v2107_v9  ;;  %v1859_v10 = vcvt.s32.f32 %v835_v2 }
 0x1ef   : > { %v10797_v14 = vld [vmem:[#allocation38_spill] sm:$0xff]  ;;  %v1571_v2 = vunpack.c.1.s8 %v659_v31 }
 0x1f0   : > { %v3814_v1 = vadd.f32 %v3813_v32, %v3781_v27  ;;  %v2875_v16 = vpack.c.bf16 %v1987_v13, %v1979_v28  ;;  %4187 = vmatpush.bf16.msra.mxu3 %v2939_v15  ;;  %v2811_v27 = vpack.c.bf16 %v1859_v10, %v1851_v57  ;;  %v10795_v32 = vld [vmem:[#allocation36_spill] sm:$0xff]  ;;  %v1451_v15 = vunpack.c.2.s8 %v627_v29 }
 0x1f1   : > { %v1691_v10 = vunpack.c.0.s8 %v691_v61 }
 0x1f2   : > { %v5729_v54 = vadd.f32 %v3814_v1, %v3321_v24  ;;  %4154 = vmatpush.bf16.msra.mxu2 %v2875_v16  ;;  %4121 = vmatpush.bf16.msra.mxu1 %v2811_v27  ;;  %v1587_v24 = vunpack.c.3.s8 %v659_v31  ;;  %v1707_v1 = vunpack.c.2.s8 %v691_v61  ;;  %v1563_v16 = vunpack.c.0.s8 %v659_v31 }
 0x1f3   : > { %v2475_v56 = vcvt.s32.f32 %v1451_v15  ;;  %v1443_v15 = vunpack.c.1.s8 %v627_v29 }
 0x1f4   : > { %5801 = vst [vmem:[#allocation2 + $0x1a0] sm:$0x7] %v5729_v54  ;;  %v2611_v54 = vcvt.s32.f32 %v1587_v24  ;;  %v2731_v28 = vcvt.s32.f32 %v1707_v1  ;;  %v1699_v24 = vunpack.c.1.s8 %v691_v61  ;;  %v2483_v1 = vcvt.s32.f32 %v1459_v59 }
 0x1f5   : > { %v3782_v17 = vpop.f32.mrf.mxu2  ;;  %v3826_v8 = vpop.f32.mrf.mxu0  ;;  %v1307_v61 = vunpack.c.0.s8 %v595_v55 }
 0x1f6   : > { %v3815_v7 = vpop.f32.mrf.mxu3  ;;  %v3859_v48 = vpop.f32.mrf.mxu1  ;;  %v3187_v12 = vpack.c.bf16 %v2611_v54, %v2603_v21  ;;  %v3251_v57 = vpack.c.bf16 %v2739_v6, %v2731_v28  ;;  %v1323_v17 = vunpack.c.2.s8 %v595_v55  ;;  %v3123_v28 = vpack.c.bf16 %v2483_v1, %v2475_v56 }
 0x1f7   : > { %v3860_v3 = vadd.f32 %v3859_v48, %v3826_v8  ;;  %v1331_v8 = vunpack.c.3.s8 %v595_v55  ;;  %v2587_v7 = vcvt.s32.f32 %v1563_v16  ;;  %v2595_v48 = vcvt.s32.f32 %v1571_v2  ;;  %v10798_v2 = vld [vmem:[#allocation39_spill] sm:$0xff] }
 0x1f8   : > { %3972 = vmatmul.bf16.gmra.mxu0 %v10794_v19  ;;  %4279 = vmatpush.bf16.msrb.mxu2 %v3187_v12  ;;  %v2331_v59 = vcvt.s32.f32 %v1307_v61 }
 0x1f9   : > { %4005 = vmatmul.bf16.gmra.mxu1 %v10795_v32  ;;  %4312 = vmatpush.bf16.msrb.mxu3 %v3251_v57  ;;  %v2355_v27 = vcvt.s32.f32 %v1331_v8  ;;  %v3179_v60 = vpack.c.bf16 %v2595_v48, %v2587_v7  ;;  %v1315_v57 = vunpack.c.1.s8 %v595_v55  ;;  %v10799_v8 = vld [vmem:[#allocation40_spill] sm:$0xff] }
 0x1fa   : > { %4038 = vmatmul.bf16.gmra.mxu2 %v10796_v4  ;;  %4246 = vmatpush.bf16.msrb.mxu1 %v3123_v28 }
 0x1fb   : > { %4071 = vmatmul.bf16.gmra.mxu3 %v10797_v14  ;;  %v2339_v7 = vcvt.s32.f32 %v1315_v57 }
 0x1fc   : > { %4280 = vmatpush.bf16.msrb.mxu2 %v3179_v60 }
 0x1fd   : > { %v3892_v11 = vpop.f32.mrf.mxu2  ;;  %v3828_v25 = vpop.f32.mrf.mxu0 }
 0x1fe   : > { %v3893_v22 = vadd.f32 %v3892_v11, %v3860_v3  ;;  %v3925_v0 = vpop.f32.mrf.mxu3  ;;  %v3861_v34 = vpop.f32.mrf.mxu1  ;;  %v2347_v3 = vcvt.s32.f32 %v1323_v17  ;;  %v2715_v11 = vcvt.s32.f32 %v1691_v10  ;;  %v1435_v17 = vunpack.c.0.s8 %v627_v29  ;;  %v10801_v10 = vld [vmem:[#allocation42_spill] sm:$0xff] }
 0x1ff   : > { %v3862_v13 = vadd.f32 %v3861_v34, %v3828_v25 }
 0x200   : > { %v9492_v9 = vadd.f32 %v3925_v0, %v3893_v22  ;;  %v3059_v31 = vpack.c.bf16 %v2355_v27, %v2347_v3  ;;  %v2723_v0 = vcvt.s32.f32 %v1699_v24  ;;  %v2459_v48 = vcvt.s32.f32 %v1435_v17 }
 0x201   : > { %v2467_v3 = vcvt.s32.f32 %v1443_v15  ;;  %v3051_v27 = vpack.c.bf16 %v2339_v7, %v2331_v59 }
 0x202   : > { %4213 = vmatpush.bf16.msrb.mxu0 %v3059_v31  ;;  %v3243_v12 = vpack.c.bf16 %v2723_v0, %v2715_v11  ;;  %v683_v31 = vld [vmem:[%s9013_s10 + $0x790] sm:$0xff] }
 0x203   : > { %v3115_v55 = vpack.c.bf16 %v2467_v3, %v2459_v48  ;;  %v587_v0 = vld [vmem:[%s9013_s10 + $0x490] sm:$0xff]  ;;  %v1683_v28 = vunpack.c.3.s8 %v683_v31 }
 0x204   : > { %4313 = vmatpush.bf16.msrb.mxu3 %v3243_v12  ;;  %v9508_v12 = vld [vmem:[%s9013_s10 + $0x590] sm:$0xff]  ;;  %v1291_v61 = vunpack.c.2.s8 %v587_v0  ;;  %v1299_v57 = vunpack.c.3.s8 %v587_v0 }
 0x205   : > { %v3894_v25 = vpop.f32.mrf.mxu2  ;;  %v3831_v22 = vpop.f32.mrf.mxu0  ;;  %4247 = vmatpush.bf16.msrb.mxu1 %v3115_v55  ;;  %v1427_v17 = vunpack.c.3.s8 %v9508_v12  ;;  %v2707_v48 = vcvt.s32.f32 %v1683_v28  ;;  %v1659_v28 = vunpack.c.0.s8 %v683_v31 }
 0x206   : > { %v3895_v34 = vadd.f32 %v3894_v25, %v3862_v13  ;;  %v3927_v21 = vpop.f32.mrf.mxu3  ;;  %v3864_v54 = vpop.f32.mrf.mxu1  ;;  %v10800_v13 = vld [vmem:[#allocation41_spill] sm:$0xff]  ;;  %4214 = vmatpush.bf16.msrb.mxu0 %v3051_v27  ;;  %v2315_v3 = vcvt.s32.f32 %v1291_v61  ;;  %v2323_v27 = vcvt.s32.f32 %v1299_v57  ;;  %v1667_v61 = vunpack.c.1.s8 %v683_v31 }
 0x207   : > { %v3865_v6 = vadd.f32 %v3864_v54, %v3831_v22  ;;  %v651_v22 = vld [vmem:[%s9013_s10 + $0x690] sm:$0xff]  ;;  %v1675_v54 = vunpack.c.2.s8 %v683_v31 }
 0x208   : > { %v9496_v16 = vadd.f32 %v3927_v21, %v3895_v34  ;;  %3977 = vmatmul.bf16.gmra.mxu0 %v10798_v2  ;;  %v1547_v34 = vunpack.c.2.s8 %v651_v22  ;;  %v1555_v21 = vunpack.c.3.s8 %v651_v22  ;;  %v3043_v2 = vpack.c.bf16 %v2323_v27, %v2315_v3 }
 0x209   : > { %4010 = vmatmul.bf16.gmra.mxu1 %v10799_v8  ;;  %v2699_v7 = vcvt.s32.f32 %v1675_v54  ;;  %v1539_v54 = vunpack.c.1.s8 %v651_v22 }
 0x20a   : > { %4043 = vmatmul.bf16.gmra.mxu2 %v10800_v13  ;;  %v2571_v15 = vcvt.s32.f32 %v1547_v34  ;;  %v2579_v59 = vcvt.s32.f32 %v1555_v21  ;;  %v1531_v21 = vunpack.c.0.s8 %v651_v22  ;;  %4215 = vmatpush.bf16.msrb.mxu0 %v3043_v2 }
 0x20b   : > { %4076 = vmatmul.bf16.gmra.mxu3 %v10801_v10  ;;  %v2563_v57 = vcvt.s32.f32 %v1539_v54 }
 0x20d   : > { %v3897_v56 = vpop.f32.mrf.mxu2  ;;  %v3833_v24 = vpop.f32.mrf.mxu0 }
 0x20e   : > { %v3898_v1 = vadd.f32 %v3897_v56, %v3865_v6  ;;  %v3930_v60 = vpop.f32.mrf.mxu3  ;;  %v3866_v11 = vpop.f32.mrf.mxu1  ;;  %v1419_v6 = vunpack.c.2.s8 %v9508_v12 }
 0x20f   : > { %v3867_v29 = vadd.f32 %v3866_v11, %v3833_v24  ;;  %v2451_v24 = vcvt.s32.f32 %v1427_v17  ;;  %v3235_v11 = vpack.c.bf16 %v2707_v48, %v2699_v7 }
 0x210   : > { %v9502_v25 = vadd.f32 %v3930_v60, %v3898_v1  ;;  %v2443_v56 = vcvt.s32.f32 %v1419_v6  ;;  %v3171_v60 = vpack.c.bf16 %v2579_v59, %v2571_v15  ;;  %v2683_v6 = vcvt.s32.f32 %v1659_v28 }
 0x211   : > { %4314 = vmatpush.bf16.msrb.mxu3 %v3235_v11 }
 0x212   : > { %v3107_v14 = vpack.c.bf16 %v2451_v24, %v2443_v56  ;;  %4281 = vmatpush.bf16.msrb.mxu2 %v3171_v60  ;;  %v1403_v24 = vunpack.c.0.s8 %v9508_v12 }
 0x214   : > { %4248 = vmatpush.bf16.msrb.mxu1 %v3107_v14 }
 0x215   : > { %v3899_v55 = vpop.f32.mrf.mxu2  ;;  %v3836_v1 = vpop.f32.mrf.mxu0 }
 0x216   : > { %v3900_v10 = vadd.f32 %v3899_v55, %v3867_v29  ;;  %v3932_v13 = vpop.f32.mrf.mxu3  ;;  %v3869_v8 = vpop.f32.mrf.mxu1  ;;  %v2555_v29 = vcvt.s32.f32 %v1531_v21  ;;  %v643_v55 = vld [vmem:[%s9013_s10 + $0x650] sm:$0xff] }
 0x217   : > { %v3870_v4 = vadd.f32 %v3869_v8, %v3836_v1  ;;  %v2691_v8 = vcvt.s32.f32 %v1667_v61  ;;  %v675_v1 = vld [vmem:[%s9013_s10 + $0x750] sm:$0xff]  ;;  %v1515_v60 = vunpack.c.2.s8 %v643_v55  ;;  %v1523_v11 = vunpack.c.3.s8 %v643_v55 }
 0x218   : > { %v9512_v34 = vadd.f32 %v3932_v13, %v3900_v10  ;;  %4089 = vmatmul.bf16.vlgmr.msra.gmra.mxu0 %v9130_v53  ;;  %v1275_v13 = vunpack.c.0.s8 %v587_v0  ;;  %v1283_v10 = vunpack.c.1.s8 %v587_v0  ;;  %v3163_v17 = vpack.c.bf16 %v2563_v57, %v2555_v29 }
 0x219   : > { %4122 = vmatmul.bf16.vlgmr.msra.gmra.mxu1 %v9133_v58  ;;  %v3227_v15 = vpack.c.bf16 %v2691_v8, %v2683_v6  ;;  %v1411_v0 = vunpack.c.1.s8 %v9508_v12  ;;  %v1643_v21 = vunpack.c.2.s8 %v675_v1  ;;  %v1651_v54 = vunpack.c.3.s8 %v675_v1 }
 0x21a   : > { %4155 = vmatmul.bf16.vlgmr.msra.gmra.mxu2 %v9137_v62  ;;  %v2299_v59 = vcvt.s32.f32 %v1275_v13  ;;  %v2307_v7 = vcvt.s32.f32 %v1283_v10  ;;  %v2539_v61 = vcvt.s32.f32 %v1515_v60  ;;  %v2547_v29 = vcvt.s32.f32 %v1523_v11 }
 0x21b   : > { %4188 = vmatmul.bf16.vlgmr.msra.gmra.mxu3 %v9139_v63  ;;  %4282 = vmatpush.bf16.msrb.mxu2 %v3163_v17  ;;  %v2435_v28 = vcvt.s32.f32 %v1411_v0  ;;  %v2667_v57 = vcvt.s32.f32 %v1643_v21  ;;  %v2675_v6 = vcvt.s32.f32 %v1651_v54 }
 0x21c   : > { %4315 = vmatpush.bf16.msrb.mxu3 %v3227_v15  ;;  %v3035_v27 = vpack.c.bf16 %v2307_v7, %v2299_v59  ;;  %v3155_v17 = vpack.c.bf16 %v2547_v29, %v2539_v61  ;;  %v579_v59 = vld [vmem:[%s9013_s10 + $0x450] sm:$0xff]  ;;  %v1627_v61 = vunpack.c.0.s8 %v675_v1  ;;  %v1635_v29 = vunpack.c.1.s8 %v675_v1 }
 0x21d   : > { %v3902_v14 = vpop.f32.mrf.mxu2  ;;  %v3838_v22 = vpop.f32.mrf.mxu0  ;;  %v3219_v12 = vpack.c.bf16 %v2675_v6, %v2667_v57  ;;  %v1251_v1 = vunpack.c.1.s8 %v579_v59 }
 0x21e   : > { %v3903_v2 = vadd.f32 %v3902_v14, %v3870_v4  ;;  %v3935_v31 = vpop.f32.mrf.mxu3  ;;  %v3871_v48 = vpop.f32.mrf.mxu1  ;;  %4216 = vmatpush.bf16.msrb.mxu0 %v3035_v27  ;;  %v2427_v4 = vcvt.s32.f32 %v1403_v24  ;;  %v611_v27 = vld [vmem:[%s9013_s10 + $0x550] sm:$0xff] }
 0x21f   : > { %v3872_v3 = vadd.f32 %v3871_v48, %v3838_v22  ;;  %4283 = vmatpush.bf16.msrb.mxu2 %v3155_v17  ;;  %v1387_v60 = vunpack.c.2.s8 %v611_v27 }
 0x220   : > { %v9518_v56 = vadd.f32 %v3935_v31, %v3903_v2  ;;  %v3099_v8 = vpack.c.bf16 %v2435_v28, %v2427_v4  ;;  %4316 = vmatpush.bf16.msrb.mxu3 %v3219_v12  ;;  %v1259_v2 = vunpack.c.2.s8 %v579_v59  ;;  %v1267_v31 = vunpack.c.3.s8 %v579_v59 }
 0x221   : > { %v2411_v21 = vcvt.s32.f32 %v1387_v60  ;;  %v1499_v4 = vunpack.c.0.s8 %v643_v55  ;;  %v1507_v28 = vunpack.c.1.s8 %v643_v55  ;;  %v1243_v55 = vunpack.c.0.s8 %v579_v59 }
 0x222   : > { %4249 = vmatpush.bf16.msrb.mxu1 %v3099_v8  ;;  %v2283_v24 = vcvt.s32.f32 %v1259_v2  ;;  %v2291_v0 = vcvt.s32.f32 %v1267_v31  ;;  %v1371_v60 = vunpack.c.0.s8 %v611_v27 }
 0x224   : > { %v3027_v11 = vpack.c.bf16 %v2291_v0, %v2283_v24 }
 0x225   : > { %v3904_v13 = vpop.f32.mrf.mxu2  ;;  %v3841_v10 = vpop.f32.mrf.mxu0 }
 0x226   : > { %v3905_v14 = vadd.f32 %v3904_v13, %v3872_v3  ;;  %v3937_v22 = vpop.f32.mrf.mxu3  ;;  %v3874_v15 = vpop.f32.mrf.mxu1  ;;  %v1395_v3 = vunpack.c.3.s8 %v611_v27  ;;  %4217 = vmatpush.bf16.msrb.mxu0 %v3027_v11  ;;  %v2523_v13 = vcvt.s32.f32 %v1499_v4 }
 0x227   : > { %v3875_v7 = vadd.f32 %v3874_v15, %v3841_v10  ;;  %v2659_v15 = vcvt.s32.f32 %v1635_v29  ;;  %v2395_v29 = vcvt.s32.f32 %v1371_v60 }
 0x228   : > { %v9525_v48 = vadd.f32 %v3937_v22, %v3905_v14  ;;  %4094 = vmatmul.bf16.gmra.mxu0 %v9153_v47  ;;  %v2419_v54 = vcvt.s32.f32 %v1395_v3  ;;  %v2531_v14 = vcvt.s32.f32 %v1507_v28  ;;  %v2651_v22 = vcvt.s32.f32 %v1627_v61 }
 0x229   : > { %4127 = vmatmul.bf16.gmra.mxu1 %v9159_v51  ;;  %v1379_v3 = vunpack.c.1.s8 %v611_v27  ;;  %v2267_v28 = vcvt.s32.f32 %v1243_v55  ;;  %v2275_v61 = vcvt.s32.f32 %v1251_v1 }
 0x22a   : > { %4160 = vmatmul.bf16.gmra.mxu2 %v9161_v52  ;;  %v3091_v8 = vpack.c.bf16 %v2419_v54, %v2411_v21  ;;  %v3147_v24 = vpack.c.bf16 %v2531_v14, %v2523_v13  ;;  %v3211_v0 = vpack.c.bf16 %v2659_v15, %v2651_v22  ;;  %v10802_v13 = vld [vmem:[#allocation29_spill] sm:$0xff]  ;;  %v635_v14 = vld [vmem:[%s9013_s10 + $0x610] sm:$0xff] }
 0x22b   : > { %4193 = vmatmul.bf16.gmra.mxu3 %v9167_v20  ;;  %v3019_v59 = vpack.c.bf16 %v2275_v61, %v2267_v28  ;;  %v667_v22 = vld [vmem:[%s9013_s10 + $0x710] sm:$0xff]  ;;  %v1491_v55 = vunpack.c.3.s8 %v635_v14 }
 0x22c   : > { %4250 = vmatpush.bf16.msrb.mxu1 %v3091_v8  ;;  %4284 = vmatpush.bf16.msrb.mxu2 %v3147_v24  ;;  %v571_v15 = vld [vmem:[%s9013_s10 + $0x410] sm:$0xff]  ;;  %v1611_v1 = vunpack.c.2.s8 %v667_v22  ;;  %v1619_v60 = vunpack.c.3.s8 %v667_v22  ;;  %v1603_v47 = vunpack.c.1.s8 %v667_v22 }
 0x22d   : > { %v3907_v57 = vpop.f32.mrf.mxu2  ;;  %v3843_v6 = vpop.f32.mrf.mxu0  ;;  %4317 = vmatpush.bf16.msrb.mxu3 %v3211_v0  ;;  %4218 = vmatpush.bf16.msrb.mxu0 %v3019_v59  ;;  %v1483_v0 = vunpack.c.2.s8 %v635_v14 }
 0x22e   : > { %v3908_v10 = vadd.f32 %v3907_v57, %v3875_v7  ;;  %v3940_v17 = vpop.f32.mrf.mxu3  ;;  %v3876_v12 = vpop.f32.mrf.mxu1  ;;  %v2643_v59 = vcvt.s32.f32 %v1619_v60 }
 0x22f   : > { %v3877_v2 = vadd.f32 %v3876_v12, %v3843_v6  ;;  %v2403_v6 = vcvt.s32.f32 %v1379_v3  ;;  %v10805_v12 = vld [vmem:[#allocation32_spill] sm:$0xff]  ;;  %v603_v3 = vld [vmem:[%s9013_s10 + $0x510] sm:$0xff]  ;;  %v2507_v61 = vcvt.s32.f32 %v1483_v0  ;;  %v1211_v0 = vunpack.c.0.s8 %v571_v15 }
 0x230   : > { %v9532_v31 = vadd.f32 %v3940_v17, %v3908_v10  ;;  %v10803_v10 = vld [vmem:[#allocation30_spill] sm:$0xff]  ;;  %v10804_v17 = vld [vmem:[#allocation31_spill] sm:$0xff]  ;;  %v1355_v28 = vunpack.c.2.s8 %v603_v3 }
 0x231   : > { %v3083_v27 = vpack.c.bf16 %v2403_v6, %v2395_v29  ;;  %v2515_v29 = vcvt.s32.f32 %v1491_v55  ;;  %v2635_v6 = vcvt.s32.f32 %v1611_v1  ;;  %v1219_v55 = vunpack.c.1.s8 %v571_v15 }
 0x232   : > { %v2379_v20 = vcvt.s32.f32 %v1355_v28  ;;  %v2235_v28 = vcvt.s32.f32 %v1211_v0 }
 0x233   : > { %4251 = vmatpush.bf16.msrb.mxu1 %v3083_v27 }
 0x235   : > { %v3909_v11 = vpop.f32.mrf.mxu2  ;;  %v3846_v21 = vpop.f32.mrf.mxu0 }
 0x236   : > { %v3910_v7 = vadd.f32 %v3909_v11, %v3877_v2  ;;  %v3942_v54 = vpop.f32.mrf.mxu3  ;;  %v3879_v4 = vpop.f32.mrf.mxu1 }
 0x237   : > { %v3880_v57 = vadd.f32 %v3879_v4, %v3846_v21  ;;  %v1235_v4 = vunpack.c.3.s8 %v571_v15 }
 0x238   : > { %v9534_v8 = vadd.f32 %v3942_v54, %v3910_v7  ;;  %4099 = vmatmul.bf16.gmra.mxu0 %v10802_v13  ;;  %v1227_v54 = vunpack.c.2.s8 %v571_v15  ;;  %v3203_v13 = vpack.c.bf16 %v2643_v59, %v2635_v6  ;;  %v564_v59 = vld [vmem:[%s9013_s10 + $0x3d8] sm:$0xff] }
 0x239   : > { %4132 = vmatmul.bf16.gmra.mxu1 %v10803_v10  ;;  %v3139_v10 = vpack.c.bf16 %v2515_v29, %v2507_v61  ;;  %v2627_v29 = vcvt.s32.f32 %v1603_v47  ;;  %v1204_v0 = vunpack.c.3.s8 %v564_v59 }
 0x23a   : > { %4165 = vmatmul.bf16.gmra.mxu2 %v10804_v17  ;;  %v2259_v17 = vcvt.s32.f32 %v1235_v4  ;;  %4318 = vmatpush.bf16.msrb.mxu3 %v3203_v13  ;;  %v1347_v13 = vunpack.c.1.s8 %v603_v3 }
 0x23b   : > { %4198 = vmatmul.bf16.gmra.mxu3 %v10805_v12  ;;  %v2251_v12 = vcvt.s32.f32 %v1227_v54  ;;  %4285 = vmatpush.bf16.msrb.mxu2 %v3139_v10 }
 0x23d   : > { %v3912_v2 = vpop.f32.mrf.mxu2  ;;  %v3848_v24 = vpop.f32.mrf.mxu0  ;;  %v3011_v52 = vpack.c.bf16 %v2259_v17, %v2251_v12  ;;  %v2243_v17 = vcvt.s32.f32 %v1219_v55 }
 0x23e   : > { %v3913_v11 = vadd.f32 %v3912_v2, %v3880_v57  ;;  %v3945_v21 = vpop.f32.mrf.mxu3  ;;  %v3881_v7 = vpop.f32.mrf.mxu1  ;;  %v1363_v24 = vunpack.c.3.s8 %v603_v3  ;;  %v1467_v57 = vunpack.c.0.s8 %v635_v14  ;;  %v1475_v2 = vunpack.c.1.s8 %v635_v14 }
 0x23f   : > { %v1595_v7 = vunpack.c.0.s8 %v667_v22  ;;  %4219 = vmatpush.bf16.msrb.mxu0 %v3011_v52  ;;  %v3003_v52 = vpack.c.bf16 %v2243_v17, %v2235_v28 }
 0x240   : > { %v9544_v27 = vadd.f32 %v3945_v21, %v3913_v11  ;;  %v2387_v51 = vcvt.s32.f32 %v1363_v24  ;;  %v2491_v60 = vcvt.s32.f32 %v1467_v57  ;;  %v2499_v11 = vcvt.s32.f32 %v1475_v2 }
 0x241   : > { %v1339_v21 = vunpack.c.0.s8 %v603_v3  ;;  %v2619_v61 = vcvt.s32.f32 %v1595_v7  ;;  %v532_v3 = vld [vmem:[%s9013_s10 + $0x2d8] sm:$0xff]  ;;  %v1196_v7 = vunpack.c.2.s8 %v564_v59 }
 0x242   : > { %v3075_v1 = vpack.c.bf16 %v2387_v51, %v2379_v20  ;;  %v3131_v10 = vpack.c.bf16 %v2499_v11, %v2491_v60  ;;  %v2371_v20 = vcvt.s32.f32 %v1347_v13  ;;  %v1076_v2 = vunpack.c.3.s8 %v532_v3  ;;  %v468_v13 = vld [vmem:[%s9013_s10 + $0xd8] sm:$0xff] }
 0x243   : > { %v2363_v14 = vcvt.s32.f32 %v1339_v21  ;;  %v3195_v22 = vpack.c.bf16 %v2627_v29, %v2619_v61  ;;  %4220 = vmatpush.bf16.msrb.mxu0 %v3003_v52  ;;  %v3258_v21 = vld [vmem:[#allocation2 + $0x8] sm:$0xff]  ;;  %v2220_v61 = vcvt.s32.f32 %v1196_v7  ;;  %v2228_v29 = vcvt.s32.f32 %v1204_v0 }
 0x244   : > { %4252 = vmatpush.bf16.msrb.mxu1 %v3075_v1  ;;  %4286 = vmatpush.bf16.msrb.mxu2 %v3131_v10  ;;  %v1060_v52 = vunpack.c.1.s8 %v532_v3 }
 0x245   : > { %v3914_v54 = vpop.f32.mrf.mxu2  ;;  %v3958_v4 = vpop.f32.mrf.mxu0  ;;  %4319 = vmatpush.bf16.msrb.mxu3 %v3195_v22  ;;  %v3067_v47 = vpack.c.bf16 %v2371_v20, %v2363_v14  ;;  %v500_v14 = vld [vmem:[%s9013_s10 + $0x1d8] sm:$0xff]  ;;  %v1052_v22 = vunpack.c.0.s8 %v532_v3 }
 0x246   : > { %v3947_v12 = vpop.f32.mrf.mxu3  ;;  %v3991_v6 = vpop.f32.mrf.mxu1  ;;  %v3959_v51 = vadd.f32 %v3958_v4, %v9492_v9  ;;  %v1068_v9 = vunpack.c.2.s8 %v532_v3  ;;  %v2100_v4 = vcvt.s32.f32 %v1076_v2 }
 0x247   : > { %v2996_v12 = vpack.c.bf16 %v2228_v29, %v2220_v61 }
 0x248   : > { %4104 = vmatmul.bf16.gmra.mxu0 %v9227_v26  ;;  %v3992_v15 = vadd.f32 %v3991_v6, %v3959_v51  ;;  %4253 = vmatpush.bf16.msrb.mxu1 %v3067_v47  ;;  %v2092_v54 = vcvt.s32.f32 %v1068_v9  ;;  %v1188_v51 = vunpack.c.1.s8 %v564_v59  ;;  %v948_v9 = vunpack.c.3.s8 %v500_v14 }
 0x249   : > { %4137 = vmatmul.bf16.gmra.mxu1 %v9231_v38  ;;  %4444 = vmatpush.bf16.msra.mxu3 %v2996_v12 }
 0x24a   : > { %4170 = vmatmul.bf16.gmra.mxu2 %v9233_v41  ;;  %v2932_v17 = vpack.c.bf16 %v2100_v4, %v2092_v54  ;;  %v1972_v3 = vcvt.s32.f32 %v948_v9  ;;  %v2212_v12 = vcvt.s32.f32 %v1188_v51 }
 0x24b   : > { %4203 = vmatmul.bf16.gmra.mxu3 %v9235_v42 }
 0x24c   : > { %4411 = vmatpush.bf16.msra.mxu2 %v2932_v17 }
 0x24d   : > { %v4024_v24 = vpop.f32.mrf.mxu2  ;;  %v3960_v57 = vpop.f32.mrf.mxu0 }
 0x24e   : > { %v4025_v55 = vadd.f32 %v4024_v24, %v3992_v15  ;;  %v4057_v1 = vpop.f32.mrf.mxu3  ;;  %v3961_v60 = vadd.f32 %v3960_v57, %v9496_v16  ;;  %v3993_v11 = vpop.f32.mrf.mxu1  ;;  %v1180_v16 = vunpack.c.0.s8 %v564_v59  ;;  %v812_v15 = vunpack.c.2.s8 %v468_v13 }
 0x24f   : > { %v820_v24 = vunpack.c.3.s8 %v468_v13  ;;  %v940_v57 = vunpack.c.2.s8 %v500_v14 }
 0x250   : > { %v4058_v28 = vadd.f32 %v4057_v1, %v4025_v55  ;;  %v3994_v10 = vadd.f32 %v3993_v11, %v3961_v60  ;;  %v2076_v1 = vcvt.s32.f32 %v1052_v22  ;;  %v2084_v60 = vcvt.s32.f32 %v1060_v52  ;;  %v3266_v11 = vld [vmem:[#allocation2 + $0x18] sm:$0xff] }
 0x251   : > { %v1844_v54 = vcvt.s32.f32 %v820_v24  ;;  %v1964_v4 = vcvt.s32.f32 %v940_v57  ;;  %v2204_v29 = vcvt.s32.f32 %v1180_v16  ;;  %v796_v22 = vunpack.c.0.s8 %v468_v13 }
 0x252   : > { %v5666_v6 = vadd.f32 %v4058_v28, %v3258_v21  ;;  %v1836_v21 = vcvt.s32.f32 %v812_v15  ;;  %v2924_v59 = vpack.c.bf16 %v2084_v60, %v2076_v1  ;;  %v804_v52 = vunpack.c.1.s8 %v468_v13 }
 0x253   : > { %v2868_v17 = vpack.c.bf16 %v1972_v3, %v1964_v4  ;;  %v932_v16 = vunpack.c.1.s8 %v500_v14  ;;  %v1820_v9 = vcvt.s32.f32 %v796_v22  ;;  %v556_v4 = vld [vmem:[%s9013_s10 + $0x398] sm:$0xff] }
 0x254   : > { %5738 = vst [vmem:[#allocation2 + $0x8] sm:$0xff] %v5666_v6  ;;  %v2804_v28 = vpack.c.bf16 %v1844_v54, %v1836_v21  ;;  %4412 = vmatpush.bf16.msra.mxu2 %v2924_v59  ;;  %v524_v54 = vld [vmem:[%s9013_s10 + $0x298] sm:$0xff] }
 0x255   : > { %v4026_v20 = vpop.f32.mrf.mxu2  ;;  %v3963_v47 = vpop.f32.mrf.mxu0  ;;  %4378 = vmatpush.bf16.msra.mxu1 %v2868_v17  ;;  %v460_v3 = vld [vmem:[%s9013_s10 + $0x98] sm:$0xff]  ;;  %v1164_v17 = vunpack.c.2.s8 %v556_v4 }
 0x256   : > { %v4027_v2 = vadd.f32 %v4026_v20, %v3994_v10  ;;  %v4059_v7 = vpop.f32.mrf.mxu3  ;;  %v3964_v0 = vadd.f32 %v3963_v47, %v9502_v25  ;;  %v3996_v55 = vpop.f32.mrf.mxu1  ;;  %4345 = vmatpush.bf16.msra.mxu0 %v2804_v28  ;;  %v2988_v10 = vpack.c.bf16 %v2212_v12, %v2204_v29  ;;  %v924_v20 = vunpack.c.0.s8 %v500_v14 }
 0x257   : > { %v1036_v29 = vunpack.c.2.s8 %v524_v54  ;;  %v1044_v28 = vunpack.c.3.s8 %v524_v54  ;;  %v1172_v12 = vunpack.c.3.s8 %v556_v4  ;;  %v780_v22 = vunpack.c.2.s8 %v460_v3 }
 0x258   : > { %v4060_v61 = vadd.f32 %v4059_v7, %v4027_v2  ;;  %4109 = vmatmul.bf16.gmra.mxu0 %v9247_v23  ;;  %v3997_v25 = vadd.f32 %v3996_v55, %v3964_v0  ;;  %4445 = vmatpush.bf16.msra.mxu3 %v2988_v10  ;;  %v1828_v2 = vcvt.s32.f32 %v804_v52  ;;  %v3274_v7 = vld [vmem:[#allocation2 + $0x190] sm:$0xff]  ;;  %v1948_v0 = vcvt.s32.f32 %v924_v20  ;;  %v9567_v20 = vld [vmem:[%s9013_s10 + $0x198] sm:$0xff] }
 0x259   : > { %4142 = vmatmul.bf16.gmra.mxu1 %v9249_v37  ;;  %v1956_v55 = vcvt.s32.f32 %v932_v16  ;;  %v788_v52 = vunpack.c.3.s8 %v460_v3  ;;  %v3282_v16 = vld [vmem:[#allocation2] sm:$0xff] }
 0x25a   : > { %v5674_v6 = vadd.f32 %v4060_v61, %v3266_v11  ;;  %4175 = vmatmul.bf16.gmra.mxu2 %v9251_v49  ;;  %v2796_v13 = vpack.c.bf16 %v1828_v2, %v1820_v9  ;;  %v1804_v9 = vcvt.s32.f32 %v780_v22 }
 0x25b   : > { %4208 = vmatmul.bf16.gmra.mxu3 %v9253_v50  ;;  %v2860_v11 = vpack.c.bf16 %v1956_v55, %v1948_v0  ;;  %v1812_v2 = vcvt.s32.f32 %v788_v52  ;;  %v916_v55 = vunpack.c.3.s8 %v9567_v20 }
 0x25c   : > { %5746 = vst [vmem:[#allocation2 + $0x18] sm:$0xff] %v5674_v6  ;;  %4346 = vmatpush.bf16.msra.mxu0 %v2796_v13 }
 0x25d   : > { %v4029_v47 = vpop.f32.mrf.mxu2  ;;  %v3965_v15 = vpop.f32.mrf.mxu0  ;;  %4379 = vmatpush.bf16.msra.mxu1 %v2860_v11 }
 0x25e   : > { %v4030_v24 = vadd.f32 %v4029_v47, %v3997_v25  ;;  %v4062_v51 = vpop.f32.mrf.mxu3  ;;  %v3998_v57 = vpop.f32.mrf.mxu1  ;;  %v3966_v60 = vadd.f32 %v3965_v15, %v9512_v34  ;;  %v2060_v47 = vcvt.s32.f32 %v1036_v29  ;;  %v2068_v15 = vcvt.s32.f32 %v1044_v28 }
 0x25f   : > { %v1156_v29 = vunpack.c.1.s8 %v556_v4 }
 0x260   : > { %v4063_v1 = vadd.f32 %v4062_v51, %v4030_v24  ;;  %v3999_v21 = vadd.f32 %v3998_v57, %v3966_v60  ;;  %v2188_v24 = vcvt.s32.f32 %v1164_v17  ;;  %v2196_v51 = vcvt.s32.f32 %v1172_v12 }
 0x261   : > { %v2788_v60 = vpack.c.bf16 %v1812_v2, %v1804_v9 }
 0x262   : > { %v5682_v14 = vadd.f32 %v4063_v1, %v3274_v7  ;;  %v2916_v7 = vpack.c.bf16 %v2068_v15, %v2060_v47  ;;  %v2980_v0 = vpack.c.bf16 %v2196_v51, %v2188_v24  ;;  %v3290_v47 = vld [vmem:[#allocation2 + $0xf8] sm:$0xff]  ;;  %v2180_v24 = vcvt.s32.f32 %v1156_v29 }
 0x263   : > { %4347 = vmatpush.bf16.msra.mxu0 %v2788_v60  ;;  %v548_v60 = vld [vmem:[%s9013_s10 + $0x358] sm:$0xff] }
 0x264   : > { %5754 = vst [vmem:[#allocation2 + $0x190] sm:$0xff] %v5682_v14  ;;  %4413 = vmatpush.bf16.msra.mxu2 %v2916_v7  ;;  %v1940_v14 = vcvt.s32.f32 %v916_v55  ;;  %4446 = vmatpush.bf16.msra.mxu3 %v2980_v0  ;;  %v900_v55 = vunpack.c.1.s8 %v9567_v20 }
 0x265   : > { %v4031_v61 = vpop.f32.mrf.mxu2  ;;  %v3968_v59 = vpop.f32.mrf.mxu0 }
 0x266   : > { %v4032_v6 = vadd.f32 %v4031_v61, %v3999_v21  ;;  %v4064_v25 = vpop.f32.mrf.mxu3  ;;  %v3969_v34 = vadd.f32 %v3968_v59, %v9518_v56  ;;  %v4001_v10 = vpop.f32.mrf.mxu1  ;;  %v908_v56 = vunpack.c.2.s8 %v9567_v20  ;;  %v1020_v21 = vunpack.c.0.s8 %v524_v54 }
 0x267   : > { %v1028_v61 = vunpack.c.1.s8 %v524_v54  ;;  %v1148_v59 = vunpack.c.0.s8 %v556_v4 }
 0x268   : > { %v4065_v57 = vadd.f32 %v4064_v25, %v4032_v6  ;;  %4221 = vmatmul.bf16.vlgmr.msrb.gmra.mxu0 %v9277_v36  ;;  %v4002_v13 = vadd.f32 %v4001_v10, %v3969_v34  ;;  %v1932_v11 = vcvt.s32.f32 %v908_v56  ;;  %v764_v6 = vunpack.c.0.s8 %v460_v3 }
 0x269   : > { %4254 = vmatmul.bf16.vlgmr.msrb.gmra.mxu1 %v9281_v40  ;;  %v772_v25 = vunpack.c.1.s8 %v460_v3  ;;  %v2044_v10 = vcvt.s32.f32 %v1020_v21  ;;  %v2172_v15 = vcvt.s32.f32 %v1148_v59  ;;  %v892_v56 = vunpack.c.0.s8 %v9567_v20 }
 0x26a   : > { %v5690_v1 = vadd.f32 %v4065_v57, %v3282_v16  ;;  %4287 = vmatmul.bf16.vlgmr.msrb.gmra.mxu2 %v9283_v45  ;;  %v2852_v12 = vpack.c.bf16 %v1940_v14, %v1932_v11  ;;  %v2052_v16 = vcvt.s32.f32 %v1028_v61  ;;  %v1788_v51 = vcvt.s32.f32 %v764_v6  ;;  %v452_v6 = vld [vmem:[%s9013_s10 + $0x58] sm:$0xff] }
 0x26b   : > { %4320 = vmatmul.bf16.vlgmr.msrb.gmra.mxu3 %v9285_v46  ;;  %v1796_v54 = vcvt.s32.f32 %v772_v25  ;;  %v2972_v2 = vpack.c.bf16 %v2180_v24, %v2172_v15  ;;  %v1132_v21 = vunpack.c.2.s8 %v548_v60  ;;  %v1140_v61 = vunpack.c.3.s8 %v548_v60  ;;  %v3298_v25 = vld [vmem:[#allocation2 + $0x98] sm:$0xff] }
 0x26c   : > { %5762 = vst [vmem:[#allocation2] sm:$0xff] %v5690_v1  ;;  %4380 = vmatpush.bf16.msra.mxu1 %v2852_v12  ;;  %v2908_v9 = vpack.c.bf16 %v2052_v16, %v2044_v10  ;;  %v516_v1 = vld [vmem:[%s9013_s10 + $0x258] sm:$0xff]  ;;  %v1924_v12 = vcvt.s32.f32 %v900_v55  ;;  %v748_v24 = vunpack.c.2.s8 %v452_v6 }
 0x26d   : > { %v4034_v28 = vpop.f32.mrf.mxu2  ;;  %v3970_v17 = vpop.f32.mrf.mxu0  ;;  %v2780_v7 = vpack.c.bf16 %v1796_v54, %v1788_v51  ;;  %4447 = vmatpush.bf16.msra.mxu3 %v2972_v2  ;;  %v1012_v14 = vunpack.c.3.s8 %v516_v1  ;;  %v2164_v20 = vcvt.s32.f32 %v1140_v61  ;;  %v484_v10 = vld [vmem:[%s9013_s10 + $0x158] sm:$0xff] }
 0x26e   : > { %v4035_v22 = vadd.f32 %v4034_v28, %v4002_v13  ;;  %v4067_v52 = vpop.f32.mrf.mxu3  ;;  %v4003_v34 = vpop.f32.mrf.mxu1  ;;  %v3971_v4 = vadd.f32 %v3970_v17, %v9525_v48  ;;  %4414 = vmatpush.bf16.msra.mxu2 %v2908_v9  ;;  %v1004_v48 = vunpack.c.2.s8 %v516_v1  ;;  %v1916_v17 = vcvt.s32.f32 %v892_v56 }
 0x26f   : > { %4348 = vmatpush.bf16.msra.mxu0 %v2780_v7  ;;  %v1772_v2 = vcvt.s32.f32 %v748_v24  ;;  %v884_v7 = vunpack.c.3.s8 %v484_v10  ;;  %v996_v56 = vunpack.c.1.s8 %v516_v1  ;;  %v860_v24 = vunpack.c.0.s8 %v484_v10 }
 0x270   : > { %v4068_v57 = vadd.f32 %v4067_v52, %v4035_v22  ;;  %v4004_v0 = vadd.f32 %v4003_v34, %v3971_v4  ;;  %v2028_v22 = vcvt.s32.f32 %v1004_v48  ;;  %v2036_v52 = vcvt.s32.f32 %v1012_v14 }
 0x271   : > { %v2156_v34 = vcvt.s32.f32 %v1132_v21  ;;  %v2844_v15 = vpack.c.bf16 %v1924_v12, %v1916_v17  ;;  %v876_v4 = vunpack.c.2.s8 %v484_v10  ;;  %v1124_v48 = vunpack.c.1.s8 %v548_v60 }
 0x272   : > { %v5698_v3 = vadd.f32 %v4068_v57, %v3290_v47  ;;  %v2900_v51 = vpack.c.bf16 %v2036_v52, %v2028_v22  ;;  %v756_v57 = vunpack.c.3.s8 %v452_v6 }
 0x273   : > { %v2964_v54 = vpack.c.bf16 %v2164_v20, %v2156_v34  ;;  %4381 = vmatpush.bf16.msra.mxu1 %v2844_v15  ;;  %v3306_v34 = vld [vmem:[#allocation2 + $0x130] sm:$0xff] }
 0x274   : > { %5770 = vst [vmem:[#allocation2 + $0xf8] sm:$0xff] %v5698_v3  ;;  %4415 = vmatpush.bf16.msra.mxu2 %v2900_v51  ;;  %v1900_v3 = vcvt.s32.f32 %v876_v4  ;;  %v868_v51 = vunpack.c.1.s8 %v484_v10 }
 0x275   : > { %v4036_v13 = vpop.f32.mrf.mxu2  ;;  %v3973_v11 = vpop.f32.mrf.mxu0  ;;  %4448 = vmatpush.bf16.msra.mxu3 %v2964_v54 }
 0x276   : > { %v4037_v59 = vadd.f32 %v4036_v13, %v4004_v0  ;;  %v4069_v29 = vpop.f32.mrf.mxu3  ;;  %v4006_v28 = vpop.f32.mrf.mxu1  ;;  %v3974_v47 = vadd.f32 %v3973_v11, %v9532_v31  ;;  %v1780_v31 = vcvt.s32.f32 %v756_v57  ;;  %v988_v0 = vunpack.c.0.s8 %v516_v1 }
 0x277   : > { %v1908_v13 = vcvt.s32.f32 %v884_v7  ;;  %v1116_v11 = vunpack.c.0.s8 %v548_v60  ;;  %v2148_v1 = vcvt.s32.f32 %v1124_v48  ;;  %v740_v60 = vunpack.c.1.s8 %v452_v6  ;;  %v508_v48 = vld [vmem:[%s9013_s10 + $0x218] sm:$0xff] }
 0x278   : > { %v4070_v16 = vadd.f32 %v4069_v29, %v4037_v59  ;;  %4226 = vmatmul.bf16.gmra.mxu0 %v9308_v33  ;;  %v4007_v55 = vadd.f32 %v4006_v28, %v3974_v47  ;;  %v2772_v61 = vpack.c.bf16 %v1780_v31, %v1772_v2  ;;  %v2012_v59 = vcvt.s32.f32 %v988_v0 }
 0x279   : > { %4259 = vmatmul.bf16.gmra.mxu1 %v9312_v35  ;;  %v2020_v29 = vcvt.s32.f32 %v996_v56  ;;  %v2836_v22 = vpack.c.bf16 %v1908_v13, %v1900_v3  ;;  %v2140_v52 = vcvt.s32.f32 %v1116_v11  ;;  %v732_v47 = vunpack.c.0.s8 %v452_v6  ;;  %v3314_v13 = vld [vmem:[#allocation2 + $0x128] sm:$0xff] }
 0x27a   : > { %v5706_v9 = vadd.f32 %v4070_v16, %v3298_v25  ;;  %4292 = vmatmul.bf16.gmra.mxu2 %v9314_v43  ;;  %4349 = vmatpush.bf16.msra.mxu0 %v2772_v61  ;;  %v1764_v4 = vcvt.s32.f32 %v740_v60  ;;  %v1892_v2 = vcvt.s32.f32 %v868_v51  ;;  %v972_v61 = vunpack.c.2.s8 %v508_v48 }
 0x27b   : > { %4325 = vmatmul.bf16.gmra.mxu3 %v9316_v44  ;;  %v2892_v20 = vpack.c.bf16 %v2020_v29, %v2012_v59  ;;  %4382 = vmatpush.bf16.msra.mxu1 %v2836_v22  ;;  %v2956_v15 = vpack.c.bf16 %v2148_v1, %v2140_v52  ;;  %v1756_v57 = vcvt.s32.f32 %v732_v47  ;;  %v980_v59 = vunpack.c.3.s8 %v508_v48 }
 0x27c   : > { %5778 = vst [vmem:[#allocation2 + $0x98] sm:$0xff] %v5706_v9  ;;  %v1884_v9 = vcvt.s32.f32 %v860_v24  ;;  %v1996_v52 = vcvt.s32.f32 %v972_v61 }
 0x27d   : > { %v4039_v14 = vpop.f32.mrf.mxu2  ;;  %v3975_v21 = vpop.f32.mrf.mxu0  ;;  %4416 = vmatpush.bf16.msra.mxu2 %v2892_v20  ;;  %4449 = vmatpush.bf16.msra.mxu3 %v2956_v15  ;;  %v2764_v31 = vpack.c.bf16 %v1764_v4, %v1756_v57 }
 0x27e   : > { %v4040_v17 = vadd.f32 %v4039_v14, %v4007_v55  ;;  %v4072_v12 = vpop.f32.mrf.mxu3  ;;  %v4008_v25 = vpop.f32.mrf.mxu1  ;;  %v3976_v28 = vadd.f32 %v3975_v21, %v9534_v8  ;;  %v2828_v0 = vpack.c.bf16 %v1892_v2, %v1884_v9  ;;  %v540_v14 = vld [vmem:[%s9013_s10 + $0x318] sm:$0xff] }
 0x27f   : > { %4350 = vmatpush.bf16.msra.mxu0 %v2764_v31  ;;  %v444_v21 = vld [vmem:[%s9013_s10 + $0x18] sm:$0xff]  ;;  %v1100_v29 = vunpack.c.2.s8 %v540_v14 }
 0x280   : > { %v4073_v16 = vadd.f32 %v4072_v12, %v4040_v17  ;;  %v4009_v7 = vadd.f32 %v4008_v25, %v3976_v28  ;;  %4383 = vmatpush.bf16.msra.mxu1 %v2828_v0  ;;  %v1108_v17 = vunpack.c.3.s8 %v540_v14  ;;  %v724_v22 = vunpack.c.3.s8 %v444_v21 }
 0x281   : > { %v2124_v20 = vcvt.s32.f32 %v1100_v29  ;;  %v708_v61 = vunpack.c.1.s8 %v444_v21 }
 0x282   : > { %v5714_v54 = vadd.f32 %v4073_v16, %v3306_v34  ;;  %v2004_v34 = vcvt.s32.f32 %v980_v59  ;;  %v2132_v1 = vcvt.s32.f32 %v1108_v17  ;;  %v476_v16 = vld [vmem:[%s9013_s10 + $0x118] sm:$0xff]  ;;  %v1748_v47 = vcvt.s32.f32 %v724_v22 }
 0x283   : > { %v844_v60 = vunpack.c.2.s8 %v476_v16  ;;  %v852_v15 = vunpack.c.3.s8 %v476_v16 }
 0x284   : > { %5786 = vst [vmem:[#allocation2 + $0x130] sm:$0xff] %v5714_v54  ;;  %v2884_v54 = vpack.c.bf16 %v2004_v34, %v1996_v52  ;;  %v2948_v57 = vpack.c.bf16 %v2132_v1, %v2124_v20  ;;  %v1732_v52 = vcvt.s32.f32 %v708_v61  ;;  %v836_v20 = vunpack.c.1.s8 %v476_v16 }
 0x285   : > { %v4041_v8 = vpop.f32.mrf.mxu2  ;;  %v3978_v3 = vpop.f32.mrf.mxu0  ;;  %v1868_v31 = vcvt.s32.f32 %v844_v60 }
 0x286   : > { %v4042_v6 = vadd.f32 %v4041_v8, %v4009_v7  ;;  %v4074_v56 = vpop.f32.mrf.mxu3  ;;  %v3979_v55 = vadd.f32 %v3978_v3, %v9544_v27  ;;  %v4011_v10 = vpop.f32.mrf.mxu1  ;;  %v716_v27 = vunpack.c.2.s8 %v444_v21  ;;  %v1876_v8 = vcvt.s32.f32 %v852_v15  ;;  %v3322_v3 = vld [vmem:[#allocation2 + $0x58] sm:$0x7]  ;;  %4417 = vmatpush.bf16.msra.mxu2 %v2884_v54  ;;  %4450 = vmatpush.bf16.msra.mxu3 %v2948_v57  ;;  %v10807_v54 = vld [vmem:[#allocation38_spill] sm:$0xff] }
 0x287   : > { %v1860_v15 = vcvt.s32.f32 %v836_v20  ;;  %v660_v57 = vld [vmem:[%s9013_s10 + $0x6d8] sm:$0xff] }
 0x288   : > { %v4075_v11 = vadd.f32 %v4074_v56, %v4042_v6  ;;  %4231 = vmatmul.bf16.gmra.mxu0 %v9331_v5  ;;  %v4012_v25 = vadd.f32 %v4011_v10, %v3979_v55  ;;  %v1740_v28 = vcvt.s32.f32 %v716_v27  ;;  %v2820_v6 = vpack.c.bf16 %v1876_v8, %v1868_v31 }
 0x289   : > { %4264 = vmatmul.bf16.gmra.mxu1 %v9335_v39  ;;  %v956_v56 = vunpack.c.0.s8 %v508_v48  ;;  %v964_v55 = vunpack.c.1.s8 %v508_v48  ;;  %v1084_v10 = vunpack.c.0.s8 %v540_v14 }
 0x28a   : > { %v5722_v12 = vadd.f32 %v4075_v11, %v3314_v13  ;;  %4297 = vmatmul.bf16.gmra.mxu2 %v10792_v18  ;;  %v2756_v7 = vpack.c.bf16 %v1748_v47, %v1740_v28  ;;  %v1092_v13 = vunpack.c.1.s8 %v540_v14  ;;  %v700_v11 = vunpack.c.0.s8 %v444_v21  ;;  %4384 = vmatpush.bf16.msra.mxu1 %v2820_v6 }
 0x28b   : > { %4330 = vmatmul.bf16.gmra.mxu3 %v10793_v30  ;;  %v1980_v29 = vcvt.s32.f32 %v956_v56  ;;  %v1988_v17 = vcvt.s32.f32 %v964_v55 }
 0x28c   : > { %5794 = vst [vmem:[#allocation2 + $0x128] sm:$0xff] %v5722_v12  ;;  %4351 = vmatpush.bf16.msra.mxu0 %v2756_v7  ;;  %v828_v12 = vunpack.c.0.s8 %v476_v16  ;;  %v2116_v27 = vcvt.s32.f32 %v1092_v13  ;;  %v1724_v22 = vcvt.s32.f32 %v700_v11  ;;  %v10806_v16 = vld [vmem:[#allocation37_spill] sm:$0xff] }
 0x28d   : > { %v4044_v24 = vpop.f32.mrf.mxu2  ;;  %v3980_v51 = vpop.f32.mrf.mxu0  ;;  %v2876_v34 = vpack.c.bf16 %v1988_v17, %v1980_v29  ;;  %v596_v17 = vld [vmem:[%s9013_s10 + $0x4d8] sm:$0xff] }
 0x28e   : > { %v4045_v4 = vadd.f32 %v4044_v24, %v4012_v25  ;;  %v4077_v9 = vpop.f32.mrf.mxu3  ;;  %v4013_v2 = vpop.f32.mrf.mxu1  ;;  %v2108_v25 = vcvt.s32.f32 %v1084_v10  ;;  %v1852_v1 = vcvt.s32.f32 %v828_v12  ;;  %v2748_v14 = vpack.c.bf16 %v1732_v52, %v1724_v22  ;;  %v628_v12 = vld [vmem:[%s9013_s10 + $0x5d8] sm:$0xff] }
 0x28f   : > { %4418 = vmatpush.bf16.msra.mxu2 %v2876_v34  ;;  %v1588_v2 = vunpack.c.3.s8 %v660_v57  ;;  %v1324_v52 = vunpack.c.2.s8 %v596_v17  ;;  %v1332_v34 = vunpack.c.3.s8 %v596_v17  ;;  %v1452_v20 = vunpack.c.2.s8 %v628_v12 }
 0x290   : > { %v4078_v0 = vadd.f32 %v4077_v9, %v4045_v4  ;;  %v2940_v48 = vpack.c.bf16 %v2116_v27, %v2108_v25  ;;  %4352 = vmatpush.bf16.msra.mxu0 %v2748_v14  ;;  %v2812_v51 = vpack.c.bf16 %v1860_v15, %v1852_v1  ;;  %v692_v4 = vld [vmem:[%s9013_s10 + $0x7d8] sm:$0xff]  ;;  %v1580_v9 = vunpack.c.2.s8 %v660_v57 }
 0x291   : > { %v1708_v7 = vunpack.c.2.s8 %v692_v4  ;;  %v1716_v31 = vunpack.c.3.s8 %v692_v4  ;;  %v2612_v10 = vcvt.s32.f32 %v1588_v2  ;;  %v1564_v25 = vunpack.c.0.s8 %v660_v57 }
 0x292   : > { %v5730_v59 = vadd.f32 %v4078_v0, %v3322_v3  ;;  %4451 = vmatpush.bf16.msra.mxu3 %v2940_v48  ;;  %4385 = vmatpush.bf16.msra.mxu1 %v2812_v51  ;;  %v2604_v55 = vcvt.s32.f32 %v1580_v9  ;;  %v1572_v27 = vunpack.c.1.s8 %v660_v57  ;;  %v1460_v1 = vunpack.c.3.s8 %v628_v12 }
 0x293   : > { %v2732_v13 = vcvt.s32.f32 %v1708_v7  ;;  %v2740_v61 = vcvt.s32.f32 %v1716_v31  ;;  %v1692_v48 = vunpack.c.0.s8 %v692_v4  ;;  %v2348_v14 = vcvt.s32.f32 %v1324_v52 }
 0x294   : > { %5802 = vst [vmem:[#allocation2 + $0x58] sm:$0x7] %v5730_v59  ;;  %v3188_v29 = vpack.c.bf16 %v2612_v10, %v2604_v55  ;;  %v1700_v15 = vunpack.c.1.s8 %v692_v4  ;;  %v1308_v4 = vunpack.c.0.s8 %v596_v17 }
 0x295   : > { %v4046_v28 = vpop.f32.mrf.mxu2  ;;  %v4090_v47 = vpop.f32.mrf.mxu0  ;;  %v3252_v22 = vpack.c.bf16 %v2740_v61, %v2732_v13  ;;  %v2716_v9 = vcvt.s32.f32 %v1692_v48  ;;  %v10808_v13 = vld [vmem:[#allocation39_spill] sm:$0xff]  ;;  %v1316_v61 = vunpack.c.1.s8 %v596_v17 }
 0x296   : > { %v4079_v21 = vpop.f32.mrf.mxu3  ;;  %v4123_v60 = vpop.f32.mrf.mxu1  ;;  %4543 = vmatpush.bf16.msrb.mxu2 %v3188_v29  ;;  %v2588_v28 = vcvt.s32.f32 %v1564_v25  ;;  %v2724_v31 = vcvt.s32.f32 %v1700_v15  ;;  %v1436_v29 = vunpack.c.0.s8 %v628_v12  ;;  %v10809_v25 = vld [vmem:[#allocation40_spill] sm:$0xff] }
 0x297   : > { %v4124_v24 = vadd.f32 %v4123_v60, %v4090_v47  ;;  %v2596_v47 = vcvt.s32.f32 %v1572_v27  ;;  %4576 = vmatpush.bf16.msrb.mxu3 %v3252_v22  ;;  %v2356_v21 = vcvt.s32.f32 %v1332_v34  ;;  %v2476_v60 = vcvt.s32.f32 %v1452_v20  ;;  %v10811_v20 = vld [vmem:[#allocation42_spill] sm:$0xff] }
 0x298   : > { %4236 = vmatmul.bf16.gmra.mxu0 %v10794_v19  ;;  %v3244_v55 = vpack.c.bf16 %v2724_v31, %v2716_v9  ;;  %v1444_v27 = vunpack.c.1.s8 %v628_v12  ;;  %v2332_v22 = vcvt.s32.f32 %v1308_v4  ;;  %v2340_v52 = vcvt.s32.f32 %v1316_v61  ;;  %v588_v9 = vld [vmem:[%s9013_s10 + $0x498] sm:$0xff] }
 0x299   : > { %4269 = vmatmul.bf16.gmra.mxu1 %v10795_v32  ;;  %v3180_v51 = vpack.c.bf16 %v2596_v47, %v2588_v28  ;;  %v3060_v57 = vpack.c.bf16 %v2356_v21, %v2348_v14  ;;  %v2460_v34 = vcvt.s32.f32 %v1436_v29 }
 0x29a   : > { %4302 = vmatmul.bf16.gmra.mxu2 %v10806_v16  ;;  %v3052_v28 = vpack.c.bf16 %v2340_v52, %v2332_v22 }
 0x29b   : > { %4335 = vmatmul.bf16.gmra.mxu3 %v10807_v54  ;;  %4544 = vmatpush.bf16.msrb.mxu2 %v3180_v51  ;;  %v684_v51 = vld [vmem:[%s9013_s10 + $0x798] sm:$0xff] }
 0x29c   : > { %4477 = vmatpush.bf16.msrb.mxu0 %v3060_v57  ;;  %4577 = vmatpush.bf16.msrb.mxu3 %v3244_v55  ;;  %v1676_v57 = vunpack.c.2.s8 %v684_v51  ;;  %v1684_v31 = vunpack.c.3.s8 %v684_v51 }
 0x29d   : > { %v4156_v8 = vpop.f32.mrf.mxu2  ;;  %v4092_v3 = vpop.f32.mrf.mxu0 }
 0x29e   : > { %v4157_v0 = vadd.f32 %v4156_v8, %v4124_v24  ;;  %v4189_v6 = vpop.f32.mrf.mxu3  ;;  %v4125_v56 = vpop.f32.mrf.mxu1  ;;  %v2484_v24 = vcvt.s32.f32 %v1460_v1  ;;  %v2468_v1 = vcvt.s32.f32 %v1444_v27  ;;  %v2700_v61 = vcvt.s32.f32 %v1676_v57 }
 0x29f   : > { %v4126_v11 = vadd.f32 %v4125_v56, %v4092_v3  ;;  %v2708_v29 = vcvt.s32.f32 %v1684_v31  ;;  %v1660_v31 = vunpack.c.0.s8 %v684_v51 }
 0x2a0   : > { %v9603_v59 = vadd.f32 %v4189_v6, %v4157_v0  ;;  %v3124_v6 = vpack.c.bf16 %v2484_v24, %v2476_v60  ;;  %v3116_v17 = vpack.c.bf16 %v2468_v1, %v2460_v34  ;;  %4478 = vmatpush.bf16.msrb.mxu0 %v3052_v28  ;;  %v652_v24 = vld [vmem:[%s9013_s10 + $0x698] sm:$0xff] }
 0x2a1   : > { %v1540_v57 = vunpack.c.1.s8 %v652_v24 }
 0x2a2   : > { %4510 = vmatpush.bf16.msrb.mxu1 %v3124_v6 }
 0x2a5   : > { %v4158_v2 = vpop.f32.mrf.mxu2  ;;  %v4095_v7 = vpop.f32.mrf.mxu0 }
 0x2a6   : > { %v4159_v8 = vadd.f32 %v4158_v2, %v4126_v11  ;;  %v4191_v3 = vpop.f32.mrf.mxu3  ;;  %v4128_v0 = vpop.f32.mrf.mxu1  ;;  %v10810_v11 = vld [vmem:[#allocation41_spill] sm:$0xff]  ;;  %4511 = vmatpush.bf16.msrb.mxu1 %v3116_v17  ;;  %v1548_v2 = vunpack.c.2.s8 %v652_v24 }
 0x2a7   : > { %v4129_v56 = vadd.f32 %v4128_v0, %v4095_v7  ;;  %v1556_v7 = vunpack.c.3.s8 %v652_v24  ;;  %v1300_v0 = vunpack.c.3.s8 %v588_v9 }
 0x2a8   : > { %v9607_v10 = vadd.f32 %v4191_v3, %v4159_v8  ;;  %4241 = vmatmul.bf16.gmra.mxu0 %v10808_v13  ;;  %v9619_v8 = vld [vmem:[%s9013_s10 + $0x598] sm:$0xff]  ;;  %v1292_v3 = vunpack.c.2.s8 %v588_v9  ;;  %v2572_v55 = vcvt.s32.f32 %v1548_v2 }
 0x2a9   : > { %4274 = vmatmul.bf16.gmra.mxu1 %v10809_v25  ;;  %v1420_v6 = vunpack.c.2.s8 %v9619_v8  ;;  %v2580_v4 = vcvt.s32.f32 %v1556_v7  ;;  %v2324_v22 = vcvt.s32.f32 %v1300_v0  ;;  %v1532_v7 = vunpack.c.0.s8 %v652_v24 }
 0x2aa   : > { %4307 = vmatmul.bf16.gmra.mxu2 %v10810_v11  ;;  %v2316_v27 = vcvt.s32.f32 %v1292_v3  ;;  %v1668_v3 = vunpack.c.1.s8 %v684_v51  ;;  %v2564_v0 = vcvt.s32.f32 %v1540_v57 }
 0x2ab   : > { %4340 = vmatmul.bf16.gmra.mxu3 %v10811_v20  ;;  %v2444_v52 = vcvt.s32.f32 %v1420_v6  ;;  %v2684_v6 = vcvt.s32.f32 %v1660_v31 }
 0x2ad   : > { %v4161_v47 = vpop.f32.mrf.mxu2  ;;  %v4097_v48 = vpop.f32.mrf.mxu0 }
 0x2ae   : > { %v4162_v14 = vadd.f32 %v4161_v47, %v4129_v56  ;;  %v4194_v21 = vpop.f32.mrf.mxu3  ;;  %v4130_v60 = vpop.f32.mrf.mxu1  ;;  %v1428_v56 = vunpack.c.3.s8 %v9619_v8  ;;  %v3172_v47 = vpack.c.bf16 %v2580_v4, %v2572_v55  ;;  %v1276_v55 = vunpack.c.0.s8 %v588_v9 }
 0x2af   : > { %v4131_v12 = vadd.f32 %v4130_v60, %v4097_v48  ;;  %v3236_v48 = vpack.c.bf16 %v2708_v29, %v2700_v61  ;;  %v3044_v60 = vpack.c.bf16 %v2324_v22, %v2316_v27  ;;  %v1284_v4 = vunpack.c.1.s8 %v588_v9 }
 0x2b0   : > { %v9613_v15 = vadd.f32 %v4194_v21, %v4162_v14  ;;  %v2452_v34 = vcvt.s32.f32 %v1428_v56  ;;  %4545 = vmatpush.bf16.msrb.mxu2 %v3172_v47  ;;  %v2692_v56 = vcvt.s32.f32 %v1668_v3  ;;  %v2300_v27 = vcvt.s32.f32 %v1276_v55 }
 0x2b1   : > { %4578 = vmatpush.bf16.msrb.mxu3 %v3236_v48  ;;  %4479 = vmatpush.bf16.msrb.mxu0 %v3044_v60  ;;  %v2308_v22 = vcvt.s32.f32 %v1284_v4  ;;  %v1404_v48 = vunpack.c.0.s8 %v9619_v8  ;;  %v1412_v9 = vunpack.c.1.s8 %v9619_v8 }
 0x2b2   : > { %v3108_v20 = vpack.c.bf16 %v2452_v34, %v2444_v52  ;;  %v3228_v29 = vpack.c.bf16 %v2692_v56, %v2684_v6 }
 0x2b3   : > { %v2436_v31 = vcvt.s32.f32 %v1412_v9  ;;  %v10813_v9 = vld [vmem:[#allocation26_spill] sm:$0xff] }
 0x2b4   : > { %4512 = vmatpush.bf16.msrb.mxu1 %v3108_v20 }
 0x2b5   : > { %v4163_v1 = vpop.f32.mrf.mxu2  ;;  %v4100_v28 = vpop.f32.mrf.mxu0  ;;  %4579 = vmatpush.bf16.msrb.mxu3 %v3228_v29 }
 0x2b6   : > { %v4164_v17 = vadd.f32 %v4163_v1, %v4131_v12  ;;  %v4196_v14 = vpop.f32.mrf.mxu3  ;;  %v4133_v21 = vpop.f32.mrf.mxu1  ;;  %v2556_v12 = vcvt.s32.f32 %v1532_v7 }
 0x2b7   : > { %v4134_v11 = vadd.f32 %v4133_v21, %v4100_v28  ;;  %v3036_v28 = vpack.c.bf16 %v2308_v22, %v2300_v27  ;;  %v580_v27 = vld [vmem:[%s9013_s10 + $0x458] sm:$0xff] }
 0x2b8   : > { %v9623_v2 = vadd.f32 %v4196_v14, %v4164_v17  ;;  %4353 = vmatmul.bf16.vlgmr.msra.gmra.mxu0 %v9130_v53  ;;  %v3164_v61 = vpack.c.bf16 %v2564_v0, %v2556_v12  ;;  %v644_v17 = vld [vmem:[%s9013_s10 + $0x658] sm:$0xff] }
 0x2b9   : > { %4386 = vmatmul.bf16.vlgmr.msra.gmra.mxu1 %v9133_v58  ;;  %v676_v14 = vld [vmem:[%s9013_s10 + $0x758] sm:$0xff]  ;;  %4480 = vmatpush.bf16.msrb.mxu0 %v3036_v28  ;;  %v1516_v21 = vunpack.c.2.s8 %v644_v17  ;;  %v1524_v60 = vunpack.c.3.s8 %v644_v17  ;;  %v10812_v28 = vld [vmem:[#allocation25_spill] sm:$0xff] }
 0x2ba   : > { %4419 = vmatmul.bf16.vlgmr.msra.gmra.mxu2 %v9137_v62  ;;  %v1644_v7 = vunpack.c.2.s8 %v676_v14  ;;  %v1652_v57 = vunpack.c.3.s8 %v676_v14 }
 0x2bb   : > { %4452 = vmatmul.bf16.vlgmr.msra.gmra.mxu3 %v9139_v63  ;;  %4546 = vmatpush.bf16.msrb.mxu2 %v3164_v61  ;;  %v2540_v3 = vcvt.s32.f32 %v1516_v21  ;;  %v2548_v12 = vcvt.s32.f32 %v1524_v60 }
 0x2bc   : > { %v2668_v0 = vcvt.s32.f32 %v1644_v7  ;;  %v2676_v6 = vcvt.s32.f32 %v1652_v57  ;;  %v10814_v57 = vld [vmem:[#allocation27_spill] sm:$0xff] }
 0x2bd   : > { %v4166_v20 = vpop.f32.mrf.mxu2  ;;  %v4102_v24 = vpop.f32.mrf.mxu0  ;;  %v3156_v61 = vpack.c.bf16 %v2548_v12, %v2540_v3 }
 0x2be   : > { %v4167_v52 = vadd.f32 %v4166_v20, %v4134_v11  ;;  %v4199_v51 = vpop.f32.mrf.mxu3  ;;  %v4135_v34 = vpop.f32.mrf.mxu1  ;;  %v2428_v11 = vcvt.s32.f32 %v1404_v48  ;;  %v3220_v8 = vpack.c.bf16 %v2676_v6, %v2668_v0  ;;  %v612_v48 = vld [vmem:[%s9013_s10 + $0x558] sm:$0xff]  ;;  %v1500_v0 = vunpack.c.0.s8 %v644_v17 }
 0x2bf   : > { %v4136_v1 = vadd.f32 %v4135_v34, %v4102_v24  ;;  %4547 = vmatpush.bf16.msrb.mxu2 %v3156_v61  ;;  %v1388_v7 = vunpack.c.2.s8 %v612_v48  ;;  %v1508_v6 = vunpack.c.1.s8 %v644_v17  ;;  %v1244_v17 = vunpack.c.0.s8 %v580_v27 }
 0x2c0   : > { %v9629_v47 = vadd.f32 %v4199_v51, %v4167_v52  ;;  %v3100_v56 = vpack.c.bf16 %v2436_v31, %v2428_v11  ;;  %4580 = vmatpush.bf16.msrb.mxu3 %v3220_v8  ;;  %v1260_v52 = vunpack.c.2.s8 %v580_v27  ;;  %v1268_v51 = vunpack.c.3.s8 %v580_v27  ;;  %v10815_v11 = vld [vmem:[#allocation28_spill] sm:$0xff] }
 0x2c1   : > { %v2412_v3 = vcvt.s32.f32 %v1388_v7 }
 0x2c2   : > { %4513 = vmatpush.bf16.msrb.mxu1 %v3100_v56  ;;  %v2284_v21 = vcvt.s32.f32 %v1260_v52  ;;  %v2292_v60 = vcvt.s32.f32 %v1268_v51  ;;  %v1628_v56 = vunpack.c.0.s8 %v676_v14  ;;  %v2532_v51 = vcvt.s32.f32 %v1508_v6 }
 0x2c4   : > { %v3028_v31 = vpack.c.bf16 %v2292_v60, %v2284_v21 }
 0x2c5   : > { %v4168_v55 = vpop.f32.mrf.mxu2  ;;  %v4105_v4 = vpop.f32.mrf.mxu0 }
 0x2c6   : > { %v4169_v20 = vadd.f32 %v4168_v55, %v4136_v1  ;;  %v4201_v24 = vpop.f32.mrf.mxu3  ;;  %v4138_v29 = vpop.f32.mrf.mxu1  ;;  %v1396_v1 = vunpack.c.3.s8 %v612_v48  ;;  %v1636_v55 = vunpack.c.1.s8 %v676_v14  ;;  %4481 = vmatpush.bf16.msrb.mxu0 %v3028_v31  ;;  %v1252_v14 = vunpack.c.1.s8 %v580_v27 }
 0x2c7   : > { %v4139_v22 = vadd.f32 %v4138_v29, %v4105_v4  ;;  %v1380_v31 = vunpack.c.1.s8 %v612_v48 }
 0x2c8   : > { %v9636_v34 = vadd.f32 %v4201_v24, %v4169_v20  ;;  %4358 = vmatmul.bf16.gmra.mxu0 %v10812_v28  ;;  %v2420_v12 = vcvt.s32.f32 %v1396_v1  ;;  %v2524_v20 = vcvt.s32.f32 %v1500_v0  ;;  %v1372_v1 = vunpack.c.0.s8 %v612_v48 }
 0x2c9   : > { %4391 = vmatmul.bf16.gmra.mxu1 %v10813_v9  ;;  %v2652_v9 = vcvt.s32.f32 %v1628_v56  ;;  %v2268_v56 = vcvt.s32.f32 %v1244_v17 }
 0x2ca   : > { %4424 = vmatmul.bf16.gmra.mxu2 %v10814_v57  ;;  %v3092_v8 = vpack.c.bf16 %v2420_v12, %v2412_v3  ;;  %v2660_v57 = vcvt.s32.f32 %v1636_v55  ;;  %v3148_v60 = vpack.c.bf16 %v2532_v51, %v2524_v20  ;;  %v2276_v55 = vcvt.s32.f32 %v1252_v14  ;;  %v10817_v20 = vld [vmem:[#allocation30_spill] sm:$0xff]  ;;  %v572_v51 = vld [vmem:[%s9013_s10 + $0x418] sm:$0xff] }
 0x2cb   : > { %4457 = vmatmul.bf16.gmra.mxu3 %v10815_v11 }
 0x2cc   : > { %4514 = vmatpush.bf16.msrb.mxu1 %v3092_v8  ;;  %v3212_v7 = vpack.c.bf16 %v2660_v57, %v2652_v9  ;;  %4548 = vmatpush.bf16.msrb.mxu2 %v3148_v60  ;;  %v2404_v8 = vcvt.s32.f32 %v1380_v31  ;;  %v10816_v57 = vld [vmem:[#allocation29_spill] sm:$0xff]  ;;  %v3020_v27 = vpack.c.bf16 %v2276_v55, %v2268_v56  ;;  %v1236_v56 = vunpack.c.3.s8 %v572_v51 }
 0x2cd   : > { %v4171_v4 = vpop.f32.mrf.mxu2  ;;  %v4107_v61 = vpop.f32.mrf.mxu0 }
 0x2ce   : > { %v4172_v24 = vadd.f32 %v4171_v4, %v4139_v22  ;;  %v4204_v29 = vpop.f32.mrf.mxu3  ;;  %v4140_v52 = vpop.f32.mrf.mxu1  ;;  %4581 = vmatpush.bf16.msrb.mxu3 %v3212_v7  ;;  %v2396_v4 = vcvt.s32.f32 %v1372_v1  ;;  %4482 = vmatpush.bf16.msrb.mxu0 %v3020_v27 }
 0x2cf   : > { %v4141_v28 = vadd.f32 %v4140_v52, %v4107_v61  ;;  %v668_v52 = vld [vmem:[%s9013_s10 + $0x718] sm:$0xff] }
 0x2d0   : > { %v9643_v21 = vadd.f32 %v4204_v29, %v4172_v24  ;;  %v3084_v48 = vpack.c.bf16 %v2404_v8, %v2396_v4  ;;  %v10819_v24 = vld [vmem:[#allocation32_spill] sm:$0xff]  ;;  %v1612_v1 = vunpack.c.2.s8 %v668_v52  ;;  %v1620_v31 = vunpack.c.3.s8 %v668_v52 }
 0x2d1   : > { %v636_v29 = vld [vmem:[%s9013_s10 + $0x618] sm:$0xff]  ;;  %v1604_v53 = vunpack.c.1.s8 %v668_v52 }
 0x2d2   : > { %4515 = vmatpush.bf16.msrb.mxu1 %v3084_v48  ;;  %v1484_v17 = vunpack.c.2.s8 %v636_v29  ;;  %v1492_v14 = vunpack.c.3.s8 %v636_v29  ;;  %v2636_v27 = vcvt.s32.f32 %v1612_v1  ;;  %v2644_v48 = vcvt.s32.f32 %v1620_v31 }
 0x2d4   : > { %v2508_v4 = vcvt.s32.f32 %v1484_v17  ;;  %v2516_v8 = vcvt.s32.f32 %v1492_v14  ;;  %v3204_v11 = vpack.c.bf16 %v2644_v48, %v2636_v27  ;;  %v1212_v17 = vunpack.c.0.s8 %v572_v51  ;;  %v565_v48 = vld [vmem:[%s9013_s10 + $0x3e0] sm:$0xff] }
 0x2d5   : > { %v4173_v3 = vpop.f32.mrf.mxu2  ;;  %v4110_v12 = vpop.f32.mrf.mxu0  ;;  %v1220_v14 = vunpack.c.1.s8 %v572_v51 }
 0x2d6   : > { %v4174_v22 = vadd.f32 %v4173_v3, %v4141_v28  ;;  %v4206_v0 = vpop.f32.mrf.mxu3  ;;  %v4143_v6 = vpop.f32.mrf.mxu1  ;;  %v10818_v28 = vld [vmem:[#allocation31_spill] sm:$0xff]  ;;  %4582 = vmatpush.bf16.msrb.mxu3 %v3204_v11 }
 0x2d7   : > { %v4144_v61 = vadd.f32 %v4143_v6, %v4110_v12  ;;  %v604_v3 = vld [vmem:[%s9013_s10 + $0x518] sm:$0xff]  ;;  %v1228_v6 = vunpack.c.2.s8 %v572_v51 }
 0x2d8   : > { %v9645_v9 = vadd.f32 %v4206_v0, %v4174_v22  ;;  %4363 = vmatmul.bf16.gmra.mxu0 %v10816_v57  ;;  %v1356_v55 = vunpack.c.2.s8 %v604_v3  ;;  %v3140_v57 = vpack.c.bf16 %v2516_v8, %v2508_v4  ;;  %v2628_v8 = vcvt.s32.f32 %v1604_v53 }
 0x2d9   : > { %4396 = vmatmul.bf16.gmra.mxu1 %v10817_v20  ;;  %v2260_v20 = vcvt.s32.f32 %v1236_v56  ;;  %v1348_v11 = vunpack.c.1.s8 %v604_v3 }
 0x2da   : > { %4429 = vmatmul.bf16.gmra.mxu2 %v10818_v28  ;;  %v2252_v28 = vcvt.s32.f32 %v1228_v6  ;;  %v2380_v63 = vcvt.s32.f32 %v1356_v55  ;;  %v2236_v55 = vcvt.s32.f32 %v1212_v17  ;;  %v1205_v17 = vunpack.c.3.s8 %v565_v48 }
 0x2db   : > { %4462 = vmatmul.bf16.gmra.mxu3 %v10819_v24  ;;  %4549 = vmatpush.bf16.msrb.mxu2 %v3140_v57 }
 0x2dc   : > { %v3012_v62 = vpack.c.bf16 %v2260_v20, %v2252_v28  ;;  %v2244_v20 = vcvt.s32.f32 %v1220_v14 }
 0x2dd   : > { %v4176_v60 = vpop.f32.mrf.mxu2  ;;  %v4112_v7 = vpop.f32.mrf.mxu0 }
 0x2de   : > { %v4177_v12 = vadd.f32 %v4176_v60, %v4144_v61  ;;  %v4209_v22 = vpop.f32.mrf.mxu3  ;;  %v4145_v0 = vpop.f32.mrf.mxu1  ;;  %v1364_v7 = vunpack.c.3.s8 %v604_v3  ;;  %v1468_v61 = vunpack.c.0.s8 %v636_v29  ;;  %v1476_v60 = vunpack.c.1.s8 %v636_v29  ;;  %4483 = vmatpush.bf16.msrb.mxu0 %v3012_v62 }
 0x2df   : > { %v1596_v0 = vunpack.c.0.s8 %v668_v52  ;;  %v3004_v62 = vpack.c.bf16 %v2244_v20, %v2236_v55 }
 0x2e0   : > { %v9655_v24 = vadd.f32 %v4209_v22, %v4177_v12  ;;  %v2388_v58 = vcvt.s32.f32 %v1364_v7  ;;  %v2492_v31 = vcvt.s32.f32 %v1468_v61  ;;  %v2500_v12 = vcvt.s32.f32 %v1476_v60 }
 0x2e1   : > { %v1340_v22 = vunpack.c.0.s8 %v604_v3  ;;  %v2620_v4 = vcvt.s32.f32 %v1596_v0  ;;  %v533_v3 = vld [vmem:[%s9013_s10 + $0x2e0] sm:$0xff]  ;;  %v1197_v0 = vunpack.c.2.s8 %v565_v48 }
 0x2e2   : > { %v3076_v1 = vpack.c.bf16 %v2388_v58, %v2380_v63  ;;  %v3132_v57 = vpack.c.bf16 %v2500_v12, %v2492_v31  ;;  %v2372_v63 = vcvt.s32.f32 %v1348_v11  ;;  %4484 = vmatpush.bf16.msrb.mxu0 %v3004_v62  ;;  %v1077_v60 = vunpack.c.3.s8 %v533_v3  ;;  %v469_v11 = vld [vmem:[%s9013_s10 + $0xe0] sm:$0xff] }
 0x2e3   : > { %v2364_v29 = vcvt.s32.f32 %v1340_v22  ;;  %v3196_v52 = vpack.c.bf16 %v2628_v8, %v2620_v4  ;;  %v3259_v22 = vld [vmem:[#allocation2 + $0x40] sm:$0xff]  ;;  %v2221_v4 = vcvt.s32.f32 %v1197_v0  ;;  %v2229_v8 = vcvt.s32.f32 %v1205_v17 }
 0x2e4   : > { %4516 = vmatpush.bf16.msrb.mxu1 %v3076_v1  ;;  %4550 = vmatpush.bf16.msrb.mxu2 %v3132_v57  ;;  %v1061_v62 = vunpack.c.1.s8 %v533_v3 }
 0x2e5   : > { %v4178_v6 = vpop.f32.mrf.mxu2  ;;  %v4222_v56 = vpop.f32.mrf.mxu0  ;;  %4583 = vmatpush.bf16.msrb.mxu3 %v3196_v52  ;;  %v3068_v53 = vpack.c.bf16 %v2372_v63, %v2364_v29  ;;  %v501_v29 = vld [vmem:[%s9013_s10 + $0x1e0] sm:$0xff]  ;;  %v1053_v52 = vunpack.c.0.s8 %v533_v3 }
 0x2e6   : > { %v4211_v28 = vpop.f32.mrf.mxu3  ;;  %v4255_v27 = vpop.f32.mrf.mxu1  ;;  %v4223_v58 = vadd.f32 %v4222_v56, %v9603_v59  ;;  %v1069_v59 = vunpack.c.2.s8 %v533_v3  ;;  %v2101_v56 = vcvt.s32.f32 %v1077_v60 }
 0x2e7   : > { %v2997_v28 = vpack.c.bf16 %v2229_v8, %v2221_v4 }
 0x2e8   : > { %4368 = vmatmul.bf16.gmra.mxu0 %v9227_v26  ;;  %v4256_v51 = vadd.f32 %v4255_v27, %v4223_v58  ;;  %4517 = vmatpush.bf16.msrb.mxu1 %v3068_v53  ;;  %v2093_v6 = vcvt.s32.f32 %v1069_v59  ;;  %v1189_v58 = vunpack.c.1.s8 %v565_v48  ;;  %v949_v59 = vunpack.c.3.s8 %v501_v29 }
 0x2e9   : > { %4401 = vmatmul.bf16.gmra.mxu1 %v9231_v38  ;;  %4708 = vmatpush.bf16.msra.mxu3 %v2997_v28 }
 0x2ea   : > { %4434 = vmatmul.bf16.gmra.mxu2 %v9233_v41  ;;  %v2933_v20 = vpack.c.bf16 %v2101_v56, %v2093_v6  ;;  %v1973_v3 = vcvt.s32.f32 %v949_v59  ;;  %v2213_v28 = vcvt.s32.f32 %v1189_v58 }
 0x2eb   : > { %4467 = vmatmul.bf16.gmra.mxu3 %v9235_v42 }
 0x2ec   : > { %4675 = vmatpush.bf16.msra.mxu2 %v2933_v20 }
 0x2ed   : > { %v4288_v7 = vpop.f32.mrf.mxu2  ;;  %v4224_v61 = vpop.f32.mrf.mxu0 }
 0x2ee   : > { %v4289_v14 = vadd.f32 %v4288_v7, %v4256_v51  ;;  %v4321_v1 = vpop.f32.mrf.mxu3  ;;  %v4225_v31 = vadd.f32 %v4224_v61, %v9607_v10  ;;  %v4257_v12 = vpop.f32.mrf.mxu1  ;;  %v1181_v10 = vunpack.c.0.s8 %v565_v48  ;;  %v813_v51 = vunpack.c.2.s8 %v469_v11 }
 0x2ef   : > { %v821_v7 = vunpack.c.3.s8 %v469_v11  ;;  %v941_v61 = vunpack.c.2.s8 %v501_v29 }
 0x2f0   : > { %v4322_v55 = vadd.f32 %v4321_v1, %v4289_v14  ;;  %v4258_v57 = vadd.f32 %v4257_v12, %v4225_v31  ;;  %v2077_v1 = vcvt.s32.f32 %v1053_v52  ;;  %v2085_v31 = vcvt.s32.f32 %v1061_v62  ;;  %v3267_v12 = vld [vmem:[#allocation2 + $0xb0] sm:$0xff] }
 0x2f1   : > { %v1845_v6 = vcvt.s32.f32 %v821_v7  ;;  %v1965_v56 = vcvt.s32.f32 %v941_v61  ;;  %v2205_v8 = vcvt.s32.f32 %v1181_v10  ;;  %v797_v52 = vunpack.c.0.s8 %v469_v11 }
 0x2f2   : > { %v5667_v27 = vadd.f32 %v4322_v55, %v3259_v22  ;;  %v1837_v22 = vcvt.s32.f32 %v813_v51  ;;  %v2925_v48 = vpack.c.bf16 %v2085_v31, %v2077_v1  ;;  %v805_v62 = vunpack.c.1.s8 %v469_v11 }
 0x2f3   : > { %v2869_v20 = vpack.c.bf16 %v1973_v3, %v1965_v56  ;;  %v933_v10 = vunpack.c.1.s8 %v501_v29  ;;  %v1821_v59 = vcvt.s32.f32 %v797_v52  ;;  %v557_v56 = vld [vmem:[%s9013_s10 + $0x3a0] sm:$0xff] }
 0x2f4   : > { %5739 = vst [vmem:[#allocation2 + $0x40] sm:$0xff] %v5667_v27  ;;  %v2805_v55 = vpack.c.bf16 %v1845_v6, %v1837_v22  ;;  %4676 = vmatpush.bf16.msra.mxu2 %v2925_v48  ;;  %v525_v6 = vld [vmem:[%s9013_s10 + $0x2a0] sm:$0xff] }
 0x2f5   : > { %v4290_v63 = vpop.f32.mrf.mxu2  ;;  %v4227_v53 = vpop.f32.mrf.mxu0  ;;  %4642 = vmatpush.bf16.msra.mxu1 %v2869_v20  ;;  %v461_v3 = vld [vmem:[%s9013_s10 + $0xa0] sm:$0xff]  ;;  %v1165_v20 = vunpack.c.2.s8 %v557_v56 }
 0x2f6   : > { %v4291_v60 = vadd.f32 %v4290_v63, %v4258_v57  ;;  %v4323_v0 = vpop.f32.mrf.mxu3  ;;  %v4228_v17 = vadd.f32 %v4227_v53, %v9613_v15  ;;  %v4260_v14 = vpop.f32.mrf.mxu1  ;;  %4609 = vmatpush.bf16.msra.mxu0 %v2805_v55  ;;  %v2989_v57 = vpack.c.bf16 %v2213_v28, %v2205_v8  ;;  %v925_v63 = vunpack.c.0.s8 %v501_v29 }
 0x2f7   : > { %v1037_v8 = vunpack.c.2.s8 %v525_v6  ;;  %v1045_v55 = vunpack.c.3.s8 %v525_v6  ;;  %v1173_v28 = vunpack.c.3.s8 %v557_v56  ;;  %v781_v52 = vunpack.c.2.s8 %v461_v3 }
 0x2f8   : > { %v4324_v4 = vadd.f32 %v4323_v0, %v4291_v60  ;;  %4373 = vmatmul.bf16.gmra.mxu0 %v9247_v23  ;;  %v4261_v15 = vadd.f32 %v4260_v14, %v4228_v17  ;;  %4709 = vmatpush.bf16.msra.mxu3 %v2989_v57  ;;  %v1829_v60 = vcvt.s32.f32 %v805_v62  ;;  %v3275_v0 = vld [vmem:[#allocation2 + $0x140] sm:$0xff]  ;;  %v1949_v17 = vcvt.s32.f32 %v925_v63 }
 0x2f9   : > { %4406 = vmatmul.bf16.gmra.mxu1 %v9249_v37  ;;  %v1957_v14 = vcvt.s32.f32 %v933_v10  ;;  %v789_v62 = vunpack.c.3.s8 %v461_v3  ;;  %v9678_v63 = vld [vmem:[%s9013_s10 + $0x1a0] sm:$0xff]  ;;  %v3283_v10 = vld [vmem:[#allocation2 + $0x188] sm:$0xff] }
 0x2fa   : > { %v5675_v27 = vadd.f32 %v4324_v4, %v3267_v12  ;;  %4439 = vmatmul.bf16.gmra.mxu2 %v9251_v49  ;;  %v2797_v11 = vpack.c.bf16 %v1829_v60, %v1821_v59  ;;  %v1805_v59 = vcvt.s32.f32 %v781_v52 }
 0x2fb   : > { %4472 = vmatmul.bf16.gmra.mxu3 %v9253_v50  ;;  %v2861_v12 = vpack.c.bf16 %v1957_v14, %v1949_v17  ;;  %v1813_v60 = vcvt.s32.f32 %v789_v62  ;;  %v917_v14 = vunpack.c.3.s8 %v9678_v63 }
 0x2fc   : > { %5747 = vst [vmem:[#allocation2 + $0xb0] sm:$0xff] %v5675_v27  ;;  %4610 = vmatpush.bf16.msra.mxu0 %v2797_v11 }
 0x2fd   : > { %v4293_v53 = vpop.f32.mrf.mxu2  ;;  %v4229_v51 = vpop.f32.mrf.mxu0  ;;  %4643 = vmatpush.bf16.msra.mxu1 %v2861_v12 }
 0x2fe   : > { %v4294_v7 = vadd.f32 %v4293_v53, %v4261_v15  ;;  %v4326_v58 = vpop.f32.mrf.mxu3  ;;  %v4262_v61 = vpop.f32.mrf.mxu1  ;;  %v4230_v31 = vadd.f32 %v4229_v51, %v9623_v2  ;;  %v2061_v53 = vcvt.s32.f32 %v1037_v8  ;;  %v2069_v51 = vcvt.s32.f32 %v1045_v55 }
 0x2ff   : > { %v1157_v8 = vunpack.c.1.s8 %v557_v56 }
 0x300   : > { %v4327_v1 = vadd.f32 %v4326_v58, %v4294_v7  ;;  %v4263_v22 = vadd.f32 %v4262_v61, %v4230_v31  ;;  %v2189_v7 = vcvt.s32.f32 %v1165_v20  ;;  %v2197_v58 = vcvt.s32.f32 %v1173_v28 }
 0x301   : > { %v2789_v31 = vpack.c.bf16 %v1813_v60, %v1805_v59 }
 0x302   : > { %v5683_v29 = vadd.f32 %v4327_v1, %v3275_v0  ;;  %v2917_v0 = vpack.c.bf16 %v2069_v51, %v2061_v53  ;;  %v2981_v17 = vpack.c.bf16 %v2197_v58, %v2189_v7  ;;  %v3291_v53 = vld [vmem:[#allocation2 + $0x78] sm:$0xff]  ;;  %v2181_v7 = vcvt.s32.f32 %v1157_v8 }
 0x303   : > { %4611 = vmatpush.bf16.msra.mxu0 %v2789_v31  ;;  %v549_v31 = vld [vmem:[%s9013_s10 + $0x360] sm:$0xff] }
 0x304   : > { %5755 = vst [vmem:[#allocation2 + $0x140] sm:$0xff] %v5683_v29  ;;  %4677 = vmatpush.bf16.msra.mxu2 %v2917_v0  ;;  %v1941_v29 = vcvt.s32.f32 %v917_v14  ;;  %4710 = vmatpush.bf16.msra.mxu3 %v2981_v17  ;;  %v901_v14 = vunpack.c.1.s8 %v9678_v63 }
 0x305   : > { %v4295_v4 = vpop.f32.mrf.mxu2  ;;  %v4232_v48 = vpop.f32.mrf.mxu0 }
 0x306   : > { %v4296_v27 = vadd.f32 %v4295_v4, %v4263_v22  ;;  %v4328_v15 = vpop.f32.mrf.mxu3  ;;  %v4233_v2 = vadd.f32 %v4232_v48, %v9629_v47  ;;  %v4265_v57 = vpop.f32.mrf.mxu1  ;;  %v909_v47 = vunpack.c.2.s8 %v9678_v63  ;;  %v1021_v22 = vunpack.c.0.s8 %v525_v6 }
 0x307   : > { %v1029_v4 = vunpack.c.1.s8 %v525_v6  ;;  %v1149_v48 = vunpack.c.0.s8 %v557_v56 }
 0x308   : > { %v4329_v61 = vadd.f32 %v4328_v15, %v4296_v27  ;;  %4485 = vmatmul.bf16.vlgmr.msrb.gmra.mxu0 %v9277_v36  ;;  %v4266_v11 = vadd.f32 %v4265_v57, %v4233_v2  ;;  %v1933_v12 = vcvt.s32.f32 %v909_v47  ;;  %v765_v27 = vunpack.c.0.s8 %v461_v3 }
 0x309   : > { %4518 = vmatmul.bf16.vlgmr.msrb.gmra.mxu1 %v9281_v40  ;;  %v773_v15 = vunpack.c.1.s8 %v461_v3  ;;  %v2045_v57 = vcvt.s32.f32 %v1021_v22  ;;  %v2173_v51 = vcvt.s32.f32 %v1149_v48  ;;  %v893_v47 = vunpack.c.0.s8 %v9678_v63 }
 0x30a   : > { %v5691_v1 = vadd.f32 %v4329_v61, %v3283_v10  ;;  %4551 = vmatmul.bf16.vlgmr.msrb.gmra.mxu2 %v9283_v45  ;;  %v2853_v28 = vpack.c.bf16 %v1941_v29, %v1933_v12  ;;  %v2053_v10 = vcvt.s32.f32 %v1029_v4  ;;  %v1789_v58 = vcvt.s32.f32 %v765_v27  ;;  %v453_v27 = vld [vmem:[%s9013_s10 + $0x60] sm:$0xff] }
 0x30b   : > { %4584 = vmatmul.bf16.vlgmr.msrb.gmra.mxu3 %v9285_v46  ;;  %v1797_v6 = vcvt.s32.f32 %v773_v15  ;;  %v2973_v60 = vpack.c.bf16 %v2181_v7, %v2173_v51  ;;  %v1133_v22 = vunpack.c.2.s8 %v549_v31  ;;  %v1141_v4 = vunpack.c.3.s8 %v549_v31  ;;  %v3299_v15 = vld [vmem:[#allocation2 + $0x238] sm:$0xff] }
 0x30c   : > { %5763 = vst [vmem:[#allocation2 + $0x188] sm:$0xff] %v5691_v1  ;;  %4644 = vmatpush.bf16.msra.mxu1 %v2853_v28  ;;  %v2909_v59 = vpack.c.bf16 %v2053_v10, %v2045_v57  ;;  %v517_v1 = vld [vmem:[%s9013_s10 + $0x260] sm:$0xff]  ;;  %v1925_v28 = vcvt.s32.f32 %v901_v14  ;;  %v749_v7 = vunpack.c.2.s8 %v453_v27 }
 0x30d   : > { %v4298_v55 = vpop.f32.mrf.mxu2  ;;  %v4234_v20 = vpop.f32.mrf.mxu0  ;;  %v2781_v0 = vpack.c.bf16 %v1797_v6, %v1789_v58  ;;  %4711 = vmatpush.bf16.msra.mxu3 %v2973_v60  ;;  %v1013_v29 = vunpack.c.3.s8 %v517_v1  ;;  %v2165_v63 = vcvt.s32.f32 %v1141_v4  ;;  %v485_v57 = vld [vmem:[%s9013_s10 + $0x160] sm:$0xff] }
 0x30e   : > { %v4299_v52 = vadd.f32 %v4298_v55, %v4266_v11  ;;  %v4331_v62 = vpop.f32.mrf.mxu3  ;;  %v4267_v2 = vpop.f32.mrf.mxu1  ;;  %v4235_v56 = vadd.f32 %v4234_v20, %v9636_v34  ;;  %4678 = vmatpush.bf16.msra.mxu2 %v2909_v59  ;;  %v1005_v34 = vunpack.c.2.s8 %v517_v1  ;;  %v1917_v20 = vcvt.s32.f32 %v893_v47 }
 0x30f   : > { %4612 = vmatpush.bf16.msra.mxu0 %v2781_v0  ;;  %v1773_v60 = vcvt.s32.f32 %v749_v7  ;;  %v885_v0 = vunpack.c.3.s8 %v485_v57  ;;  %v997_v47 = vunpack.c.1.s8 %v517_v1  ;;  %v861_v7 = vunpack.c.0.s8 %v485_v57 }
 0x310   : > { %v4332_v61 = vadd.f32 %v4331_v62, %v4299_v52  ;;  %v4268_v17 = vadd.f32 %v4267_v2, %v4235_v56  ;;  %v2029_v52 = vcvt.s32.f32 %v1005_v34  ;;  %v2037_v62 = vcvt.s32.f32 %v1013_v29 }
 0x311   : > { %v2157_v2 = vcvt.s32.f32 %v1133_v22  ;;  %v2845_v51 = vpack.c.bf16 %v1925_v28, %v1917_v20  ;;  %v877_v56 = vunpack.c.2.s8 %v485_v57  ;;  %v1125_v34 = vunpack.c.1.s8 %v549_v31 }
 0x312   : > { %v5699_v3 = vadd.f32 %v4332_v61, %v3291_v53  ;;  %v2901_v58 = vpack.c.bf16 %v2037_v62, %v2029_v52  ;;  %v757_v61 = vunpack.c.3.s8 %v453_v27 }
 0x313   : > { %v2965_v6 = vpack.c.bf16 %v2165_v63, %v2157_v2  ;;  %4645 = vmatpush.bf16.msra.mxu1 %v2845_v51  ;;  %v3307_v2 = vld [vmem:[#allocation2 + $0x68] sm:$0xff] }
 0x314   : > { %5771 = vst [vmem:[#allocation2 + $0x78] sm:$0xff] %v5699_v3  ;;  %4679 = vmatpush.bf16.msra.mxu2 %v2901_v58  ;;  %v1901_v3 = vcvt.s32.f32 %v877_v56  ;;  %v869_v58 = vunpack.c.1.s8 %v485_v57 }
 0x315   : > { %v4300_v11 = vpop.f32.mrf.mxu2  ;;  %v4237_v12 = vpop.f32.mrf.mxu0  ;;  %4712 = vmatpush.bf16.msra.mxu3 %v2965_v6 }
 0x316   : > { %v4301_v48 = vadd.f32 %v4300_v11, %v4268_v17  ;;  %v4333_v8 = vpop.f32.mrf.mxu3  ;;  %v4270_v55 = vpop.f32.mrf.mxu1  ;;  %v4238_v53 = vadd.f32 %v4237_v12, %v9643_v21  ;;  %v1781_v21 = vcvt.s32.f32 %v757_v61  ;;  %v989_v17 = vunpack.c.0.s8 %v517_v1 }
 0x317   : > { %v1909_v11 = vcvt.s32.f32 %v885_v0  ;;  %v1117_v12 = vunpack.c.0.s8 %v549_v31  ;;  %v2149_v1 = vcvt.s32.f32 %v1125_v34  ;;  %v741_v31 = vunpack.c.1.s8 %v453_v27  ;;  %v509_v34 = vld [vmem:[%s9013_s10 + $0x220] sm:$0xff] }
 0x318   : > { %v4334_v10 = vadd.f32 %v4333_v8, %v4301_v48  ;;  %4490 = vmatmul.bf16.gmra.mxu0 %v9308_v33  ;;  %v4271_v14 = vadd.f32 %v4270_v55, %v4238_v53  ;;  %v2773_v4 = vpack.c.bf16 %v1781_v21, %v1773_v60  ;;  %v2013_v48 = vcvt.s32.f32 %v989_v17 }
 0x319   : > { %4523 = vmatmul.bf16.gmra.mxu1 %v9312_v35  ;;  %v2021_v8 = vcvt.s32.f32 %v997_v47  ;;  %v2837_v52 = vpack.c.bf16 %v1909_v11, %v1901_v3  ;;  %v2141_v62 = vcvt.s32.f32 %v1117_v12  ;;  %v733_v53 = vunpack.c.0.s8 %v453_v27  ;;  %v3315_v11 = vld [vmem:[#allocation2 + $0x178] sm:$0xff] }
 0x31a   : > { %v5707_v59 = vadd.f32 %v4334_v10, %v3299_v15  ;;  %4556 = vmatmul.bf16.gmra.mxu2 %v9314_v43  ;;  %4613 = vmatpush.bf16.msra.mxu0 %v2773_v4  ;;  %v1765_v56 = vcvt.s32.f32 %v741_v31  ;;  %v1893_v60 = vcvt.s32.f32 %v869_v58  ;;  %v973_v4 = vunpack.c.2.s8 %v509_v34 }
 0x31b   : > { %4589 = vmatmul.bf16.gmra.mxu3 %v9316_v44  ;;  %v2893_v63 = vpack.c.bf16 %v2021_v8, %v2013_v48  ;;  %4646 = vmatpush.bf16.msra.mxu1 %v2837_v52  ;;  %v2957_v51 = vpack.c.bf16 %v2149_v1, %v2141_v62  ;;  %v1757_v61 = vcvt.s32.f32 %v733_v53  ;;  %v981_v48 = vunpack.c.3.s8 %v509_v34 }
 0x31c   : > { %5779 = vst [vmem:[#allocation2 + $0x238] sm:$0xff] %v5707_v59  ;;  %v1885_v59 = vcvt.s32.f32 %v861_v7  ;;  %v1997_v62 = vcvt.s32.f32 %v973_v4 }
 0x31d   : > { %v4303_v29 = vpop.f32.mrf.mxu2  ;;  %v4239_v22 = vpop.f32.mrf.mxu0  ;;  %4680 = vmatpush.bf16.msra.mxu2 %v2893_v63  ;;  %4713 = vmatpush.bf16.msra.mxu3 %v2957_v51  ;;  %v2765_v21 = vpack.c.bf16 %v1765_v56, %v1757_v61 }
 0x31e   : > { %v4304_v20 = vadd.f32 %v4303_v29, %v4271_v14  ;;  %v4336_v28 = vpop.f32.mrf.mxu3  ;;  %v4272_v15 = vpop.f32.mrf.mxu1  ;;  %v4240_v55 = vadd.f32 %v4239_v22, %v9645_v9  ;;  %v2829_v17 = vpack.c.bf16 %v1893_v60, %v1885_v59  ;;  %v541_v29 = vld [vmem:[%s9013_s10 + $0x320] sm:$0xff] }
 0x31f   : > { %4614 = vmatpush.bf16.msra.mxu0 %v2765_v21  ;;  %v445_v22 = vld [vmem:[%s9013_s10 + $0x20] sm:$0xff]  ;;  %v1101_v8 = vunpack.c.2.s8 %v541_v29 }
 0x320   : > { %v4337_v10 = vadd.f32 %v4336_v28, %v4304_v20  ;;  %v4273_v0 = vadd.f32 %v4272_v15, %v4240_v55  ;;  %4647 = vmatpush.bf16.msra.mxu1 %v2829_v17  ;;  %v1109_v20 = vunpack.c.3.s8 %v541_v29  ;;  %v725_v52 = vunpack.c.3.s8 %v445_v22 }
 0x321   : > { %v2125_v63 = vcvt.s32.f32 %v1101_v8  ;;  %v709_v4 = vunpack.c.1.s8 %v445_v22 }
 0x322   : > { %v5715_v6 = vadd.f32 %v4337_v10, %v3307_v2  ;;  %v2005_v2 = vcvt.s32.f32 %v981_v48  ;;  %v2133_v1 = vcvt.s32.f32 %v1109_v20  ;;  %v477_v10 = vld [vmem:[%s9013_s10 + $0x120] sm:$0xff]  ;;  %v1749_v53 = vcvt.s32.f32 %v725_v52 }
 0x323   : > { %v845_v31 = vunpack.c.2.s8 %v477_v10  ;;  %v853_v51 = vunpack.c.3.s8 %v477_v10 }
 0x324   : > { %5787 = vst [vmem:[#allocation2 + $0x68] sm:$0xff] %v5715_v6  ;;  %v2885_v6 = vpack.c.bf16 %v2005_v2, %v1997_v62  ;;  %v2949_v61 = vpack.c.bf16 %v2133_v1, %v2125_v63  ;;  %v1733_v62 = vcvt.s32.f32 %v709_v4  ;;  %v837_v63 = vunpack.c.1.s8 %v477_v10 }
 0x325   : > { %v4305_v9 = vpop.f32.mrf.mxu2  ;;  %v4242_v3 = vpop.f32.mrf.mxu0  ;;  %v1869_v21 = vcvt.s32.f32 %v845_v31 }
 0x326   : > { %v4306_v27 = vadd.f32 %v4305_v9, %v4273_v0  ;;  %v4338_v47 = vpop.f32.mrf.mxu3  ;;  %v4243_v14 = vadd.f32 %v4242_v3, %v9655_v24  ;;  %v4275_v57 = vpop.f32.mrf.mxu1  ;;  %v717_v24 = vunpack.c.2.s8 %v445_v22  ;;  %v1877_v9 = vcvt.s32.f32 %v853_v51  ;;  %v3323_v3 = vld [vmem:[#allocation2 + $0x118] sm:$0x7]  ;;  %4681 = vmatpush.bf16.msra.mxu2 %v2885_v6  ;;  %4714 = vmatpush.bf16.msra.mxu3 %v2949_v61  ;;  %v693_v6 = vld [vmem:[%s9013_s10 + $0x7e0] sm:$0xff] }
 0x327   : > { %v1861_v51 = vcvt.s32.f32 %v837_v63 }
 0x328   : > { %v4339_v12 = vadd.f32 %v4338_v47, %v4306_v27  ;;  %4495 = vmatmul.bf16.gmra.mxu0 %v9331_v5  ;;  %v4276_v15 = vadd.f32 %v4275_v57, %v4243_v14  ;;  %v1741_v55 = vcvt.s32.f32 %v717_v24  ;;  %v2821_v27 = vpack.c.bf16 %v1877_v9, %v1869_v21 }
 0x329   : > { %4528 = vmatmul.bf16.gmra.mxu1 %v9335_v39  ;;  %v957_v47 = vunpack.c.0.s8 %v509_v34  ;;  %v965_v14 = vunpack.c.1.s8 %v509_v34  ;;  %v1085_v57 = vunpack.c.0.s8 %v541_v29 }
 0x32a   : > { %v5723_v28 = vadd.f32 %v4339_v12, %v3315_v11  ;;  %4561 = vmatmul.bf16.gmra.mxu2 %v10792_v18  ;;  %v2757_v0 = vpack.c.bf16 %v1749_v53, %v1741_v55  ;;  %v1093_v11 = vunpack.c.1.s8 %v541_v29  ;;  %v701_v12 = vunpack.c.0.s8 %v445_v22  ;;  %4648 = vmatpush.bf16.msra.mxu1 %v2821_v27 }
 0x32b   : > { %4594 = vmatmul.bf16.gmra.mxu3 %v10793_v30  ;;  %v1981_v8 = vcvt.s32.f32 %v957_v47  ;;  %v1989_v20 = vcvt.s32.f32 %v965_v14 }
 0x32c   : > { %5795 = vst [vmem:[#allocation2 + $0x178] sm:$0xff] %v5723_v28  ;;  %4615 = vmatpush.bf16.msra.mxu0 %v2757_v0  ;;  %v829_v28 = vunpack.c.0.s8 %v477_v10  ;;  %v2117_v24 = vcvt.s32.f32 %v1093_v11  ;;  %v1725_v52 = vcvt.s32.f32 %v701_v12  ;;  %v661_v10 = vld [vmem:[%s9013_s10 + $0x6e0] sm:$0xff] }
 0x32d   : > { %v4308_v7 = vpop.f32.mrf.mxu2  ;;  %v4244_v58 = vpop.f32.mrf.mxu0  ;;  %v2877_v2 = vpack.c.bf16 %v1989_v20, %v1981_v8  ;;  %v1581_v61 = vunpack.c.2.s8 %v661_v10  ;;  %v629_v8 = vld [vmem:[%s9013_s10 + $0x5e0] sm:$0xff]  ;;  %v1565_v20 = vunpack.c.0.s8 %v661_v10 }
 0x32e   : > { %v4309_v56 = vadd.f32 %v4308_v7, %v4276_v15  ;;  %v4341_v59 = vpop.f32.mrf.mxu3  ;;  %v4277_v60 = vpop.f32.mrf.mxu1  ;;  %v2109_v15 = vcvt.s32.f32 %v1085_v57  ;;  %v1853_v1 = vcvt.s32.f32 %v829_v28  ;;  %v2749_v29 = vpack.c.bf16 %v1733_v62, %v1725_v52 }
 0x32f   : > { %4682 = vmatpush.bf16.msra.mxu2 %v2877_v2  ;;  %v1717_v60 = vunpack.c.3.s8 %v693_v6  ;;  %v2605_v27 = vcvt.s32.f32 %v1581_v61  ;;  %v1573_v28 = vunpack.c.1.s8 %v661_v10  ;;  %v1453_v62 = vunpack.c.2.s8 %v629_v8 }
 0x330   : > { %v4342_v17 = vadd.f32 %v4341_v59, %v4309_v56  ;;  %v2941_v34 = vpack.c.bf16 %v2117_v24, %v2109_v15  ;;  %4616 = vmatpush.bf16.msra.mxu0 %v2749_v29  ;;  %v2813_v58 = vpack.c.bf16 %v1861_v51, %v1853_v1  ;;  %v1589_v56 = vunpack.c.3.s8 %v661_v10 }
 0x331   : > { %v1709_v59 = vunpack.c.2.s8 %v693_v6  ;;  %v2741_v11 = vcvt.s32.f32 %v1717_v60  ;;  %v1461_v2 = vunpack.c.3.s8 %v629_v8  ;;  %v2589_v63 = vcvt.s32.f32 %v1565_v20 }
 0x332   : > { %v5731_v48 = vadd.f32 %v4342_v17, %v3323_v3  ;;  %4715 = vmatpush.bf16.msra.mxu3 %v2941_v34  ;;  %4649 = vmatpush.bf16.msra.mxu1 %v2813_v58  ;;  %v2613_v47 = vcvt.s32.f32 %v1589_v56  ;;  %v2597_v1 = vcvt.s32.f32 %v1573_v28  ;;  %v2477_v29 = vcvt.s32.f32 %v1453_v62  ;;  %v10821_v28 = vld [vmem:[#allocation42_spill] sm:$0xff] }
 0x333   : > { %v2733_v14 = vcvt.s32.f32 %v1709_v59 }
 0x334   : > { %5803 = vst [vmem:[#allocation2 + $0x118] sm:$0x7] %v5731_v48  ;;  %v3189_v4 = vpack.c.bf16 %v2613_v47, %v2605_v27  ;;  %v597_v48 = vld [vmem:[%s9013_s10 + $0x4e0] sm:$0xff]  ;;  %v3181_v51 = vpack.c.bf16 %v2597_v1, %v2589_v63  ;;  %v1437_v47 = vunpack.c.0.s8 %v629_v8 }
 0x335   : > { %v4310_v55 = vpop.f32.mrf.mxu2  ;;  %v4354_v53 = vpop.f32.mrf.mxu0  ;;  %v3253_v15 = vpack.c.bf16 %v2741_v11, %v2733_v14  ;;  %v1325_v24 = vunpack.c.2.s8 %v597_v48  ;;  %v1333_v52 = vunpack.c.3.s8 %v597_v48  ;;  %v1317_v27 = vunpack.c.1.s8 %v597_v48 }
 0x336   : > { %v4343_v22 = vpop.f32.mrf.mxu3  ;;  %v4387_v31 = vpop.f32.mrf.mxu1  ;;  %4807 = vmatpush.bf16.msrb.mxu2 %v3189_v4  ;;  %v1693_v55 = vunpack.c.0.s8 %v693_v6  ;;  %v1445_v14 = vunpack.c.1.s8 %v629_v8  ;;  %v2461_v20 = vcvt.s32.f32 %v1437_v47 }
 0x337   : > { %v4388_v7 = vadd.f32 %v4387_v31, %v4354_v53  ;;  %4840 = vmatpush.bf16.msrb.mxu3 %v3253_v15  ;;  %v2349_v53 = vcvt.s32.f32 %v1325_v24  ;;  %v2357_v34 = vcvt.s32.f32 %v1333_v52  ;;  %v1701_v22 = vunpack.c.1.s8 %v693_v6 }
 0x338   : > { %4500 = vmatmul.bf16.gmra.mxu0 %v10794_v19  ;;  %v2485_v31 = vcvt.s32.f32 %v1461_v2  ;;  %v1309_v6 = vunpack.c.0.s8 %v597_v48  ;;  %v2341_v4 = vcvt.s32.f32 %v1317_v27  ;;  %v2469_v15 = vcvt.s32.f32 %v1445_v14 }
 0x339   : > { %4533 = vmatmul.bf16.gmra.mxu1 %v10795_v32  ;;  %v3061_v10 = vpack.c.bf16 %v2357_v34, %v2349_v53  ;;  %v2725_v56 = vcvt.s32.f32 %v1701_v22  ;;  %v653_v53 = vld [vmem:[%s9013_s10 + $0x6a0] sm:$0xff] }
 0x33a   : > { %4566 = vmatmul.bf16.gmra.mxu2 %v10806_v16  ;;  %v2333_v11 = vcvt.s32.f32 %v1309_v6  ;;  %v3117_v48 = vpack.c.bf16 %v2469_v15, %v2461_v20  ;;  %v685_v34 = vld [vmem:[%s9013_s10 + $0x7a0] sm:$0xff]  ;;  %v1549_v22 = vunpack.c.2.s8 %v653_v53 }
 0x33b   : > { %4599 = vmatmul.bf16.gmra.mxu3 %v10807_v54  ;;  %4808 = vmatpush.bf16.msrb.mxu2 %v3181_v51  ;;  %v1677_v51 = vunpack.c.2.s8 %v685_v34 }
 0x33c   : > { %4741 = vmatpush.bf16.msrb.mxu0 %v3061_v10  ;;  %v3053_v24 = vpack.c.bf16 %v2341_v4, %v2333_v11 }
 0x33d   : > { %v4420_v0 = vpop.f32.mrf.mxu2  ;;  %v4356_v21 = vpop.f32.mrf.mxu0 }
 0x33e   : > { %v4421_v9 = vadd.f32 %v4420_v0, %v4388_v7  ;;  %v4453_v3 = vpop.f32.mrf.mxu3  ;;  %v4389_v17 = vpop.f32.mrf.mxu1  ;;  %v2717_v7 = vcvt.s32.f32 %v1693_v55 }
 0x33f   : > { %v4390_v57 = vadd.f32 %v4389_v17, %v4356_v21  ;;  %v3125_v21 = vpack.c.bf16 %v2485_v31, %v2477_v29  ;;  %v589_v29 = vld [vmem:[%s9013_s10 + $0x4a0] sm:$0xff]  ;;  %v1557_v31 = vunpack.c.3.s8 %v653_v53 }
 0x340   : > { %v9714_v12 = vadd.f32 %v4453_v3, %v4421_v9  ;;  %v3245_v3 = vpack.c.bf16 %v2725_v56, %v2717_v7  ;;  %4742 = vmatpush.bf16.msrb.mxu0 %v3053_v24  ;;  %v1685_v7 = vunpack.c.3.s8 %v685_v34  ;;  %v1301_v10 = vunpack.c.3.s8 %v589_v29 }
 0x341   : > { %4774 = vmatpush.bf16.msrb.mxu1 %v3125_v21  ;;  %v2701_v21 = vcvt.s32.f32 %v1677_v51  ;;  %v1661_v51 = vunpack.c.0.s8 %v685_v34 }
 0x342   : > { %4841 = vmatpush.bf16.msrb.mxu3 %v3245_v3  ;;  %v2325_v6 = vcvt.s32.f32 %v1301_v10 }
 0x345   : > { %v4422_v58 = vpop.f32.mrf.mxu2  ;;  %v4359_v61 = vpop.f32.mrf.mxu0  ;;  %4775 = vmatpush.bf16.msrb.mxu1 %v3117_v48 }
 0x346   : > { %v4423_v59 = vadd.f32 %v4422_v58, %v4390_v57  ;;  %v4455_v60 = vpop.f32.mrf.mxu3  ;;  %v4392_v0 = vpop.f32.mrf.mxu1  ;;  %v10820_v57 = vld [vmem:[#allocation41_spill] sm:$0xff] }
 0x347   : > { %v4393_v9 = vadd.f32 %v4392_v0, %v4359_v61  ;;  %v9730_v58 = vld [vmem:[%s9013_s10 + $0x5a0] sm:$0xff]  ;;  %v1293_v61 = vunpack.c.2.s8 %v589_v29  ;;  %v2581_v0 = vcvt.s32.f32 %v1557_v31  ;;  %v1541_v31 = vunpack.c.1.s8 %v653_v53 }
 0x348   : > { %v9718_v17 = vadd.f32 %v4455_v60, %v4423_v59  ;;  %4505 = vmatmul.bf16.gmra.mxu0 %v10808_v13  ;;  %v1421_v56 = vunpack.c.2.s8 %v9730_v58  ;;  %v1429_v59 = vunpack.c.3.s8 %v9730_v58  ;;  %v2573_v60 = vcvt.s32.f32 %v1549_v22 }
 0x349   : > { %4538 = vmatmul.bf16.gmra.mxu1 %v10809_v25  ;;  %v2317_v3 = vcvt.s32.f32 %v1293_v61  ;;  %v1533_v22 = vunpack.c.0.s8 %v653_v53  ;;  %v1669_v61 = vunpack.c.1.s8 %v685_v34 }
 0x34a   : > { %4571 = vmatmul.bf16.gmra.mxu2 %v10820_v57  ;;  %v2445_v27 = vcvt.s32.f32 %v1421_v56  ;;  %v2453_v47 = vcvt.s32.f32 %v1429_v59  ;;  %v3173_v4 = vpack.c.bf16 %v2581_v0, %v2573_v60  ;;  %v2565_v56 = vcvt.s32.f32 %v1541_v31  ;;  %v10825_v60 = vld [vmem:[#allocation24_spill] sm:$0xff] }
 0x34b   : > { %4604 = vmatmul.bf16.gmra.mxu3 %v10821_v28  ;;  %v2557_v10 = vcvt.s32.f32 %v1533_v22  ;;  %v2685_v59 = vcvt.s32.f32 %v1661_v51  ;;  %v2693_v0 = vcvt.s32.f32 %v1669_v61 }
 0x34c   : > { %v3109_v48 = vpack.c.bf16 %v2453_v47, %v2445_v27  ;;  %4809 = vmatpush.bf16.msrb.mxu2 %v3173_v4 }
 0x34d   : > { %v4425_v52 = vpop.f32.mrf.mxu2  ;;  %v4361_v62 = vpop.f32.mrf.mxu0  ;;  %v3229_v27 = vpack.c.bf16 %v2693_v0, %v2685_v59 }
 0x34e   : > { %v4426_v2 = vadd.f32 %v4425_v52, %v4393_v9  ;;  %v4458_v63 = vpop.f32.mrf.mxu3  ;;  %v4394_v1 = vpop.f32.mrf.mxu1  ;;  %v2709_v9 = vcvt.s32.f32 %v1685_v7  ;;  %4776 = vmatpush.bf16.msrb.mxu1 %v3109_v48  ;;  %v10823_v7 = vld [vmem:[#allocation22_spill] sm:$0xff]  ;;  %v677_v48 = vld [vmem:[%s9013_s10 + $0x760] sm:$0xff] }
 0x34f   : > { %v4395_v8 = vadd.f32 %v4394_v1, %v4361_v62  ;;  %v3045_v62 = vpack.c.bf16 %v2325_v6, %v2317_v3  ;;  %v10822_v1 = vld [vmem:[#allocation21_spill] sm:$0xff]  ;;  %v3165_v3 = vpack.c.bf16 %v2565_v56, %v2557_v10  ;;  %v1645_v51 = vunpack.c.2.s8 %v677_v48 }
 0x350   : > { %v9724_v55 = vadd.f32 %v4458_v63, %v4426_v2  ;;  %v3237_v20 = vpack.c.bf16 %v2709_v9, %v2701_v21  ;;  %v1277_v21 = vunpack.c.0.s8 %v589_v29  ;;  %v1285_v9 = vunpack.c.1.s8 %v589_v29 }
 0x351   : > { %4743 = vmatpush.bf16.msrb.mxu0 %v3045_v62  ;;  %4810 = vmatpush.bf16.msrb.mxu2 %v3165_v3  ;;  %v1413_v29 = vunpack.c.1.s8 %v9730_v58  ;;  %v645_v62 = vld [vmem:[%s9013_s10 + $0x660] sm:$0xff]  ;;  %v1653_v61 = vunpack.c.3.s8 %v677_v48  ;;  %v2669_v0 = vcvt.s32.f32 %v1645_v51 }
 0x352   : > { %4842 = vmatpush.bf16.msrb.mxu3 %v3237_v20  ;;  %v2301_v47 = vcvt.s32.f32 %v1277_v21  ;;  %v1517_v22 = vunpack.c.2.s8 %v645_v62  ;;  %v1525_v31 = vunpack.c.3.s8 %v645_v62 }
 0x353   : > { %v2437_v10 = vcvt.s32.f32 %v1413_v29  ;;  %v2677_v21 = vcvt.s32.f32 %v1653_v61  ;;  %v10826_v29 = vld [vmem:[#allocation25_spill] sm:$0xff] }
 0x354   : > { %v2541_v56 = vcvt.s32.f32 %v1517_v22  ;;  %v2549_v59 = vcvt.s32.f32 %v1525_v31  ;;  %v613_v22 = vld [vmem:[%s9013_s10 + $0x560] sm:$0xff]  ;;  %v10827_v31 = vld [vmem:[#allocation26_spill] sm:$0xff] }
 0x355   : > { %v4427_v14 = vpop.f32.mrf.mxu2  ;;  %v4364_v11 = vpop.f32.mrf.mxu0 }
 0x356   : > { %v4428_v15 = vadd.f32 %v4427_v14, %v4395_v8  ;;  %v4460_v24 = vpop.f32.mrf.mxu3  ;;  %v4397_v52 = vpop.f32.mrf.mxu1  ;;  %v10824_v8 = vld [vmem:[#allocation23_spill] sm:$0xff]  ;;  %v2309_v14 = vcvt.s32.f32 %v1285_v9  ;;  %4843 = vmatpush.bf16.msrb.mxu3 %v3229_v27 }
 0x357   : > { %v4398_v2 = vadd.f32 %v4397_v52, %v4364_v11  ;;  %v1405_v52 = vunpack.c.0.s8 %v9730_v58  ;;  %v3221_v58 = vpack.c.bf16 %v2677_v21, %v2669_v0 }
 0x358   : > { %v9734_v63 = vadd.f32 %v4460_v24, %v4428_v15  ;;  %4617 = vmatmul.bf16.vlgmr.msra.gmra.mxu0 %v10822_v1  ;;  %v3037_v15 = vpack.c.bf16 %v2309_v14, %v2301_v47 }
 0x359   : > { %4650 = vmatmul.bf16.vlgmr.msra.gmra.mxu1 %v10823_v7 }
 0x35a   : > { %4683 = vmatmul.bf16.vlgmr.msra.gmra.mxu2 %v10824_v8  ;;  %4744 = vmatpush.bf16.msrb.mxu0 %v3037_v15 }
 0x35b   : > { %4716 = vmatmul.bf16.vlgmr.msra.gmra.mxu3 %v10825_v60 }
 0x35c   : > { %4844 = vmatpush.bf16.msrb.mxu3 %v3221_v58 }
 0x35d   : > { %v4430_v6 = vpop.f32.mrf.mxu2  ;;  %v4366_v53 = vpop.f32.mrf.mxu0 }
 0x35e   : > { %v4431_v11 = vadd.f32 %v4430_v6, %v4398_v2  ;;  %v4463_v34 = vpop.f32.mrf.mxu3  ;;  %v4399_v4 = vpop.f32.mrf.mxu1  ;;  %v2429_v2 = vcvt.s32.f32 %v1405_v52 }
 0x35f   : > { %v4400_v20 = vadd.f32 %v4399_v4, %v4366_v53  ;;  %v3157_v53 = vpack.c.bf16 %v2549_v59, %v2541_v56  ;;  %v10829_v56 = vld [vmem:[#allocation28_spill] sm:$0xff] }
 0x360   : > { %v9740_v24 = vadd.f32 %v4463_v34, %v4431_v11  ;;  %v3101_v9 = vpack.c.bf16 %v2437_v10, %v2429_v2  ;;  %v581_v11 = vld [vmem:[%s9013_s10 + $0x460] sm:$0xff]  ;;  %v1389_v2 = vunpack.c.2.s8 %v613_v22  ;;  %v10828_v10 = vld [vmem:[#allocation27_spill] sm:$0xff] }
 0x361   : > { %4811 = vmatpush.bf16.msrb.mxu2 %v3157_v53  ;;  %v1261_v4 = vunpack.c.2.s8 %v581_v11  ;;  %v1269_v15 = vunpack.c.3.s8 %v581_v11  ;;  %v1637_v53 = vunpack.c.1.s8 %v677_v48 }
 0x362   : > { %4777 = vmatpush.bf16.msrb.mxu1 %v3101_v9  ;;  %v2413_v0 = vcvt.s32.f32 %v1389_v2  ;;  %v1501_v9 = vunpack.c.0.s8 %v645_v62 }
 0x363   : > { %v2285_v51 = vcvt.s32.f32 %v1261_v4  ;;  %v2293_v61 = vcvt.s32.f32 %v1269_v15 }
 0x365   : > { %v4432_v3 = vpop.f32.mrf.mxu2  ;;  %v4369_v6 = vpop.f32.mrf.mxu0  ;;  %v3029_v59 = vpack.c.bf16 %v2293_v61, %v2285_v51 }
 0x366   : > { %v4433_v27 = vadd.f32 %v4432_v3, %v4400_v20  ;;  %v4465_v47 = vpop.f32.mrf.mxu3  ;;  %v4402_v14 = vpop.f32.mrf.mxu1  ;;  %v1397_v20 = vunpack.c.3.s8 %v613_v22  ;;  %v1509_v3 = vunpack.c.1.s8 %v645_v62  ;;  %v1245_v62 = vunpack.c.0.s8 %v581_v11 }
 0x367   : > { %v4403_v34 = vadd.f32 %v4402_v14, %v4369_v6  ;;  %v1629_v6 = vunpack.c.0.s8 %v677_v48  ;;  %4745 = vmatpush.bf16.msrb.mxu0 %v3029_v59  ;;  %v2525_v14 = vcvt.s32.f32 %v1501_v9  ;;  %v1253_v48 = vunpack.c.1.s8 %v581_v11 }
 0x368   : > { %v9747_v52 = vadd.f32 %v4465_v47, %v4433_v27  ;;  %4622 = vmatmul.bf16.gmra.mxu0 %v10826_v29  ;;  %v2421_v21 = vcvt.s32.f32 %v1397_v20  ;;  %v2533_v29 = vcvt.s32.f32 %v1509_v3  ;;  %v1373_v20 = vunpack.c.0.s8 %v613_v22 }
 0x369   : > { %4655 = vmatmul.bf16.gmra.mxu1 %v10827_v31  ;;  %v2653_v60 = vcvt.s32.f32 %v1629_v6  ;;  %v1381_v59 = vunpack.c.1.s8 %v613_v22  ;;  %v2269_v6 = vcvt.s32.f32 %v1245_v62 }
 0x36a   : > { %4688 = vmatmul.bf16.gmra.mxu2 %v10828_v10  ;;  %v3093_v47 = vpack.c.bf16 %v2421_v21, %v2413_v0  ;;  %v2661_v10 = vcvt.s32.f32 %v1637_v53  ;;  %v3149_v61 = vpack.c.bf16 %v2533_v29, %v2525_v14  ;;  %v2397_v53 = vcvt.s32.f32 %v1373_v20  ;;  %v637_v14 = vld [vmem:[%s9013_s10 + $0x620] sm:$0xff] }
 0x36b   : > { %4721 = vmatmul.bf16.gmra.mxu3 %v10829_v56  ;;  %v2405_v29 = vcvt.s32.f32 %v1381_v59  ;;  %v1485_v62 = vunpack.c.2.s8 %v637_v14 }
 0x36c   : > { %4778 = vmatpush.bf16.msrb.mxu1 %v3093_v47  ;;  %v3213_v2 = vpack.c.bf16 %v2661_v10, %v2653_v60  ;;  %4812 = vmatpush.bf16.msrb.mxu2 %v3149_v61  ;;  %v10830_v10 = vld [vmem:[#allocation29_spill] sm:$0xff]  ;;  %v10833_v47 = vld [vmem:[#allocation32_spill] sm:$0xff] }
 0x36d   : > { %v4435_v58 = vpop.f32.mrf.mxu2  ;;  %v4371_v27 = vpop.f32.mrf.mxu0  ;;  %v3085_v22 = vpack.c.bf16 %v2405_v29, %v2397_v53  ;;  %v2509_v53 = vcvt.s32.f32 %v1485_v62 }
 0x36e   : > { %v4436_v4 = vadd.f32 %v4435_v58, %v4403_v34  ;;  %v4468_v15 = vpop.f32.mrf.mxu3  ;;  %v4404_v31 = vpop.f32.mrf.mxu1  ;;  %4845 = vmatpush.bf16.msrb.mxu3 %v3213_v2 }
 0x36f   : > { %v4405_v8 = vadd.f32 %v4404_v31, %v4371_v27  ;;  %v2277_v31 = vcvt.s32.f32 %v1253_v48  ;;  %v10831_v27 = vld [vmem:[#allocation30_spill] sm:$0xff]  ;;  %v1493_v48 = vunpack.c.3.s8 %v637_v14 }
 0x370   : > { %v9754_v51 = vadd.f32 %v4468_v15, %v4436_v4  ;;  %4779 = vmatpush.bf16.msrb.mxu1 %v3085_v22  ;;  %v669_v4 = vld [vmem:[%s9013_s10 + $0x720] sm:$0xff] }
 0x371   : > { %v3021_v11 = vpack.c.bf16 %v2277_v31, %v2269_v6  ;;  %v573_v15 = vld [vmem:[%s9013_s10 + $0x420] sm:$0xff]  ;;  %v1613_v20 = vunpack.c.2.s8 %v669_v4  ;;  %v1621_v59 = vunpack.c.3.s8 %v669_v4  ;;  %v2517_v29 = vcvt.s32.f32 %v1493_v48 }
 0x372   : > { %v1237_v6 = vunpack.c.3.s8 %v573_v15  ;;  %v1605_v57 = vunpack.c.1.s8 %v669_v4  ;;  %v1213_v62 = vunpack.c.0.s8 %v573_v15  ;;  %v1221_v48 = vunpack.c.1.s8 %v573_v15 }
 0x373   : > { %4746 = vmatpush.bf16.msrb.mxu0 %v3021_v11  ;;  %v2637_v11 = vcvt.s32.f32 %v1613_v20  ;;  %v2645_v22 = vcvt.s32.f32 %v1621_v59 }
 0x375   : > { %v4437_v0 = vpop.f32.mrf.mxu2  ;;  %v4374_v21 = vpop.f32.mrf.mxu0  ;;  %v3205_v56 = vpack.c.bf16 %v2645_v22, %v2637_v11  ;;  %v566_v22 = vld [vmem:[%s9013_s10 + $0x3e8] sm:$0xff] }
 0x376   : > { %v4438_v34 = vadd.f32 %v4437_v0, %v4405_v8  ;;  %v4470_v9 = vpop.f32.mrf.mxu3  ;;  %v4407_v3 = vpop.f32.mrf.mxu1  ;;  %v10832_v8 = vld [vmem:[#allocation31_spill] sm:$0xff]  ;;  %v605_v0 = vld [vmem:[%s9013_s10 + $0x520] sm:$0xff] }
 0x377   : > { %v4408_v58 = vadd.f32 %v4407_v3, %v4374_v21  ;;  %v1229_v3 = vunpack.c.2.s8 %v573_v15  ;;  %v1357_v31 = vunpack.c.2.s8 %v605_v0  ;;  %4846 = vmatpush.bf16.msrb.mxu3 %v3205_v56  ;;  %v1349_v56 = vunpack.c.1.s8 %v605_v0 }
 0x378   : > { %v9756_v60 = vadd.f32 %v4470_v9, %v4438_v34  ;;  %4627 = vmatmul.bf16.gmra.mxu0 %v10830_v10  ;;  %v3141_v10 = vpack.c.bf16 %v2517_v29, %v2509_v53  ;;  %v2629_v29 = vcvt.s32.f32 %v1605_v57 }
 0x379   : > { %4660 = vmatmul.bf16.gmra.mxu1 %v10831_v27  ;;  %v2261_v27 = vcvt.s32.f32 %v1237_v6  ;;  %v2381_v7 = vcvt.s32.f32 %v1357_v31  ;;  %v2237_v31 = vcvt.s32.f32 %v1213_v62  ;;  %v1206_v62 = vunpack.c.3.s8 %v566_v22 }
 0x37a   : > { %4693 = vmatmul.bf16.gmra.mxu2 %v10832_v8  ;;  %v2253_v8 = vcvt.s32.f32 %v1229_v3 }
 0x37b   : > { %4726 = vmatmul.bf16.gmra.mxu3 %v10833_v47  ;;  %4813 = vmatpush.bf16.msrb.mxu2 %v3141_v10 }
 0x37c   : > { %v3013_v1 = vpack.c.bf16 %v2261_v27, %v2253_v8  ;;  %v2245_v27 = vcvt.s32.f32 %v1221_v48 }
 0x37d   : > { %v4440_v61 = vpop.f32.mrf.mxu2  ;;  %v4376_v2 = vpop.f32.mrf.mxu0 }
 0x37e   : > { %v4441_v21 = vadd.f32 %v4440_v61, %v4408_v58  ;;  %v4473_v34 = vpop.f32.mrf.mxu3  ;;  %v4409_v9 = vpop.f32.mrf.mxu1  ;;  %v1365_v2 = vunpack.c.3.s8 %v605_v0  ;;  %v1469_v58 = vunpack.c.0.s8 %v637_v14  ;;  %v1477_v61 = vunpack.c.1.s8 %v637_v14  ;;  %4747 = vmatpush.bf16.msrb.mxu0 %v3013_v1 }
 0x37f   : > { %v1597_v9 = vunpack.c.0.s8 %v669_v4  ;;  %v3005_v1 = vpack.c.bf16 %v2245_v27, %v2237_v31 }
 0x380   : > { %v9766_v47 = vadd.f32 %v4473_v34, %v4441_v21  ;;  %v2389_v28 = vcvt.s32.f32 %v1365_v2  ;;  %v2493_v59 = vcvt.s32.f32 %v1469_v58  ;;  %v2501_v21 = vcvt.s32.f32 %v1477_v61 }
 0x381   : > { %v1341_v34 = vunpack.c.0.s8 %v605_v0  ;;  %v2621_v53 = vcvt.s32.f32 %v1597_v9  ;;  %v534_v0 = vld [vmem:[%s9013_s10 + $0x2e8] sm:$0xff]  ;;  %v1198_v9 = vunpack.c.2.s8 %v566_v22 }
 0x382   : > { %v3077_v20 = vpack.c.bf16 %v2389_v28, %v2381_v7  ;;  %v3133_v10 = vpack.c.bf16 %v2501_v21, %v2493_v59  ;;  %v2373_v7 = vcvt.s32.f32 %v1349_v56  ;;  %4748 = vmatpush.bf16.msrb.mxu0 %v3005_v1  ;;  %v1078_v61 = vunpack.c.3.s8 %v534_v0  ;;  %v470_v56 = vld [vmem:[%s9013_s10 + $0xe8] sm:$0xff] }
 0x383   : > { %v2365_v14 = vcvt.s32.f32 %v1341_v34  ;;  %v3197_v4 = vpack.c.bf16 %v2629_v29, %v2621_v53  ;;  %v3260_v34 = vld [vmem:[#allocation2 + $0x28] sm:$0xff]  ;;  %v2222_v53 = vcvt.s32.f32 %v1198_v9  ;;  %v2230_v29 = vcvt.s32.f32 %v1206_v62 }
 0x384   : > { %4780 = vmatpush.bf16.msrb.mxu1 %v3077_v20  ;;  %4814 = vmatpush.bf16.msrb.mxu2 %v3133_v10  ;;  %v1062_v1 = vunpack.c.1.s8 %v534_v0 }
 0x385   : > { %v4442_v3 = vpop.f32.mrf.mxu2  ;;  %v4486_v6 = vpop.f32.mrf.mxu0  ;;  %4847 = vmatpush.bf16.msrb.mxu3 %v3197_v4  ;;  %v3069_v57 = vpack.c.bf16 %v2373_v7, %v2365_v14  ;;  %v502_v14 = vld [vmem:[%s9013_s10 + $0x1e8] sm:$0xff]  ;;  %v1054_v4 = vunpack.c.0.s8 %v534_v0 }
 0x386   : > { %v4475_v8 = vpop.f32.mrf.mxu3  ;;  %v4519_v11 = vpop.f32.mrf.mxu1  ;;  %v4487_v28 = vadd.f32 %v4486_v6, %v9714_v12  ;;  %v1070_v12 = vunpack.c.2.s8 %v534_v0  ;;  %v2102_v6 = vcvt.s32.f32 %v1078_v61 }
 0x387   : > { %v2998_v8 = vpack.c.bf16 %v2230_v29, %v2222_v53 }
 0x388   : > { %4632 = vmatmul.bf16.gmra.mxu0 %v9227_v26  ;;  %v4520_v15 = vadd.f32 %v4519_v11, %v4487_v28  ;;  %4781 = vmatpush.bf16.msrb.mxu1 %v3069_v57  ;;  %v2094_v3 = vcvt.s32.f32 %v1070_v12  ;;  %v1190_v28 = vunpack.c.1.s8 %v566_v22  ;;  %v950_v12 = vunpack.c.3.s8 %v502_v14 }
 0x389   : > { %4665 = vmatmul.bf16.gmra.mxu1 %v9231_v38  ;;  %4972 = vmatpush.bf16.msra.mxu3 %v2998_v8 }
 0x38a   : > { %4698 = vmatmul.bf16.gmra.mxu2 %v9233_v41  ;;  %v2934_v27 = vpack.c.bf16 %v2102_v6, %v2094_v3  ;;  %v1974_v0 = vcvt.s32.f32 %v950_v12  ;;  %v2214_v8 = vcvt.s32.f32 %v1190_v28 }
 0x38b   : > { %4731 = vmatmul.bf16.gmra.mxu3 %v9235_v42 }
 0x38c   : > { %4939 = vmatpush.bf16.msra.mxu2 %v2934_v27 }
 0x38d   : > { %v4552_v2 = vpop.f32.mrf.mxu2  ;;  %v4488_v58 = vpop.f32.mrf.mxu0 }
 0x38e   : > { %v4553_v48 = vadd.f32 %v4552_v2, %v4520_v15  ;;  %v4585_v20 = vpop.f32.mrf.mxu3  ;;  %v4489_v59 = vadd.f32 %v4488_v58, %v9718_v17  ;;  %v4521_v21 = vpop.f32.mrf.mxu1  ;;  %v1182_v17 = vunpack.c.0.s8 %v566_v22  ;;  %v814_v15 = vunpack.c.2.s8 %v470_v56 }
 0x38f   : > { %v822_v2 = vunpack.c.3.s8 %v470_v56  ;;  %v942_v58 = vunpack.c.2.s8 %v502_v14 }
 0x390   : > { %v4586_v31 = vadd.f32 %v4585_v20, %v4553_v48  ;;  %v4522_v10 = vadd.f32 %v4521_v21, %v4489_v59  ;;  %v2078_v20 = vcvt.s32.f32 %v1054_v4  ;;  %v2086_v59 = vcvt.s32.f32 %v1062_v1  ;;  %v3268_v21 = vld [vmem:[#allocation2 + $0x158] sm:$0xff] }
 0x391   : > { %v1846_v3 = vcvt.s32.f32 %v822_v2  ;;  %v1966_v6 = vcvt.s32.f32 %v942_v58  ;;  %v2206_v29 = vcvt.s32.f32 %v1182_v17  ;;  %v798_v4 = vunpack.c.0.s8 %v470_v56 }
 0x392   : > { %v5668_v11 = vadd.f32 %v4586_v31, %v3260_v34  ;;  %v1838_v34 = vcvt.s32.f32 %v814_v15  ;;  %v2926_v22 = vpack.c.bf16 %v2086_v59, %v2078_v20  ;;  %v806_v1 = vunpack.c.1.s8 %v470_v56 }
 0x393   : > { %v2870_v27 = vpack.c.bf16 %v1974_v0, %v1966_v6  ;;  %v934_v17 = vunpack.c.1.s8 %v502_v14  ;;  %v1822_v12 = vcvt.s32.f32 %v798_v4  ;;  %v558_v6 = vld [vmem:[%s9013_s10 + $0x3a8] sm:$0xff] }
 0x394   : > { %5740 = vst [vmem:[#allocation2 + $0x28] sm:$0xff] %v5668_v11  ;;  %v2806_v31 = vpack.c.bf16 %v1846_v3, %v1838_v34  ;;  %4940 = vmatpush.bf16.msra.mxu2 %v2926_v22  ;;  %v526_v3 = vld [vmem:[%s9013_s10 + $0x2a8] sm:$0xff] }
 0x395   : > { %v4554_v7 = vpop.f32.mrf.mxu2  ;;  %v4491_v57 = vpop.f32.mrf.mxu0  ;;  %4906 = vmatpush.bf16.msra.mxu1 %v2870_v27  ;;  %v462_v0 = vld [vmem:[%s9013_s10 + $0xa8] sm:$0xff]  ;;  %v1166_v27 = vunpack.c.2.s8 %v558_v6 }
 0x396   : > { %v4555_v61 = vadd.f32 %v4554_v7, %v4522_v10  ;;  %v4587_v9 = vpop.f32.mrf.mxu3  ;;  %v4492_v62 = vadd.f32 %v4491_v57, %v9724_v55  ;;  %v4524_v48 = vpop.f32.mrf.mxu1  ;;  %4873 = vmatpush.bf16.msra.mxu0 %v2806_v31  ;;  %v2990_v10 = vpack.c.bf16 %v2214_v8, %v2206_v29  ;;  %v926_v7 = vunpack.c.0.s8 %v502_v14 }
 0x397   : > { %v1038_v29 = vunpack.c.2.s8 %v526_v3  ;;  %v1046_v31 = vunpack.c.3.s8 %v526_v3  ;;  %v1174_v8 = vunpack.c.3.s8 %v558_v6  ;;  %v782_v4 = vunpack.c.2.s8 %v462_v0 }
 0x398   : > { %v4588_v53 = vadd.f32 %v4587_v9, %v4555_v61  ;;  %4637 = vmatmul.bf16.gmra.mxu0 %v9247_v23  ;;  %v4525_v55 = vadd.f32 %v4524_v48, %v4492_v62  ;;  %4973 = vmatpush.bf16.msra.mxu3 %v2990_v10  ;;  %v1830_v61 = vcvt.s32.f32 %v806_v1  ;;  %v3276_v9 = vld [vmem:[#allocation2 + $0x1c0] sm:$0xff]  ;;  %v1950_v62 = vcvt.s32.f32 %v926_v7  ;;  %v9789_v7 = vld [vmem:[%s9013_s10 + $0x1a8] sm:$0xff] }
 0x399   : > { %4670 = vmatmul.bf16.gmra.mxu1 %v9249_v37  ;;  %v1958_v48 = vcvt.s32.f32 %v934_v17  ;;  %v790_v1 = vunpack.c.3.s8 %v462_v0  ;;  %v3284_v17 = vld [vmem:[#allocation2 + $0x38] sm:$0xff] }
 0x39a   : > { %v5676_v11 = vadd.f32 %v4588_v53, %v3268_v21  ;;  %4703 = vmatmul.bf16.gmra.mxu2 %v9251_v49  ;;  %v2798_v56 = vpack.c.bf16 %v1830_v61, %v1822_v12  ;;  %v1806_v12 = vcvt.s32.f32 %v782_v4 }
 0x39b   : > { %4736 = vmatmul.bf16.gmra.mxu3 %v9253_v50  ;;  %v2862_v21 = vpack.c.bf16 %v1958_v48, %v1950_v62  ;;  %v1814_v61 = vcvt.s32.f32 %v790_v1  ;;  %v918_v48 = vunpack.c.3.s8 %v9789_v7 }
 0x39c   : > { %5748 = vst [vmem:[#allocation2 + $0x158] sm:$0xff] %v5676_v11  ;;  %4874 = vmatpush.bf16.msra.mxu0 %v2798_v56 }
 0x39d   : > { %v4557_v57 = vpop.f32.mrf.mxu2  ;;  %v4493_v15 = vpop.f32.mrf.mxu0  ;;  %4907 = vmatpush.bf16.msra.mxu1 %v2862_v21 }
 0x39e   : > { %v4558_v2 = vadd.f32 %v4557_v57, %v4525_v55  ;;  %v4590_v28 = vpop.f32.mrf.mxu3  ;;  %v4526_v58 = vpop.f32.mrf.mxu1  ;;  %v4494_v59 = vadd.f32 %v4493_v15, %v9734_v63  ;;  %v2062_v57 = vcvt.s32.f32 %v1038_v29  ;;  %v2070_v15 = vcvt.s32.f32 %v1046_v31 }
 0x39f   : > { %v1158_v29 = vunpack.c.1.s8 %v558_v6 }
 0x3a0   : > { %v4591_v20 = vadd.f32 %v4590_v28, %v4558_v2  ;;  %v4527_v34 = vadd.f32 %v4526_v58, %v4494_v59  ;;  %v2190_v2 = vcvt.s32.f32 %v1166_v27  ;;  %v2198_v28 = vcvt.s32.f32 %v1174_v8 }
 0x3a1   : > { %v2790_v59 = vpack.c.bf16 %v1814_v61, %v1806_v12 }
 0x3a2   : > { %v5684_v14 = vadd.f32 %v4591_v20, %v3276_v9  ;;  %v2918_v9 = vpack.c.bf16 %v2070_v15, %v2062_v57  ;;  %v2982_v62 = vpack.c.bf16 %v2198_v28, %v2190_v2  ;;  %v3292_v57 = vld [vmem:[#allocation2 + $0x170] sm:$0xff]  ;;  %v2182_v2 = vcvt.s32.f32 %v1158_v29 }
 0x3a3   : > { %4875 = vmatpush.bf16.msra.mxu0 %v2790_v59  ;;  %v550_v59 = vld [vmem:[%s9013_s10 + $0x368] sm:$0xff] }
 0x3a4   : > { %5756 = vst [vmem:[#allocation2 + $0x1c0] sm:$0xff] %v5684_v14  ;;  %4941 = vmatpush.bf16.msra.mxu2 %v2918_v9  ;;  %v1942_v14 = vcvt.s32.f32 %v918_v48  ;;  %4974 = vmatpush.bf16.msra.mxu3 %v2982_v62  ;;  %v902_v48 = vunpack.c.1.s8 %v9789_v7 }
 0x3a5   : > { %v4559_v53 = vpop.f32.mrf.mxu2  ;;  %v4496_v22 = vpop.f32.mrf.mxu0 }
 0x3a6   : > { %v4560_v11 = vadd.f32 %v4559_v53, %v4527_v34  ;;  %v4592_v55 = vpop.f32.mrf.mxu3  ;;  %v4497_v63 = vadd.f32 %v4496_v22, %v9740_v24  ;;  %v4529_v10 = vpop.f32.mrf.mxu1  ;;  %v910_v24 = vunpack.c.2.s8 %v9789_v7  ;;  %v1022_v34 = vunpack.c.0.s8 %v526_v3 }
 0x3a7   : > { %v1030_v53 = vunpack.c.1.s8 %v526_v3  ;;  %v1150_v22 = vunpack.c.0.s8 %v558_v6 }
 0x3a8   : > { %v4593_v58 = vadd.f32 %v4592_v55, %v4560_v11  ;;  %4749 = vmatmul.bf16.vlgmr.msrb.gmra.mxu0 %v9277_v36  ;;  %v4530_v56 = vadd.f32 %v4529_v10, %v4497_v63  ;;  %v1934_v21 = vcvt.s32.f32 %v910_v24  ;;  %v766_v11 = vunpack.c.0.s8 %v462_v0 }
 0x3a9   : > { %4782 = vmatmul.bf16.vlgmr.msrb.gmra.mxu1 %v9281_v40  ;;  %v774_v55 = vunpack.c.1.s8 %v462_v0  ;;  %v2046_v10 = vcvt.s32.f32 %v1022_v34  ;;  %v2174_v15 = vcvt.s32.f32 %v1150_v22  ;;  %v894_v24 = vunpack.c.0.s8 %v9789_v7 }
 0x3aa   : > { %v5692_v20 = vadd.f32 %v4593_v58, %v3284_v17  ;;  %4815 = vmatmul.bf16.vlgmr.msrb.gmra.mxu2 %v9283_v45  ;;  %v2854_v8 = vpack.c.bf16 %v1942_v14, %v1934_v21  ;;  %v2054_v17 = vcvt.s32.f32 %v1030_v53  ;;  %v1790_v28 = vcvt.s32.f32 %v766_v11  ;;  %v454_v11 = vld [vmem:[%s9013_s10 + $0x68] sm:$0xff] }
 0x3ab   : > { %4848 = vmatmul.bf16.vlgmr.msrb.gmra.mxu3 %v9285_v46  ;;  %v1798_v3 = vcvt.s32.f32 %v774_v55  ;;  %v2974_v61 = vpack.c.bf16 %v2182_v2, %v2174_v15  ;;  %v1134_v34 = vunpack.c.2.s8 %v550_v59  ;;  %v1142_v53 = vunpack.c.3.s8 %v550_v59  ;;  %v3300_v55 = vld [vmem:[#allocation2 + $0x160] sm:$0xff] }
 0x3ac   : > { %5764 = vst [vmem:[#allocation2 + $0x38] sm:$0xff] %v5692_v20  ;;  %4908 = vmatpush.bf16.msra.mxu1 %v2854_v8  ;;  %v2910_v12 = vpack.c.bf16 %v2054_v17, %v2046_v10  ;;  %v518_v20 = vld [vmem:[%s9013_s10 + $0x268] sm:$0xff]  ;;  %v1926_v8 = vcvt.s32.f32 %v902_v48  ;;  %v750_v2 = vunpack.c.2.s8 %v454_v11 }
 0x3ad   : > { %v4562_v31 = vpop.f32.mrf.mxu2  ;;  %v4498_v27 = vpop.f32.mrf.mxu0  ;;  %v2782_v9 = vpack.c.bf16 %v1798_v3, %v1790_v28  ;;  %4975 = vmatpush.bf16.msra.mxu3 %v2974_v61  ;;  %v1014_v14 = vunpack.c.3.s8 %v518_v20  ;;  %v2166_v7 = vcvt.s32.f32 %v1142_v53  ;;  %v486_v10 = vld [vmem:[%s9013_s10 + $0x168] sm:$0xff] }
 0x3ae   : > { %v4563_v4 = vadd.f32 %v4562_v31, %v4530_v56  ;;  %v4595_v1 = vpop.f32.mrf.mxu3  ;;  %v4531_v63 = vpop.f32.mrf.mxu1  ;;  %v4499_v6 = vadd.f32 %v4498_v27, %v9747_v52  ;;  %4942 = vmatpush.bf16.msra.mxu2 %v2910_v12  ;;  %v1006_v52 = vunpack.c.2.s8 %v518_v20  ;;  %v1918_v27 = vcvt.s32.f32 %v894_v24 }
 0x3af   : > { %4876 = vmatpush.bf16.msra.mxu0 %v2782_v9  ;;  %v1774_v61 = vcvt.s32.f32 %v750_v2  ;;  %v886_v9 = vunpack.c.3.s8 %v486_v10  ;;  %v998_v24 = vunpack.c.1.s8 %v518_v20  ;;  %v862_v2 = vunpack.c.0.s8 %v486_v10 }
 0x3b0   : > { %v4596_v58 = vadd.f32 %v4595_v1, %v4563_v4  ;;  %v4532_v62 = vadd.f32 %v4531_v63, %v4499_v6  ;;  %v2030_v4 = vcvt.s32.f32 %v1006_v52  ;;  %v2038_v1 = vcvt.s32.f32 %v1014_v14 }
 0x3b1   : > { %v2158_v63 = vcvt.s32.f32 %v1134_v34  ;;  %v2846_v15 = vpack.c.bf16 %v1926_v8, %v1918_v27  ;;  %v878_v6 = vunpack.c.2.s8 %v486_v10  ;;  %v1126_v52 = vunpack.c.1.s8 %v550_v59 }
 0x3b2   : > { %v5700_v0 = vadd.f32 %v4596_v58, %v3292_v57  ;;  %v2902_v28 = vpack.c.bf16 %v2038_v1, %v2030_v4  ;;  %v758_v58 = vunpack.c.3.s8 %v454_v11 }
 0x3b3   : > { %v2966_v3 = vpack.c.bf16 %v2166_v7, %v2158_v63  ;;  %4909 = vmatpush.bf16.msra.mxu1 %v2846_v15  ;;  %v3308_v63 = vld [vmem:[#allocation2 + $0x230] sm:$0xff] }
 0x3b4   : > { %5772 = vst [vmem:[#allocation2 + $0x170] sm:$0xff] %v5700_v0  ;;  %4943 = vmatpush.bf16.msra.mxu2 %v2902_v28  ;;  %v1902_v0 = vcvt.s32.f32 %v878_v6  ;;  %v870_v28 = vunpack.c.1.s8 %v486_v10 }
 0x3b5   : > { %v4564_v56 = vpop.f32.mrf.mxu2  ;;  %v4501_v21 = vpop.f32.mrf.mxu0  ;;  %4976 = vmatpush.bf16.msra.mxu3 %v2966_v3 }
 0x3b6   : > { %v4565_v22 = vadd.f32 %v4564_v56, %v4532_v62  ;;  %v4597_v29 = vpop.f32.mrf.mxu3  ;;  %v4534_v31 = vpop.f32.mrf.mxu1  ;;  %v4502_v57 = vadd.f32 %v4501_v21, %v9754_v51  ;;  %v1782_v51 = vcvt.s32.f32 %v758_v58  ;;  %v990_v62 = vunpack.c.0.s8 %v518_v20 }
 0x3b7   : > { %v1910_v56 = vcvt.s32.f32 %v886_v9  ;;  %v1118_v21 = vunpack.c.0.s8 %v550_v59  ;;  %v2150_v20 = vcvt.s32.f32 %v1126_v52  ;;  %v742_v59 = vunpack.c.1.s8 %v454_v11  ;;  %v510_v52 = vld [vmem:[%s9013_s10 + $0x228] sm:$0xff] }
 0x3b8   : > { %v4598_v17 = vadd.f32 %v4597_v29, %v4565_v22  ;;  %4754 = vmatmul.bf16.gmra.mxu0 %v9308_v33  ;;  %v4535_v48 = vadd.f32 %v4534_v31, %v4502_v57  ;;  %v2774_v53 = vpack.c.bf16 %v1782_v51, %v1774_v61  ;;  %v2014_v22 = vcvt.s32.f32 %v990_v62 }
 0x3b9   : > { %4787 = vmatmul.bf16.gmra.mxu1 %v9312_v35  ;;  %v2022_v29 = vcvt.s32.f32 %v998_v24  ;;  %v2838_v4 = vpack.c.bf16 %v1910_v56, %v1902_v0  ;;  %v2142_v1 = vcvt.s32.f32 %v1118_v21  ;;  %v734_v57 = vunpack.c.0.s8 %v454_v11  ;;  %v3316_v56 = vld [vmem:[#allocation2 + $0x208] sm:$0xff] }
 0x3ba   : > { %v5708_v12 = vadd.f32 %v4598_v17, %v3300_v55  ;;  %4820 = vmatmul.bf16.gmra.mxu2 %v9314_v43  ;;  %4877 = vmatpush.bf16.msra.mxu0 %v2774_v53  ;;  %v1766_v6 = vcvt.s32.f32 %v742_v59  ;;  %v1894_v61 = vcvt.s32.f32 %v870_v28  ;;  %v974_v53 = vunpack.c.2.s8 %v510_v52 }
 0x3bb   : > { %4853 = vmatmul.bf16.gmra.mxu3 %v9316_v44  ;;  %v2894_v7 = vpack.c.bf16 %v2022_v29, %v2014_v22  ;;  %4910 = vmatpush.bf16.msra.mxu1 %v2838_v4  ;;  %v2958_v15 = vpack.c.bf16 %v2150_v20, %v2142_v1  ;;  %v1758_v58 = vcvt.s32.f32 %v734_v57  ;;  %v982_v22 = vunpack.c.3.s8 %v510_v52 }
 0x3bc   : > { %5780 = vst [vmem:[#allocation2 + $0x160] sm:$0xff] %v5708_v12  ;;  %v1886_v12 = vcvt.s32.f32 %v862_v2  ;;  %v1998_v1 = vcvt.s32.f32 %v974_v53 }
 0x3bd   : > { %v4567_v14 = vpop.f32.mrf.mxu2  ;;  %v4503_v34 = vpop.f32.mrf.mxu0  ;;  %4944 = vmatpush.bf16.msra.mxu2 %v2894_v7  ;;  %4977 = vmatpush.bf16.msra.mxu3 %v2958_v15  ;;  %v2766_v51 = vpack.c.bf16 %v1766_v6, %v1758_v58 }
 0x3be   : > { %v4568_v27 = vadd.f32 %v4567_v14, %v4535_v48  ;;  %v4600_v8 = vpop.f32.mrf.mxu3  ;;  %v4536_v55 = vpop.f32.mrf.mxu1  ;;  %v4504_v31 = vadd.f32 %v4503_v34, %v9756_v60  ;;  %v2830_v62 = vpack.c.bf16 %v1894_v61, %v1886_v12  ;;  %v542_v14 = vld [vmem:[%s9013_s10 + $0x328] sm:$0xff] }
 0x3bf   : > { %4878 = vmatpush.bf16.msra.mxu0 %v2766_v51  ;;  %v446_v34 = vld [vmem:[%s9013_s10 + $0x28] sm:$0xff]  ;;  %v1102_v29 = vunpack.c.2.s8 %v542_v14 }
 0x3c0   : > { %v4601_v17 = vadd.f32 %v4600_v8, %v4568_v27  ;;  %v4537_v9 = vadd.f32 %v4536_v55, %v4504_v31  ;;  %4911 = vmatpush.bf16.msra.mxu1 %v2830_v62  ;;  %v1110_v27 = vunpack.c.3.s8 %v542_v14  ;;  %v726_v4 = vunpack.c.3.s8 %v446_v34 }
 0x3c1   : > { %v2126_v7 = vcvt.s32.f32 %v1102_v29  ;;  %v710_v53 = vunpack.c.1.s8 %v446_v34 }
 0x3c2   : > { %v5716_v3 = vadd.f32 %v4601_v17, %v3308_v63  ;;  %v2006_v63 = vcvt.s32.f32 %v982_v22  ;;  %v2134_v20 = vcvt.s32.f32 %v1110_v27  ;;  %v478_v17 = vld [vmem:[%s9013_s10 + $0x128] sm:$0xff]  ;;  %v1750_v57 = vcvt.s32.f32 %v726_v4 }
 0x3c3   : > { %v846_v59 = vunpack.c.2.s8 %v478_v17  ;;  %v854_v15 = vunpack.c.3.s8 %v478_v17 }
 0x3c4   : > { %5788 = vst [vmem:[#allocation2 + $0x230] sm:$0xff] %v5716_v3  ;;  %v2886_v3 = vpack.c.bf16 %v2006_v63, %v1998_v1  ;;  %v2950_v58 = vpack.c.bf16 %v2134_v20, %v2126_v7  ;;  %v1734_v1 = vcvt.s32.f32 %v710_v53  ;;  %v838_v7 = vunpack.c.1.s8 %v478_v17 }
 0x3c5   : > { %v4569_v60 = vpop.f32.mrf.mxu2  ;;  %v4506_v0 = vpop.f32.mrf.mxu0  ;;  %v1870_v51 = vcvt.s32.f32 %v846_v59 }
 0x3c6   : > { %v4570_v11 = vadd.f32 %v4569_v60, %v4537_v9  ;;  %v4602_v24 = vpop.f32.mrf.mxu3  ;;  %v4507_v48 = vadd.f32 %v4506_v0, %v9766_v47  ;;  %v4539_v10 = vpop.f32.mrf.mxu1  ;;  %v718_v47 = vunpack.c.2.s8 %v446_v34  ;;  %v1878_v60 = vcvt.s32.f32 %v854_v15  ;;  %v3324_v0 = vld [vmem:[#allocation2 + $0x20] sm:$0x7]  ;;  %4945 = vmatpush.bf16.msra.mxu2 %v2886_v3  ;;  %4978 = vmatpush.bf16.msra.mxu3 %v2950_v58  ;;  %v694_v3 = vld [vmem:[%s9013_s10 + $0x7e8] sm:$0xff] }
 0x3c7   : > { %v1862_v15 = vcvt.s32.f32 %v838_v7 }
 0x3c8   : > { %v4603_v21 = vadd.f32 %v4602_v24, %v4570_v11  ;;  %4759 = vmatmul.bf16.gmra.mxu0 %v9331_v5  ;;  %v4540_v55 = vadd.f32 %v4539_v10, %v4507_v48  ;;  %v1742_v31 = vcvt.s32.f32 %v718_v47  ;;  %v2822_v11 = vpack.c.bf16 %v1878_v60, %v1870_v51 }
 0x3c9   : > { %4792 = vmatmul.bf16.gmra.mxu1 %v9335_v39  ;;  %v958_v24 = vunpack.c.0.s8 %v510_v52  ;;  %v966_v48 = vunpack.c.1.s8 %v510_v52  ;;  %v1086_v10 = vunpack.c.0.s8 %v542_v14 }
 0x3ca   : > { %v5724_v8 = vadd.f32 %v4603_v21, %v3316_v56  ;;  %4825 = vmatmul.bf16.gmra.mxu2 %v10792_v18  ;;  %v2758_v9 = vpack.c.bf16 %v1750_v57, %v1742_v31  ;;  %v1094_v56 = vunpack.c.1.s8 %v542_v14  ;;  %v702_v21 = vunpack.c.0.s8 %v446_v34  ;;  %4912 = vmatpush.bf16.msra.mxu1 %v2822_v11 }
 0x3cb   : > { %4858 = vmatmul.bf16.gmra.mxu3 %v10793_v30  ;;  %v1982_v29 = vcvt.s32.f32 %v958_v24  ;;  %v1990_v27 = vcvt.s32.f32 %v966_v48 }
 0x3cc   : > { %5796 = vst [vmem:[#allocation2 + $0x208] sm:$0xff] %v5724_v8  ;;  %4879 = vmatpush.bf16.msra.mxu0 %v2758_v9  ;;  %v830_v8 = vunpack.c.0.s8 %v478_v17  ;;  %v2118_v47 = vcvt.s32.f32 %v1094_v56  ;;  %v1726_v4 = vcvt.s32.f32 %v702_v21  ;;  %v662_v17 = vld [vmem:[%s9013_s10 + $0x6e8] sm:$0xff] }
 0x3cd   : > { %v4572_v2 = vpop.f32.mrf.mxu2  ;;  %v4508_v28 = vpop.f32.mrf.mxu0  ;;  %v2878_v63 = vpack.c.bf16 %v1990_v27, %v1982_v29  ;;  %v1582_v58 = vunpack.c.2.s8 %v662_v17  ;;  %v630_v29 = vld [vmem:[%s9013_s10 + $0x5e8] sm:$0xff]  ;;  %v1566_v27 = vunpack.c.0.s8 %v662_v17 }
 0x3ce   : > { %v4573_v6 = vadd.f32 %v4572_v2, %v4540_v55  ;;  %v4605_v12 = vpop.f32.mrf.mxu3  ;;  %v4541_v61 = vpop.f32.mrf.mxu1  ;;  %v2110_v55 = vcvt.s32.f32 %v1086_v10  ;;  %v1854_v20 = vcvt.s32.f32 %v830_v8  ;;  %v2750_v14 = vpack.c.bf16 %v1734_v1, %v1726_v4 }
 0x3cf   : > { %4946 = vmatpush.bf16.msra.mxu2 %v2878_v63  ;;  %v1718_v61 = vunpack.c.3.s8 %v694_v3  ;;  %v2606_v11 = vcvt.s32.f32 %v1582_v58  ;;  %v1574_v8 = vunpack.c.1.s8 %v662_v17  ;;  %v1454_v1 = vunpack.c.2.s8 %v630_v29 }
 0x3d0   : > { %v4606_v62 = vadd.f32 %v4605_v12, %v4573_v6  ;;  %v2942_v52 = vpack.c.bf16 %v2118_v47, %v2110_v55  ;;  %4880 = vmatpush.bf16.msra.mxu0 %v2750_v14  ;;  %v2814_v28 = vpack.c.bf16 %v1862_v15, %v1854_v20  ;;  %v1590_v6 = vunpack.c.3.s8 %v662_v17 }
 0x3d1   : > { %v1710_v12 = vunpack.c.2.s8 %v694_v3  ;;  %v2742_v56 = vcvt.s32.f32 %v1718_v61  ;;  %v1462_v63 = vunpack.c.3.s8 %v630_v29  ;;  %v2590_v7 = vcvt.s32.f32 %v1566_v27 }
 0x3d2   : > { %v5732_v22 = vadd.f32 %v4606_v62, %v3324_v0  ;;  %4979 = vmatpush.bf16.msra.mxu3 %v2942_v52  ;;  %4913 = vmatpush.bf16.msra.mxu1 %v2814_v28  ;;  %v2614_v24 = vcvt.s32.f32 %v1590_v6  ;;  %v2598_v20 = vcvt.s32.f32 %v1574_v8  ;;  %v2478_v14 = vcvt.s32.f32 %v1454_v1  ;;  %v10835_v8 = vld [vmem:[#allocation42_spill] sm:$0xff] }
 0x3d3   : > { %v2734_v48 = vcvt.s32.f32 %v1710_v12 }
 0x3d4   : > { %5804 = vst [vmem:[#allocation2 + $0x20] sm:$0x7] %v5732_v22  ;;  %v3190_v53 = vpack.c.bf16 %v2614_v24, %v2606_v11  ;;  %v598_v22 = vld [vmem:[%s9013_s10 + $0x4e8] sm:$0xff]  ;;  %v3182_v15 = vpack.c.bf16 %v2598_v20, %v2590_v7  ;;  %v1438_v24 = vunpack.c.0.s8 %v630_v29 }
 0x3d5   : > { %v4574_v31 = vpop.f32.mrf.mxu2  ;;  %v4618_v57 = vpop.f32.mrf.mxu0  ;;  %v3254_v55 = vpack.c.bf16 %v2742_v56, %v2734_v48  ;;  %v1326_v47 = vunpack.c.2.s8 %v598_v22  ;;  %v1334_v4 = vunpack.c.3.s8 %v598_v22  ;;  %v1318_v11 = vunpack.c.1.s8 %v598_v22 }
 0x3d6   : > { %v4607_v34 = vpop.f32.mrf.mxu3  ;;  %v4651_v59 = vpop.f32.mrf.mxu1  ;;  %5071 = vmatpush.bf16.msrb.mxu2 %v3190_v53  ;;  %v1694_v31 = vunpack.c.0.s8 %v694_v3  ;;  %v1446_v48 = vunpack.c.1.s8 %v630_v29  ;;  %v2462_v27 = vcvt.s32.f32 %v1438_v24 }
 0x3d7   : > { %v4652_v2 = vadd.f32 %v4651_v59, %v4618_v57  ;;  %5104 = vmatpush.bf16.msrb.mxu3 %v3254_v55  ;;  %v2350_v57 = vcvt.s32.f32 %v1326_v47  ;;  %v2358_v52 = vcvt.s32.f32 %v1334_v4  ;;  %v1702_v34 = vunpack.c.1.s8 %v694_v3 }
 0x3d8   : > { %4764 = vmatmul.bf16.gmra.mxu0 %v10794_v19  ;;  %v2486_v59 = vcvt.s32.f32 %v1462_v63  ;;  %v1310_v3 = vunpack.c.0.s8 %v598_v22  ;;  %v2342_v53 = vcvt.s32.f32 %v1318_v11  ;;  %v2470_v55 = vcvt.s32.f32 %v1446_v48 }
 0x3d9   : > { %4797 = vmatmul.bf16.gmra.mxu1 %v10795_v32  ;;  %v3062_v17 = vpack.c.bf16 %v2358_v52, %v2350_v57  ;;  %v2726_v6 = vcvt.s32.f32 %v1702_v34  ;;  %v654_v57 = vld [vmem:[%s9013_s10 + $0x6a8] sm:$0xff] }
 0x3da   : > { %4830 = vmatmul.bf16.gmra.mxu2 %v10806_v16  ;;  %v2334_v56 = vcvt.s32.f32 %v1310_v3  ;;  %v3118_v22 = vpack.c.bf16 %v2470_v55, %v2462_v27  ;;  %v686_v52 = vld [vmem:[%s9013_s10 + $0x7a8] sm:$0xff]  ;;  %v1550_v34 = vunpack.c.2.s8 %v654_v57 }
 0x3db   : > { %4863 = vmatmul.bf16.gmra.mxu3 %v10807_v54  ;;  %5072 = vmatpush.bf16.msrb.mxu2 %v3182_v15  ;;  %v1678_v15 = vunpack.c.2.s8 %v686_v52 }
 0x3dc   : > { %5005 = vmatpush.bf16.msrb.mxu0 %v3062_v17  ;;  %v3054_v47 = vpack.c.bf16 %v2342_v53, %v2334_v56 }
 0x3dd   : > { %v4684_v9 = vpop.f32.mrf.mxu2  ;;  %v4620_v51 = vpop.f32.mrf.mxu0 }
 0x3de   : > { %v4685_v60 = vadd.f32 %v4684_v9, %v4652_v2  ;;  %v4717_v0 = vpop.f32.mrf.mxu3  ;;  %v4653_v62 = vpop.f32.mrf.mxu1  ;;  %v2718_v2 = vcvt.s32.f32 %v1694_v31 }
 0x3df   : > { %v4654_v10 = vadd.f32 %v4653_v62, %v4620_v51  ;;  %v3126_v51 = vpack.c.bf16 %v2486_v59, %v2478_v14  ;;  %v590_v14 = vld [vmem:[%s9013_s10 + $0x4a8] sm:$0xff]  ;;  %v1558_v59 = vunpack.c.3.s8 %v654_v57 }
 0x3e0   : > { %v9825_v21 = vadd.f32 %v4717_v0, %v4685_v60  ;;  %v3246_v0 = vpack.c.bf16 %v2726_v6, %v2718_v2  ;;  %5006 = vmatpush.bf16.msrb.mxu0 %v3054_v47  ;;  %v1686_v2 = vunpack.c.3.s8 %v686_v52  ;;  %v1302_v17 = vunpack.c.3.s8 %v590_v14 }
 0x3e1   : > { %5038 = vmatpush.bf16.msrb.mxu1 %v3126_v51  ;;  %v2702_v51 = vcvt.s32.f32 %v1678_v15  ;;  %v1662_v15 = vunpack.c.0.s8 %v686_v52 }
 0x3e2   : > { %5105 = vmatpush.bf16.msrb.mxu3 %v3246_v0  ;;  %v2326_v3 = vcvt.s32.f32 %v1302_v17 }
 0x3e5   : > { %v4686_v28 = vpop.f32.mrf.mxu2  ;;  %v4623_v58 = vpop.f32.mrf.mxu0  ;;  %5039 = vmatpush.bf16.msrb.mxu1 %v3118_v22 }
 0x3e6   : > { %v4687_v12 = vadd.f32 %v4686_v28, %v4654_v10  ;;  %v4719_v61 = vpop.f32.mrf.mxu3  ;;  %v4656_v9 = vpop.f32.mrf.mxu1  ;;  %v10834_v10 = vld [vmem:[#allocation41_spill] sm:$0xff] }
 0x3e7   : > { %v4657_v60 = vadd.f32 %v4656_v9, %v4623_v58  ;;  %v9841_v28 = vld [vmem:[%s9013_s10 + $0x5a8] sm:$0xff]  ;;  %v1294_v58 = vunpack.c.2.s8 %v590_v14  ;;  %v2582_v9 = vcvt.s32.f32 %v1558_v59  ;;  %v1542_v59 = vunpack.c.1.s8 %v654_v57 }
 0x3e8   : > { %v9829_v62 = vadd.f32 %v4719_v61, %v4687_v12  ;;  %4769 = vmatmul.bf16.gmra.mxu0 %v10808_v13  ;;  %v1422_v6 = vunpack.c.2.s8 %v9841_v28  ;;  %v1430_v12 = vunpack.c.3.s8 %v9841_v28  ;;  %v2574_v61 = vcvt.s32.f32 %v1550_v34 }
 0x3e9   : > { %4802 = vmatmul.bf16.gmra.mxu1 %v10809_v25  ;;  %v2318_v0 = vcvt.s32.f32 %v1294_v58  ;;  %v1534_v34 = vunpack.c.0.s8 %v654_v57  ;;  %v1670_v58 = vunpack.c.1.s8 %v686_v52 }
 0x3ea   : > { %4835 = vmatmul.bf16.gmra.mxu2 %v10834_v10  ;;  %v2446_v11 = vcvt.s32.f32 %v1422_v6  ;;  %v2454_v24 = vcvt.s32.f32 %v1430_v12  ;;  %v3174_v53 = vpack.c.bf16 %v2582_v9, %v2574_v61  ;;  %v2566_v6 = vcvt.s32.f32 %v1542_v59  ;;  %v10839_v61 = vld [vmem:[#allocation24_spill] sm:$0xff] }
 0x3eb   : > { %4868 = vmatmul.bf16.gmra.mxu3 %v10835_v8  ;;  %v2558_v17 = vcvt.s32.f32 %v1534_v34  ;;  %v2686_v12 = vcvt.s32.f32 %v1662_v15  ;;  %v2694_v9 = vcvt.s32.f32 %v1670_v58 }
 0x3ec   : > { %v3110_v22 = vpack.c.bf16 %v2454_v24, %v2446_v11  ;;  %5073 = vmatpush.bf16.msrb.mxu2 %v3174_v53 }
 0x3ed   : > { %v4689_v4 = vpop.f32.mrf.mxu2  ;;  %v4625_v1 = vpop.f32.mrf.mxu0  ;;  %v3230_v11 = vpack.c.bf16 %v2694_v9, %v2686_v12 }
 0x3ee   : > { %v4690_v63 = vadd.f32 %v4689_v4, %v4657_v60  ;;  %v4722_v7 = vpop.f32.mrf.mxu3  ;;  %v4658_v20 = vpop.f32.mrf.mxu1  ;;  %v2710_v60 = vcvt.s32.f32 %v1686_v2  ;;  %5040 = vmatpush.bf16.msrb.mxu1 %v3110_v22  ;;  %v10837_v2 = vld [vmem:[#allocation22_spill] sm:$0xff] }
 0x3ef   : > { %v4659_v29 = vadd.f32 %v4658_v20, %v4625_v1  ;;  %v3046_v1 = vpack.c.bf16 %v2326_v3, %v2318_v0  ;;  %v10836_v20 = vld [vmem:[#allocation21_spill] sm:$0xff]  ;;  %v3166_v0 = vpack.c.bf16 %v2566_v6, %v2558_v17 }
 0x3f0   : > { %v9835_v31 = vadd.f32 %v4722_v7, %v4690_v63  ;;  %v3238_v27 = vpack.c.bf16 %v2710_v60, %v2702_v51  ;;  %v1278_v51 = vunpack.c.0.s8 %v590_v14  ;;  %v1286_v60 = vunpack.c.1.s8 %v590_v14  ;;  %v678_v22 = vld [vmem:[%s9013_s10 + $0x768] sm:$0xff] }
 0x3f1   : > { %5007 = vmatpush.bf16.msrb.mxu0 %v3046_v1  ;;  %5074 = vmatpush.bf16.msrb.mxu2 %v3166_v0  ;;  %v1414_v14 = vunpack.c.1.s8 %v9841_v28  ;;  %v646_v1 = vld [vmem:[%s9013_s10 + $0x668] sm:$0xff]  ;;  %v1646_v15 = vunpack.c.2.s8 %v678_v22  ;;  %v1654_v58 = vunpack.c.3.s8 %v678_v22 }
 0x3f2   : > { %5106 = vmatpush.bf16.msrb.mxu3 %v3238_v27  ;;  %v2302_v24 = vcvt.s32.f32 %v1278_v51  ;;  %v1518_v34 = vunpack.c.2.s8 %v646_v1  ;;  %v1526_v59 = vunpack.c.3.s8 %v646_v1 }
 0x3f3   : > { %v2438_v17 = vcvt.s32.f32 %v1414_v14  ;;  %v2670_v9 = vcvt.s32.f32 %v1646_v15  ;;  %v2678_v51 = vcvt.s32.f32 %v1654_v58  ;;  %v10840_v14 = vld [vmem:[#allocation25_spill] sm:$0xff] }
 0x3f4   : > { %v2542_v6 = vcvt.s32.f32 %v1518_v34  ;;  %v2550_v12 = vcvt.s32.f32 %v1526_v59  ;;  %v614_v34 = vld [vmem:[%s9013_s10 + $0x568] sm:$0xff] }
 0x3f5   : > { %v4691_v48 = vpop.f32.mrf.mxu2  ;;  %v4628_v56 = vpop.f32.mrf.mxu0  ;;  %v10841_v59 = vld [vmem:[#allocation26_spill] sm:$0xff] }
 0x3f6   : > { %v4692_v55 = vadd.f32 %v4691_v48, %v4659_v29  ;;  %v4724_v47 = vpop.f32.mrf.mxu3  ;;  %v4661_v4 = vpop.f32.mrf.mxu1  ;;  %v10838_v29 = vld [vmem:[#allocation23_spill] sm:$0xff]  ;;  %v2310_v48 = vcvt.s32.f32 %v1286_v60  ;;  %5107 = vmatpush.bf16.msrb.mxu3 %v3230_v11 }
 0x3f7   : > { %v4662_v63 = vadd.f32 %v4661_v4, %v4628_v56  ;;  %v1406_v4 = vunpack.c.0.s8 %v9841_v28  ;;  %v3222_v28 = vpack.c.bf16 %v2678_v51, %v2670_v9 }
 0x3f8   : > { %v9845_v7 = vadd.f32 %v4724_v47, %v4692_v55  ;;  %4881 = vmatmul.bf16.vlgmr.msra.gmra.mxu0 %v10836_v20  ;;  %v3038_v55 = vpack.c.bf16 %v2310_v48, %v2302_v24 }
 0x3f9   : > { %4914 = vmatmul.bf16.vlgmr.msra.gmra.mxu1 %v10837_v2 }
 0x3fa   : > { %4947 = vmatmul.bf16.vlgmr.msra.gmra.mxu2 %v10838_v29  ;;  %5008 = vmatpush.bf16.msrb.mxu0 %v3038_v55 }
 0x3fb   : > { %4980 = vmatmul.bf16.vlgmr.msra.gmra.mxu3 %v10839_v61 }
 0x3fc   : > { %5108 = vmatpush.bf16.msrb.mxu3 %v3222_v28 }
 0x3fd   : > { %v4694_v3 = vpop.f32.mrf.mxu2  ;;  %v4630_v57 = vpop.f32.mrf.mxu0 }
 0x3fe   : > { %v4695_v56 = vadd.f32 %v4694_v3, %v4662_v63  ;;  %v4727_v52 = vpop.f32.mrf.mxu3  ;;  %v4663_v53 = vpop.f32.mrf.mxu1  ;;  %v2430_v63 = vcvt.s32.f32 %v1406_v4 }
 0x3ff   : > { %v4664_v27 = vadd.f32 %v4663_v53, %v4630_v57  ;;  %v3158_v57 = vpack.c.bf16 %v2550_v12, %v2542_v6  ;;  %v10843_v6 = vld [vmem:[#allocation28_spill] sm:$0xff] }
 0x400   : > { %v9851_v47 = vadd.f32 %v4727_v52, %v4695_v56  ;;  %v3102_v60 = vpack.c.bf16 %v2438_v17, %v2430_v63  ;;  %v582_v56 = vld [vmem:[%s9013_s10 + $0x468] sm:$0xff]  ;;  %v1390_v63 = vunpack.c.2.s8 %v614_v34  ;;  %v10842_v17 = vld [vmem:[#allocation27_spill] sm:$0xff] }
 0x401   : > { %5075 = vmatpush.bf16.msrb.mxu2 %v3158_v57  ;;  %v1262_v53 = vunpack.c.2.s8 %v582_v56  ;;  %v1270_v55 = vunpack.c.3.s8 %v582_v56  ;;  %v1638_v57 = vunpack.c.1.s8 %v678_v22 }
 0x402   : > { %5041 = vmatpush.bf16.msrb.mxu1 %v3102_v60  ;;  %v2414_v9 = vcvt.s32.f32 %v1390_v63  ;;  %v1502_v60 = vunpack.c.0.s8 %v646_v1 }
 0x403   : > { %v2286_v15 = vcvt.s32.f32 %v1262_v53  ;;  %v2294_v58 = vcvt.s32.f32 %v1270_v55 }
 0x405   : > { %v4696_v0 = vpop.f32.mrf.mxu2  ;;  %v4633_v3 = vpop.f32.mrf.mxu0  ;;  %v3030_v12 = vpack.c.bf16 %v2294_v58, %v2286_v15 }
 0x406   : > { %v4697_v11 = vadd.f32 %v4696_v0, %v4664_v27  ;;  %v4729_v24 = vpop.f32.mrf.mxu3  ;;  %v4666_v48 = vpop.f32.mrf.mxu1  ;;  %v1398_v27 = vunpack.c.3.s8 %v614_v34  ;;  %v1510_v0 = vunpack.c.1.s8 %v646_v1  ;;  %v1246_v1 = vunpack.c.0.s8 %v582_v56 }
 0x407   : > { %v4667_v52 = vadd.f32 %v4666_v48, %v4633_v3  ;;  %v1630_v3 = vunpack.c.0.s8 %v678_v22  ;;  %5009 = vmatpush.bf16.msrb.mxu0 %v3030_v12  ;;  %v2526_v48 = vcvt.s32.f32 %v1502_v60  ;;  %v1254_v22 = vunpack.c.1.s8 %v582_v56 }
 0x408   : > { %v9858_v4 = vadd.f32 %v4729_v24, %v4697_v11  ;;  %4886 = vmatmul.bf16.gmra.mxu0 %v10840_v14  ;;  %v2422_v51 = vcvt.s32.f32 %v1398_v27  ;;  %v2534_v14 = vcvt.s32.f32 %v1510_v0  ;;  %v1374_v27 = vunpack.c.0.s8 %v614_v34 }
 0x409   : > { %4919 = vmatmul.bf16.gmra.mxu1 %v10841_v59  ;;  %v2654_v61 = vcvt.s32.f32 %v1630_v3  ;;  %v1382_v12 = vunpack.c.1.s8 %v614_v34  ;;  %v2270_v3 = vcvt.s32.f32 %v1246_v1 }
 0x40a   : > { %4952 = vmatmul.bf16.gmra.mxu2 %v10842_v17  ;;  %v3094_v24 = vpack.c.bf16 %v2422_v51, %v2414_v9  ;;  %v2662_v17 = vcvt.s32.f32 %v1638_v57  ;;  %v3150_v58 = vpack.c.bf16 %v2534_v14, %v2526_v48  ;;  %v2398_v57 = vcvt.s32.f32 %v1374_v27  ;;  %v638_v48 = vld [vmem:[%s9013_s10 + $0x628] sm:$0xff] }
 0x40b   : > { %4985 = vmatmul.bf16.gmra.mxu3 %v10843_v6  ;;  %v2406_v14 = vcvt.s32.f32 %v1382_v12  ;;  %v1486_v1 = vunpack.c.2.s8 %v638_v48 }
 0x40c   : > { %5042 = vmatpush.bf16.msrb.mxu1 %v3094_v24  ;;  %v3214_v63 = vpack.c.bf16 %v2662_v17, %v2654_v61  ;;  %5076 = vmatpush.bf16.msrb.mxu2 %v3150_v58  ;;  %v10844_v17 = vld [vmem:[#allocation29_spill] sm:$0xff]  ;;  %v10847_v24 = vld [vmem:[#allocation32_spill] sm:$0xff] }
 0x40d   : > { %v4699_v28 = vpop.f32.mrf.mxu2  ;;  %v4635_v11 = vpop.f32.mrf.mxu0  ;;  %v3086_v34 = vpack.c.bf16 %v2406_v14, %v2398_v57  ;;  %v2510_v57 = vcvt.s32.f32 %v1486_v1 }
 0x40e   : > { %v4700_v53 = vadd.f32 %v4699_v28, %v4667_v52  ;;  %v4732_v55 = vpop.f32.mrf.mxu3  ;;  %v4668_v59 = vpop.f32.mrf.mxu1  ;;  %5109 = vmatpush.bf16.msrb.mxu3 %v3214_v63 }
 0x40f   : > { %v4669_v29 = vadd.f32 %v4668_v59, %v4635_v11  ;;  %v2278_v59 = vcvt.s32.f32 %v1254_v22  ;;  %v10845_v11 = vld [vmem:[#allocation30_spill] sm:$0xff]  ;;  %v1494_v22 = vunpack.c.3.s8 %v638_v48 }
 0x410   : > { %v9865_v15 = vadd.f32 %v4732_v55, %v4700_v53  ;;  %5043 = vmatpush.bf16.msrb.mxu1 %v3086_v34  ;;  %v670_v53 = vld [vmem:[%s9013_s10 + $0x728] sm:$0xff] }
 0x411   : > { %v3022_v56 = vpack.c.bf16 %v2278_v59, %v2270_v3  ;;  %v574_v55 = vld [vmem:[%s9013_s10 + $0x428] sm:$0xff]  ;;  %v1614_v27 = vunpack.c.2.s8 %v670_v53  ;;  %v1622_v12 = vunpack.c.3.s8 %v670_v53  ;;  %v2518_v14 = vcvt.s32.f32 %v1494_v22 }
 0x412   : > { %v1238_v3 = vunpack.c.3.s8 %v574_v55  ;;  %v1606_v10 = vunpack.c.1.s8 %v670_v53  ;;  %v1214_v1 = vunpack.c.0.s8 %v574_v55  ;;  %v1222_v22 = vunpack.c.1.s8 %v574_v55 }
 0x413   : > { %5010 = vmatpush.bf16.msrb.mxu0 %v3022_v56  ;;  %v2638_v56 = vcvt.s32.f32 %v1614_v27  ;;  %v2646_v34 = vcvt.s32.f32 %v1622_v12 }
 0x415   : > { %v4701_v9 = vpop.f32.mrf.mxu2  ;;  %v4638_v51 = vpop.f32.mrf.mxu0  ;;  %v3206_v6 = vpack.c.bf16 %v2646_v34, %v2638_v56  ;;  %v567_v34 = vld [vmem:[%s9013_s10 + $0x3f0] sm:$0xff] }
 0x416   : > { %v4702_v52 = vadd.f32 %v4701_v9, %v4669_v29  ;;  %v4734_v60 = vpop.f32.mrf.mxu3  ;;  %v4671_v0 = vpop.f32.mrf.mxu1  ;;  %v10846_v29 = vld [vmem:[#allocation31_spill] sm:$0xff]  ;;  %v606_v9 = vld [vmem:[%s9013_s10 + $0x528] sm:$0xff] }
 0x417   : > { %v4672_v28 = vadd.f32 %v4671_v0, %v4638_v51  ;;  %v1230_v0 = vunpack.c.2.s8 %v574_v55  ;;  %v1358_v59 = vunpack.c.2.s8 %v606_v9  ;;  %5110 = vmatpush.bf16.msrb.mxu3 %v3206_v6  ;;  %v1350_v6 = vunpack.c.1.s8 %v606_v9 }
 0x418   : > { %v9867_v61 = vadd.f32 %v4734_v60, %v4702_v52  ;;  %4891 = vmatmul.bf16.gmra.mxu0 %v10844_v17  ;;  %v3142_v17 = vpack.c.bf16 %v2518_v14, %v2510_v57  ;;  %v2630_v14 = vcvt.s32.f32 %v1606_v10 }
 0x419   : > { %4924 = vmatmul.bf16.gmra.mxu1 %v10845_v11  ;;  %v2262_v11 = vcvt.s32.f32 %v1238_v3  ;;  %v2382_v2 = vcvt.s32.f32 %v1358_v59  ;;  %v2238_v59 = vcvt.s32.f32 %v1214_v1  ;;  %v1207_v1 = vunpack.c.3.s8 %v567_v34 }
 0x41a   : > { %4957 = vmatmul.bf16.gmra.mxu2 %v10846_v29  ;;  %v2254_v29 = vcvt.s32.f32 %v1230_v0 }
 0x41b   : > { %4990 = vmatmul.bf16.gmra.mxu3 %v10847_v24  ;;  %5077 = vmatpush.bf16.msrb.mxu2 %v3142_v17 }
 0x41c   : > { %v3014_v20 = vpack.c.bf16 %v2262_v11, %v2254_v29  ;;  %v2246_v11 = vcvt.s32.f32 %v1222_v22 }
 0x41d   : > { %v4704_v58 = vpop.f32.mrf.mxu2  ;;  %v4640_v63 = vpop.f32.mrf.mxu0 }
 0x41e   : > { %v4705_v51 = vadd.f32 %v4704_v58, %v4672_v28  ;;  %v4737_v52 = vpop.f32.mrf.mxu3  ;;  %v4673_v60 = vpop.f32.mrf.mxu1  ;;  %v1366_v63 = vunpack.c.3.s8 %v606_v9  ;;  %v1470_v28 = vunpack.c.0.s8 %v638_v48  ;;  %v1478_v58 = vunpack.c.1.s8 %v638_v48  ;;  %5011 = vmatpush.bf16.msrb.mxu0 %v3014_v20 }
 0x41f   : > { %v1598_v60 = vunpack.c.0.s8 %v670_v53  ;;  %v3006_v20 = vpack.c.bf16 %v2246_v11, %v2238_v59 }
 0x420   : > { %v9877_v24 = vadd.f32 %v4737_v52, %v4705_v51  ;;  %v2390_v8 = vcvt.s32.f32 %v1366_v63  ;;  %v2494_v12 = vcvt.s32.f32 %v1470_v28  ;;  %v2502_v51 = vcvt.s32.f32 %v1478_v58 }
 0x421   : > { %v1342_v52 = vunpack.c.0.s8 %v606_v9  ;;  %v2622_v57 = vcvt.s32.f32 %v1598_v60  ;;  %v535_v9 = vld [vmem:[%s9013_s10 + $0x2f0] sm:$0xff]  ;;  %v1199_v60 = vunpack.c.2.s8 %v567_v34 }
 0x422   : > { %v3078_v27 = vpack.c.bf16 %v2390_v8, %v2382_v2  ;;  %v3134_v17 = vpack.c.bf16 %v2502_v51, %v2494_v12  ;;  %v2374_v2 = vcvt.s32.f32 %v1350_v6  ;;  %5012 = vmatpush.bf16.msrb.mxu0 %v3006_v20  ;;  %v1079_v58 = vunpack.c.3.s8 %v535_v9  ;;  %v471_v6 = vld [vmem:[%s9013_s10 + $0xf0] sm:$0xff] }
 0x423   : > { %v2366_v48 = vcvt.s32.f32 %v1342_v52  ;;  %v3198_v53 = vpack.c.bf16 %v2630_v14, %v2622_v57  ;;  %v3261_v52 = vld [vmem:[#allocation2 + $0xe8] sm:$0xff]  ;;  %v2223_v57 = vcvt.s32.f32 %v1199_v60  ;;  %v2231_v14 = vcvt.s32.f32 %v1207_v1 }
 0x424   : > { %5044 = vmatpush.bf16.msrb.mxu1 %v3078_v27  ;;  %5078 = vmatpush.bf16.msrb.mxu2 %v3134_v17  ;;  %v1063_v20 = vunpack.c.1.s8 %v535_v9 }
 0x425   : > { %v4706_v0 = vpop.f32.mrf.mxu2  ;;  %v4750_v3 = vpop.f32.mrf.mxu0  ;;  %5111 = vmatpush.bf16.msrb.mxu3 %v3198_v53  ;;  %v3070_v10 = vpack.c.bf16 %v2374_v2, %v2366_v48  ;;  %v503_v48 = vld [vmem:[%s9013_s10 + $0x1f0] sm:$0xff]  ;;  %v1055_v53 = vunpack.c.0.s8 %v535_v9 }
 0x426   : > { %v4739_v29 = vpop.f32.mrf.mxu3  ;;  %v4783_v56 = vpop.f32.mrf.mxu1  ;;  %v4751_v8 = vadd.f32 %v4750_v3, %v9825_v21  ;;  %v1071_v21 = vunpack.c.2.s8 %v535_v9  ;;  %v2103_v3 = vcvt.s32.f32 %v1079_v58 }
 0x427   : > { %v2999_v29 = vpack.c.bf16 %v2231_v14, %v2223_v57 }
 0x428   : > { %4896 = vmatmul.bf16.gmra.mxu0 %v9227_v26  ;;  %v4784_v55 = vadd.f32 %v4783_v56, %v4751_v8  ;;  %5045 = vmatpush.bf16.msrb.mxu1 %v3070_v10  ;;  %v2095_v0 = vcvt.s32.f32 %v1071_v21  ;;  %v1191_v8 = vunpack.c.1.s8 %v567_v34  ;;  %v951_v21 = vunpack.c.3.s8 %v503_v48 }
 0x429   : > { %4929 = vmatmul.bf16.gmra.mxu1 %v9231_v38  ;;  %5236 = vmatpush.bf16.msra.mxu3 %v2999_v29 }
 0x42a   : > { %4962 = vmatmul.bf16.gmra.mxu2 %v9233_v41  ;;  %v2935_v11 = vpack.c.bf16 %v2103_v3, %v2095_v0  ;;  %v1975_v9 = vcvt.s32.f32 %v951_v21  ;;  %v2215_v29 = vcvt.s32.f32 %v1191_v8 }
 0x42b   : > { %4995 = vmatmul.bf16.gmra.mxu3 %v9235_v42 }
 0x42c   : > { %5203 = vmatpush.bf16.msra.mxu2 %v2935_v11 }
 0x42d   : > { %v4816_v63 = vpop.f32.mrf.mxu2  ;;  %v4752_v28 = vpop.f32.mrf.mxu0 }
 0x42e   : > { %v4817_v22 = vadd.f32 %v4816_v63, %v4784_v55  ;;  %v4849_v27 = vpop.f32.mrf.mxu3  ;;  %v4753_v12 = vadd.f32 %v4752_v28, %v9829_v62  ;;  %v4785_v51 = vpop.f32.mrf.mxu1  ;;  %v1183_v62 = vunpack.c.0.s8 %v567_v34  ;;  %v815_v55 = vunpack.c.2.s8 %v471_v6 }
 0x42f   : > { %v823_v63 = vunpack.c.3.s8 %v471_v6  ;;  %v943_v28 = vunpack.c.2.s8 %v503_v48 }
 0x430   : > { %v4850_v59 = vadd.f32 %v4849_v27, %v4817_v22  ;;  %v4786_v17 = vadd.f32 %v4785_v51, %v4753_v12  ;;  %v2079_v27 = vcvt.s32.f32 %v1055_v53  ;;  %v2087_v12 = vcvt.s32.f32 %v1063_v20  ;;  %v3269_v51 = vld [vmem:[#allocation2 + $0x108] sm:$0xff] }
 0x431   : > { %v1847_v0 = vcvt.s32.f32 %v823_v63  ;;  %v1967_v3 = vcvt.s32.f32 %v943_v28  ;;  %v2207_v14 = vcvt.s32.f32 %v1183_v62  ;;  %v799_v53 = vunpack.c.0.s8 %v471_v6 }
 0x432   : > { %v5669_v56 = vadd.f32 %v4850_v59, %v3261_v52  ;;  %v1839_v52 = vcvt.s32.f32 %v815_v55  ;;  %v2927_v34 = vpack.c.bf16 %v2087_v12, %v2079_v27  ;;  %v807_v20 = vunpack.c.1.s8 %v471_v6 }
 0x433   : > { %v2871_v11 = vpack.c.bf16 %v1975_v9, %v1967_v3  ;;  %v935_v62 = vunpack.c.1.s8 %v503_v48  ;;  %v1823_v21 = vcvt.s32.f32 %v799_v53  ;;  %v559_v3 = vld [vmem:[%s9013_s10 + $0x3b0] sm:$0xff] }
 0x434   : > { %5741 = vst [vmem:[#allocation2 + $0xe8] sm:$0xff] %v5669_v56  ;;  %v2807_v59 = vpack.c.bf16 %v1847_v0, %v1839_v52  ;;  %5204 = vmatpush.bf16.msra.mxu2 %v2927_v34  ;;  %v527_v0 = vld [vmem:[%s9013_s10 + $0x2b0] sm:$0xff] }
 0x435   : > { %v4818_v2 = vpop.f32.mrf.mxu2  ;;  %v4755_v10 = vpop.f32.mrf.mxu0  ;;  %5170 = vmatpush.bf16.msra.mxu1 %v2871_v11  ;;  %v463_v9 = vld [vmem:[%s9013_s10 + $0xb0] sm:$0xff]  ;;  %v1167_v11 = vunpack.c.2.s8 %v559_v3 }
 0x436   : > { %v4819_v58 = vadd.f32 %v4818_v2, %v4786_v17  ;;  %v4851_v60 = vpop.f32.mrf.mxu3  ;;  %v4756_v1 = vadd.f32 %v4755_v10, %v9835_v31  ;;  %v4788_v22 = vpop.f32.mrf.mxu1  ;;  %5137 = vmatpush.bf16.msra.mxu0 %v2807_v59  ;;  %v2991_v17 = vpack.c.bf16 %v2215_v29, %v2207_v14  ;;  %v927_v2 = vunpack.c.0.s8 %v503_v48 }
 0x437   : > { %v1039_v14 = vunpack.c.2.s8 %v527_v0  ;;  %v1047_v59 = vunpack.c.3.s8 %v527_v0  ;;  %v1175_v29 = vunpack.c.3.s8 %v559_v3  ;;  %v783_v53 = vunpack.c.2.s8 %v463_v9 }
 0x438   : > { %v4852_v57 = vadd.f32 %v4851_v60, %v4819_v58  ;;  %4901 = vmatmul.bf16.gmra.mxu0 %v9247_v23  ;;  %v4789_v31 = vadd.f32 %v4788_v22, %v4756_v1  ;;  %5237 = vmatpush.bf16.msra.mxu3 %v2991_v17  ;;  %v1831_v58 = vcvt.s32.f32 %v807_v20  ;;  %v3277_v60 = vld [vmem:[#allocation2 + $0xd0] sm:$0xff]  ;;  %v1951_v1 = vcvt.s32.f32 %v927_v2 }
 0x439   : > { %4934 = vmatmul.bf16.gmra.mxu1 %v9249_v37  ;;  %v1959_v22 = vcvt.s32.f32 %v935_v62  ;;  %v791_v20 = vunpack.c.3.s8 %v463_v9  ;;  %v9900_v2 = vld [vmem:[%s9013_s10 + $0x1b0] sm:$0xff]  ;;  %v3285_v62 = vld [vmem:[#allocation2 + $0x1a8] sm:$0xff] }
 0x43a   : > { %v5677_v56 = vadd.f32 %v4852_v57, %v3269_v51  ;;  %4967 = vmatmul.bf16.gmra.mxu2 %v9251_v49  ;;  %v2799_v6 = vpack.c.bf16 %v1831_v58, %v1823_v21  ;;  %v1807_v21 = vcvt.s32.f32 %v783_v53 }
 0x43b   : > { %5000 = vmatmul.bf16.gmra.mxu3 %v9253_v50  ;;  %v2863_v51 = vpack.c.bf16 %v1959_v22, %v1951_v1  ;;  %v1815_v58 = vcvt.s32.f32 %v791_v20  ;;  %v919_v22 = vunpack.c.3.s8 %v9900_v2 }
 0x43c   : > { %5749 = vst [vmem:[#allocation2 + $0x108] sm:$0xff] %v5677_v56  ;;  %5138 = vmatpush.bf16.msra.mxu0 %v2799_v6 }
 0x43d   : > { %v4821_v10 = vpop.f32.mrf.mxu2  ;;  %v4757_v55 = vpop.f32.mrf.mxu0  ;;  %5171 = vmatpush.bf16.msra.mxu1 %v2863_v51 }
 0x43e   : > { %v4822_v63 = vadd.f32 %v4821_v10, %v4789_v31  ;;  %v4854_v8 = vpop.f32.mrf.mxu3  ;;  %v4790_v28 = vpop.f32.mrf.mxu1  ;;  %v4758_v12 = vadd.f32 %v4757_v55, %v9845_v7  ;;  %v2063_v10 = vcvt.s32.f32 %v1039_v14  ;;  %v2071_v55 = vcvt.s32.f32 %v1047_v59 }
 0x43f   : > { %v1159_v14 = vunpack.c.1.s8 %v559_v3 }
 0x440   : > { %v4855_v27 = vadd.f32 %v4854_v8, %v4822_v63  ;;  %v4791_v52 = vadd.f32 %v4790_v28, %v4758_v12  ;;  %v2191_v63 = vcvt.s32.f32 %v1167_v11  ;;  %v2199_v8 = vcvt.s32.f32 %v1175_v29 }
 0x441   : > { %v2791_v12 = vpack.c.bf16 %v1815_v58, %v1807_v21 }
 0x442   : > { %v5685_v48 = vadd.f32 %v4855_v27, %v3277_v60  ;;  %v2919_v60 = vpack.c.bf16 %v2071_v55, %v2063_v10  ;;  %v2983_v1 = vpack.c.bf16 %v2199_v8, %v2191_v63  ;;  %v3293_v10 = vld [vmem:[#allocation2 + $0x198] sm:$0xff]  ;;  %v2183_v63 = vcvt.s32.f32 %v1159_v14 }
 0x443   : > { %5139 = vmatpush.bf16.msra.mxu0 %v2791_v12  ;;  %v551_v12 = vld [vmem:[%s9013_s10 + $0x370] sm:$0xff] }
 0x444   : > { %5757 = vst [vmem:[#allocation2 + $0xd0] sm:$0xff] %v5685_v48  ;;  %5205 = vmatpush.bf16.msra.mxu2 %v2919_v60  ;;  %v1943_v48 = vcvt.s32.f32 %v919_v22  ;;  %5238 = vmatpush.bf16.msra.mxu3 %v2983_v1  ;;  %v903_v22 = vunpack.c.1.s8 %v9900_v2 }
 0x445   : > { %v4823_v57 = vpop.f32.mrf.mxu2  ;;  %v4760_v34 = vpop.f32.mrf.mxu0 }
 0x446   : > { %v4824_v56 = vadd.f32 %v4823_v57, %v4791_v52  ;;  %v4856_v31 = vpop.f32.mrf.mxu3  ;;  %v4761_v7 = vadd.f32 %v4760_v34, %v9851_v47  ;;  %v4793_v17 = vpop.f32.mrf.mxu1  ;;  %v911_v47 = vunpack.c.2.s8 %v9900_v2  ;;  %v1023_v52 = vunpack.c.0.s8 %v527_v0 }
 0x447   : > { %v1031_v57 = vunpack.c.1.s8 %v527_v0  ;;  %v1151_v34 = vunpack.c.0.s8 %v559_v3 }
 0x448   : > { %v4857_v28 = vadd.f32 %v4856_v31, %v4824_v56  ;;  %5013 = vmatmul.bf16.vlgmr.msrb.gmra.mxu0 %v9277_v36  ;;  %v4794_v6 = vadd.f32 %v4793_v17, %v4761_v7  ;;  %v1935_v51 = vcvt.s32.f32 %v911_v47  ;;  %v767_v56 = vunpack.c.0.s8 %v463_v9 }
 0x449   : > { %5046 = vmatmul.bf16.vlgmr.msrb.gmra.mxu1 %v9281_v40  ;;  %v775_v31 = vunpack.c.1.s8 %v463_v9  ;;  %v2047_v17 = vcvt.s32.f32 %v1023_v52  ;;  %v2175_v55 = vcvt.s32.f32 %v1151_v34  ;;  %v895_v47 = vunpack.c.0.s8 %v9900_v2 }
 0x44a   : > { %v5693_v27 = vadd.f32 %v4857_v28, %v3285_v62  ;;  %5079 = vmatmul.bf16.vlgmr.msrb.gmra.mxu2 %v9283_v45  ;;  %v2855_v29 = vpack.c.bf16 %v1943_v48, %v1935_v51  ;;  %v2055_v62 = vcvt.s32.f32 %v1031_v57  ;;  %v1791_v8 = vcvt.s32.f32 %v767_v56  ;;  %v455_v56 = vld [vmem:[%s9013_s10 + $0x70] sm:$0xff] }
 0x44b   : > { %5112 = vmatmul.bf16.vlgmr.msrb.gmra.mxu3 %v9285_v46  ;;  %v1799_v0 = vcvt.s32.f32 %v775_v31  ;;  %v2975_v58 = vpack.c.bf16 %v2183_v63, %v2175_v55  ;;  %v1135_v52 = vunpack.c.2.s8 %v551_v12  ;;  %v1143_v57 = vunpack.c.3.s8 %v551_v12  ;;  %v3301_v31 = vld [vmem:[#allocation2 + $0x50] sm:$0xff] }
 0x44c   : > { %5765 = vst [vmem:[#allocation2 + $0x1a8] sm:$0xff] %v5693_v27  ;;  %5172 = vmatpush.bf16.msra.mxu1 %v2855_v29  ;;  %v2911_v21 = vpack.c.bf16 %v2055_v62, %v2047_v17  ;;  %v519_v27 = vld [vmem:[%s9013_s10 + $0x270] sm:$0xff]  ;;  %v1927_v29 = vcvt.s32.f32 %v903_v22  ;;  %v751_v63 = vunpack.c.2.s8 %v455_v56 }
 0x44d   : > { %v4826_v59 = vpop.f32.mrf.mxu2  ;;  %v4762_v11 = vpop.f32.mrf.mxu0  ;;  %v2783_v60 = vpack.c.bf16 %v1799_v0, %v1791_v8  ;;  %5239 = vmatpush.bf16.msra.mxu3 %v2975_v58  ;;  %v1015_v48 = vunpack.c.3.s8 %v519_v27  ;;  %v2167_v2 = vcvt.s32.f32 %v1143_v57  ;;  %v487_v17 = vld [vmem:[%s9013_s10 + $0x170] sm:$0xff] }
 0x44e   : > { %v4827_v53 = vadd.f32 %v4826_v59, %v4794_v6  ;;  %v4859_v20 = vpop.f32.mrf.mxu3  ;;  %v4795_v7 = vpop.f32.mrf.mxu1  ;;  %v4763_v3 = vadd.f32 %v4762_v11, %v9858_v4  ;;  %5206 = vmatpush.bf16.msra.mxu2 %v2911_v21  ;;  %v1007_v4 = vunpack.c.2.s8 %v519_v27  ;;  %v1919_v11 = vcvt.s32.f32 %v895_v47 }
 0x44f   : > { %5140 = vmatpush.bf16.msra.mxu0 %v2783_v60  ;;  %v1775_v58 = vcvt.s32.f32 %v751_v63  ;;  %v887_v60 = vunpack.c.3.s8 %v487_v17  ;;  %v999_v47 = vunpack.c.1.s8 %v519_v27  ;;  %v863_v63 = vunpack.c.0.s8 %v487_v17 }
 0x450   : > { %v4860_v28 = vadd.f32 %v4859_v20, %v4827_v53  ;;  %v4796_v1 = vadd.f32 %v4795_v7, %v4763_v3  ;;  %v2031_v53 = vcvt.s32.f32 %v1007_v4  ;;  %v2039_v20 = vcvt.s32.f32 %v1015_v48 }
 0x451   : > { %v2159_v7 = vcvt.s32.f32 %v1135_v52  ;;  %v2847_v55 = vpack.c.bf16 %v1927_v29, %v1919_v11  ;;  %v879_v3 = vunpack.c.2.s8 %v487_v17  ;;  %v1127_v4 = vunpack.c.1.s8 %v551_v12 }
 0x452   : > { %v5701_v9 = vadd.f32 %v4860_v28, %v3293_v10  ;;  %v2903_v8 = vpack.c.bf16 %v2039_v20, %v2031_v53  ;;  %v759_v28 = vunpack.c.3.s8 %v455_v56 }
 0x453   : > { %v2967_v0 = vpack.c.bf16 %v2167_v2, %v2159_v7  ;;  %5173 = vmatpush.bf16.msra.mxu1 %v2847_v55  ;;  %v3309_v7 = vld [vmem:[#allocation2 + $0x1d8] sm:$0xff] }
 0x454   : > { %5773 = vst [vmem:[#allocation2 + $0x198] sm:$0xff] %v5701_v9  ;;  %5207 = vmatpush.bf16.msra.mxu2 %v2903_v8  ;;  %v1903_v9 = vcvt.s32.f32 %v879_v3  ;;  %v871_v8 = vunpack.c.1.s8 %v487_v17 }
 0x455   : > { %v4828_v6 = vpop.f32.mrf.mxu2  ;;  %v4765_v51 = vpop.f32.mrf.mxu0  ;;  %5240 = vmatpush.bf16.msra.mxu3 %v2967_v0 }
 0x456   : > { %v4829_v34 = vadd.f32 %v4828_v6, %v4796_v1  ;;  %v4861_v14 = vpop.f32.mrf.mxu3  ;;  %v4798_v59 = vpop.f32.mrf.mxu1  ;;  %v4766_v10 = vadd.f32 %v4765_v51, %v9865_v15  ;;  %v1783_v15 = vcvt.s32.f32 %v759_v28  ;;  %v991_v1 = vunpack.c.0.s8 %v519_v27 }
 0x457   : > { %v1911_v6 = vcvt.s32.f32 %v887_v60  ;;  %v1119_v51 = vunpack.c.0.s8 %v551_v12  ;;  %v2151_v27 = vcvt.s32.f32 %v1127_v4  ;;  %v743_v12 = vunpack.c.1.s8 %v455_v56  ;;  %v511_v4 = vld [vmem:[%s9013_s10 + $0x230] sm:$0xff] }
 0x458   : > { %v4862_v62 = vadd.f32 %v4861_v14, %v4829_v34  ;;  %5018 = vmatmul.bf16.gmra.mxu0 %v9308_v33  ;;  %v4799_v22 = vadd.f32 %v4798_v59, %v4766_v10  ;;  %v2775_v57 = vpack.c.bf16 %v1783_v15, %v1775_v58  ;;  %v2015_v34 = vcvt.s32.f32 %v991_v1 }
 0x459   : > { %5051 = vmatmul.bf16.gmra.mxu1 %v9312_v35  ;;  %v2023_v14 = vcvt.s32.f32 %v999_v47  ;;  %v2839_v53 = vpack.c.bf16 %v1911_v6, %v1903_v9  ;;  %v2143_v20 = vcvt.s32.f32 %v1119_v51  ;;  %v735_v10 = vunpack.c.0.s8 %v455_v56  ;;  %v3317_v6 = vld [vmem:[#allocation2 + $0x210] sm:$0xff] }
 0x45a   : > { %v5709_v21 = vadd.f32 %v4862_v62, %v3301_v31  ;;  %5084 = vmatmul.bf16.gmra.mxu2 %v9314_v43  ;;  %5141 = vmatpush.bf16.msra.mxu0 %v2775_v57  ;;  %v1767_v3 = vcvt.s32.f32 %v743_v12  ;;  %v1895_v58 = vcvt.s32.f32 %v871_v8  ;;  %v975_v57 = vunpack.c.2.s8 %v511_v4 }
 0x45b   : > { %5117 = vmatmul.bf16.gmra.mxu3 %v9316_v44  ;;  %v2895_v2 = vpack.c.bf16 %v2023_v14, %v2015_v34  ;;  %5174 = vmatpush.bf16.msra.mxu1 %v2839_v53  ;;  %v2959_v55 = vpack.c.bf16 %v2151_v27, %v2143_v20  ;;  %v1759_v28 = vcvt.s32.f32 %v735_v10  ;;  %v983_v34 = vunpack.c.3.s8 %v511_v4 }
 0x45c   : > { %5781 = vst [vmem:[#allocation2 + $0x50] sm:$0xff] %v5709_v21  ;;  %v1887_v21 = vcvt.s32.f32 %v863_v63  ;;  %v1999_v20 = vcvt.s32.f32 %v975_v57 }
 0x45d   : > { %v4831_v48 = vpop.f32.mrf.mxu2  ;;  %v4767_v52 = vpop.f32.mrf.mxu0  ;;  %5208 = vmatpush.bf16.msra.mxu2 %v2895_v2  ;;  %5241 = vmatpush.bf16.msra.mxu3 %v2959_v55  ;;  %v2767_v15 = vpack.c.bf16 %v1767_v3, %v1759_v28 }
 0x45e   : > { %v4832_v11 = vadd.f32 %v4831_v48, %v4799_v22  ;;  %v4864_v29 = vpop.f32.mrf.mxu3  ;;  %v4800_v31 = vpop.f32.mrf.mxu1  ;;  %v4768_v59 = vadd.f32 %v4767_v52, %v9867_v61  ;;  %v2831_v1 = vpack.c.bf16 %v1895_v58, %v1887_v21  ;;  %v543_v48 = vld [vmem:[%s9013_s10 + $0x330] sm:$0xff] }
 0x45f   : > { %5142 = vmatpush.bf16.msra.mxu0 %v2767_v15  ;;  %v447_v52 = vld [vmem:[%s9013_s10 + $0x30] sm:$0xff]  ;;  %v1103_v14 = vunpack.c.2.s8 %v543_v48 }
 0x460   : > { %v4865_v62 = vadd.f32 %v4864_v29, %v4832_v11  ;;  %v4801_v60 = vadd.f32 %v4800_v31, %v4768_v59  ;;  %5175 = vmatpush.bf16.msra.mxu1 %v2831_v1  ;;  %v1111_v11 = vunpack.c.3.s8 %v543_v48  ;;  %v727_v53 = vunpack.c.3.s8 %v447_v52 }
 0x461   : > { %v2127_v2 = vcvt.s32.f32 %v1103_v14  ;;  %v711_v57 = vunpack.c.1.s8 %v447_v52 }
 0x462   : > { %v5717_v0 = vadd.f32 %v4865_v62, %v3309_v7  ;;  %v2007_v7 = vcvt.s32.f32 %v983_v34  ;;  %v2135_v27 = vcvt.s32.f32 %v1111_v11  ;;  %v479_v62 = vld [vmem:[%s9013_s10 + $0x130] sm:$0xff]  ;;  %v1751_v10 = vcvt.s32.f32 %v727_v53 }
 0x463   : > { %v847_v12 = vunpack.c.2.s8 %v479_v62  ;;  %v855_v55 = vunpack.c.3.s8 %v479_v62 }
 0x464   : > { %5789 = vst [vmem:[#allocation2 + $0x1d8] sm:$0xff] %v5717_v0  ;;  %v2887_v0 = vpack.c.bf16 %v2007_v7, %v1999_v20  ;;  %v2951_v28 = vpack.c.bf16 %v2135_v27, %v2127_v2  ;;  %v1735_v20 = vcvt.s32.f32 %v711_v57  ;;  %v839_v2 = vunpack.c.1.s8 %v479_v62 }
 0x465   : > { %v4833_v61 = vpop.f32.mrf.mxu2  ;;  %v4770_v9 = vpop.f32.mrf.mxu0  ;;  %v1871_v15 = vcvt.s32.f32 %v847_v12 }
 0x466   : > { %v4834_v56 = vadd.f32 %v4833_v61, %v4801_v60  ;;  %v4866_v47 = vpop.f32.mrf.mxu3  ;;  %v4771_v22 = vadd.f32 %v4770_v9, %v9877_v24  ;;  %v4803_v17 = vpop.f32.mrf.mxu1  ;;  %v719_v24 = vunpack.c.2.s8 %v447_v52  ;;  %v1879_v61 = vcvt.s32.f32 %v855_v55  ;;  %v3325_v9 = vld [vmem:[#allocation2 + $0x148] sm:$0x7]  ;;  %5209 = vmatpush.bf16.msra.mxu2 %v2887_v0  ;;  %5242 = vmatpush.bf16.msra.mxu3 %v2951_v28  ;;  %v695_v0 = vld [vmem:[%s9013_s10 + $0x7f0] sm:$0xff] }
 0x467   : > { %v1863_v55 = vcvt.s32.f32 %v839_v2 }
 0x468   : > { %v4867_v51 = vadd.f32 %v4866_v47, %v4834_v56  ;;  %5023 = vmatmul.bf16.gmra.mxu0 %v9331_v5  ;;  %v4804_v31 = vadd.f32 %v4803_v17, %v4771_v22  ;;  %v1743_v59 = vcvt.s32.f32 %v719_v24  ;;  %v2823_v56 = vpack.c.bf16 %v1879_v61, %v1871_v15 }
 0x469   : > { %5056 = vmatmul.bf16.gmra.mxu1 %v9335_v39  ;;  %v959_v47 = vunpack.c.0.s8 %v511_v4  ;;  %v967_v22 = vunpack.c.1.s8 %v511_v4  ;;  %v1087_v17 = vunpack.c.0.s8 %v543_v48 }
 0x46a   : > { %v5725_v29 = vadd.f32 %v4867_v51, %v3317_v6  ;;  %5089 = vmatmul.bf16.gmra.mxu2 %v10792_v18  ;;  %v2759_v60 = vpack.c.bf16 %v1751_v10, %v1743_v59  ;;  %v1095_v6 = vunpack.c.1.s8 %v543_v48  ;;  %v703_v51 = vunpack.c.0.s8 %v447_v52  ;;  %5176 = vmatpush.bf16.msra.mxu1 %v2823_v56 }
 0x46b   : > { %5122 = vmatmul.bf16.gmra.mxu3 %v10793_v30  ;;  %v1983_v14 = vcvt.s32.f32 %v959_v47  ;;  %v1991_v11 = vcvt.s32.f32 %v967_v22 }
 0x46c   : > { %5797 = vst [vmem:[#allocation2 + $0x210] sm:$0xff] %v5725_v29  ;;  %5143 = vmatpush.bf16.msra.mxu0 %v2759_v60  ;;  %v831_v29 = vunpack.c.0.s8 %v479_v62  ;;  %v2119_v24 = vcvt.s32.f32 %v1095_v6  ;;  %v1727_v53 = vcvt.s32.f32 %v703_v51  ;;  %v663_v62 = vld [vmem:[%s9013_s10 + $0x6f0] sm:$0xff] }
 0x46d   : > { %v4836_v63 = vpop.f32.mrf.mxu2  ;;  %v4772_v8 = vpop.f32.mrf.mxu0  ;;  %v2879_v7 = vpack.c.bf16 %v1991_v11, %v1983_v14  ;;  %v1583_v28 = vunpack.c.2.s8 %v663_v62  ;;  %v631_v14 = vld [vmem:[%s9013_s10 + $0x5f0] sm:$0xff]  ;;  %v1567_v11 = vunpack.c.0.s8 %v663_v62 }
 0x46e   : > { %v4837_v3 = vadd.f32 %v4836_v63, %v4804_v31  ;;  %v4869_v21 = vpop.f32.mrf.mxu3  ;;  %v4805_v58 = vpop.f32.mrf.mxu1  ;;  %v2111_v31 = vcvt.s32.f32 %v1087_v17  ;;  %v1855_v27 = vcvt.s32.f32 %v831_v29  ;;  %v2751_v48 = vpack.c.bf16 %v1735_v20, %v1727_v53 }
 0x46f   : > { %5210 = vmatpush.bf16.msra.mxu2 %v2879_v7  ;;  %v1719_v58 = vunpack.c.3.s8 %v695_v0  ;;  %v2607_v56 = vcvt.s32.f32 %v1583_v28  ;;  %v1575_v29 = vunpack.c.1.s8 %v663_v62  ;;  %v1455_v20 = vunpack.c.2.s8 %v631_v14 }
 0x470   : > { %v4870_v1 = vadd.f32 %v4869_v21, %v4837_v3  ;;  %v2943_v4 = vpack.c.bf16 %v2119_v24, %v2111_v31  ;;  %5144 = vmatpush.bf16.msra.mxu0 %v2751_v48  ;;  %v2815_v8 = vpack.c.bf16 %v1863_v55, %v1855_v27  ;;  %v1591_v3 = vunpack.c.3.s8 %v663_v62 }
 0x471   : > { %v1711_v21 = vunpack.c.2.s8 %v695_v0  ;;  %v2743_v6 = vcvt.s32.f32 %v1719_v58  ;;  %v1463_v7 = vunpack.c.3.s8 %v631_v14  ;;  %v2591_v2 = vcvt.s32.f32 %v1567_v11 }
 0x472   : > { %v5733_v34 = vadd.f32 %v4870_v1, %v3325_v9  ;;  %5243 = vmatpush.bf16.msra.mxu3 %v2943_v4  ;;  %5177 = vmatpush.bf16.msra.mxu1 %v2815_v8  ;;  %v2615_v47 = vcvt.s32.f32 %v1591_v3  ;;  %v2599_v27 = vcvt.s32.f32 %v1575_v29  ;;  %v2479_v48 = vcvt.s32.f32 %v1455_v20  ;;  %v10849_v29 = vld [vmem:[#allocation42_spill] sm:$0xff] }
 0x473   : > { %v2735_v22 = vcvt.s32.f32 %v1711_v21 }
 0x474   : > { %5805 = vst [vmem:[#allocation2 + $0x148] sm:$0x7] %v5733_v34  ;;  %v3191_v57 = vpack.c.bf16 %v2615_v47, %v2607_v56  ;;  %v599_v34 = vld [vmem:[%s9013_s10 + $0x4f0] sm:$0xff]  ;;  %v3183_v55 = vpack.c.bf16 %v2599_v27, %v2591_v2  ;;  %v1439_v47 = vunpack.c.0.s8 %v631_v14 }
 0x475   : > { %v4838_v59 = vpop.f32.mrf.mxu2  ;;  %v4882_v10 = vpop.f32.mrf.mxu0  ;;  %v3255_v31 = vpack.c.bf16 %v2743_v6, %v2735_v22  ;;  %v1327_v24 = vunpack.c.2.s8 %v599_v34  ;;  %v1335_v53 = vunpack.c.3.s8 %v599_v34  ;;  %v1319_v56 = vunpack.c.1.s8 %v599_v34 }
 0x476   : > { %v4871_v52 = vpop.f32.mrf.mxu3  ;;  %v4915_v12 = vpop.f32.mrf.mxu1  ;;  %5335 = vmatpush.bf16.msrb.mxu2 %v3191_v57  ;;  %v1695_v59 = vunpack.c.0.s8 %v695_v0  ;;  %v1447_v22 = vunpack.c.1.s8 %v631_v14  ;;  %v2463_v11 = vcvt.s32.f32 %v1439_v47 }
 0x477   : > { %v4916_v63 = vadd.f32 %v4915_v12, %v4882_v10  ;;  %5368 = vmatpush.bf16.msrb.mxu3 %v3255_v31  ;;  %v2351_v10 = vcvt.s32.f32 %v1327_v24  ;;  %v2359_v4 = vcvt.s32.f32 %v1335_v53  ;;  %v1703_v52 = vunpack.c.1.s8 %v695_v0 }
 0x478   : > { %5028 = vmatmul.bf16.gmra.mxu0 %v10794_v19  ;;  %v2487_v12 = vcvt.s32.f32 %v1463_v7  ;;  %v1311_v0 = vunpack.c.0.s8 %v599_v34  ;;  %v2343_v57 = vcvt.s32.f32 %v1319_v56  ;;  %v2471_v31 = vcvt.s32.f32 %v1447_v22 }
 0x479   : > { %5061 = vmatmul.bf16.gmra.mxu1 %v10795_v32  ;;  %v3063_v62 = vpack.c.bf16 %v2359_v4, %v2351_v10  ;;  %v2727_v3 = vcvt.s32.f32 %v1703_v52  ;;  %v655_v10 = vld [vmem:[%s9013_s10 + $0x6b0] sm:$0xff] }
 0x47a   : > { %5094 = vmatmul.bf16.gmra.mxu2 %v10806_v16  ;;  %v2335_v6 = vcvt.s32.f32 %v1311_v0  ;;  %v3119_v34 = vpack.c.bf16 %v2471_v31, %v2463_v11  ;;  %v687_v4 = vld [vmem:[%s9013_s10 + $0x7b0] sm:$0xff]  ;;  %v1551_v52 = vunpack.c.2.s8 %v655_v10 }
 0x47b   : > { %5127 = vmatmul.bf16.gmra.mxu3 %v10807_v54  ;;  %5336 = vmatpush.bf16.msrb.mxu2 %v3183_v55  ;;  %v1679_v55 = vunpack.c.2.s8 %v687_v4 }
 0x47c   : > { %5269 = vmatpush.bf16.msrb.mxu0 %v3063_v62  ;;  %v3055_v24 = vpack.c.bf16 %v2343_v57, %v2335_v6 }
 0x47d   : > { %v4948_v60 = vpop.f32.mrf.mxu2  ;;  %v4884_v15 = vpop.f32.mrf.mxu0 }
 0x47e   : > { %v4949_v61 = vadd.f32 %v4948_v60, %v4916_v63  ;;  %v4981_v9 = vpop.f32.mrf.mxu3  ;;  %v4917_v1 = vpop.f32.mrf.mxu1  ;;  %v2719_v63 = vcvt.s32.f32 %v1695_v59 }
 0x47f   : > { %v4918_v17 = vadd.f32 %v4917_v1, %v4884_v15  ;;  %v3127_v15 = vpack.c.bf16 %v2487_v12, %v2479_v48  ;;  %v591_v48 = vld [vmem:[%s9013_s10 + $0x4b0] sm:$0xff]  ;;  %v1559_v12 = vunpack.c.3.s8 %v655_v10 }
 0x480   : > { %v9936_v51 = vadd.f32 %v4981_v9, %v4949_v61  ;;  %v3247_v9 = vpack.c.bf16 %v2727_v3, %v2719_v63  ;;  %5270 = vmatpush.bf16.msrb.mxu0 %v3055_v24  ;;  %v1687_v63 = vunpack.c.3.s8 %v687_v4  ;;  %v1303_v62 = vunpack.c.3.s8 %v591_v48 }
 0x481   : > { %5302 = vmatpush.bf16.msrb.mxu1 %v3127_v15  ;;  %v2703_v15 = vcvt.s32.f32 %v1679_v55  ;;  %v1663_v55 = vunpack.c.0.s8 %v687_v4 }
 0x482   : > { %5369 = vmatpush.bf16.msrb.mxu3 %v3247_v9  ;;  %v2327_v0 = vcvt.s32.f32 %v1303_v62 }
 0x485   : > { %v4950_v8 = vpop.f32.mrf.mxu2  ;;  %v4887_v28 = vpop.f32.mrf.mxu0  ;;  %5303 = vmatpush.bf16.msrb.mxu1 %v3119_v34 }
 0x486   : > { %v4951_v21 = vadd.f32 %v4950_v8, %v4918_v17  ;;  %v4983_v58 = vpop.f32.mrf.mxu3  ;;  %v4920_v60 = vpop.f32.mrf.mxu1  ;;  %v10848_v17 = vld [vmem:[#allocation41_spill] sm:$0xff]  ;;  %v9952_v8 = vld [vmem:[%s9013_s10 + $0x5b0] sm:$0xff] }
 0x487   : > { %v4921_v61 = vadd.f32 %v4920_v60, %v4887_v28  ;;  %v1295_v28 = vunpack.c.2.s8 %v591_v48  ;;  %v1423_v3 = vunpack.c.2.s8 %v9952_v8  ;;  %v2583_v60 = vcvt.s32.f32 %v1559_v12 }
 0x488   : > { %v9940_v1 = vadd.f32 %v4983_v58, %v4951_v21  ;;  %5033 = vmatmul.bf16.gmra.mxu0 %v10808_v13  ;;  %v1431_v21 = vunpack.c.3.s8 %v9952_v8  ;;  %v2575_v58 = vcvt.s32.f32 %v1551_v52  ;;  %v1535_v52 = vunpack.c.0.s8 %v655_v10 }
 0x489   : > { %5066 = vmatmul.bf16.gmra.mxu1 %v10809_v25  ;;  %v2319_v9 = vcvt.s32.f32 %v1295_v28  ;;  %v2447_v56 = vcvt.s32.f32 %v1423_v3  ;;  %v1543_v12 = vunpack.c.1.s8 %v655_v10  ;;  %v1671_v28 = vunpack.c.1.s8 %v687_v4 }
 0x48a   : > { %5099 = vmatmul.bf16.gmra.mxu2 %v10848_v17  ;;  %v2455_v47 = vcvt.s32.f32 %v1431_v21  ;;  %v3175_v57 = vpack.c.bf16 %v2583_v60, %v2575_v58  ;;  %v2559_v62 = vcvt.s32.f32 %v1535_v52  ;;  %v2687_v21 = vcvt.s32.f32 %v1663_v55  ;;  %v10853_v58 = vld [vmem:[#allocation24_spill] sm:$0xff] }
 0x48b   : > { %5132 = vmatmul.bf16.gmra.mxu3 %v10849_v29  ;;  %v2567_v3 = vcvt.s32.f32 %v1543_v12  ;;  %v2695_v60 = vcvt.s32.f32 %v1671_v28 }
 0x48c   : > { %v3111_v34 = vpack.c.bf16 %v2455_v47, %v2447_v56  ;;  %5337 = vmatpush.bf16.msrb.mxu2 %v3175_v57 }
 0x48d   : > { %v4953_v53 = vpop.f32.mrf.mxu2  ;;  %v4889_v20 = vpop.f32.mrf.mxu0  ;;  %v3231_v56 = vpack.c.bf16 %v2695_v60, %v2687_v21 }
 0x48e   : > { %v4954_v7 = vadd.f32 %v4953_v53, %v4921_v61  ;;  %v4986_v2 = vpop.f32.mrf.mxu3  ;;  %v4922_v27 = vpop.f32.mrf.mxu1  ;;  %v2711_v61 = vcvt.s32.f32 %v1687_v63  ;;  %5304 = vmatpush.bf16.msrb.mxu1 %v3111_v34  ;;  %v10851_v63 = vld [vmem:[#allocation22_spill] sm:$0xff] }
 0x48f   : > { %v4923_v14 = vadd.f32 %v4922_v27, %v4889_v20  ;;  %v3047_v20 = vpack.c.bf16 %v2327_v0, %v2319_v9  ;;  %v10850_v27 = vld [vmem:[#allocation21_spill] sm:$0xff]  ;;  %v3167_v9 = vpack.c.bf16 %v2567_v3, %v2559_v62  ;;  %v679_v34 = vld [vmem:[%s9013_s10 + $0x770] sm:$0xff] }
 0x490   : > { %v9946_v59 = vadd.f32 %v4986_v2, %v4954_v7  ;;  %v3239_v11 = vpack.c.bf16 %v2711_v61, %v2703_v15  ;;  %v1279_v15 = vunpack.c.0.s8 %v591_v48  ;;  %v1287_v61 = vunpack.c.1.s8 %v591_v48 }
 0x491   : > { %5271 = vmatpush.bf16.msrb.mxu0 %v3047_v20  ;;  %5338 = vmatpush.bf16.msrb.mxu2 %v3167_v9  ;;  %v1415_v48 = vunpack.c.1.s8 %v9952_v8  ;;  %v647_v20 = vld [vmem:[%s9013_s10 + $0x670] sm:$0xff]  ;;  %v1647_v55 = vunpack.c.2.s8 %v679_v34  ;;  %v1655_v28 = vunpack.c.3.s8 %v679_v34 }
 0x492   : > { %5370 = vmatpush.bf16.msrb.mxu3 %v3239_v11  ;;  %v2303_v47 = vcvt.s32.f32 %v1279_v15  ;;  %v1519_v52 = vunpack.c.2.s8 %v647_v20  ;;  %v1527_v12 = vunpack.c.3.s8 %v647_v20 }
 0x493   : > { %v2439_v62 = vcvt.s32.f32 %v1415_v48  ;;  %v2671_v60 = vcvt.s32.f32 %v1647_v55  ;;  %v2679_v15 = vcvt.s32.f32 %v1655_v28  ;;  %v10854_v48 = vld [vmem:[#allocation25_spill] sm:$0xff] }
 0x494   : > { %v2543_v3 = vcvt.s32.f32 %v1519_v52  ;;  %v2551_v21 = vcvt.s32.f32 %v1527_v12  ;;  %v615_v52 = vld [vmem:[%s9013_s10 + $0x570] sm:$0xff] }
 0x495   : > { %v4955_v22 = vpop.f32.mrf.mxu2  ;;  %v4892_v6 = vpop.f32.mrf.mxu0  ;;  %v10855_v12 = vld [vmem:[#allocation26_spill] sm:$0xff] }
 0x496   : > { %v4956_v31 = vadd.f32 %v4955_v22, %v4923_v14  ;;  %v4988_v24 = vpop.f32.mrf.mxu3  ;;  %v4925_v53 = vpop.f32.mrf.mxu1  ;;  %v10852_v14 = vld [vmem:[#allocation23_spill] sm:$0xff]  ;;  %v2311_v22 = vcvt.s32.f32 %v1287_v61  ;;  %5371 = vmatpush.bf16.msrb.mxu3 %v3231_v56 }
 0x497   : > { %v4926_v7 = vadd.f32 %v4925_v53, %v4892_v6  ;;  %v1407_v53 = vunpack.c.0.s8 %v9952_v8  ;;  %v3223_v8 = vpack.c.bf16 %v2679_v15, %v2671_v60 }
 0x498   : > { %v9956_v2 = vadd.f32 %v4988_v24, %v4956_v31  ;;  %5145 = vmatmul.bf16.vlgmr.msra.gmra.mxu0 %v10850_v27  ;;  %v3039_v31 = vpack.c.bf16 %v2311_v22, %v2303_v47 }
 0x499   : > { %5178 = vmatmul.bf16.vlgmr.msra.gmra.mxu1 %v10851_v63 }
 0x49a   : > { %5211 = vmatmul.bf16.vlgmr.msra.gmra.mxu2 %v10852_v14  ;;  %5272 = vmatpush.bf16.msrb.mxu0 %v3039_v31 }
 0x49b   : > { %5244 = vmatmul.bf16.vlgmr.msra.gmra.mxu3 %v10853_v58 }
 0x49c   : > { %5372 = vmatpush.bf16.msrb.mxu3 %v3223_v8 }
 0x49d   : > { %v4958_v0 = vpop.f32.mrf.mxu2  ;;  %v4894_v10 = vpop.f32.mrf.mxu0 }
 0x49e   : > { %v4959_v6 = vadd.f32 %v4958_v0, %v4926_v7  ;;  %v4991_v4 = vpop.f32.mrf.mxu3  ;;  %v4927_v57 = vpop.f32.mrf.mxu1  ;;  %v2431_v7 = vcvt.s32.f32 %v1407_v53 }
 0x49f   : > { %v4928_v11 = vadd.f32 %v4927_v57, %v4894_v10  ;;  %v3159_v10 = vpack.c.bf16 %v2551_v21, %v2543_v3  ;;  %v10857_v3 = vld [vmem:[#allocation28_spill] sm:$0xff] }
 0x4a0   : > { %v9962_v24 = vadd.f32 %v4991_v4, %v4959_v6  ;;  %v3103_v61 = vpack.c.bf16 %v2439_v62, %v2431_v7  ;;  %v583_v6 = vld [vmem:[%s9013_s10 + $0x470] sm:$0xff]  ;;  %v1391_v7 = vunpack.c.2.s8 %v615_v52 }
 0x4a1   : > { %5339 = vmatpush.bf16.msrb.mxu2 %v3159_v10  ;;  %v1263_v57 = vunpack.c.2.s8 %v583_v6  ;;  %v1271_v31 = vunpack.c.3.s8 %v583_v6  ;;  %v10856_v62 = vld [vmem:[#allocation27_spill] sm:$0xff]  ;;  %v1639_v10 = vunpack.c.1.s8 %v679_v34 }
 0x4a2   : > { %5305 = vmatpush.bf16.msrb.mxu1 %v3103_v61  ;;  %v2415_v60 = vcvt.s32.f32 %v1391_v7  ;;  %v1503_v61 = vunpack.c.0.s8 %v647_v20 }
 0x4a3   : > { %v2287_v55 = vcvt.s32.f32 %v1263_v57  ;;  %v2295_v28 = vcvt.s32.f32 %v1271_v31 }
 0x4a5   : > { %v4960_v9 = vpop.f32.mrf.mxu2  ;;  %v4897_v0 = vpop.f32.mrf.mxu0  ;;  %v3031_v21 = vpack.c.bf16 %v2295_v28, %v2287_v55 }
 0x4a6   : > { %v4961_v56 = vadd.f32 %v4960_v9, %v4928_v11  ;;  %v4993_v47 = vpop.f32.mrf.mxu3  ;;  %v4930_v22 = vpop.f32.mrf.mxu1  ;;  %v1399_v11 = vunpack.c.3.s8 %v615_v52  ;;  %v1511_v9 = vunpack.c.1.s8 %v647_v20  ;;  %v1247_v20 = vunpack.c.0.s8 %v583_v6 }
 0x4a7   : > { %v4931_v4 = vadd.f32 %v4930_v22, %v4897_v0  ;;  %v1631_v0 = vunpack.c.0.s8 %v679_v34  ;;  %5273 = vmatpush.bf16.msrb.mxu0 %v3031_v21  ;;  %v2527_v22 = vcvt.s32.f32 %v1503_v61  ;;  %v1255_v34 = vunpack.c.1.s8 %v583_v6 }
 0x4a8   : > { %v9969_v53 = vadd.f32 %v4993_v47, %v4961_v56  ;;  %5150 = vmatmul.bf16.gmra.mxu0 %v10854_v48  ;;  %v2423_v15 = vcvt.s32.f32 %v1399_v11  ;;  %v2535_v48 = vcvt.s32.f32 %v1511_v9  ;;  %v1375_v11 = vunpack.c.0.s8 %v615_v52 }
 0x4a9   : > { %5183 = vmatmul.bf16.gmra.mxu1 %v10855_v12  ;;  %v2655_v58 = vcvt.s32.f32 %v1631_v0  ;;  %v1383_v21 = vunpack.c.1.s8 %v615_v52  ;;  %v2271_v0 = vcvt.s32.f32 %v1247_v20 }
 0x4aa   : > { %5216 = vmatmul.bf16.gmra.mxu2 %v10856_v62  ;;  %v3095_v47 = vpack.c.bf16 %v2423_v15, %v2415_v60  ;;  %v2663_v62 = vcvt.s32.f32 %v1639_v10  ;;  %v3151_v28 = vpack.c.bf16 %v2535_v48, %v2527_v22  ;;  %v2399_v10 = vcvt.s32.f32 %v1375_v11  ;;  %v639_v22 = vld [vmem:[%s9013_s10 + $0x630] sm:$0xff] }
 0x4ab   : > { %5249 = vmatmul.bf16.gmra.mxu3 %v10857_v3  ;;  %v2407_v48 = vcvt.s32.f32 %v1383_v21  ;;  %v1487_v20 = vunpack.c.2.s8 %v639_v22 }
 0x4ac   : > { %5306 = vmatpush.bf16.msrb.mxu1 %v3095_v47  ;;  %v3215_v7 = vpack.c.bf16 %v2663_v62, %v2655_v58  ;;  %5340 = vmatpush.bf16.msrb.mxu2 %v3151_v28  ;;  %v10858_v62 = vld [vmem:[#allocation29_spill] sm:$0xff]  ;;  %v10861_v47 = vld [vmem:[#allocation32_spill] sm:$0xff] }
 0x4ad   : > { %v4963_v8 = vpop.f32.mrf.mxu2  ;;  %v4899_v56 = vpop.f32.mrf.mxu0  ;;  %v3087_v52 = vpack.c.bf16 %v2407_v48, %v2399_v10  ;;  %v2511_v10 = vcvt.s32.f32 %v1487_v20 }
 0x4ae   : > { %v4964_v57 = vadd.f32 %v4963_v8, %v4931_v4  ;;  %v4996_v31 = vpop.f32.mrf.mxu3  ;;  %v4932_v12 = vpop.f32.mrf.mxu1  ;;  %5373 = vmatpush.bf16.msrb.mxu3 %v3215_v7 }
 0x4af   : > { %v4933_v14 = vadd.f32 %v4932_v12, %v4899_v56  ;;  %v2279_v12 = vcvt.s32.f32 %v1255_v34  ;;  %v10859_v56 = vld [vmem:[#allocation30_spill] sm:$0xff]  ;;  %v1495_v34 = vunpack.c.3.s8 %v639_v22 }
 0x4b0   : > { %v9976_v55 = vadd.f32 %v4996_v31, %v4964_v57  ;;  %5307 = vmatpush.bf16.msrb.mxu1 %v3087_v52  ;;  %v671_v57 = vld [vmem:[%s9013_s10 + $0x730] sm:$0xff] }
 0x4b1   : > { %v3023_v6 = vpack.c.bf16 %v2279_v12, %v2271_v0  ;;  %v575_v31 = vld [vmem:[%s9013_s10 + $0x430] sm:$0xff]  ;;  %v1615_v11 = vunpack.c.2.s8 %v671_v57  ;;  %v1623_v21 = vunpack.c.3.s8 %v671_v57  ;;  %v2519_v48 = vcvt.s32.f32 %v1495_v34 }
 0x4b2   : > { %v1239_v0 = vunpack.c.3.s8 %v575_v31  ;;  %v1607_v17 = vunpack.c.1.s8 %v671_v57  ;;  %v1215_v20 = vunpack.c.0.s8 %v575_v31  ;;  %v1223_v34 = vunpack.c.1.s8 %v575_v31 }
 0x4b3   : > { %5274 = vmatpush.bf16.msrb.mxu0 %v3023_v6  ;;  %v2639_v6 = vcvt.s32.f32 %v1615_v11  ;;  %v2647_v52 = vcvt.s32.f32 %v1623_v21 }
 0x4b5   : > { %v4965_v60 = vpop.f32.mrf.mxu2  ;;  %v4902_v15 = vpop.f32.mrf.mxu0  ;;  %v3207_v3 = vpack.c.bf16 %v2647_v52, %v2639_v6  ;;  %v568_v52 = vld [vmem:[%s9013_s10 + $0x3f8] sm:$0xff] }
 0x4b6   : > { %v4966_v4 = vadd.f32 %v4965_v60, %v4933_v14  ;;  %v4998_v61 = vpop.f32.mrf.mxu3  ;;  %v4935_v9 = vpop.f32.mrf.mxu1  ;;  %v10860_v14 = vld [vmem:[#allocation31_spill] sm:$0xff] }
 0x4b7   : > { %v4936_v8 = vadd.f32 %v4935_v9, %v4902_v15  ;;  %v607_v60 = vld [vmem:[%s9013_s10 + $0x530] sm:$0xff]  ;;  %v1231_v9 = vunpack.c.2.s8 %v575_v31  ;;  %5374 = vmatpush.bf16.msrb.mxu3 %v3207_v3 }
 0x4b8   : > { %v9978_v58 = vadd.f32 %v4998_v61, %v4966_v4  ;;  %5155 = vmatmul.bf16.gmra.mxu0 %v10858_v62  ;;  %v1359_v12 = vunpack.c.2.s8 %v607_v60  ;;  %v3143_v62 = vpack.c.bf16 %v2519_v48, %v2511_v10  ;;  %v2631_v48 = vcvt.s32.f32 %v1607_v17 }
 0x4b9   : > { %5188 = vmatmul.bf16.gmra.mxu1 %v10859_v56  ;;  %v2263_v56 = vcvt.s32.f32 %v1239_v0  ;;  %v1351_v3 = vunpack.c.1.s8 %v607_v60 }
 0x4ba   : > { %5221 = vmatmul.bf16.gmra.mxu2 %v10860_v14  ;;  %v2255_v14 = vcvt.s32.f32 %v1231_v9  ;;  %v2383_v63 = vcvt.s32.f32 %v1359_v12  ;;  %v2239_v12 = vcvt.s32.f32 %v1215_v20  ;;  %v1208_v20 = vunpack.c.3.s8 %v568_v52 }
 0x4bb   : > { %5254 = vmatmul.bf16.gmra.mxu3 %v10861_v47  ;;  %5341 = vmatpush.bf16.msrb.mxu2 %v3143_v62 }
 0x4bc   : > { %v3015_v27 = vpack.c.bf16 %v2263_v56, %v2255_v14  ;;  %v2247_v56 = vcvt.s32.f32 %v1223_v34 }
 0x4bd   : > { %v4968_v28 = vpop.f32.mrf.mxu2  ;;  %v4904_v7 = vpop.f32.mrf.mxu0 }
 0x4be   : > { %v4969_v15 = vadd.f32 %v4968_v28, %v4936_v8  ;;  %v5001_v4 = vpop.f32.mrf.mxu3  ;;  %v4937_v61 = vpop.f32.mrf.mxu1  ;;  %v1367_v7 = vunpack.c.3.s8 %v607_v60  ;;  %v1471_v8 = vunpack.c.0.s8 %v639_v22  ;;  %v1479_v28 = vunpack.c.1.s8 %v639_v22  ;;  %5275 = vmatpush.bf16.msrb.mxu0 %v3015_v27 }
 0x4bf   : > { %v1599_v61 = vunpack.c.0.s8 %v671_v57  ;;  %v3007_v27 = vpack.c.bf16 %v2247_v56, %v2239_v12 }
 0x4c0   : > { %v9988_v47 = vadd.f32 %v5001_v4, %v4969_v15  ;;  %v2391_v29 = vcvt.s32.f32 %v1367_v7  ;;  %v2495_v21 = vcvt.s32.f32 %v1471_v8  ;;  %v2503_v15 = vcvt.s32.f32 %v1479_v28 }
 0x4c1   : > { %v1343_v4 = vunpack.c.0.s8 %v607_v60  ;;  %v2623_v10 = vcvt.s32.f32 %v1599_v61  ;;  %v536_v60 = vld [vmem:[%s9013_s10 + $0x2f8] sm:$0xff]  ;;  %v1200_v61 = vunpack.c.2.s8 %v568_v52 }
 0x4c2   : > { %v3079_v11 = vpack.c.bf16 %v2391_v29, %v2383_v63  ;;  %v3135_v62 = vpack.c.bf16 %v2503_v15, %v2495_v21  ;;  %v2375_v63 = vcvt.s32.f32 %v1351_v3  ;;  %5276 = vmatpush.bf16.msrb.mxu0 %v3007_v27  ;;  %v1080_v28 = vunpack.c.3.s8 %v536_v60  ;;  %v472_v3 = vld [vmem:[%s9013_s10 + $0xf8] sm:$0xff] }
 0x4c3   : > { %v2367_v22 = vcvt.s32.f32 %v1343_v4  ;;  %v3199_v57 = vpack.c.bf16 %v2631_v48, %v2623_v10  ;;  %v3262_v4 = vld [vmem:[#allocation2 + $0xf0] sm:$0xff]  ;;  %v2224_v10 = vcvt.s32.f32 %v1200_v61  ;;  %v2232_v48 = vcvt.s32.f32 %v1208_v20 }
 0x4c4   : > { %5308 = vmatpush.bf16.msrb.mxu1 %v3079_v11  ;;  %5342 = vmatpush.bf16.msrb.mxu2 %v3135_v62  ;;  %v1064_v27 = vunpack.c.1.s8 %v536_v60 }
 0x4c5   : > { %v4970_v9 = vpop.f32.mrf.mxu2  ;;  %v5014_v0 = vpop.f32.mrf.mxu0  ;;  %5375 = vmatpush.bf16.msrb.mxu3 %v3199_v57  ;;  %v3071_v17 = vpack.c.bf16 %v2375_v63, %v2367_v22  ;;  %v504_v22 = vld [vmem:[%s9013_s10 + $0x1f8] sm:$0xff]  ;;  %v1056_v57 = vunpack.c.0.s8 %v536_v60 }
 0x4c6   : > { %v5003_v14 = vpop.f32.mrf.mxu3  ;;  %v5047_v6 = vpop.f32.mrf.mxu1  ;;  %v5015_v29 = vadd.f32 %v5014_v0, %v9936_v51  ;;  %v1072_v51 = vunpack.c.2.s8 %v536_v60  ;;  %v2104_v0 = vcvt.s32.f32 %v1080_v28 }
 0x4c7   : > { %v3000_v14 = vpack.c.bf16 %v2232_v48, %v2224_v10 }
 0x4c8   : > { %5160 = vmatmul.bf16.gmra.mxu0 %v9227_v26  ;;  %v5048_v31 = vadd.f32 %v5047_v6, %v5015_v29  ;;  %5309 = vmatpush.bf16.msrb.mxu1 %v3071_v17  ;;  %v2096_v9 = vcvt.s32.f32 %v1072_v51  ;;  %v1192_v29 = vunpack.c.1.s8 %v568_v52  ;;  %v952_v51 = vunpack.c.3.s8 %v504_v22 }
 0x4c9   : > { %5193 = vmatmul.bf16.gmra.mxu1 %v9231_v38  ;;  %5500 = vmatpush.bf16.msra.mxu3 %v3000_v14 }
 0x4ca   : > { %5226 = vmatmul.bf16.gmra.mxu2 %v9233_v41  ;;  %v2936_v56 = vpack.c.bf16 %v2104_v0, %v2096_v9  ;;  %v1976_v60 = vcvt.s32.f32 %v952_v51  ;;  %v2216_v14 = vcvt.s32.f32 %v1192_v29 }
 0x4cb   : > { %5259 = vmatmul.bf16.gmra.mxu3 %v9235_v42 }
 0x4cc   : > { %5467 = vmatpush.bf16.msra.mxu2 %v2936_v56 }
 0x4cd   : > { %v5080_v7 = vpop.f32.mrf.mxu2  ;;  %v5016_v8 = vpop.f32.mrf.mxu0 }
 0x4ce   : > { %v5081_v34 = vadd.f32 %v5080_v7, %v5048_v31  ;;  %v5113_v11 = vpop.f32.mrf.mxu3  ;;  %v5017_v21 = vadd.f32 %v5016_v8, %v9940_v1  ;;  %v5049_v15 = vpop.f32.mrf.mxu1  ;;  %v1184_v1 = vunpack.c.0.s8 %v568_v52  ;;  %v816_v31 = vunpack.c.2.s8 %v472_v3 }
 0x4cf   : > { %v824_v7 = vunpack.c.3.s8 %v472_v3  ;;  %v944_v8 = vunpack.c.2.s8 %v504_v22 }
 0x4d0   : > { %v5114_v12 = vadd.f32 %v5113_v11, %v5081_v34  ;;  %v5050_v62 = vadd.f32 %v5049_v15, %v5017_v21  ;;  %v2080_v11 = vcvt.s32.f32 %v1056_v57  ;;  %v2088_v21 = vcvt.s32.f32 %v1064_v27  ;;  %v3270_v15 = vld [vmem:[#allocation2 + $0x110] sm:$0xff] }
 0x4d1   : > { %v1848_v9 = vcvt.s32.f32 %v824_v7  ;;  %v1968_v0 = vcvt.s32.f32 %v944_v8  ;;  %v2208_v48 = vcvt.s32.f32 %v1184_v1  ;;  %v800_v57 = vunpack.c.0.s8 %v472_v3 }
 0x4d2   : > { %v5670_v6 = vadd.f32 %v5114_v12, %v3262_v4  ;;  %v1840_v4 = vcvt.s32.f32 %v816_v31  ;;  %v2928_v52 = vpack.c.bf16 %v2088_v21, %v2080_v11  ;;  %v808_v27 = vunpack.c.1.s8 %v472_v3 }
 0x4d3   : > { %v2872_v56 = vpack.c.bf16 %v1976_v60, %v1968_v0  ;;  %v936_v1 = vunpack.c.1.s8 %v504_v22  ;;  %v1824_v51 = vcvt.s32.f32 %v800_v57  ;;  %v560_v0 = vld [vmem:[%s9013_s10 + $0x3b8] sm:$0xff] }
 0x4d4   : > { %5742 = vst [vmem:[#allocation2 + $0xf0] sm:$0xff] %v5670_v6  ;;  %v2808_v12 = vpack.c.bf16 %v1848_v9, %v1840_v4  ;;  %5468 = vmatpush.bf16.msra.mxu2 %v2928_v52  ;;  %v528_v9 = vld [vmem:[%s9013_s10 + $0x2b8] sm:$0xff] }
 0x4d5   : > { %v5082_v63 = vpop.f32.mrf.mxu2  ;;  %v5019_v17 = vpop.f32.mrf.mxu0  ;;  %5434 = vmatpush.bf16.msra.mxu1 %v2872_v56  ;;  %v464_v60 = vld [vmem:[%s9013_s10 + $0xb8] sm:$0xff]  ;;  %v1168_v56 = vunpack.c.2.s8 %v560_v0 }
 0x4d6   : > { %v5083_v28 = vadd.f32 %v5082_v63, %v5050_v62  ;;  %v5115_v61 = vpop.f32.mrf.mxu3  ;;  %v5020_v20 = vadd.f32 %v5019_v17, %v9946_v59  ;;  %v5052_v34 = vpop.f32.mrf.mxu1  ;;  %5401 = vmatpush.bf16.msra.mxu0 %v2808_v12  ;;  %v2992_v62 = vpack.c.bf16 %v2216_v14, %v2208_v48  ;;  %v928_v63 = vunpack.c.0.s8 %v504_v22 }
 0x4d7   : > { %v1040_v48 = vunpack.c.2.s8 %v528_v9  ;;  %v1048_v12 = vunpack.c.3.s8 %v528_v9  ;;  %v1176_v14 = vunpack.c.3.s8 %v560_v0  ;;  %v784_v57 = vunpack.c.2.s8 %v464_v60 }
 0x4d8   : > { %v5116_v10 = vadd.f32 %v5115_v61, %v5083_v28  ;;  %5165 = vmatmul.bf16.gmra.mxu0 %v9247_v23  ;;  %v5053_v59 = vadd.f32 %v5052_v34, %v5020_v20  ;;  %5501 = vmatpush.bf16.msra.mxu3 %v2992_v62  ;;  %v1832_v28 = vcvt.s32.f32 %v808_v27  ;;  %v3278_v61 = vld [vmem:[#allocation2 + $0x138] sm:$0xff]  ;;  %v1952_v20 = vcvt.s32.f32 %v928_v63 }
 0x4d9   : > { %5198 = vmatmul.bf16.gmra.mxu1 %v9249_v37  ;;  %v1960_v34 = vcvt.s32.f32 %v936_v1  ;;  %v792_v27 = vunpack.c.3.s8 %v464_v60  ;;  %v10011_v63 = vld [vmem:[%s9013_s10 + $0x1b8] sm:$0xff]  ;;  %v3286_v1 = vld [vmem:[#allocation2 + $0x220] sm:$0xff] }
 0x4da   : > { %v5678_v6 = vadd.f32 %v5116_v10, %v3270_v15  ;;  %5231 = vmatmul.bf16.gmra.mxu2 %v9251_v49  ;;  %v2800_v3 = vpack.c.bf16 %v1832_v28, %v1824_v51  ;;  %v1808_v51 = vcvt.s32.f32 %v784_v57 }
 0x4db   : > { %5264 = vmatmul.bf16.gmra.mxu3 %v9253_v50  ;;  %v2864_v15 = vpack.c.bf16 %v1960_v34, %v1952_v20  ;;  %v1816_v28 = vcvt.s32.f32 %v792_v27  ;;  %v920_v34 = vunpack.c.3.s8 %v10011_v63 }
 0x4dc   : > { %5750 = vst [vmem:[#allocation2 + $0x110] sm:$0xff] %v5678_v6  ;;  %5402 = vmatpush.bf16.msra.mxu0 %v2800_v3 }
 0x4dd   : > { %v5085_v17 = vpop.f32.mrf.mxu2  ;;  %v5021_v31 = vpop.f32.mrf.mxu0  ;;  %5435 = vmatpush.bf16.msra.mxu1 %v2864_v15 }
 0x4de   : > { %v5086_v7 = vadd.f32 %v5085_v17, %v5053_v59  ;;  %v5118_v29 = vpop.f32.mrf.mxu3  ;;  %v5054_v8 = vpop.f32.mrf.mxu1  ;;  %v5022_v21 = vadd.f32 %v5021_v31, %v9956_v2  ;;  %v2064_v17 = vcvt.s32.f32 %v1040_v48  ;;  %v2072_v31 = vcvt.s32.f32 %v1048_v12 }
 0x4df   : > { %v1160_v48 = vunpack.c.1.s8 %v560_v0 }
 0x4e0   : > { %v5119_v11 = vadd.f32 %v5118_v29, %v5086_v7  ;;  %v5055_v4 = vadd.f32 %v5054_v8, %v5022_v21  ;;  %v2192_v7 = vcvt.s32.f32 %v1168_v56  ;;  %v2200_v29 = vcvt.s32.f32 %v1176_v14 }
 0x4e1   : > { %v2792_v21 = vpack.c.bf16 %v1816_v28, %v1808_v51 }
 0x4e2   : > { %v5686_v22 = vadd.f32 %v5119_v11, %v3278_v61  ;;  %v2920_v61 = vpack.c.bf16 %v2072_v31, %v2064_v17  ;;  %v2984_v20 = vpack.c.bf16 %v2200_v29, %v2192_v7  ;;  %v3294_v17 = vld [vmem:[#allocation2 + $0xe0] sm:$0xff]  ;;  %v2184_v7 = vcvt.s32.f32 %v1160_v48 }
 0x4e3   : > { %5403 = vmatpush.bf16.msra.mxu0 %v2792_v21  ;;  %v552_v21 = vld [vmem:[%s9013_s10 + $0x378] sm:$0xff] }
 0x4e4   : > { %5758 = vst [vmem:[#allocation2 + $0x138] sm:$0xff] %v5686_v22  ;;  %5469 = vmatpush.bf16.msra.mxu2 %v2920_v61  ;;  %v1944_v22 = vcvt.s32.f32 %v920_v34  ;;  %5502 = vmatpush.bf16.msra.mxu3 %v2984_v20  ;;  %v904_v34 = vunpack.c.1.s8 %v10011_v63 }
 0x4e5   : > { %v5087_v10 = vpop.f32.mrf.mxu2  ;;  %v5024_v52 = vpop.f32.mrf.mxu0 }
 0x4e6   : > { %v5088_v6 = vadd.f32 %v5087_v10, %v5055_v4  ;;  %v5120_v59 = vpop.f32.mrf.mxu3  ;;  %v5025_v2 = vadd.f32 %v5024_v52, %v9962_v24  ;;  %v5057_v62 = vpop.f32.mrf.mxu1  ;;  %v912_v24 = vunpack.c.2.s8 %v10011_v63  ;;  %v1024_v4 = vunpack.c.0.s8 %v528_v9 }
 0x4e7   : > { %v1032_v10 = vunpack.c.1.s8 %v528_v9  ;;  %v1152_v52 = vunpack.c.0.s8 %v560_v0 }
 0x4e8   : > { %v5121_v8 = vadd.f32 %v5120_v59, %v5088_v6  ;;  %5277 = vmatmul.bf16.vlgmr.msrb.gmra.mxu0 %v9277_v36  ;;  %v5058_v3 = vadd.f32 %v5057_v62, %v5025_v2  ;;  %v1936_v15 = vcvt.s32.f32 %v912_v24  ;;  %v768_v6 = vunpack.c.0.s8 %v464_v60 }
 0x4e9   : > { %5310 = vmatmul.bf16.vlgmr.msrb.gmra.mxu1 %v9281_v40  ;;  %v776_v59 = vunpack.c.1.s8 %v464_v60  ;;  %v2048_v62 = vcvt.s32.f32 %v1024_v4  ;;  %v2176_v31 = vcvt.s32.f32 %v1152_v52  ;;  %v896_v24 = vunpack.c.0.s8 %v10011_v63 }
 0x4ea   : > { %v5694_v11 = vadd.f32 %v5121_v8, %v3286_v1  ;;  %5343 = vmatmul.bf16.vlgmr.msrb.gmra.mxu2 %v9283_v45  ;;  %v2856_v14 = vpack.c.bf16 %v1944_v22, %v1936_v15  ;;  %v2056_v1 = vcvt.s32.f32 %v1032_v10  ;;  %v1792_v29 = vcvt.s32.f32 %v768_v6  ;;  %v456_v6 = vld [vmem:[%s9013_s10 + $0x78] sm:$0xff] }
 0x4eb   : > { %5376 = vmatmul.bf16.vlgmr.msrb.gmra.mxu3 %v9285_v46  ;;  %v1800_v9 = vcvt.s32.f32 %v776_v59  ;;  %v2976_v28 = vpack.c.bf16 %v2184_v7, %v2176_v31  ;;  %v1136_v4 = vunpack.c.2.s8 %v552_v21  ;;  %v1144_v10 = vunpack.c.3.s8 %v552_v21  ;;  %v3302_v59 = vld [vmem:[#allocation2 + $0x100] sm:$0xff] }
 0x4ec   : > { %5766 = vst [vmem:[#allocation2 + $0x220] sm:$0xff] %v5694_v11  ;;  %5436 = vmatpush.bf16.msra.mxu1 %v2856_v14  ;;  %v2912_v51 = vpack.c.bf16 %v2056_v1, %v2048_v62  ;;  %v520_v11 = vld [vmem:[%s9013_s10 + $0x278] sm:$0xff]  ;;  %v1928_v14 = vcvt.s32.f32 %v904_v34  ;;  %v752_v7 = vunpack.c.2.s8 %v456_v6 }
 0x4ed   : > { %v5090_v12 = vpop.f32.mrf.mxu2  ;;  %v5026_v56 = vpop.f32.mrf.mxu0  ;;  %v2784_v61 = vpack.c.bf16 %v1800_v9, %v1792_v29  ;;  %5503 = vmatpush.bf16.msra.mxu3 %v2976_v28  ;;  %v1016_v22 = vunpack.c.3.s8 %v520_v11  ;;  %v2168_v63 = vcvt.s32.f32 %v1144_v10  ;;  %v488_v62 = vld [vmem:[%s9013_s10 + $0x178] sm:$0xff] }
 0x4ee   : > { %v5091_v57 = vadd.f32 %v5090_v12, %v5058_v3  ;;  %v5123_v27 = vpop.f32.mrf.mxu3  ;;  %v5059_v2 = vpop.f32.mrf.mxu1  ;;  %v5027_v0 = vadd.f32 %v5026_v56, %v9969_v53  ;;  %5470 = vmatpush.bf16.msra.mxu2 %v2912_v51  ;;  %v1008_v53 = vunpack.c.2.s8 %v520_v11  ;;  %v1920_v56 = vcvt.s32.f32 %v896_v24 }
 0x4ef   : > { %5404 = vmatpush.bf16.msra.mxu0 %v2784_v61  ;;  %v1776_v28 = vcvt.s32.f32 %v752_v7  ;;  %v888_v61 = vunpack.c.3.s8 %v488_v62  ;;  %v1000_v24 = vunpack.c.1.s8 %v520_v11  ;;  %v864_v7 = vunpack.c.0.s8 %v488_v62 }
 0x4f0   : > { %v5124_v8 = vadd.f32 %v5123_v27, %v5091_v57  ;;  %v5060_v20 = vadd.f32 %v5059_v2, %v5027_v0  ;;  %v2032_v57 = vcvt.s32.f32 %v1008_v53  ;;  %v2040_v27 = vcvt.s32.f32 %v1016_v22 }
 0x4f1   : > { %v2160_v2 = vcvt.s32.f32 %v1136_v4  ;;  %v2848_v31 = vpack.c.bf16 %v1928_v14, %v1920_v56  ;;  %v880_v0 = vunpack.c.2.s8 %v488_v62  ;;  %v1128_v53 = vunpack.c.1.s8 %v552_v21 }
 0x4f2   : > { %v5702_v60 = vadd.f32 %v5124_v8, %v3294_v17  ;;  %v2904_v29 = vpack.c.bf16 %v2040_v27, %v2032_v57  ;;  %v760_v8 = vunpack.c.3.s8 %v456_v6 }
 0x4f3   : > { %v2968_v9 = vpack.c.bf16 %v2168_v63, %v2160_v2  ;;  %5437 = vmatpush.bf16.msra.mxu1 %v2848_v31  ;;  %v3310_v2 = vld [vmem:[#allocation2 + $0x228] sm:$0xff] }
 0x4f4   : > { %5774 = vst [vmem:[#allocation2 + $0xe0] sm:$0xff] %v5702_v60  ;;  %5471 = vmatpush.bf16.msra.mxu2 %v2904_v29  ;;  %v1904_v60 = vcvt.s32.f32 %v880_v0  ;;  %v872_v29 = vunpack.c.1.s8 %v488_v62 }
 0x4f5   : > { %v5092_v3 = vpop.f32.mrf.mxu2  ;;  %v5029_v15 = vpop.f32.mrf.mxu0  ;;  %5504 = vmatpush.bf16.msra.mxu3 %v2968_v9 }
 0x4f6   : > { %v5093_v52 = vadd.f32 %v5092_v3, %v5060_v20  ;;  %v5125_v48 = vpop.f32.mrf.mxu3  ;;  %v5062_v12 = vpop.f32.mrf.mxu1  ;;  %v5030_v17 = vadd.f32 %v5029_v15, %v9976_v55  ;;  %v1784_v55 = vcvt.s32.f32 %v760_v8  ;;  %v992_v20 = vunpack.c.0.s8 %v520_v11 }
 0x4f7   : > { %v1912_v3 = vcvt.s32.f32 %v888_v61  ;;  %v1120_v15 = vunpack.c.0.s8 %v552_v21  ;;  %v2152_v11 = vcvt.s32.f32 %v1128_v53  ;;  %v744_v21 = vunpack.c.1.s8 %v456_v6  ;;  %v512_v53 = vld [vmem:[%s9013_s10 + $0x238] sm:$0xff] }
 0x4f8   : > { %v5126_v1 = vadd.f32 %v5125_v48, %v5093_v52  ;;  %5282 = vmatmul.bf16.gmra.mxu0 %v9308_v33  ;;  %v5063_v34 = vadd.f32 %v5062_v12, %v5030_v17  ;;  %v2776_v10 = vpack.c.bf16 %v1784_v55, %v1776_v28  ;;  %v2016_v52 = vcvt.s32.f32 %v992_v20 }
 0x4f9   : > { %5315 = vmatmul.bf16.gmra.mxu1 %v9312_v35  ;;  %v2024_v48 = vcvt.s32.f32 %v1000_v24  ;;  %v2840_v57 = vpack.c.bf16 %v1912_v3, %v1904_v60  ;;  %v2144_v27 = vcvt.s32.f32 %v1120_v15  ;;  %v736_v17 = vunpack.c.0.s8 %v456_v6  ;;  %v3318_v3 = vld [vmem:[#allocation2 + $0x1d0] sm:$0xff] }
 0x4fa   : > { %v5710_v51 = vadd.f32 %v5126_v1, %v3302_v59  ;;  %5348 = vmatmul.bf16.gmra.mxu2 %v9314_v43  ;;  %5405 = vmatpush.bf16.msra.mxu0 %v2776_v10  ;;  %v1768_v0 = vcvt.s32.f32 %v744_v21  ;;  %v1896_v28 = vcvt.s32.f32 %v872_v29  ;;  %v976_v10 = vunpack.c.2.s8 %v512_v53 }
 0x4fb   : > { %5381 = vmatmul.bf16.gmra.mxu3 %v9316_v44  ;;  %v2896_v63 = vpack.c.bf16 %v2024_v48, %v2016_v52  ;;  %5438 = vmatpush.bf16.msra.mxu1 %v2840_v57  ;;  %v2960_v31 = vpack.c.bf16 %v2152_v11, %v2144_v27  ;;  %v1760_v8 = vcvt.s32.f32 %v736_v17  ;;  %v984_v52 = vunpack.c.3.s8 %v512_v53 }
 0x4fc   : > { %5782 = vst [vmem:[#allocation2 + $0x100] sm:$0xff] %v5710_v51  ;;  %v1888_v51 = vcvt.s32.f32 %v864_v7  ;;  %v2000_v27 = vcvt.s32.f32 %v976_v10 }
 0x4fd   : > { %v5095_v22 = vpop.f32.mrf.mxu2  ;;  %v5031_v4 = vpop.f32.mrf.mxu0  ;;  %5472 = vmatpush.bf16.msra.mxu2 %v2896_v63  ;;  %5505 = vmatpush.bf16.msra.mxu3 %v2960_v31  ;;  %v2768_v55 = vpack.c.bf16 %v1768_v0, %v1760_v8 }
 0x4fe   : > { %v5096_v56 = vadd.f32 %v5095_v22, %v5063_v34  ;;  %v5128_v14 = vpop.f32.mrf.mxu3  ;;  %v5064_v59 = vpop.f32.mrf.mxu1  ;;  %v5032_v12 = vadd.f32 %v5031_v4, %v9978_v58  ;;  %v2832_v20 = vpack.c.bf16 %v1896_v28, %v1888_v51  ;;  %v544_v22 = vld [vmem:[%s9013_s10 + $0x338] sm:$0xff] }
 0x4ff   : > { %5406 = vmatpush.bf16.msra.mxu0 %v2768_v55  ;;  %v448_v4 = vld [vmem:[%s9013_s10 + $0x38] sm:$0xff]  ;;  %v1104_v48 = vunpack.c.2.s8 %v544_v22 }
 0x500   : > { %v5129_v1 = vadd.f32 %v5128_v14, %v5096_v56  ;;  %v5065_v61 = vadd.f32 %v5064_v59, %v5032_v12  ;;  %5439 = vmatpush.bf16.msra.mxu1 %v2832_v20  ;;  %v1112_v56 = vunpack.c.3.s8 %v544_v22  ;;  %v728_v57 = vunpack.c.3.s8 %v448_v4 }
 0x501   : > { %v2128_v63 = vcvt.s32.f32 %v1104_v48  ;;  %v712_v10 = vunpack.c.1.s8 %v448_v4 }
 0x502   : > { %v5718_v9 = vadd.f32 %v5129_v1, %v3310_v2  ;;  %v2008_v2 = vcvt.s32.f32 %v984_v52  ;;  %v2136_v11 = vcvt.s32.f32 %v1112_v56  ;;  %v480_v1 = vld [vmem:[%s9013_s10 + $0x138] sm:$0xff]  ;;  %v1752_v17 = vcvt.s32.f32 %v728_v57 }
 0x503   : > { %v848_v21 = vunpack.c.2.s8 %v480_v1  ;;  %v856_v31 = vunpack.c.3.s8 %v480_v1 }
 0x504   : > { %5790 = vst [vmem:[#allocation2 + $0x228] sm:$0xff] %v5718_v9  ;;  %v2888_v9 = vpack.c.bf16 %v2008_v2, %v2000_v27  ;;  %v2952_v8 = vpack.c.bf16 %v2136_v11, %v2128_v63  ;;  %v1736_v27 = vcvt.s32.f32 %v712_v10  ;;  %v840_v63 = vunpack.c.1.s8 %v480_v1 }
 0x505   : > { %v5097_v58 = vpop.f32.mrf.mxu2  ;;  %v5034_v60 = vpop.f32.mrf.mxu0  ;;  %v1872_v55 = vcvt.s32.f32 %v848_v21 }
 0x506   : > { %v5098_v6 = vadd.f32 %v5097_v58, %v5065_v61  ;;  %v5130_v24 = vpop.f32.mrf.mxu3  ;;  %v5035_v34 = vadd.f32 %v5034_v60, %v9988_v47  ;;  %v5067_v62 = vpop.f32.mrf.mxu1  ;;  %v720_v47 = vunpack.c.2.s8 %v448_v4  ;;  %v1880_v58 = vcvt.s32.f32 %v856_v31  ;;  %v3326_v60 = vld [vmem:[#allocation2 + $0xa8] sm:$0x7]  ;;  %5473 = vmatpush.bf16.msra.mxu2 %v2888_v9  ;;  %5506 = vmatpush.bf16.msra.mxu3 %v2952_v8  ;;  %v696_v9 = vld [vmem:[%s9013_s10 + $0x7f8] sm:$0xff] }
 0x507   : > { %v1864_v31 = vcvt.s32.f32 %v840_v63 }
 0x508   : > { %v5131_v15 = vadd.f32 %v5130_v24, %v5098_v6  ;;  %5287 = vmatmul.bf16.gmra.mxu0 %v9331_v5  ;;  %v5068_v59 = vadd.f32 %v5067_v62, %v5035_v34  ;;  %v1744_v12 = vcvt.s32.f32 %v720_v47  ;;  %v2824_v6 = vpack.c.bf16 %v1880_v58, %v1872_v55 }
 0x509   : > { %5320 = vmatmul.bf16.gmra.mxu1 %v9335_v39  ;;  %v960_v24 = vunpack.c.0.s8 %v512_v53  ;;  %v968_v34 = vunpack.c.1.s8 %v512_v53  ;;  %v1088_v62 = vunpack.c.0.s8 %v544_v22 }
 0x50a   : > { %v5726_v14 = vadd.f32 %v5131_v15, %v3318_v3  ;;  %5353 = vmatmul.bf16.gmra.mxu2 %v10792_v18  ;;  %v2760_v61 = vpack.c.bf16 %v1752_v17, %v1744_v12  ;;  %v1096_v3 = vunpack.c.1.s8 %v544_v22  ;;  %v704_v15 = vunpack.c.0.s8 %v448_v4  ;;  %5440 = vmatpush.bf16.msra.mxu1 %v2824_v6 }
 0x50b   : > { %5386 = vmatmul.bf16.gmra.mxu3 %v10793_v30  ;;  %v1984_v48 = vcvt.s32.f32 %v960_v24  ;;  %v1992_v56 = vcvt.s32.f32 %v968_v34 }
 0x50c   : > { %5798 = vst [vmem:[#allocation2 + $0x1d0] sm:$0xff] %v5726_v14  ;;  %5407 = vmatpush.bf16.msra.mxu0 %v2760_v61  ;;  %v832_v14 = vunpack.c.0.s8 %v480_v1  ;;  %v2120_v47 = vcvt.s32.f32 %v1096_v3  ;;  %v1728_v57 = vcvt.s32.f32 %v704_v15  ;;  %v664_v1 = vld [vmem:[%s9013_s10 + $0x6f8] sm:$0xff] }
 0x50d   : > { %v5100_v7 = vpop.f32.mrf.mxu2  ;;  %v5036_v29 = vpop.f32.mrf.mxu0  ;;  %v2880_v2 = vpack.c.bf16 %v1992_v56, %v1984_v48  ;;  %v1584_v8 = vunpack.c.2.s8 %v664_v1  ;;  %v632_v48 = vld [vmem:[%s9013_s10 + $0x5f8] sm:$0xff]  ;;  %v1568_v56 = vunpack.c.0.s8 %v664_v1 }
 0x50e   : > { %v5101_v0 = vadd.f32 %v5100_v7, %v5068_v59  ;;  %v5133_v51 = vpop.f32.mrf.mxu3  ;;  %v5069_v28 = vpop.f32.mrf.mxu1  ;;  %v2112_v59 = vcvt.s32.f32 %v1088_v62  ;;  %v1856_v11 = vcvt.s32.f32 %v832_v14  ;;  %v2752_v22 = vpack.c.bf16 %v1736_v27, %v1728_v57 }
 0x50f   : > { %5474 = vmatpush.bf16.msra.mxu2 %v2880_v2  ;;  %v1720_v28 = vunpack.c.3.s8 %v696_v9  ;;  %v2608_v6 = vcvt.s32.f32 %v1584_v8  ;;  %v1576_v14 = vunpack.c.1.s8 %v664_v1  ;;  %v1456_v27 = vunpack.c.2.s8 %v632_v48 }
 0x510   : > { %v5134_v20 = vadd.f32 %v5133_v51, %v5101_v0  ;;  %v2944_v53 = vpack.c.bf16 %v2120_v47, %v2112_v59  ;;  %5408 = vmatpush.bf16.msra.mxu0 %v2752_v22  ;;  %v2816_v29 = vpack.c.bf16 %v1864_v31, %v1856_v11  ;;  %v1592_v0 = vunpack.c.3.s8 %v664_v1 }
 0x511   : > { %v1712_v51 = vunpack.c.2.s8 %v696_v9  ;;  %v2744_v3 = vcvt.s32.f32 %v1720_v28  ;;  %v1464_v2 = vunpack.c.3.s8 %v632_v48  ;;  %v2592_v63 = vcvt.s32.f32 %v1568_v56 }
 0x512   : > { %v5734_v52 = vadd.f32 %v5134_v20, %v3326_v60  ;;  %5507 = vmatpush.bf16.msra.mxu3 %v2944_v53  ;;  %5441 = vmatpush.bf16.msra.mxu1 %v2816_v29  ;;  %v2616_v24 = vcvt.s32.f32 %v1592_v0  ;;  %v2600_v11 = vcvt.s32.f32 %v1576_v14  ;;  %v2480_v22 = vcvt.s32.f32 %v1456_v27  ;;  %v10863_v14 = vld [vmem:[#allocation42_spill] sm:$0xff] }
 0x513   : > { %v2736_v34 = vcvt.s32.f32 %v1712_v51 }
 0x514   : > { %5806 = vst [vmem:[#allocation2 + $0xa8] sm:$0x7] %v5734_v52  ;;  %v3192_v10 = vpack.c.bf16 %v2616_v24, %v2608_v6  ;;  %v600_v52 = vld [vmem:[%s9013_s10 + $0x4f8] sm:$0xff]  ;;  %v3184_v31 = vpack.c.bf16 %v2600_v11, %v2592_v63  ;;  %v1440_v24 = vunpack.c.0.s8 %v632_v48 }
 0x515   : > { %v5102_v12 = vpop.f32.mrf.mxu2  ;;  %v5146_v17 = vpop.f32.mrf.mxu0  ;;  %v3256_v59 = vpack.c.bf16 %v2744_v3, %v2736_v34  ;;  %v1328_v47 = vunpack.c.2.s8 %v600_v52  ;;  %v1336_v57 = vunpack.c.3.s8 %v600_v52  ;;  %v1320_v6 = vunpack.c.1.s8 %v600_v52 }
 0x516   : > { %v5135_v4 = vpop.f32.mrf.mxu3  ;;  %v5179_v21 = vpop.f32.mrf.mxu1  ;;  %5599 = vmatpush.bf16.msrb.mxu2 %v3192_v10  ;;  %v1696_v12 = vunpack.c.0.s8 %v696_v9  ;;  %v1448_v34 = vunpack.c.1.s8 %v632_v48  ;;  %v2464_v56 = vcvt.s32.f32 %v1440_v24 }
 0x517   : > { %v5180_v7 = vadd.f32 %v5179_v21, %v5146_v17  ;;  %5632 = vmatpush.bf16.msrb.mxu3 %v3256_v59  ;;  %v2352_v17 = vcvt.s32.f32 %v1328_v47  ;;  %v2360_v53 = vcvt.s32.f32 %v1336_v57  ;;  %v1704_v4 = vunpack.c.1.s8 %v696_v9 }
 0x518   : > { %5292 = vmatmul.bf16.gmra.mxu0 %v10794_v19  ;;  %v2488_v21 = vcvt.s32.f32 %v1464_v2  ;;  %v1312_v9 = vunpack.c.0.s8 %v600_v52  ;;  %v2344_v10 = vcvt.s32.f32 %v1320_v6  ;;  %v2472_v59 = vcvt.s32.f32 %v1448_v34 }
 0x519   : > { %5325 = vmatmul.bf16.gmra.mxu1 %v10795_v32  ;;  %v3064_v1 = vpack.c.bf16 %v2360_v53, %v2352_v17  ;;  %v2728_v0 = vcvt.s32.f32 %v1704_v4  ;;  %v656_v17 = vld [vmem:[%s9013_s10 + $0x6b8] sm:$0xff] }
 0x51a   : > { %5358 = vmatmul.bf16.gmra.mxu2 %v10806_v16  ;;  %v2336_v3 = vcvt.s32.f32 %v1312_v9  ;;  %v3120_v52 = vpack.c.bf16 %v2472_v59, %v2464_v56  ;;  %v688_v53 = vld [vmem:[%s9013_s10 + $0x7b8] sm:$0xff]  ;;  %v1552_v4 = vunpack.c.2.s8 %v656_v17 }
 0x51b   : > { %5391 = vmatmul.bf16.gmra.mxu3 %v10807_v54  ;;  %5600 = vmatpush.bf16.msrb.mxu2 %v3184_v31  ;;  %v1680_v31 = vunpack.c.2.s8 %v688_v53 }
 0x51c   : > { %5533 = vmatpush.bf16.msrb.mxu0 %v3064_v1  ;;  %v3056_v47 = vpack.c.bf16 %v2344_v10, %v2336_v3 }
 0x51d   : > { %v5212_v61 = vpop.f32.mrf.mxu2  ;;  %v5148_v55 = vpop.f32.mrf.mxu0 }
 0x51e   : > { %v5213_v58 = vadd.f32 %v5212_v61, %v5180_v7  ;;  %v5245_v60 = vpop.f32.mrf.mxu3  ;;  %v5181_v20 = vpop.f32.mrf.mxu1  ;;  %v2720_v7 = vcvt.s32.f32 %v1696_v12 }
 0x51f   : > { %v5182_v62 = vadd.f32 %v5181_v20, %v5148_v55  ;;  %v3128_v55 = vpack.c.bf16 %v2488_v21, %v2480_v22  ;;  %v592_v22 = vld [vmem:[%s9013_s10 + $0x4b8] sm:$0xff]  ;;  %v1560_v21 = vunpack.c.3.s8 %v656_v17 }
 0x520   : > { %v10047_v15 = vadd.f32 %v5245_v60, %v5213_v58  ;;  %v3248_v60 = vpack.c.bf16 %v2728_v0, %v2720_v7  ;;  %5534 = vmatpush.bf16.msrb.mxu0 %v3056_v47  ;;  %v1688_v7 = vunpack.c.3.s8 %v688_v53  ;;  %v1304_v1 = vunpack.c.3.s8 %v592_v22 }
 0x521   : > { %5566 = vmatpush.bf16.msrb.mxu1 %v3128_v55  ;;  %v2704_v55 = vcvt.s32.f32 %v1680_v31  ;;  %v1664_v31 = vunpack.c.0.s8 %v688_v53 }
 0x522   : > { %5633 = vmatpush.bf16.msrb.mxu3 %v3248_v60  ;;  %v2328_v9 = vcvt.s32.f32 %v1304_v1 }
 0x525   : > { %v5214_v29 = vpop.f32.mrf.mxu2  ;;  %v5151_v8 = vpop.f32.mrf.mxu0  ;;  %5567 = vmatpush.bf16.msrb.mxu1 %v3120_v52 }
 0x526   : > { %v5215_v51 = vadd.f32 %v5214_v29, %v5182_v62  ;;  %v5247_v28 = vpop.f32.mrf.mxu3  ;;  %v5184_v61 = vpop.f32.mrf.mxu1  ;;  %v10862_v62 = vld [vmem:[#allocation41_spill] sm:$0xff]  ;;  %v10063_v29 = vld [vmem:[%s9013_s10 + $0x5b8] sm:$0xff] }
 0x527   : > { %v5185_v58 = vadd.f32 %v5184_v61, %v5151_v8  ;;  %v1296_v8 = vunpack.c.2.s8 %v592_v22  ;;  %v1424_v0 = vunpack.c.2.s8 %v10063_v29  ;;  %v2584_v61 = vcvt.s32.f32 %v1560_v21 }
 0x528   : > { %v10051_v20 = vadd.f32 %v5247_v28, %v5215_v51  ;;  %5297 = vmatmul.bf16.gmra.mxu0 %v10808_v13  ;;  %v1432_v51 = vunpack.c.3.s8 %v10063_v29  ;;  %v2576_v28 = vcvt.s32.f32 %v1552_v4  ;;  %v1536_v4 = vunpack.c.0.s8 %v656_v17 }
 0x529   : > { %5330 = vmatmul.bf16.gmra.mxu1 %v10809_v25  ;;  %v2320_v60 = vcvt.s32.f32 %v1296_v8  ;;  %v2448_v6 = vcvt.s32.f32 %v1424_v0  ;;  %v1544_v21 = vunpack.c.1.s8 %v656_v17  ;;  %v1672_v8 = vunpack.c.1.s8 %v688_v53 }
 0x52a   : > { %5363 = vmatmul.bf16.gmra.mxu2 %v10862_v62  ;;  %v2456_v24 = vcvt.s32.f32 %v1432_v51  ;;  %v3176_v10 = vpack.c.bf16 %v2584_v61, %v2576_v28  ;;  %v2560_v1 = vcvt.s32.f32 %v1536_v4  ;;  %v2688_v51 = vcvt.s32.f32 %v1664_v31  ;;  %v10867_v28 = vld [vmem:[#allocation24_spill] sm:$0xff] }
 0x52b   : > { %5396 = vmatmul.bf16.gmra.mxu3 %v10863_v14  ;;  %v2568_v0 = vcvt.s32.f32 %v1544_v21  ;;  %v2696_v61 = vcvt.s32.f32 %v1672_v8 }
 0x52c   : > { %v3112_v52 = vpack.c.bf16 %v2456_v24, %v2448_v6  ;;  %5601 = vmatpush.bf16.msrb.mxu2 %v3176_v10 }
 0x52d   : > { %v5217_v57 = vpop.f32.mrf.mxu2  ;;  %v5153_v27 = vpop.f32.mrf.mxu0  ;;  %v3232_v6 = vpack.c.bf16 %v2696_v61, %v2688_v51 }
 0x52e   : > { %v5218_v2 = vadd.f32 %v5217_v57, %v5185_v58  ;;  %v5250_v63 = vpop.f32.mrf.mxu3  ;;  %v5186_v11 = vpop.f32.mrf.mxu1  ;;  %v2712_v58 = vcvt.s32.f32 %v1688_v7  ;;  %5568 = vmatpush.bf16.msrb.mxu1 %v3112_v52  ;;  %v10865_v7 = vld [vmem:[#allocation22_spill] sm:$0xff]  ;;  %v680_v52 = vld [vmem:[%s9013_s10 + $0x778] sm:$0xff] }
 0x52f   : > { %v5187_v48 = vadd.f32 %v5186_v11, %v5153_v27  ;;  %v3048_v27 = vpack.c.bf16 %v2328_v9, %v2320_v60  ;;  %v10864_v11 = vld [vmem:[#allocation21_spill] sm:$0xff]  ;;  %v3168_v60 = vpack.c.bf16 %v2568_v0, %v2560_v1  ;;  %v1648_v21 = vunpack.c.2.s8 %v680_v52 }
 0x530   : > { %v10057_v12 = vadd.f32 %v5250_v63, %v5218_v2  ;;  %v3240_v56 = vpack.c.bf16 %v2712_v58, %v2704_v55  ;;  %v1280_v55 = vunpack.c.0.s8 %v592_v22  ;;  %v1288_v58 = vunpack.c.1.s8 %v592_v22 }
 0x531   : > { %5535 = vmatpush.bf16.msrb.mxu0 %v3048_v27  ;;  %5602 = vmatpush.bf16.msrb.mxu2 %v3168_v60  ;;  %v1416_v22 = vunpack.c.1.s8 %v10063_v29  ;;  %v648_v27 = vld [vmem:[%s9013_s10 + $0x678] sm:$0xff]  ;;  %v1656_v31 = vunpack.c.3.s8 %v680_v52  ;;  %v2672_v1 = vcvt.s32.f32 %v1648_v21 }
 0x532   : > { %5634 = vmatpush.bf16.msrb.mxu3 %v3240_v56  ;;  %v2304_v24 = vcvt.s32.f32 %v1280_v55  ;;  %v1528_v4 = vunpack.c.3.s8 %v648_v27  ;;  %v10871_v21 = vld [vmem:[#allocation28_spill] sm:$0xff] }
 0x533   : > { %v2680_v0 = vcvt.s32.f32 %v1656_v31 }
 0x535   : > { %v5219_v34 = vpop.f32.mrf.mxu2  ;;  %v5156_v3 = vpop.f32.mrf.mxu0 }
 0x536   : > { %v5220_v59 = vadd.f32 %v5219_v34, %v5187_v48  ;;  %v5252_v47 = vpop.f32.mrf.mxu3  ;;  %v5189_v57 = vpop.f32.mrf.mxu1  ;;  %v10866_v48 = vld [vmem:[#allocation23_spill] sm:$0xff]  ;;  %v2312_v34 = vcvt.s32.f32 %v1288_v58  ;;  %5635 = vmatpush.bf16.msrb.mxu3 %v3232_v6 }
 0x537   : > { %v5190_v2 = vadd.f32 %v5189_v57, %v5156_v3  ;;  %v1408_v57 = vunpack.c.0.s8 %v10063_v29  ;;  %v3224_v29 = vpack.c.bf16 %v2680_v0, %v2672_v1  ;;  %v1632_v1 = vunpack.c.0.s8 %v680_v52 }
 0x538   : > { %v10067_v63 = vadd.f32 %v5252_v47, %v5220_v59  ;;  %5409 = vmatmul.bf16.vlgmr.msra.gmra.mxu0 %v10864_v11  ;;  %v3040_v59 = vpack.c.bf16 %v2312_v34, %v2304_v24  ;;  %v1520_v11 = vunpack.c.2.s8 %v648_v27  ;;  %v1640_v0 = vunpack.c.1.s8 %v680_v52 }
 0x539   : > { %5442 = vmatmul.bf16.vlgmr.msra.gmra.mxu1 %v10865_v7  ;;  %v2440_v7 = vcvt.s32.f32 %v1416_v22 }
 0x53a   : > { %5475 = vmatmul.bf16.vlgmr.msra.gmra.mxu2 %v10866_v48  ;;  %5536 = vmatpush.bf16.msrb.mxu0 %v3040_v59  ;;  %v2544_v8 = vcvt.s32.f32 %v1520_v11  ;;  %v2552_v48 = vcvt.s32.f32 %v1528_v4  ;;  %v10869_v59 = vld [vmem:[#allocation26_spill] sm:$0xff]  ;;  %v10870_v4 = vld [vmem:[#allocation27_spill] sm:$0xff] }
 0x53b   : > { %5508 = vmatmul.bf16.vlgmr.msra.gmra.mxu3 %v10867_v28 }
 0x53c   : > { %v3160_v55 = vpack.c.bf16 %v2552_v48, %v2544_v8  ;;  %5636 = vmatpush.bf16.msrb.mxu3 %v3224_v29  ;;  %v1504_v8 = vunpack.c.0.s8 %v648_v27  ;;  %v1512_v48 = vunpack.c.1.s8 %v648_v27 }
 0x53d   : > { %v5222_v9 = vpop.f32.mrf.mxu2  ;;  %v5158_v17 = vpop.f32.mrf.mxu0 }
 0x53e   : > { %v5223_v3 = vadd.f32 %v5222_v9, %v5190_v2  ;;  %v5255_v53 = vpop.f32.mrf.mxu3  ;;  %v5191_v10 = vpop.f32.mrf.mxu1  ;;  %v2432_v2 = vcvt.s32.f32 %v1408_v57  ;;  %5603 = vmatpush.bf16.msrb.mxu2 %v3160_v55  ;;  %v2528_v55 = vcvt.s32.f32 %v1504_v8 }
 0x53f   : > { %v5192_v56 = vadd.f32 %v5191_v10, %v5158_v17  ;;  %v584_v17 = vld [vmem:[%s9013_s10 + $0x478] sm:$0xff] }
 0x540   : > { %v10073_v47 = vadd.f32 %v5255_v53, %v5223_v3  ;;  %v3104_v51 = vpack.c.bf16 %v2440_v7, %v2432_v2  ;;  %v1264_v24 = vunpack.c.2.s8 %v584_v17  ;;  %v1272_v34 = vunpack.c.3.s8 %v584_v17  ;;  %v10868_v53 = vld [vmem:[#allocation25_spill] sm:$0xff]  ;;  %v616_v10 = vld [vmem:[%s9013_s10 + $0x578] sm:$0xff] }
 0x541   : > { %v1392_v11 = vunpack.c.2.s8 %v616_v10  ;;  %v1248_v27 = vunpack.c.0.s8 %v584_v17  ;;  %v1256_v52 = vunpack.c.1.s8 %v584_v17 }
 0x542   : > { %5569 = vmatpush.bf16.msrb.mxu1 %v3104_v51  ;;  %v2288_v57 = vcvt.s32.f32 %v1264_v24  ;;  %v2296_v22 = vcvt.s32.f32 %v1272_v34  ;;  %v2656_v24 = vcvt.s32.f32 %v1632_v1  ;;  %v2664_v34 = vcvt.s32.f32 %v1640_v0 }
 0x543   : > { %v2416_v2 = vcvt.s32.f32 %v1392_v11  ;;  %v1376_v11 = vunpack.c.0.s8 %v616_v10  ;;  %v2280_v8 = vcvt.s32.f32 %v1256_v52  ;;  %v608_v52 = vld [vmem:[%s9013_s10 + $0x538] sm:$0xff] }
 0x544   : > { %v3032_v31 = vpack.c.bf16 %v2296_v22, %v2288_v57  ;;  %v3216_v22 = vpack.c.bf16 %v2664_v34, %v2656_v24 }
 0x545   : > { %v5224_v28 = vpop.f32.mrf.mxu2  ;;  %v5161_v61 = vpop.f32.mrf.mxu0 }
 0x546   : > { %v5225_v58 = vadd.f32 %v5224_v28, %v5192_v56  ;;  %v5257_v60 = vpop.f32.mrf.mxu3  ;;  %v5194_v9 = vpop.f32.mrf.mxu1  ;;  %v1400_v56 = vunpack.c.3.s8 %v616_v10  ;;  %5537 = vmatpush.bf16.msrb.mxu0 %v3032_v31  ;;  %5637 = vmatpush.bf16.msrb.mxu3 %v3216_v22 }
 0x547   : > { %v5195_v6 = vadd.f32 %v5194_v9, %v5161_v61  ;;  %v2536_v9 = vcvt.s32.f32 %v1512_v48  ;;  %v2400_v48 = vcvt.s32.f32 %v1376_v11 }
 0x548   : > { %v10080_v3 = vadd.f32 %v5257_v60, %v5225_v58  ;;  %5414 = vmatmul.bf16.gmra.mxu0 %v10868_v53  ;;  %v2424_v7 = vcvt.s32.f32 %v1400_v56  ;;  %v1384_v56 = vunpack.c.1.s8 %v616_v10 }
 0x549   : > { %5447 = vmatmul.bf16.gmra.mxu1 %v10869_v59  ;;  %v3152_v57 = vpack.c.bf16 %v2536_v9, %v2528_v55  ;;  %v10874_v55 = vld [vmem:[#allocation31_spill] sm:$0xff] }
 0x54a   : > { %5480 = vmatmul.bf16.gmra.mxu2 %v10870_v4  ;;  %v3096_v61 = vpack.c.bf16 %v2424_v7, %v2416_v2  ;;  %v2272_v7 = vcvt.s32.f32 %v1248_v27  ;;  %v2408_v0 = vcvt.s32.f32 %v1384_v56  ;;  %v576_v9 = vld [vmem:[%s9013_s10 + $0x438] sm:$0xff] }
 0x54b   : > { %5513 = vmatmul.bf16.gmra.mxu3 %v10871_v21  ;;  %5604 = vmatpush.bf16.msrb.mxu2 %v3152_v57 }
 0x54c   : > { %5570 = vmatpush.bf16.msrb.mxu1 %v3096_v61  ;;  %v3024_v17 = vpack.c.bf16 %v2280_v8, %v2272_v7  ;;  %v10873_v61 = vld [vmem:[#allocation30_spill] sm:$0xff]  ;;  %v3088_v10 = vpack.c.bf16 %v2408_v0, %v2400_v48 }
 0x54d   : > { %v5227_v51 = vpop.f32.mrf.mxu2  ;;  %v5163_v28 = vpop.f32.mrf.mxu0 }
 0x54e   : > { %v5228_v29 = vadd.f32 %v5227_v51, %v5195_v6  ;;  %v5260_v58 = vpop.f32.mrf.mxu3  ;;  %v5196_v60 = vpop.f32.mrf.mxu1  ;;  %5538 = vmatpush.bf16.msrb.mxu0 %v3024_v17 }
 0x54f   : > { %v5197_v53 = vadd.f32 %v5196_v60, %v5163_v28  ;;  %v10872_v28 = vld [vmem:[#allocation29_spill] sm:$0xff]  ;;  %v672_v60 = vld [vmem:[%s9013_s10 + $0x738] sm:$0xff] }
 0x550   : > { %v10087_v59 = vadd.f32 %v5260_v58, %v5228_v29  ;;  %v10875_v29 = vld [vmem:[#allocation32_spill] sm:$0xff]  ;;  %5571 = vmatpush.bf16.msrb.mxu1 %v3088_v10  ;;  %v1616_v22 = vunpack.c.2.s8 %v672_v60  ;;  %v1624_v27 = vunpack.c.3.s8 %v672_v60  ;;  %v1608_v62 = vunpack.c.1.s8 %v672_v60 }
 0x551   : > { %v640_v58 = vld [vmem:[%s9013_s10 + $0x638] sm:$0xff] }
 0x552   : > { %v1496_v57 = vunpack.c.3.s8 %v640_v58  ;;  %v2640_v8 = vcvt.s32.f32 %v1616_v22  ;;  %v2648_v48 = vcvt.s32.f32 %v1624_v27 }
 0x554   : > { %v2520_v7 = vcvt.s32.f32 %v1496_v57  ;;  %v1224_v57 = vunpack.c.1.s8 %v576_v9 }
 0x555   : > { %v5229_v4 = vpop.f32.mrf.mxu2  ;;  %v5166_v21 = vpop.f32.mrf.mxu0 }
 0x556   : > { %v5230_v6 = vadd.f32 %v5229_v4, %v5197_v53  ;;  %v5262_v31 = vpop.f32.mrf.mxu3  ;;  %v5199_v2 = vpop.f32.mrf.mxu1  ;;  %v1488_v53 = vunpack.c.2.s8 %v640_v58 }
 0x557   : > { %v5200_v1 = vadd.f32 %v5199_v2, %v5166_v21  ;;  %v1232_v21 = vunpack.c.2.s8 %v576_v9 }
 0x558   : > { %v10089_v51 = vadd.f32 %v5262_v31, %v5230_v6  ;;  %5419 = vmatmul.bf16.gmra.mxu0 %v10872_v28  ;;  %v1240_v6 = vunpack.c.3.s8 %v576_v9  ;;  %v1360_v31 = vunpack.c.2.s8 %v608_v52  ;;  %v2512_v2 = vcvt.s32.f32 %v1488_v53 }
 0x559   : > { %5452 = vmatmul.bf16.gmra.mxu1 %v10873_v61  ;;  %v2256_v28 = vcvt.s32.f32 %v1232_v21  ;;  %v1368_v61 = vunpack.c.3.s8 %v608_v52  ;;  %v1216_v53 = vunpack.c.0.s8 %v576_v9 }
 0x55a   : > { %5485 = vmatmul.bf16.gmra.mxu2 %v10874_v55  ;;  %v2264_v17 = vcvt.s32.f32 %v1240_v6  ;;  %v3144_v10 = vpack.c.bf16 %v2520_v7, %v2512_v2  ;;  %v3208_v55 = vpack.c.bf16 %v2648_v48, %v2640_v8  ;;  %v2632_v7 = vcvt.s32.f32 %v1608_v62 }
 0x55b   : > { %5518 = vmatmul.bf16.gmra.mxu3 %v10875_v29  ;;  %v2384_v29 = vcvt.s32.f32 %v1360_v31  ;;  %v2392_v14 = vcvt.s32.f32 %v1368_v61  ;;  %v2240_v31 = vcvt.s32.f32 %v1216_v53  ;;  %v2248_v8 = vcvt.s32.f32 %v1224_v57 }
 0x55c   : > { %5605 = vmatpush.bf16.msrb.mxu2 %v3144_v10  ;;  %5638 = vmatpush.bf16.msrb.mxu3 %v3208_v55 }
 0x55d   : > { %v5232_v24 = vpop.f32.mrf.mxu2  ;;  %v5168_v34 = vpop.f32.mrf.mxu0  ;;  %v3080_v22 = vpack.c.bf16 %v2392_v14, %v2384_v29  ;;  %v3008_v10 = vpack.c.bf16 %v2248_v8, %v2240_v31 }
 0x55e   : > { %v5233_v11 = vadd.f32 %v5232_v24, %v5200_v1  ;;  %v5265_v56 = vpop.f32.mrf.mxu3  ;;  %v5201_v4 = vpop.f32.mrf.mxu1  ;;  %v3016_v34 = vpack.c.bf16 %v2264_v17, %v2256_v28  ;;  %v1472_v1 = vunpack.c.0.s8 %v640_v58  ;;  %v1480_v24 = vunpack.c.1.s8 %v640_v58 }
 0x55f   : > { %v1600_v4 = vunpack.c.0.s8 %v672_v60  ;;  %5572 = vmatpush.bf16.msrb.mxu1 %v3080_v22  ;;  %v1352_v17 = vunpack.c.1.s8 %v608_v52 }
 0x560   : > { %v10099_v0 = vadd.f32 %v5265_v56, %v5233_v11  ;;  %5539 = vmatpush.bf16.msrb.mxu0 %v3016_v34  ;;  %v2496_v27 = vcvt.s32.f32 %v1472_v1  ;;  %v2504_v11 = vcvt.s32.f32 %v1480_v24  ;;  %v1344_v56 = vunpack.c.0.s8 %v608_v52  ;;  %v3263_v24 = vld [vmem:[#allocation2 + $0x70] sm:$0xff] }
 0x561   : > { %v2624_v2 = vcvt.s32.f32 %v1600_v4  ;;  %v2376_v14 = vcvt.s32.f32 %v1352_v17 }
 0x562   : > { %v3136_v58 = vpack.c.bf16 %v2504_v11, %v2496_v27  ;;  %v2368_v61 = vcvt.s32.f32 %v1344_v56 }
 0x563   : > { %v3200_v60 = vpack.c.bf16 %v2632_v7, %v2624_v2 }
 0x564   : > { %5606 = vmatpush.bf16.msrb.mxu2 %v3136_v58  ;;  %5540 = vmatpush.bf16.msrb.mxu0 %v3008_v10  ;;  %v3072_v62 = vpack.c.bf16 %v2376_v14, %v2368_v61 }
 0x565   : > { %v5234_v21 = vpop.f32.mrf.mxu2  ;;  %v5278_v6 = vpop.f32.mrf.mxu0  ;;  %5639 = vmatpush.bf16.msrb.mxu3 %v3200_v60 }
 0x566   : > { %v5267_v48 = vpop.f32.mrf.mxu3  ;;  %v5311_v28 = vpop.f32.mrf.mxu1  ;;  %v5279_v9 = vadd.f32 %v5278_v6, %v10047_v15  ;;  %5573 = vmatpush.bf16.msrb.mxu1 %v3072_v62 }
 0x568   : > { %5424 = vmatmul.bf16.gmra.mxu0 %v9227_v26  ;;  %v5312_v55 = vadd.f32 %v5311_v28, %v5279_v9  ;;  %v3279_v28 = vld [vmem:[#allocation2 + $0x60] sm:$0xff] }
 0x569   : > { %5457 = vmatmul.bf16.gmra.mxu1 %v9231_v38 }
 0x56a   : > { %5490 = vmatmul.bf16.gmra.mxu2 %v9233_v41 }
 0x56b   : > { %5523 = vmatmul.bf16.gmra.mxu3 %v9235_v42  ;;  %v3271_v42 = vld [vmem:[#allocation2 + $0x1f8] sm:$0xff] }
 0x56d   : > { %v5344_v52 = vpop.f32.mrf.mxu2  ;;  %v5280_v29 = vpop.f32.mrf.mxu0 }
 0x56e   : > { %v5345_v34 = vadd.f32 %v5344_v52, %v5312_v55  ;;  %v5377_v1 = vpop.f32.mrf.mxu3  ;;  %v5313_v15 = vpop.f32.mrf.mxu1  ;;  %v5281_v4 = vadd.f32 %v5280_v29, %v10051_v20 }
 0x570   : > { %v5378_v26 = vadd.f32 %v5377_v1, %v5345_v34  ;;  %v5314_v38 = vadd.f32 %v5313_v15, %v5281_v4  ;;  %v3295_v15 = vld [vmem:[#allocation2 + $0x1e0] sm:$0xff] }
 0x572   : > { %v5671_v53 = vadd.f32 %v5378_v26, %v3263_v24 }
 0x574   : > { %5743 = vst [vmem:[#allocation2 + $0x70] sm:$0xff] %v5671_v53 }
 0x575   : > { %v5346_v57 = vpop.f32.mrf.mxu2  ;;  %v5283_v41 = vpop.f32.mrf.mxu0 }
 0x576   : > { %v5347_v22 = vadd.f32 %v5346_v57, %v5314_v38  ;;  %v5379_v27 = vpop.f32.mrf.mxu3  ;;  %v5316_v11 = vpop.f32.mrf.mxu1  ;;  %v5284_v21 = vadd.f32 %v5283_v41, %v10057_v12 }
 0x578   : > { %v5380_v56 = vadd.f32 %v5379_v27, %v5347_v22  ;;  %5429 = vmatmul.bf16.gmra.mxu0 %v9247_v23  ;;  %v5317_v20 = vadd.f32 %v5316_v11, %v5284_v21 }
 0x579   : > { %5462 = vmatmul.bf16.gmra.mxu1 %v9249_v37 }
 0x57a   : > { %v5679_v6 = vadd.f32 %v5380_v56, %v3271_v42  ;;  %5495 = vmatmul.bf16.gmra.mxu2 %v9251_v49 }
 0x57b   : > { %5528 = vmatmul.bf16.gmra.mxu3 %v9253_v50  ;;  %v3287_v50 = vld [vmem:[#allocation2 + $0x1e8] sm:$0xff] }
 0x57c   : > { %5751 = vst [vmem:[#allocation2 + $0x1f8] sm:$0xff] %v5679_v6  ;;  %v3311_v6 = vld [vmem:[#allocation2 + $0x218] sm:$0xff] }
 0x57d   : > { %v5349_v2 = vpop.f32.mrf.mxu2  ;;  %v5285_v7 = vpop.f32.mrf.mxu0 }
 0x57e   : > { %v5350_v31 = vadd.f32 %v5349_v2, %v5317_v20  ;;  %v5382_v8 = vpop.f32.mrf.mxu3  ;;  %v5318_v48 = vpop.f32.mrf.mxu1  ;;  %v5286_v12 = vadd.f32 %v5285_v7, %v10067_v63 }
 0x580   : > { %v5383_v58 = vadd.f32 %v5382_v8, %v5350_v31  ;;  %v5319_v23 = vadd.f32 %v5318_v48, %v5286_v12 }
 0x582   : > { %v5687_v17 = vadd.f32 %v5383_v58, %v3279_v28 }
 0x584   : > { %5759 = vst [vmem:[#allocation2 + $0x60] sm:$0xff] %v5687_v17 }
 0x585   : > { %v5351_v37 = vpop.f32.mrf.mxu2  ;;  %v5288_v61 = vpop.f32.mrf.mxu0 }
 0x586   : > { %v5352_v60 = vadd.f32 %v5351_v37, %v5319_v23  ;;  %v5384_v49 = vpop.f32.mrf.mxu3  ;;  %v5321_v10 = vpop.f32.mrf.mxu1  ;;  %v5289_v14 = vadd.f32 %v5288_v61, %v10073_v47 }
 0x588   : > { %v5385_v9 = vadd.f32 %v5384_v49, %v5352_v60  ;;  %5541 = vmatmul.bf16.vlgmr.msrb.gmra.mxu0 %v9277_v36  ;;  %v5322_v63 = vadd.f32 %v5321_v10, %v5289_v14  ;;  %v3327_v60 = vld [vmem:[#allocation2 + $0x150] sm:$0x7] }
 0x589   : > { %5574 = vmatmul.bf16.vlgmr.msrb.gmra.mxu1 %v9281_v40 }
 0x58a   : > { %v5695_v62 = vadd.f32 %v5385_v9, %v3287_v50  ;;  %5607 = vmatmul.bf16.vlgmr.msrb.gmra.mxu2 %v9283_v45 }
 0x58b   : > { %5640 = vmatmul.bf16.vlgmr.msrb.gmra.mxu3 %v9285_v46  ;;  %v3303_v46 = vld [vmem:[#allocation2 + $0x30] sm:$0xff] }
 0x58c   : > { %5767 = vst [vmem:[#allocation2 + $0x1e8] sm:$0xff] %v5695_v62 }
 0x58d   : > { %v5354_v55 = vpop.f32.mrf.mxu2  ;;  %v5290_v52 = vpop.f32.mrf.mxu0 }
 0x58e   : > { %v5355_v29 = vadd.f32 %v5354_v55, %v5322_v63  ;;  %v5387_v34 = vpop.f32.mrf.mxu3  ;;  %v5323_v1 = vpop.f32.mrf.mxu1  ;;  %v5291_v47 = vadd.f32 %v5290_v52, %v10080_v3 }
 0x590   : > { %v5388_v24 = vadd.f32 %v5387_v34, %v5355_v29  ;;  %v5324_v36 = vadd.f32 %v5323_v1, %v5291_v47 }
 0x592   : > { %v5703_v26 = vadd.f32 %v5388_v24, %v3295_v15 }
 0x594   : > { %5775 = vst [vmem:[#allocation2 + $0x1e0] sm:$0xff] %v5703_v26 }
 0x595   : > { %v5356_v40 = vpop.f32.mrf.mxu2  ;;  %v5293_v4 = vpop.f32.mrf.mxu0 }
 0x596   : > { %v5357_v53 = vadd.f32 %v5356_v40, %v5324_v36  ;;  %v5389_v45 = vpop.f32.mrf.mxu3  ;;  %v5326_v38 = vpop.f32.mrf.mxu1  ;;  %v5294_v41 = vadd.f32 %v5293_v4, %v10087_v59 }
 0x598   : > { %v5390_v57 = vadd.f32 %v5389_v45, %v5357_v53  ;;  %5546 = vmatmul.bf16.gmra.mxu0 %v9308_v33  ;;  %v5327_v3 = vadd.f32 %v5326_v38, %v5294_v41 }
 0x599   : > { %5579 = vmatmul.bf16.gmra.mxu1 %v9312_v35 }
 0x59a   : > { %v5711_v22 = vadd.f32 %v5390_v57, %v3303_v46  ;;  %5612 = vmatmul.bf16.gmra.mxu2 %v9314_v43 }
 0x59b   : > { %5645 = vmatmul.bf16.gmra.mxu3 %v9316_v44  ;;  %v3319_v44 = vld [vmem:[#allocation2 + $0x168] sm:$0xff] }
 0x59c   : > { %5783 = vst [vmem:[#allocation2 + $0x30] sm:$0xff] %v5711_v22 }
 0x59d   : > { %v5359_v27 = vpop.f32.mrf.mxu2  ;;  %v5295_v11 = vpop.f32.mrf.mxu0 }
 0x59e   : > { %v5360_v42 = vadd.f32 %v5359_v27, %v5327_v3  ;;  %v5392_v56 = vpop.f32.mrf.mxu3  ;;  %v5328_v21 = vpop.f32.mrf.mxu1  ;;  %v5296_v59 = vadd.f32 %v5295_v11, %v10089_v51 }
 0x5a0   : > { %v5393_v20 = vadd.f32 %v5392_v56, %v5360_v42  ;;  %v5329_v33 = vadd.f32 %v5328_v21, %v5296_v59 }
 0x5a2   : > { %v5719_v2 = vadd.f32 %v5393_v20, %v3311_v6 }
 0x5a4   : > { %5791 = vst [vmem:[#allocation2 + $0x218] sm:$0xff] %v5719_v2 }
 0x5a5   : > { %v5361_v35 = vpop.f32.mrf.mxu2  ;;  %v5298_v7 = vpop.f32.mrf.mxu0 }
 0x5a6   : > { %v5362_v31 = vadd.f32 %v5361_v35, %v5329_v33  ;;  %v5394_v43 = vpop.f32.mrf.mxu3  ;;  %v5331_v8 = vpop.f32.mrf.mxu1  ;;  %v5299_v28 = vadd.f32 %v5298_v7, %v10099_v0 }
 0x5a8   : > { %v5395_v48 = vadd.f32 %v5394_v43, %v5362_v31  ;;  %5551 = vmatmul.bf16.gmra.mxu0 %v9331_v5  ;;  %v5332_v51 = vadd.f32 %v5331_v8, %v5299_v28 }
 0x5a9   : > { %5584 = vmatmul.bf16.gmra.mxu1 %v9335_v39 }
 0x5aa   : > { %v5727_v58 = vadd.f32 %v5395_v48, %v3319_v44  ;;  %5617 = vmatmul.bf16.gmra.mxu2 %v10792_v18 }
 0x5ab   : > { %5650 = vmatmul.bf16.gmra.mxu3 %v10793_v30 }
 0x5ac   : > { %5799 = vst [vmem:[#allocation2 + $0x168] sm:$0xff] %v5727_v58 }
 0x5ad   : > { %v5364_v12 = vpop.f32.mrf.mxu2  ;;  %v5300_v17 = vpop.f32.mrf.mxu0 }
 0x5ae   : > { %v5365_v23 = vadd.f32 %v5364_v12, %v5332_v51  ;;  %v5397_v37 = vpop.f32.mrf.mxu3  ;;  %v5333_v61 = vpop.f32.mrf.mxu1 }
 0x5b0   : > { %v5398_v49 = vadd.f32 %v5397_v37, %v5365_v23 }
 0x5b2   : > { %v5735_v10 = vadd.f32 %v5398_v49, %v3327_v60 }
 0x5b4   : > { %5807 = vst [vmem:[#allocation2 + $0x150] sm:$0x7] %v5735_v10 }
 0x5b5   : > { %v5366_v0 = vpop.f32.mrf.mxu2  ;;  %v5410_v5 = vpop.f32.mrf.mxu0 }
 0x5b6   : > { %v5399_v50 = vpop.f32.mrf.mxu3  ;;  %v5443_v39 = vpop.f32.mrf.mxu1 }
 0x5b7   : > { %v5444_v9 = vadd.f32 %v5443_v39, %v5410_v5 }
 0x5b8   : > { %5556 = vmatmul.bf16.gmra.mxu0 %v10794_v19 }
 0x5b9   : > { %5589 = vmatmul.bf16.gmra.mxu1 %v10795_v32  ;;  %v10876_v32 = vld [vmem:[#allocation41_spill] sm:$0xff] }
 0x5ba   : > { %5622 = vmatmul.bf16.gmra.mxu2 %v10806_v16  ;;  %v10877_v16 = vld [vmem:[#allocation42_spill] sm:$0xff] }
 0x5bb   : > { %5655 = vmatmul.bf16.gmra.mxu3 %v10807_v54 }
 0x5bd   : > { %v5476_v18 = vpop.f32.mrf.mxu2  ;;  %v5412_v30 = vpop.f32.mrf.mxu0 }
 0x5be   : > { %v5477_v14 = vadd.f32 %v5476_v18, %v5444_v9  ;;  %v5509_v62 = vpop.f32.mrf.mxu3  ;;  %v5445_v63 = vpop.f32.mrf.mxu1 }
 0x5bf   : > { %v5446_v55 = vadd.f32 %v5445_v63, %v5412_v30 }
 0x5c0   : > { %v10134_v52 = vadd.f32 %v5509_v62, %v5477_v14 }
 0x5c5   : > { %v5478_v29 = vpop.f32.mrf.mxu2  ;;  %v5415_v34 = vpop.f32.mrf.mxu0 }
 0x5c6   : > { %v5479_v1 = vadd.f32 %v5478_v29, %v5446_v55  ;;  %v5511_v15 = vpop.f32.mrf.mxu3  ;;  %v5448_v24 = vpop.f32.mrf.mxu1 }
 0x5c7   : > { %v5449_v19 = vadd.f32 %v5448_v24, %v5415_v34 }
 0x5c8   : > { %v10136_v47 = vadd.f32 %v5511_v15, %v5479_v1  ;;  %5561 = vmatmul.bf16.gmra.mxu0 %v10808_v13 }
 0x5c9   : > { %5594 = vmatmul.bf16.gmra.mxu1 %v10809_v25 }
 0x5ca   : > { %5627 = vmatmul.bf16.gmra.mxu2 %v10876_v32 }
 0x5cb   : > { %5660 = vmatmul.bf16.gmra.mxu3 %v10877_v16 }
 0x5cd   : > { %v5481_v54 = vpop.f32.mrf.mxu2  ;;  %v5417_v26 = vpop.f32.mrf.mxu0 }
 0x5ce   : > { %v5482_v36 = vadd.f32 %v5481_v54, %v5449_v19  ;;  %v5514_v40 = vpop.f32.mrf.mxu3  ;;  %v5450_v4 = vpop.f32.mrf.mxu1  ;;  %v3264_v19 = vld [vmem:[#allocation2 + $0x120] sm:$0xff] }
 0x5cf   : > { %v5451_v53 = vadd.f32 %v5450_v4, %v5417_v26 }
 0x5d0   : > { %v10142_v45 = vadd.f32 %v5514_v40, %v5482_v36 }
 0x5d5   : > { %v5483_v38 = vpop.f32.mrf.mxu2  ;;  %v5420_v46 = vpop.f32.mrf.mxu0 }
 0x5d6   : > { %v5484_v57 = vadd.f32 %v5483_v38, %v5451_v53  ;;  %v5516_v41 = vpop.f32.mrf.mxu3  ;;  %v5453_v22 = vpop.f32.mrf.mxu1 }
 0x5d7   : > { %v5454_v13 = vadd.f32 %v5453_v22, %v5420_v46  ;;  %v3272_v46 = vld [vmem:[#allocation2 + $0xb8] sm:$0xff] }
 0x5d8   : > { %v10144_v3 = vadd.f32 %v5516_v41, %v5484_v57 }
 0x5dd   : > { %v5486_v25 = vpop.f32.mrf.mxu2  ;;  %v5422_v27 = vpop.f32.mrf.mxu0 }
 0x5de   : > { %v5487_v11 = vadd.f32 %v5486_v25, %v5454_v13  ;;  %v5519_v42 = vpop.f32.mrf.mxu3  ;;  %v5455_v56 = vpop.f32.mrf.mxu1 }
 0x5df   : > { %v5456_v21 = vadd.f32 %v5455_v56, %v5422_v27 }
 0x5e0   : > { %v10146_v6 = vadd.f32 %v5519_v42, %v5487_v11  ;;  %v3280_v42 = vld [vmem:[#allocation2 + $0x1b8] sm:$0xff] }
 0x5e5   : > { %v5488_v20 = vpop.f32.mrf.mxu2  ;;  %v5425_v59 = vpop.f32.mrf.mxu0 }
 0x5e6   : > { %v5489_v2 = vadd.f32 %v5488_v20, %v5456_v21  ;;  %v5521_v33 = vpop.f32.mrf.mxu3  ;;  %v5458_v35 = vpop.f32.mrf.mxu1 }
 0x5e7   : > { %v5459_v7 = vadd.f32 %v5458_v35, %v5425_v59 }
 0x5e8   : > { %v10148_v31 = vadd.f32 %v5521_v33, %v5489_v2 }
 0x5ed   : > { %v5491_v43 = vpop.f32.mrf.mxu2  ;;  %v5427_v8 = vpop.f32.mrf.mxu0 }
 0x5ee   : > { %v5492_v44 = vadd.f32 %v5491_v43, %v5459_v7  ;;  %v5524_v48 = vpop.f32.mrf.mxu3  ;;  %v5460_v28 = vpop.f32.mrf.mxu1  ;;  %v3288_v43 = vld [vmem:[#allocation2 + $0x1c8] sm:$0xff] }
 0x5ef   : > { %v5461_v58 = vadd.f32 %v5460_v28, %v5427_v8 }
 0x5f0   : > { %v10150_v51 = vadd.f32 %v5524_v48, %v5492_v44 }
 0x5f5   : > { %v5493_v12 = vpop.f32.mrf.mxu2  ;;  %v5430_v17 = vpop.f32.mrf.mxu0 }
 0x5f6   : > { %v5494_v23 = vadd.f32 %v5493_v12, %v5461_v58  ;;  %v5526_v37 = vpop.f32.mrf.mxu3  ;;  %v5463_v61 = vpop.f32.mrf.mxu1 }
 0x5f7   : > { %v5464_v60 = vadd.f32 %v5463_v61, %v5430_v17 }
 0x5f8   : > { %v10152_v49 = vadd.f32 %v5526_v37, %v5494_v23  ;;  %v3296_v37 = vld [vmem:[#allocation2 + $0x1f0] sm:$0xff] }
 0x5fd   : > { %v5496_v10 = vpop.f32.mrf.mxu2  ;;  %v5432_v0 = vpop.f32.mrf.mxu0 }
 0x5fe   : > { %v5497_v5 = vadd.f32 %v5496_v10, %v5464_v60  ;;  %v5529_v50 = vpop.f32.mrf.mxu3  ;;  %v5465_v39 = vpop.f32.mrf.mxu1 }
 0x600   : > { %v10154_v9 = vadd.f32 %v5529_v50, %v5497_v5 }
 0x605   : > { %v5498_v18 = vpop.f32.mrf.mxu2  ;;  %v5542_v30 = vpop.f32.mrf.mxu0 }
 0x606   : > { %v5531_v14 = vpop.f32.mrf.mxu3  ;;  %v5575_v62 = vpop.f32.mrf.mxu1  ;;  %v5543_v63 = vadd.f32 %v5542_v30, %v10134_v52  ;;  %v3304_v30 = vld [vmem:[#allocation2 + $0x1b0] sm:$0xff] }
 0x608   : > { %v5576_v55 = vadd.f32 %v5575_v62, %v5543_v63 }
 0x60d   : > { %v5608_v29 = vpop.f32.mrf.mxu2  ;;  %v5544_v34 = vpop.f32.mrf.mxu0 }
 0x60e   : > { %v5609_v1 = vadd.f32 %v5608_v29, %v5576_v55  ;;  %v5641_v15 = vpop.f32.mrf.mxu3  ;;  %v5577_v24 = vpop.f32.mrf.mxu1  ;;  %v5545_v16 = vadd.f32 %v5544_v34, %v10136_v47 }
 0x610   : > { %v5642_v32 = vadd.f32 %v5641_v15, %v5609_v1  ;;  %v5578_v26 = vadd.f32 %v5577_v24, %v5545_v16  ;;  %v3312_v24 = vld [vmem:[#allocation2 + $0x200] sm:$0xff] }
 0x612   : > { %v5672_v54 = vadd.f32 %v5642_v32, %v3264_v19 }
 0x614   : > { %5744 = vst [vmem:[#allocation2 + $0x120] sm:$0xff] %v5672_v54 }
 0x615   : > { %v5610_v36 = vpop.f32.mrf.mxu2  ;;  %v5547_v40 = vpop.f32.mrf.mxu0 }
 0x616   : > { %v5611_v4 = vadd.f32 %v5610_v36, %v5578_v26  ;;  %v5643_v53 = vpop.f32.mrf.mxu3  ;;  %v5580_v38 = vpop.f32.mrf.mxu1  ;;  %v5548_v57 = vadd.f32 %v5547_v40, %v10142_v45 }
 0x618   : > { %v5644_v52 = vadd.f32 %v5643_v53, %v5611_v4  ;;  %v5581_v22 = vadd.f32 %v5580_v38, %v5548_v57  ;;  %v3320_v53 = vld [vmem:[#allocation2 + $0xc0] sm:$0xff] }
 0x61a   : > { %v5680_v41 = vadd.f32 %v5644_v52, %v3272_v46 }
 0x61c   : > { %5752 = vst [vmem:[#allocation2 + $0xb8] sm:$0xff] %v5680_v41 }
 0x61d   : > { %v5613_v13 = vpop.f32.mrf.mxu2  ;;  %v5549_v25 = vpop.f32.mrf.mxu0 }
 0x61e   : > { %v5614_v27 = vadd.f32 %v5613_v13, %v5581_v22  ;;  %v5646_v11 = vpop.f32.mrf.mxu3  ;;  %v5582_v47 = vpop.f32.mrf.mxu1  ;;  %v5550_v21 = vadd.f32 %v5549_v25, %v10144_v3 }
 0x620   : > { %v5647_v56 = vadd.f32 %v5646_v11, %v5614_v27  ;;  %v5583_v59 = vadd.f32 %v5582_v47, %v5550_v21  ;;  %v3328_v27 = vld [vmem:[#allocation2 + $0xa0] sm:$0x7] }
 0x622   : > { %v5688_v20 = vadd.f32 %v5647_v56, %v3280_v42 }
 0x624   : > { %5760 = vst [vmem:[#allocation2 + $0x1b8] sm:$0xff] %v5688_v20 }
 0x625   : > { %v5615_v2 = vpop.f32.mrf.mxu2  ;;  %v5552_v33 = vpop.f32.mrf.mxu0 }
 0x626   : > { %v5616_v35 = vadd.f32 %v5615_v2, %v5583_v59  ;;  %v5648_v7 = vpop.f32.mrf.mxu3  ;;  %v5585_v45 = vpop.f32.mrf.mxu1  ;;  %v5553_v44 = vadd.f32 %v5552_v33, %v10146_v6 }
 0x628   : > { %v5649_v8 = vadd.f32 %v5648_v7, %v5616_v35  ;;  %v5586_v28 = vadd.f32 %v5585_v45, %v5553_v44 }
 0x62a   : > { %v5696_v48 = vadd.f32 %v5649_v8, %v3288_v43 }
 0x62c   : > { %5768 = vst [vmem:[#allocation2 + $0x1c8] sm:$0xff] %v5696_v48 }
 0x62d   : > { %v5618_v58 = vpop.f32.mrf.mxu2  ;;  %v5554_v12 = vpop.f32.mrf.mxu0 }
 0x62e   : > { %v5619_v17 = vadd.f32 %v5618_v58, %v5586_v28  ;;  %v5651_v23 = vpop.f32.mrf.mxu3  ;;  %v5587_v3 = vpop.f32.mrf.mxu1  ;;  %v5555_v60 = vadd.f32 %v5554_v12, %v10148_v31 }
 0x630   : > { %v5652_v61 = vadd.f32 %v5651_v23, %v5619_v17  ;;  %v5588_v0 = vadd.f32 %v5587_v3, %v5555_v60 }
 0x632   : > { %v5704_v10 = vadd.f32 %v5652_v61, %v3296_v37 }
 0x634   : > { %5776 = vst [vmem:[#allocation2 + $0x1f0] sm:$0xff] %v5704_v10 }
 0x635   : > { %v5620_v5 = vpop.f32.mrf.mxu2  ;;  %v5557_v50 = vpop.f32.mrf.mxu0 }
 0x636   : > { %v5621_v39 = vadd.f32 %v5620_v5, %v5588_v0  ;;  %v5653_v18 = vpop.f32.mrf.mxu3  ;;  %v5590_v6 = vpop.f32.mrf.mxu1  ;;  %v5558_v62 = vadd.f32 %v5557_v50, %v10150_v51 }
 0x638   : > { %v5654_v14 = vadd.f32 %v5653_v18, %v5621_v39  ;;  %v5591_v55 = vadd.f32 %v5590_v6, %v5558_v62 }
 0x63a   : > { %v5712_v63 = vadd.f32 %v5654_v14, %v3304_v30 }
 0x63c   : > { %5784 = vst [vmem:[#allocation2 + $0x1b0] sm:$0xff] %v5712_v63 }
 0x63d   : > { %v5623_v29 = vpop.f32.mrf.mxu2  ;;  %v5559_v34 = vpop.f32.mrf.mxu0 }
 0x63e   : > { %v5624_v1 = vadd.f32 %v5623_v29, %v5591_v55  ;;  %v5656_v15 = vpop.f32.mrf.mxu3  ;;  %v5592_v31 = vpop.f32.mrf.mxu1  ;;  %v5560_v32 = vadd.f32 %v5559_v34, %v10152_v49 }
 0x640   : > { %v5657_v19 = vadd.f32 %v5656_v15, %v5624_v1  ;;  %v5593_v54 = vadd.f32 %v5592_v31, %v5560_v32 }
 0x642   : > { %v5720_v16 = vadd.f32 %v5657_v19, %v3312_v24 }
 0x644   : > { %5792 = vst [vmem:[#allocation2 + $0x200] sm:$0xff] %v5720_v16 }
 0x645   : > { %v5625_v26 = vpop.f32.mrf.mxu2  ;;  %v5562_v36 = vpop.f32.mrf.mxu0 }
 0x646   : > { %v5626_v40 = vadd.f32 %v5625_v26, %v5593_v54  ;;  %v5658_v4 = vpop.f32.mrf.mxu3  ;;  %v5595_v51 = vpop.f32.mrf.mxu1  ;;  %v5563_v46 = vadd.f32 %v5562_v36, %v10154_v9 }
 0x648   : > { %v5659_v38 = vadd.f32 %v5658_v4, %v5626_v40  ;;  %v5596_v57 = vadd.f32 %v5595_v51, %v5563_v46 }
 0x64a   : > { %v5728_v52 = vadd.f32 %v5659_v38, %v3320_v53 }
 0x64c   : > { %5800 = vst [vmem:[#allocation2 + $0xc0] sm:$0xff] %v5728_v52 }
 0x64d   : > { %v5628_v41 = vpop.f32.mrf.mxu2  ;;  %v5564_v22 = vpop.f32.mrf.mxu0 }
 0x64e   : > { %v5629_v13 = vadd.f32 %v5628_v41, %v5596_v57  ;;  %v5661_v25 = vpop.f32.mrf.mxu3  ;;  %v5597_v49 = vpop.f32.mrf.mxu1 }
 0x650   : > { %v5662_v11 = vadd.f32 %v5661_v25, %v5629_v13 }
 0x652   : > { %v5736_v47 = vadd.f32 %v5662_v11, %v3328_v27  ;;  %5812 = sbr.rel (%p7785_p1) target bundleno = 2104 (0x838), region = 76 }
 0x654   : > { %5808 = vst [vmem:[#allocation2 + $0xa0] sm:$0x7] %v5736_v47 }
 0x655   : > { %v5630_v42 = vpop.f32.mrf.mxu2 }
 0x656   : > { %v5663_v56 = vpop.f32.mrf.mxu3 }
 0x657   : > { %v7844_v21 = vld [vmem:[#allocation11 + $0x70] sm:$0xf]  ;;  %v8352_v20 = vld [vmem:[#allocation11 + $0x74] sm:$0xf0]  ;;  %v7836_v44 = vld [vmem:[#allocation11 + $0x60] sm:$0xf] }
 0x658   : > { %v7908_v9 = vld [vmem:[#allocation11 + $0xf0] sm:$0xf]  ;;  %v7845_v59 = vor.u32 %v8352_v20, %v7844_v21  ;;  %v8368_v2 = vld [vmem:[#allocation11 + $0xf4] sm:$0xf0]  ;;  %v8350_v28 = vld [vmem:[#allocation11 + $0x64] sm:$0xf0] }
 0x659   : > { %v7972_v33 = vld [vmem:[#allocation11 + $0x170] sm:$0xf]  ;;  %v8384_v35 = vld [vmem:[#allocation11 + $0x174] sm:$0xf0]  ;;  %v7909_v7 = vor.u32 %v8368_v2, %v7908_v9  ;;  %v7900_v58 = vld [vmem:[#allocation11 + $0xe0] sm:$0xf]  ;;  %v7837_v17 = vor.u32 %v8350_v28, %v7836_v44 }
 0x65a   : > { %v7973_v45 = vor.u32 %v8384_v35, %v7972_v33  ;;  %v8036_v43 = vld [vmem:[#allocation11 + $0x1f0] sm:$0xf]  ;;  %v8400_v8 = vld [vmem:[#allocation11 + $0x1f4] sm:$0xf0]  ;;  %6951 = vmatpush.bf16.msra.mxu0 %v7845_v59  ;;  %v8366_v12 = vld [vmem:[#allocation11 + $0xe4] sm:$0xf0] }
 0x65b   : > { %v8037_v48 = vor.u32 %v8400_v8, %v8036_v43  ;;  %6984 = vmatpush.bf16.msra.mxu1 %v7909_v7  ;;  %v7901_v23 = vor.u32 %v8366_v12, %v7900_v58  ;;  %v7964_v3 = vld [vmem:[#allocation11 + $0x160] sm:$0xf]  ;;  %v8382_v37 = vld [vmem:[#allocation11 + $0x164] sm:$0xf0]  ;;  %v7828_v0 = vld [vmem:[#allocation11 + $0x50] sm:$0xf] }
 0x65c   : > { %7017 = vmatpush.bf16.msra.mxu2 %v7973_v45  ;;  %v8028_v61 = vld [vmem:[#allocation11 + $0x1e0] sm:$0xf]  ;;  %v7965_v60 = vor.u32 %v8382_v37, %v7964_v3  ;;  %v8398_v10 = vld [vmem:[#allocation11 + $0x1e4] sm:$0xf0]  ;;  %v8348_v5 = vld [vmem:[#allocation11 + $0x54] sm:$0xf0] }
 0x65d   : > { %7050 = vmatpush.bf16.msra.mxu3 %v8037_v48  ;;  %v8029_v50 = vor.u32 %v8398_v10, %v8028_v61  ;;  %v7892_v39 = vld [vmem:[#allocation11 + $0xd0] sm:$0xf]  ;;  %v8364_v18 = vld [vmem:[#allocation11 + $0xd4] sm:$0xf0]  ;;  %v7829_v30 = vor.u32 %v8348_v5, %v7828_v0  ;;  %v7820_v34 = vld [vmem:[#allocation11 + $0x40] sm:$0xf] }
 0x65e   : > { %v7956_v6 = vld [vmem:[#allocation11 + $0x150] sm:$0xf]  ;;  %6952 = vmatpush.bf16.msra.mxu0 %v7837_v17  ;;  %v8380_v14 = vld [vmem:[#allocation11 + $0x154] sm:$0xf0]  ;;  %v7893_v55 = vor.u32 %v8364_v18, %v7892_v39  ;;  %v8346_v1 = vld [vmem:[#allocation11 + $0x44] sm:$0xf0] }
 0x65f   : > { %v8020_v62 = vld [vmem:[#allocation11 + $0x1d0] sm:$0xf]  ;;  %v8396_v63 = vld [vmem:[#allocation11 + $0x1d4] sm:$0xf0]  ;;  %6985 = vmatpush.bf16.msra.mxu1 %v7901_v23  ;;  %v7957_v29 = vor.u32 %v8380_v14, %v7956_v6  ;;  %v7884_v15 = vld [vmem:[#allocation11 + $0xc0] sm:$0xf]  ;;  %v7821_v26 = vor.u32 %v8346_v1, %v7820_v34 }
 0x660   : > { %7018 = vmatpush.bf16.msra.mxu2 %v7965_v60  ;;  %v8021_v31 = vor.u32 %v8396_v63, %v8020_v62  ;;  %v8362_v24 = vld [vmem:[#allocation11 + $0xc4] sm:$0xf0]  ;;  %v7948_v19 = vld [vmem:[#allocation11 + $0x140] sm:$0xf]  ;;  %v7812_v36 = vld [vmem:[#allocation11 + $0x30] sm:$0xf] }
 0x661   : > { %7051 = vmatpush.bf16.msra.mxu3 %v8029_v50  ;;  %v8378_v32 = vld [vmem:[#allocation11 + $0x144] sm:$0xf0]  ;;  %v8012_v16 = vld [vmem:[#allocation11 + $0x1c0] sm:$0xf]  ;;  %v7885_v40 = vor.u32 %v8362_v24, %v7884_v15  ;;  %v8344_v51 = vld [vmem:[#allocation11 + $0x34] sm:$0xf0] }
 0x662   : > { %v8394_v54 = vld [vmem:[#allocation11 + $0x1c4] sm:$0xf0]  ;;  %6953 = vmatpush.bf16.msra.mxu0 %v7829_v30  ;;  %v7949_v4 = vor.u32 %v8378_v32, %v7948_v19  ;;  %v7876_v53 = vld [vmem:[#allocation11 + $0xb0] sm:$0xf]  ;;  %v8360_v38 = vld [vmem:[#allocation11 + $0xb4] sm:$0xf0]  ;;  %v7813_v49 = vor.u32 %v8344_v51, %v7812_v36 }
 0x663   : > { %6986 = vmatpush.bf16.msra.mxu1 %v7893_v55  ;;  %v8013_v46 = vor.u32 %v8394_v54, %v8012_v16  ;;  %v7940_v52 = vld [vmem:[#allocation11 + $0x130] sm:$0xf]  ;;  %v8376_v57 = vld [vmem:[#allocation11 + $0x134] sm:$0xf0]  ;;  %v7804_v13 = vld [vmem:[#allocation11 + $0x20] sm:$0xf]  ;;  %v7877_v56 = vor.u32 %v8360_v38, %v7876_v53 }
 0x664   : > { %7019 = vmatpush.bf16.msra.mxu2 %v7957_v29  ;;  %v8004_v41 = vld [vmem:[#allocation11 + $0x1b0] sm:$0xf]  ;;  %v8392_v22 = vld [vmem:[#allocation11 + $0x1b4] sm:$0xf0]  ;;  %v8342_v25 = vld [vmem:[#allocation11 + $0x24] sm:$0xf0]  ;;  %v7941_v21 = vor.u32 %v8376_v57, %v7940_v52 }
 0x665   : > { %7052 = vmatpush.bf16.msra.mxu3 %v8021_v31  ;;  %v7868_v27 = vld [vmem:[#allocation11 + $0xa0] sm:$0xf]  ;;  %v8358_v11 = vld [vmem:[#allocation11 + $0xa4] sm:$0xf0]  ;;  %v10166_v59 = vld [vmem:[#allocation11 + $0x10] sm:$0xf]  ;;  %v8005_v35 = vor.u32 %v8392_v22, %v8004_v41  ;;  %v7805_v28 = vor.u32 %v8342_v25, %v7804_v13 }
 0x666   : > { %6954 = vmatpush.bf16.msra.mxu0 %v7821_v26  ;;  %v7932_v47 = vld [vmem:[#allocation11 + $0x120] sm:$0xf]  ;;  %v8374_v42 = vld [vmem:[#allocation11 + $0x124] sm:$0xf0]  ;;  %v10168_v2 = vld [vmem:[#allocation11 + $0x14] sm:$0xf0]  ;;  %v7869_v23 = vor.u32 %v8358_v11, %v7868_v27 }
 0x667   : > { %6987 = vmatpush.bf16.msra.mxu1 %v7885_v40  ;;  %v7996_v20 = vld [vmem:[#allocation11 + $0x1a0] sm:$0xf]  ;;  %v8390_v9 = vld [vmem:[#allocation11 + $0x1a4] sm:$0xf0]  ;;  %v10170_v33 = vld [vmem:[#allocation11 + $0x90] sm:$0xf]  ;;  %v7933_v3 = vor.u32 %v8374_v42, %v7932_v47  ;;  %v7797_v0 = vor.u32 %v10168_v2, %v10166_v59 }
 0x668   : > { %7020 = vmatpush.bf16.msra.mxu2 %v7949_v4  ;;  %v10172_v7 = vld [vmem:[#allocation11 + $0x94] sm:$0xf0]  ;;  %v10174_v45 = vld [vmem:[#allocation11 + $0x110] sm:$0xf]  ;;  %v10182_v48 = vld [vmem:[#allocation11] sm:$0xf]  ;;  %v7997_v10 = vor.u32 %v8390_v9, %v7996_v20 }
 0x669   : > { %7053 = vmatpush.bf16.msra.mxu3 %v8013_v46  ;;  %v10176_v43 = vld [vmem:[#allocation11 + $0x114] sm:$0xf0]  ;;  %v10178_v8 = vld [vmem:[#allocation11 + $0x190] sm:$0xf]  ;;  %v10184_v58 = vld [vmem:[#allocation11 + $0x4] sm:$0xf0]  ;;  %v7861_v5 = vor.u32 %v10172_v7, %v10170_v33 }
 0x66a   : > { %v10180_v44 = vld [vmem:[#allocation11 + $0x194] sm:$0xf0]  ;;  %6955 = vmatpush.bf16.msra.mxu0 %v7813_v49  ;;  %v10186_v12 = vld [vmem:[#allocation11 + $0x80] sm:$0xf]  ;;  %v10188_v17 = vld [vmem:[#allocation11 + $0x84] sm:$0xf0]  ;;  %v7925_v50 = vor.u32 %v10176_v43, %v10174_v45  ;;  %v7789_v14 = vor.u32 %v10184_v58, %v10182_v48 }
 0x66b   : > { %6988 = vmatpush.bf16.msra.mxu1 %v7877_v56  ;;  %v10190_v37 = vld [vmem:[#allocation11 + $0x100] sm:$0xf]  ;;  %v10192_v61 = vld [vmem:[#allocation11 + $0x104] sm:$0xf0]  ;;  %v5813_v18 = vld [vmem:[#allocation2 + $0xc8] sm:$0xff]  ;;  %v7989_v30 = vor.u32 %v10180_v44, %v10178_v8  ;;  %v7853_v62 = vor.u32 %v10188_v17, %v10186_v12 }
 0x66c   : > { %7021 = vmatpush.bf16.msra.mxu2 %v7941_v21  ;;  %v10194_v60 = vld [vmem:[#allocation11 + $0x180] sm:$0xf]  ;;  %v10202_v39 = vld [vmem:[#allocation11 + $0x184] sm:$0xf0]  ;;  %v7917_v63 = vor.u32 %v10192_v61, %v10190_v37  ;;  %v10212_v55 = vld [vmem:[#allocation8] sm:$0xff] }
 0x66d   : > { %7054 = vmatpush.bf16.msra.mxu3 %v8005_v35  ;;  %v5821_v6 = vld [vmem:[#allocation2 + $0xd8] sm:$0xff]  ;;  %v10214_v29 = vld [vmem:[#allocation9] sm:$0xff]  ;;  %v10217_v1 = vperm.slane %v10212_v55, 0  ;;  %v10223_v24 = vperm.slane %v10212_v55, 1  ;;  %v5815_v32 = vld [vmem:[#allocation2 + $0x40] sm:$0xff]  ;;  %v7981_v16 = vor.u32 %v10202_v39, %v10194_v60  ;;  %v10231_v26 = vperm.slane %v10212_v55, 2 }
 0x66e   : > { %v5814_v34 = vld [vmem:[#allocation2 + $0x8] sm:$0xff]  ;;  %6956 = vmatpush.bf16.msra.mxu0 %v7805_v28  ;;  %v10220_v15 = vperm.slane %v10214_v29, 0  ;;  %v5822_v31 = vld [vmem:[#allocation2 + $0x18] sm:$0xff]  ;;  %v10226_v19 = vperm.slane %v10214_v29, 1  ;;  %v5823_v54 = vld [vmem:[#allocation2 + $0xb0] sm:$0xff]  ;;  %v10234_v36 = vperm.slane %v10214_v29, 2 }
 0x66f   : > { %6989 = vmatpush.bf16.msra.mxu1 %v7869_v23  ;;  %v5816_v40 = vld [vmem:[#allocation2 + $0x28] sm:$0xff]  ;;  %v5824_v4 = vld [vmem:[#allocation2 + $0x158] sm:$0xff]  ;;  %v10237_v51 = vperm.slane %v10212_v55, 3  ;;  %v5903_v53 = vmul.f32 %v10217_v1, %v5813_v18  ;;  %v5911_v38 = vmul.f32 %v10217_v1, %v5821_v6  ;;  %v5904_v46 = vmul.f32 %v10223_v24, %v5814_v34  ;;  %v8228_v57 = vld [vmem:[#allocation11 + $0x370] sm:$0xf] }
 0x670   : > { %7022 = vmatpush.bf16.msra.mxu2 %v7933_v3  ;;  %v5912_v52 = vmul.f32 %v10223_v24, %v5822_v31  ;;  %v8448_v41 = vld [vmem:[#allocation11 + $0x374] sm:$0xf0]  ;;  %v5905_v22 = vmul.f32 %v10231_v26, %v5815_v32  ;;  %v5913_v13 = vmul.f32 %v10231_v26, %v5823_v54  ;;  %v8292_v27 = vld [vmem:[#allocation11 + $0x3f0] sm:$0xf]  ;;  %v10254_v33 = vperm.slane %v10214_v29, 3 }
 0x671   : > { %7055 = vmatpush.bf16.msra.mxu3 %v7997_v10  ;;  %v5906_v25 = vmul.f32 %v10237_v51, %v5816_v40  ;;  %v5914_v49 = vmul.f32 %v10237_v51, %v5824_v4  ;;  %v5993_v11 = vadd.f32 %v10220_v15, %v5903_v53  ;;  %v6001_v47 = vadd.f32 %v10220_v15, %v5911_v38  ;;  %v8464_v21 = vld [vmem:[#allocation11 + $0x3f4] sm:$0xf0]  ;;  %v8100_v20 = vld [vmem:[#allocation11 + $0x270] sm:$0xf]  ;;  %v8220_v43 = vld [vmem:[#allocation11 + $0x360] sm:$0xf] }
 0x672   : > { %6957 = vmatpush.bf16.msra.mxu0 %v7797_v0  ;;  %v5994_v42 = vadd.f32 %v10226_v19, %v5904_v46  ;;  %v6002_v56 = vadd.f32 %v10226_v19, %v5912_v52  ;;  %v8416_v9 = vld [vmem:[#allocation11 + $0x274] sm:$0xf0]  ;;  %v5995_v59 = vadd.f32 %v10234_v36, %v5905_v22  ;;  %v6003_v2 = vadd.f32 %v10234_v36, %v5913_v13  ;;  %v8164_v7 = vld [vmem:[#allocation11 + $0x2f0] sm:$0xf]  ;;  %v8446_v58 = vld [vmem:[#allocation11 + $0x364] sm:$0xf0] }
 0x673   : > { %6990 = vmatpush.bf16.msra.mxu1 %v7861_v5  ;;  %v8229_v35 = vor.u32 %v8448_v41, %v8228_v57  ;;  %v8432_v45 = vld [vmem:[#allocation11 + $0x2f4] sm:$0xf0]  ;;  %v6065_v8 = vmax.f32 %v5993_v11, 0.0  ;;  %v6073_v44 = vmax.f32 %v6001_v47, 0.0  ;;  %v5996_v10 = vadd.f32 %v10254_v33, %v5906_v25  ;;  %v8284_v5 = vld [vmem:[#allocation11 + $0x3e0] sm:$0xf] }
 0x674   : > { %7023 = vmatpush.bf16.msra.mxu2 %v7925_v50  ;;  %v6066_v48 = vmax.f32 %v5994_v42, 0.0  ;;  %v6074_v28 = vmax.f32 %v6002_v56, 0.0  ;;  %v6067_v23 = vmax.f32 %v5995_v59, 0.0  ;;  %v6075_v3 = vmax.f32 %v6003_v2, 0.0  ;;  %v8462_v50 = vld [vmem:[#allocation11 + $0x3e4] sm:$0xf0] }
 0x675   : > { %7056 = vmatpush.bf16.msra.mxu3 %v7989_v30  ;;  %v6004_v0 = vadd.f32 %v10254_v33, %v5914_v49  ;;  %v10258_v18 = vpack.c.bf16 %v6073_v44, %v6065_v8  ;;  %v8293_v34 = vor.u32 %v8464_v21, %v8292_v27  ;;  %v8092_v30 = vld [vmem:[#allocation11 + $0x260] sm:$0xf]  ;;  %v8414_v31 = vld [vmem:[#allocation11 + $0x264] sm:$0xf0]  ;;  %v5829_v32 = vld [vmem:[#allocation2 + $0x180] sm:$0xff]  ;;  %v6068_v40 = vmax.f32 %v5996_v10, 0.0 }
 0x676   : > { %6958 = vmatpush.bf16.msra.mxu0 %v7789_v14  ;;  %v10260_v6 = vpack.c.bf16 %v6074_v28, %v6066_v48  ;;  %v10268_v54 = vpack.c.bf16 %v6075_v3, %v6067_v23  ;;  %v8101_v4 = vor.u32 %v8416_v9, %v8100_v20  ;;  %v5837_v53 = vld [vmem:[#allocation2 + $0x88] sm:$0xff]  ;;  %v5830_v38 = vld [vmem:[#allocation2 + $0x190] sm:$0xff]  ;;  %v5838_v46 = vld [vmem:[#allocation2] sm:$0xff]  ;;  %v8165_v52 = vor.u32 %v8432_v45, %v8164_v7 }
 0x677   : > { %6991 = vmatpush.bf16.msra.mxu1 %v7853_v62  ;;  %v6076_v14 = vmax.f32 %v6004_v0, 0.0  ;;  %v8221_v12 = vor.u32 %v8446_v58, %v8220_v43  ;;  %v8285_v17 = vor.u32 %v8462_v50, %v8284_v5  ;;  %v5831_v62 = vld [vmem:[#allocation2 + $0x140] sm:$0xff]  ;;  %v5839_v57 = vld [vmem:[#allocation2 + $0x188] sm:$0xff]  ;;  %v8093_v61 = vor.u32 %v8414_v31, %v8092_v30  ;;  %v8430_v41 = vld [vmem:[#allocation11 + $0x2e4] sm:$0xf0] }
 0x678   : > { %7024 = vmatpush.bf16.msra.mxu2 %v7917_v63  ;;  %v8156_v63 = vld [vmem:[#allocation11 + $0x2e0] sm:$0xf]  ;;  %v5919_v22 = vmul.f32 %v10217_v1, %v5829_v32  ;;  %v5927_v60 = vmul.f32 %v10217_v1, %v5837_v53  ;;  %v5920_v39 = vmul.f32 %v10223_v24, %v5830_v38  ;;  %v5832_v13 = vld [vmem:[#allocation2 + $0x1c0] sm:$0xff]  ;;  %v5921_v49 = vmul.f32 %v10231_v26, %v5831_v62  ;;  %v5840_v11 = vld [vmem:[#allocation2 + $0x38] sm:$0xff] }
 0x679   : > { %7057 = vmatpush.bf16.msra.mxu3 %v7981_v16  ;;  %6959 = vmatmul.bf16.vlgmr.msra.gmra.mxu0 %v10258_v18  ;;  %v10274_v37 = vpack.c.bf16 %v6076_v14, %v6068_v40  ;;  %v5928_v16 = vmul.f32 %v10223_v24, %v5838_v46  ;;  %v5929_v27 = vmul.f32 %v10231_v26, %v5839_v57  ;;  %v8212_v47 = vld [vmem:[#allocation11 + $0x350] sm:$0xf]  ;;  %v8444_v20 = vld [vmem:[#allocation11 + $0x354] sm:$0xf0]  ;;  %v8204_v58 = vld [vmem:[#allocation11 + $0x340] sm:$0xf] }
 0x67a   : > { %6992 = vmatmul.bf16.vlgmr.msra.gmra.mxu1 %v10260_v6  ;;  %7083 = vmatpush.bf16.msrb.mxu0 %v8101_v4  ;;  %v10284_v25 = vadd.f32 %v10220_v15, %v5919_v22  ;;  %v8157_v42 = vor.u32 %v8430_v41, %v8156_v63  ;;  %v6017_v56 = vadd.f32 %v10220_v15, %v5927_v60  ;;  %v8276_v9 = vld [vmem:[#allocation11 + $0x3d0] sm:$0xf]  ;;  %v8460_v59 = vld [vmem:[#allocation11 + $0x3d4] sm:$0xf0]  ;;  %v8442_v23 = vld [vmem:[#allocation11 + $0x344] sm:$0xf0] }
 0x67b   : > { %7025 = vmatmul.bf16.vlgmr.msra.gmra.mxu2 %v10268_v54  ;;  %7116 = vmatpush.bf16.msrb.mxu1 %v8165_v52  ;;  %v6010_v21 = vadd.f32 %v10226_v19, %v5920_v39  ;;  %v6018_v2 = vadd.f32 %v10226_v19, %v5928_v16  ;;  %v5922_v7 = vmul.f32 %v10237_v51, %v5832_v13  ;;  %v8084_v45 = vld [vmem:[#allocation11 + $0x250] sm:$0xf]  ;;  %v8412_v43 = vld [vmem:[#allocation11 + $0x254] sm:$0xf0]  ;;  %v8268_v5 = vld [vmem:[#allocation11 + $0x3c0] sm:$0xf] }
 0x67c   : > { %7149 = vmatpush.bf16.msrb.mxu2 %v8229_v35  ;;  %7058 = vmatmul.bf16.vlgmr.msra.gmra.mxu3 %v10274_v37  ;;  %v6011_v35 = vadd.f32 %v10234_v36, %v5921_v49  ;;  %v8148_v8 = vld [vmem:[#allocation11 + $0x2d0] sm:$0xf]  ;;  %v6019_v44 = vadd.f32 %v10234_v36, %v5929_v27  ;;  %v5930_v48 = vmul.f32 %v10237_v51, %v5840_v11  ;;  %v8428_v28 = vld [vmem:[#allocation11 + $0x2d4] sm:$0xf0]  ;;  %v6081_v3 = vmax.f32 %v10284_v25, 0.0  ;;  %v5846_v4 = vld [vmem:[#allocation2 + $0xf8] sm:$0xff] }
 0x67d   : > { %7182 = vmatpush.bf16.msrb.mxu3 %v8293_v34  ;;  %v6012_v10 = vadd.f32 %v10254_v33, %v5922_v7  ;;  %v8213_v0 = vor.u32 %v8444_v20, %v8212_v47  ;;  %v8458_v50 = vld [vmem:[#allocation11 + $0x3c4] sm:$0xf0]  ;;  %v6089_v34 = vmax.f32 %v6017_v56, 0.0  ;;  %v6082_v30 = vmax.f32 %v6010_v21, 0.0  ;;  %v5845_v40 = vld [vmem:[#allocation2 + $0x80] sm:$0xff]  ;;  %v5853_v14 = vld [vmem:[#allocation2 + $0x48] sm:$0xff] }
 0x67e   : > { %7084 = vmatpush.bf16.msrb.mxu0 %v8093_v61  ;;  %v6020_v31 = vadd.f32 %v10254_v33, %v5930_v48  ;;  %v8277_v32 = vor.u32 %v8460_v59, %v8276_v9  ;;  %v6090_v53 = vmax.f32 %v6018_v2, 0.0  ;;  %v6083_v38 = vmax.f32 %v6011_v35, 0.0  ;;  %v5855_v62 = vld [vmem:[#allocation2 + $0x238] sm:$0xff]  ;;  %v5848_v22 = vld [vmem:[#allocation2 + $0x170] sm:$0xff]  ;;  %v5856_v25 = vld [vmem:[#allocation2 + $0x160] sm:$0xff] }
 0x67f   : > { %7117 = vmatpush.bf16.msrb.mxu1 %v8157_v42  ;;  %v8085_v46 = vor.u32 %v8412_v43, %v8084_v45  ;;  %v8149_v52 = vor.u32 %v8428_v28, %v8148_v8  ;;  %v6091_v57 = vmax.f32 %v6019_v44, 0.0  ;;  %v6084_v61 = vmax.f32 %v6012_v10, 0.0  ;;  %v8076_v56 = vld [vmem:[#allocation11 + $0x240] sm:$0xf]  ;;  %v8410_v21 = vld [vmem:[#allocation11 + $0x244] sm:$0xf0] }
 0x680   : > { %7150 = vmatpush.bf16.msrb.mxu2 %v8221_v12  ;;  %v5854_v12 = vld [vmem:[#allocation2 + $0x98] sm:$0xff]  ;;  %v8205_v63 = vor.u32 %v8442_v23, %v8204_v58  ;;  %v8269_v41 = vor.u32 %v8458_v50, %v8268_v5  ;;  %v6092_v60 = vmax.f32 %v6020_v31, 0.0  ;;  %v5935_v39 = vmul.f32 %v10217_v1, %v5845_v40  ;;  %v8140_v20 = vld [vmem:[#allocation11 + $0x2c0] sm:$0xf]  ;;  %v8196_v7 = vld [vmem:[#allocation11 + $0x330] sm:$0xf] }
 0x681   : > { %7183 = vmatpush.bf16.msrb.mxu3 %v8285_v17  ;;  %v5847_v17 = vld [vmem:[#allocation2 + $0x78] sm:$0xff]  ;;  %v5943_v16 = vmul.f32 %v10217_v1, %v5853_v14  ;;  %v5936_v13 = vmul.f32 %v10223_v24, %v5846_v4  ;;  %v5944_v49 = vmul.f32 %v10223_v24, %v5854_v12  ;;  %v5945_v11 = vmul.f32 %v10231_v26, %v5855_v62  ;;  %v8440_v45 = vld [vmem:[#allocation11 + $0x334] sm:$0xf0]  ;;  %v8260_v28 = vld [vmem:[#allocation11 + $0x3b0] sm:$0xf] }
 0x682   : > { %7085 = vmatpush.bf16.msrb.mxu0 %v8085_v46  ;;  %v5937_v27 = vmul.f32 %v10231_v26, %v5847_v17  ;;  %v10304_v47 = vpack.c.bf16 %v6089_v34, %v6081_v3  ;;  %v5938_v42 = vmul.f32 %v10237_v51, %v5848_v22  ;;  %v10307_v9 = vpack.c.bf16 %v6090_v53, %v6082_v30  ;;  %v8426_v35 = vld [vmem:[#allocation11 + $0x2c4] sm:$0xf0]  ;;  %v8456_v58 = vld [vmem:[#allocation11 + $0x3b4] sm:$0xf0]  ;;  %v8068_v5 = vld [vmem:[#allocation11 + $0x230] sm:$0xf] }
 0x683   : > { %7118 = vmatpush.bf16.msrb.mxu1 %v8149_v52  ;;  %v10309_v59 = vpack.c.bf16 %v6091_v57, %v6083_v38  ;;  %v5946_v2 = vmul.f32 %v10237_v51, %v5856_v25  ;;  %v10312_v43 = vpack.c.bf16 %v6092_v60, %v6084_v61  ;;  %v6025_v8 = vadd.f32 %v10220_v15, %v5935_v39  ;;  %v8408_v50 = vld [vmem:[#allocation11 + $0x234] sm:$0xf0]  ;;  %v8132_v40 = vld [vmem:[#allocation11 + $0x2b0] sm:$0xf]  ;;  %v5861_v62 = vld [vmem:[#allocation2 + $0x90] sm:$0xff] }
 0x684   : > { %7151 = vmatpush.bf16.msrb.mxu2 %v8213_v0  ;;  %v6033_v44 = vadd.f32 %v10220_v15, %v5943_v16  ;;  %v6026_v48 = vadd.f32 %v10226_v19, %v5936_v13  ;;  %v6034_v23 = vadd.f32 %v10226_v19, %v5944_v49  ;;  %v6027_v3 = vadd.f32 %v10234_v36, %v5937_v27  ;;  %v8424_v14 = vld [vmem:[#allocation11 + $0x2b4] sm:$0xf0]  ;;  %v5869_v57 = vld [vmem:[#allocation2 + $0x10] sm:$0xff]  ;;  %v5871_v13 = vld [vmem:[#allocation2 + $0x178] sm:$0xff] }
 0x685   : > { %7184 = vmatpush.bf16.msrb.mxu3 %v8277_v32  ;;  %v6035_v10 = vadd.f32 %v10234_v36, %v5945_v11  ;;  %v8077_v0 = vor.u32 %v8410_v21, %v8076_v56  ;;  %v6028_v34 = vadd.f32 %v10254_v33, %v5938_v42  ;;  %v6036_v30 = vadd.f32 %v10254_v33, %v5946_v2  ;;  %v5862_v61 = vld [vmem:[#allocation2 + $0x130] sm:$0xff]  ;;  %v5870_v39 = vld [vmem:[#allocation2 + $0x128] sm:$0xff]  ;;  %v8438_v49 = vld [vmem:[#allocation11 + $0x324] sm:$0xf0] }
 0x686   : > { %v8141_v31 = vor.u32 %v8426_v35, %v8140_v20  ;;  %v8197_v32 = vor.u32 %v8440_v45, %v8196_v7  ;;  %v8261_v4 = vor.u32 %v8456_v58, %v8260_v28  ;;  %v6097_v53 = vmax.f32 %v6025_v8, 0.0  ;;  %v5863_v16 = vld [vmem:[#allocation2 + $0x68] sm:$0xff]  ;;  %v8188_v25 = vld [vmem:[#allocation11 + $0x320] sm:$0xf]  ;;  %v8454_v11 = vld [vmem:[#allocation11 + $0x3a4] sm:$0xf0] }
 0x687   : > { %7086 = vmatpush.bf16.msrb.mxu0 %v8077_v0  ;;  %v8069_v38 = vor.u32 %v8408_v50, %v8068_v5  ;;  %v6105_v46 = vmax.f32 %v6033_v44, 0.0  ;;  %v6098_v52 = vmax.f32 %v6026_v48, 0.0  ;;  %v6106_v12 = vmax.f32 %v6034_v23, 0.0  ;;  %v8252_v27 = vld [vmem:[#allocation11 + $0x3a0] sm:$0xf] }
 0x688   : > { %7152 = vmatpush.bf16.msrb.mxu2 %v8205_v63  ;;  %7119 = vmatpush.bf16.msrb.mxu1 %v8141_v31  ;;  %v8133_v17 = vor.u32 %v8424_v14, %v8132_v40  ;;  %v6099_v63 = vmax.f32 %v6027_v3, 0.0  ;;  %v6100_v22 = vmax.f32 %v6028_v34, 0.0  ;;  %v6108_v60 = vmax.f32 %v6036_v30, 0.0  ;;  %v8060_v56 = vld [vmem:[#allocation11 + $0x220] sm:$0xf] }
 0x689   : > { %7185 = vmatpush.bf16.msrb.mxu3 %v8269_v41  ;;  %6964 = vmatmul.bf16.gmra.mxu0 %v10304_v47  ;;  %v6107_v41 = vmax.f32 %v6035_v10, 0.0  ;;  %v5951_v42 = vmul.f32 %v10217_v1, %v5861_v62  ;;  %v8406_v21 = vld [vmem:[#allocation11 + $0x224] sm:$0xf0]  ;;  %v8124_v20 = vld [vmem:[#allocation11 + $0x2a0] sm:$0xf]  ;;  %v10327_v2 = vpack.c.bf16 %v6105_v46, %v6097_v53  ;;  %v5959_v35 = vmul.f32 %v10217_v1, %v5869_v57 }
 0x68a   : > { %6997 = vmatmul.bf16.gmra.mxu1 %v10307_v9  ;;  %v5952_v7 = vmul.f32 %v10223_v24, %v5862_v61  ;;  %v8422_v45 = vld [vmem:[#allocation11 + $0x2a4] sm:$0xf0]  ;;  %v8180_v8 = vld [vmem:[#allocation11 + $0x310] sm:$0xf]  ;;  %v8436_v44 = vld [vmem:[#allocation11 + $0x314] sm:$0xf0]  ;;  %v10331_v48 = vpack.c.bf16 %v6106_v12, %v6098_v52  ;;  %v10335_v58 = vpack.c.bf16 %v6108_v60, %v6100_v22  ;;  %v8189_v23 = vor.u32 %v8438_v49, %v8188_v25 }
 0x68b   : > { %7030 = vmatmul.bf16.gmra.mxu2 %v10309_v59  ;;  %7087 = vmatpush.bf16.msrb.mxu0 %v8069_v38  ;;  %v10333_v28 = vpack.c.bf16 %v6107_v41, %v6099_v63  ;;  %v8244_v3 = vld [vmem:[#allocation11 + $0x390] sm:$0xf]  ;;  %v8452_v10 = vld [vmem:[#allocation11 + $0x394] sm:$0xf0]  ;;  %v5960_v5 = vmul.f32 %v10223_v24, %v5870_v39  ;;  %v5953_v50 = vmul.f32 %v10231_v26, %v5863_v16  ;;  %v5878_v31 = vld [vmem:[#allocation2 + $0x58] sm:$0x7] }
 0x68c   : > { %7063 = vmatmul.bf16.gmra.mxu3 %v10312_v43  ;;  %7153 = vmatpush.bf16.msrb.mxu2 %v8197_v32  ;;  %v5877_v0 = vld [vmem:[#allocation2 + $0x1a0] sm:$0x7]  ;;  %v5961_v34 = vmul.f32 %v10231_v26, %v5871_v13  ;;  %v8253_v30 = vor.u32 %v8454_v11, %v8252_v27  ;;  %v5879_v32 = vld [vmem:[#allocation2 + $0x118] sm:$0x7]  ;;  %v10341_v40 = vadd.f32 %v10220_v15, %v5951_v42  ;;  %v8404_v62 = vld [vmem:[#allocation11 + $0x214] sm:$0xf0] }
 0x68d   : > { %7186 = vmatpush.bf16.msrb.mxu3 %v8261_v4  ;;  %7120 = vmatpush.bf16.msrb.mxu1 %v8133_v17  ;;  %v8061_v14 = vor.u32 %v8406_v21, %v8060_v56  ;;  %v8125_v4 = vor.u32 %v8422_v45, %v8124_v20  ;;  %v8181_v53 = vor.u32 %v8436_v44, %v8180_v8  ;;  %v5880_v38 = vld [vmem:[#allocation2 + $0x20] sm:$0x7]  ;;  %v5864_v16 = vld [vmem:[#allocation2 + $0x230] sm:$0xff]  ;;  %v5872_v13 = vld [vmem:[#allocation2 + $0x208] sm:$0xff] }
 0x68e   : > { %v6049_v46 = vadd.f32 %v10220_v15, %v5959_v35  ;;  %v6042_v52 = vadd.f32 %v10226_v19, %v5952_v7  ;;  %v8245_v12 = vor.u32 %v8452_v10, %v8244_v3  ;;  %v8052_v17 = vld [vmem:[#allocation11 + $0x210] sm:$0xf]  ;;  %v5967_v57 = vmul.f32 %v10217_v1, %v5877_v0  ;;  %v8420_v35 = vld [vmem:[#allocation11 + $0x294] sm:$0xf0]  ;;  %v8172_v7 = vld [vmem:[#allocation11 + $0x300] sm:$0xf] }
 0x68f   : > { %7088 = vmatpush.bf16.msrb.mxu0 %v8061_v14  ;;  %v5968_v61 = vmul.f32 %v10223_v24, %v5878_v31  ;;  %v5969_v63 = vmul.f32 %v10231_v26, %v5879_v32  ;;  %v5970_v41 = vmul.f32 %v10237_v51, %v5880_v38  ;;  %v6050_v22 = vadd.f32 %v10226_v19, %v5960_v5  ;;  %v8116_v20 = vld [vmem:[#allocation11 + $0x290] sm:$0xf]  ;;  %v8434_v8 = vld [vmem:[#allocation11 + $0x304] sm:$0xf0]  ;;  %v8236_v44 = vld [vmem:[#allocation11 + $0x380] sm:$0xf] }
 0x690   : > { %7154 = vmatpush.bf16.msrb.mxu2 %v8189_v23  ;;  %v6043_v60 = vadd.f32 %v10234_v36, %v5953_v50  ;;  %v6051_v39 = vadd.f32 %v10234_v36, %v5961_v34  ;;  %v10353_v25 = vadd.f32 %v10220_v15, %v5967_v57  ;;  %v8053_v1 = vor.u32 %v8404_v62, %v8052_v17  ;;  %v8450_v23 = vld [vmem:[#allocation11 + $0x384] sm:$0xf0]  ;;  %v8044_v0 = vld [vmem:[#allocation11 + $0x200] sm:$0xf]  ;;  %v5817_v32 = vld [vmem:[#allocation2 + $0xe8] sm:$0xff] }
 0x691   : > { %7187 = vmatpush.bf16.msrb.mxu3 %v8253_v30  ;;  %7121 = vmatpush.bf16.msrb.mxu1 %v8125_v4  ;;  %v10356_v49 = vadd.f32 %v10226_v19, %v5968_v61  ;;  %v10359_v24 = vadd.f32 %v10234_v36, %v5969_v63  ;;  %v10362_v26 = vadd.f32 %v10254_v33, %v5970_v41  ;;  %v6113_v27 = vmax.f32 %v10341_v40, 0.0  ;;  %v8402_v5 = vld [vmem:[#allocation11 + $0x204] sm:$0xf0]  ;;  %v8108_v50 = vld [vmem:[#allocation11 + $0x280] sm:$0xf]  ;;  %v5825_v40 = vld [vmem:[#allocation2 + $0x108] sm:$0xff] }
 0x692   : > { %v6121_v11 = vmax.f32 %v6049_v46, 0.0  ;;  %v5954_v15 = vmul.f32 %v10237_v51, %v5864_v16  ;;  %v5962_v42 = vmul.f32 %v10237_v51, %v5872_v13  ;;  %v6114_v19 = vmax.f32 %v6042_v52, 0.0  ;;  %v8418_v31 = vld [vmem:[#allocation11 + $0x284] sm:$0xf0]  ;;  %v5819_v16 = vld [vmem:[#allocation2 + $0x70] sm:$0xff] }
 0x693   : > { %v6122_v36 = vmax.f32 %v6050_v22, 0.0  ;;  %v6115_v56 = vmax.f32 %v6043_v60, 0.0  ;;  %v6123_v21 = vmax.f32 %v6051_v39, 0.0  ;;  %7089 = vmatpush.bf16.msrb.mxu0 %v8053_v1  ;;  %v8117_v45 = vor.u32 %v8420_v35, %v8116_v20  ;;  %v5818_v60 = vld [vmem:[#allocation2 + $0xf0] sm:$0xff] }
 0x694   : > { %7155 = vmatpush.bf16.msrb.mxu2 %v8181_v53  ;;  %v6044_v51 = vadd.f32 %v10254_v33, %v5954_v15  ;;  %v8173_v3 = vor.u32 %v8434_v8, %v8172_v7  ;;  %v8237_v10 = vor.u32 %v8450_v23, %v8236_v44  ;;  %v6052_v34 = vadd.f32 %v10254_v33, %v5962_v42  ;;  %v5826_v39 = vld [vmem:[#allocation2 + $0x110] sm:$0xff]  ;;  %v5820_v15 = vld [vmem:[#allocation2 + $0x120] sm:$0xff]  ;;  %v5828_v42 = vld [vmem:[#allocation2 + $0xb8] sm:$0xff] }
 0x695   : > { %7188 = vmatpush.bf16.msrb.mxu3 %v8245_v12  ;;  %7122 = vmatpush.bf16.msrb.mxu1 %v8117_v45  ;;  %v8045_v30 = vor.u32 %v8402_v5, %v8044_v0  ;;  %v10374_v14 = vperm.slane %v10212_v55, 4  ;;  %v10377_v4 = vperm.slane %v10214_v29, 4  ;;  %v8109_v53 = vor.u32 %v8418_v31, %v8108_v50 }
 0x696   : > { %v10379_v38 = vpack.c.bf16 %v6121_v11, %v6113_v27  ;;  %v10381_v46 = vpack.c.bf16 %v6122_v36, %v6114_v19  ;;  %v6116_v12 = vmax.f32 %v6044_v51, 0.0  ;;  %v10386_v17 = vperm.slane %v10212_v55, 5 }
 0x697   : > { %7090 = vmatpush.bf16.msrb.mxu0 %v8045_v30  ;;  %v5907_v33 = vmul.f32 %v10374_v14, %v5817_v32  ;;  %v5915_v52 = vmul.f32 %v10374_v14, %v5825_v40  ;;  %v10389_v62 = vperm.slane %v10212_v55, 6  ;;  %v10392_v57 = vperm.slane %v10212_v55, 7  ;;  %v5827_v55 = vld [vmem:[#allocation2 + $0x1f8] sm:$0xff] }
 0x698   : > { %7156 = vmatpush.bf16.msrb.mxu2 %v8173_v3  ;;  %v10394_v61 = vpack.c.bf16 %v6123_v21, %v6115_v56  ;;  %v6124_v63 = vmax.f32 %v6052_v34, 0.0  ;;  %v5908_v13 = vmul.f32 %v10386_v17, %v5818_v60  ;;  %v5916_v1 = vmul.f32 %v10386_v17, %v5826_v39  ;;  %v8351_v60 = vld [vmem:[#allocation11 + $0x74] sm:$0xf]  ;;  %v7846_v39 = vld [vmem:[#allocation11 + $0x78] sm:$0xf0] }
 0x699   : > { %6969 = vmatmul.bf16.gmra.mxu0 %v10327_v2  ;;  %7189 = vmatpush.bf16.msrb.mxu3 %v8237_v10  ;;  %v5997_v41 = vadd.f32 %v10377_v4, %v5907_v33  ;;  %v6005_v22 = vadd.f32 %v10377_v4, %v5915_v52  ;;  %v10401_v27 = vperm.slane %v10214_v29, 5  ;;  %v5909_v11 = vmul.f32 %v10389_v62, %v5819_v16 }
 0x69a   : > { %7002 = vmatmul.bf16.gmra.mxu1 %v10331_v48  ;;  %v5917_v56 = vmul.f32 %v10389_v62, %v5827_v55  ;;  %v10406_v21 = vperm.slane %v10214_v29, 6  ;;  %v5910_v7 = vmul.f32 %v10392_v57, %v5820_v15  ;;  %v5918_v45 = vmul.f32 %v10392_v57, %v5828_v42  ;;  %v7910_v55 = vld [vmem:[#allocation11 + $0xf8] sm:$0xf0]  ;;  %v7966_v15 = vld [vmem:[#allocation11 + $0x168] sm:$0xf0] }
 0x69b   : > { %7035 = vmatmul.bf16.gmra.mxu2 %v10333_v28  ;;  %7123 = vmatpush.bf16.msrb.mxu1 %v8109_v53  ;;  %v6069_v19 = vmax.f32 %v5997_v41, 0.0  ;;  %v6077_v36 = vmax.f32 %v6005_v22, 0.0  ;;  %v5998_v20 = vadd.f32 %v10401_v27, %v5908_v13  ;;  %v6006_v35 = vadd.f32 %v10401_v27, %v5916_v1  ;;  %v8399_v41 = vld [vmem:[#allocation11 + $0x1f4] sm:$0xf]  ;;  %v8038_v22 = vld [vmem:[#allocation11 + $0x1f8] sm:$0xf0] }
 0x69c   : > { %7068 = vmatmul.bf16.gmra.mxu3 %v10335_v58  ;;  %v5999_v44 = vadd.f32 %v10406_v21, %v5909_v11  ;;  %v6007_v23 = vadd.f32 %v10406_v21, %v5917_v56  ;;  %v10417_v51 = vperm.slane %v10214_v29, 7  ;;  %v10419_v3 = vpack.c.bf16 %v6124_v63, %v6116_v12  ;;  %v8383_v12 = vld [vmem:[#allocation11 + $0x174] sm:$0xf]  ;;  %v7974_v63 = vld [vmem:[#allocation11 + $0x178] sm:$0xf0] }
 0x69d   : > { %v10412_v8 = vpack.c.bf16 %v6077_v36, %v6069_v19  ;;  %v6070_v10 = vmax.f32 %v5998_v20, 0.0  ;;  %v6078_v0 = vmax.f32 %v6006_v35, 0.0  ;;  %v6129_v31 = vmax.f32 %v10353_v25, 0.0  ;;  %v8367_v1 = vld [vmem:[#allocation11 + $0xf4] sm:$0xf] }
 0x69e   : > { %v6071_v5 = vmax.f32 %v5999_v44, 0.0  ;;  %v6079_v50 = vmax.f32 %v6007_v23, 0.0  ;;  %v6000_v34 = vadd.f32 %v10417_v51, %v5910_v7  ;;  %v6008_v30 = vadd.f32 %v10417_v51, %v5918_v45  ;;  %v8397_v42 = vld [vmem:[#allocation11 + $0x1e4] sm:$0xf]  ;;  %v8030_v19 = vld [vmem:[#allocation11 + $0x1e8] sm:$0xf0] }
 0x69f   : > { %v6130_v32 = vmax.f32 %v10356_v49, 0.0  ;;  %v10426_v40 = vpack.c.bf16 %v6078_v0, %v6070_v10  ;;  %v6131_v29 = vmax.f32 %v10359_v24, 0.0  ;;  %v7977_v49 = vor.u32 %v8383_v12, %v7974_v63  ;;  %v8381_v24 = vld [vmem:[#allocation11 + $0x164] sm:$0xf]  ;;  %v7838_v35 = vld [vmem:[#allocation11 + $0x68] sm:$0xf0] }
 0x6a0   : > { %v10431_v53 = vpack.c.bf16 %v6079_v50, %v6071_v5  ;;  %v6072_v33 = vmax.f32 %v6000_v34, 0.0  ;;  %v6080_v52 = vmax.f32 %v6008_v30, 0.0  ;;  %v8041_v16 = vor.u32 %v8399_v41, %v8038_v22  ;;  %v8349_v20 = vld [vmem:[#allocation11 + $0x64] sm:$0xf]  ;;  %v7902_v44 = vld [vmem:[#allocation11 + $0xe8] sm:$0xf0] }
 0x6a1   : > { %v7849_v13 = vor.u32 %v8351_v60, %v7846_v39  ;;  %7281 = vmatpush.bf16.msra.mxu2 %v7977_v49  ;;  %v7913_v11 = vor.u32 %v8367_v1, %v7910_v55  ;;  %v7969_v36 = vor.u32 %v8381_v24, %v7966_v15  ;;  %v8033_v56 = vor.u32 %v8397_v42, %v8030_v19  ;;  %v8365_v7 = vld [vmem:[#allocation11 + $0xe4] sm:$0xf]  ;;  %v5841_v10 = vld [vmem:[#allocation2 + $0x1a8] sm:$0xff]  ;;  %v5842_v12 = vld [vmem:[#allocation2 + $0x220] sm:$0xff] }
 0x6a2   : > { %v10434_v25 = vpack.c.bf16 %v6080_v52, %v6072_v33  ;;  %7314 = vmatpush.bf16.msra.mxu3 %v8041_v16  ;;  %v7841_v45 = vor.u32 %v8349_v20, %v7838_v35  ;;  %v5833_v23 = vld [vmem:[#allocation2 + $0xd0] sm:$0xff]  ;;  %v7905_v0 = vor.u32 %v8365_v7, %v7902_v44  ;;  %v5931_v50 = vmul.f32 %v10374_v14, %v5841_v10  ;;  %v5834_v52 = vld [vmem:[#allocation2 + $0x138] sm:$0xff]  ;;  %v5835_v63 = vld [vmem:[#allocation2 + $0x60] sm:$0xff] }
 0x6a3   : > { %7215 = vmatpush.bf16.msra.mxu0 %v7849_v13  ;;  %7248 = vmatpush.bf16.msra.mxu1 %v7913_v11  ;;  %v5923_v5 = vmul.f32 %v10374_v14, %v5833_v23  ;;  %v10438_v34 = vpack.c.bf16 %v6129_v31, %v6129_v31  ;;  %v10440_v30 = vpack.c.bf16 %v6130_v32, %v6130_v32  ;;  %v6132_v41 = vmax.f32 %v10362_v26, 0.0  ;;  %v5843_v31 = vld [vmem:[#allocation2 + $0x1e8] sm:$0xff]  ;;  %v5836_v39 = vld [vmem:[#allocation2 + $0x1b8] sm:$0xff] }
 0x6a4   : > { %v10442_v33 = vpack.c.bf16 %v6131_v29, %v6131_v29  ;;  %v6021_v22 = vadd.f32 %v10377_v4, %v5931_v50  ;;  %v5924_v60 = vmul.f32 %v10386_v17, %v5834_v52  ;;  %v5844_v32 = vld [vmem:[#allocation2 + $0x1c8] sm:$0xff]  ;;  %v5932_v29 = vmul.f32 %v10386_v17, %v5842_v12  ;;  %v8379_v12 = vld [vmem:[#allocation11 + $0x154] sm:$0xf] }
 0x6a5   : > { %7282 = vmatpush.bf16.msra.mxu2 %v7969_v36  ;;  %v6013_v49 = vadd.f32 %v10377_v4, %v5923_v5  ;;  %v5925_v16 = vmul.f32 %v10389_v62, %v5835_v63  ;;  %v5933_v13 = vmul.f32 %v10389_v62, %v5843_v31  ;;  %v5926_v26 = vmul.f32 %v10392_v57, %v5836_v39  ;;  %v7958_v63 = vld [vmem:[#allocation11 + $0x158] sm:$0xf0] }
 0x6a6   : > { %7315 = vmatpush.bf16.msra.mxu3 %v8033_v56  ;;  %v6093_v55 = vmax.f32 %v6021_v22, 0.0  ;;  %v6014_v24 = vadd.f32 %v10401_v27, %v5924_v60  ;;  %v5934_v11 = vmul.f32 %v10392_v57, %v5844_v32  ;;  %v6022_v15 = vadd.f32 %v10401_v27, %v5932_v29  ;;  %v8022_v22 = vld [vmem:[#allocation11 + $0x1d8] sm:$0xf0]  ;;  %v8347_v60 = vld [vmem:[#allocation11 + $0x54] sm:$0xf] }
 0x6a7   : > { %7216 = vmatpush.bf16.msra.mxu0 %v7841_v45  ;;  %7249 = vmatpush.bf16.msra.mxu1 %v7905_v0  ;;  %v6085_v1 = vmax.f32 %v6013_v49, 0.0  ;;  %v6015_v42 = vadd.f32 %v10406_v21, %v5925_v16  ;;  %v6023_v19 = vadd.f32 %v10406_v21, %v5933_v13  ;;  %v6016_v36 = vadd.f32 %v10417_v51, %v5926_v26  ;;  %v7830_v31 = vld [vmem:[#allocation11 + $0x58] sm:$0xf0]  ;;  %v8363_v29 = vld [vmem:[#allocation11 + $0xd4] sm:$0xf] }
 0x6a8   : > { %v10458_v56 = vpack.c.bf16 %v6132_v41, %v6132_v41  ;;  %v6086_v35 = vmax.f32 %v6014_v24, 0.0  ;;  %v6024_v7 = vadd.f32 %v10417_v51, %v5934_v11  ;;  %v6094_v45 = vmax.f32 %v6022_v15, 0.0  ;;  %v8395_v41 = vld [vmem:[#allocation11 + $0x1d4] sm:$0xf]  ;;  %v7894_v16 = vld [vmem:[#allocation11 + $0xd8] sm:$0xf0] }
 0x6a9   : > { %6974 = vmatmul.bf16.gmra.mxu0 %v10379_v38  ;;  %v10460_v20 = vpack.c.bf16 %v6093_v55, %v6085_v1  ;;  %v6087_v44 = vmax.f32 %v6015_v42, 0.0  ;;  %v6095_v23 = vmax.f32 %v6023_v19, 0.0  ;;  %v6088_v10 = vmax.f32 %v6016_v36, 0.0  ;;  %v8377_v13 = vld [vmem:[#allocation11 + $0x144] sm:$0xf]  ;;  %v5849_v42 = vld [vmem:[#allocation2 + $0x198] sm:$0xff] }
 0x6aa   : > { %7007 = vmatmul.bf16.gmra.mxu1 %v10381_v46  ;;  %v6096_v0 = vmax.f32 %v6024_v7, 0.0  ;;  %v10466_v5 = vpack.c.bf16 %v6094_v45, %v6086_v35  ;;  %v7961_v49 = vor.u32 %v8379_v12, %v7958_v63  ;;  %v8025_v39 = vor.u32 %v8395_v41, %v8022_v22  ;;  %v7950_v1 = vld [vmem:[#allocation11 + $0x148] sm:$0xf0]  ;;  %v8393_v55 = vld [vmem:[#allocation11 + $0x1c4] sm:$0xf] }
 0x6ab   : > { %7040 = vmatmul.bf16.gmra.mxu2 %v10394_v61  ;;  %v10468_v50 = vpack.c.bf16 %v6095_v23, %v6087_v44  ;;  %v7833_v32 = vor.u32 %v8347_v60, %v7830_v31  ;;  %v7897_v26 = vor.u32 %v8363_v29, %v7894_v16  ;;  %v8014_v24 = vld [vmem:[#allocation11 + $0x1c8] sm:$0xf0]  ;;  %v7953_v11 = vor.u32 %v8377_v13, %v7950_v1  ;;  %v5857_v19 = vld [vmem:[#allocation2 + $0x50] sm:$0xff]  ;;  %v5850_v44 = vld [vmem:[#allocation2 + $0xe0] sm:$0xff] }
 0x6ac   : > { %7073 = vmatmul.bf16.gmra.mxu3 %v10419_v3  ;;  %v10471_v52 = vpack.c.bf16 %v6096_v0, %v6088_v10  ;;  %7283 = vmatpush.bf16.msra.mxu2 %v7961_v49  ;;  %v8017_v15 = vor.u32 %v8393_v55, %v8014_v24  ;;  %v5939_v36 = vmul.f32 %v10374_v14, %v5849_v42  ;;  %v5858_v23 = vld [vmem:[#allocation2 + $0x100] sm:$0xff]  ;;  %v5859_v63 = vld [vmem:[#allocation2 + $0x30] sm:$0xff] }
 0x6ad   : > { %7316 = vmatpush.bf16.msra.mxu3 %v8025_v39  ;;  %7217 = vmatpush.bf16.msra.mxu0 %v7833_v32  ;;  %v5947_v35 = vmul.f32 %v10374_v14, %v5857_v19  ;;  %v5851_v10 = vld [vmem:[#allocation2 + $0x1e0] sm:$0xff]  ;;  %v5940_v0 = vmul.f32 %v10386_v17, %v5850_v44  ;;  %v5948_v12 = vmul.f32 %v10386_v17, %v5858_v23  ;;  %v5852_v49 = vld [vmem:[#allocation2 + $0x1f0] sm:$0xff] }
 0x6ae   : > { %7250 = vmatpush.bf16.msra.mxu1 %v7897_v26  ;;  %v6029_v7 = vadd.f32 %v10377_v4, %v5939_v36  ;;  %v5941_v41 = vmul.f32 %v10389_v62, %v5851_v10  ;;  %v5860_v22 = vld [vmem:[#allocation2 + $0x1b0] sm:$0xff]  ;;  %v5949_v39 = vmul.f32 %v10389_v62, %v5859_v63  ;;  %v5942_v32 = vmul.f32 %v10392_v57, %v5852_v49  ;;  %v8375_v49 = vld [vmem:[#allocation11 + $0x134] sm:$0xf] }
 0x6af   : > { %v6037_v45 = vadd.f32 %v10377_v4, %v5947_v35  ;;  %v6030_v29 = vadd.f32 %v10401_v27, %v5940_v0  ;;  %v6038_v16 = vadd.f32 %v10401_v27, %v5948_v12  ;;  %v5950_v26 = vmul.f32 %v10392_v57, %v5860_v22  ;;  %v8345_v10 = vld [vmem:[#allocation11 + $0x44] sm:$0xf]  ;;  %v7822_v0 = vld [vmem:[#allocation11 + $0x48] sm:$0xf0]  ;;  %v7942_v22 = vld [vmem:[#allocation11 + $0x138] sm:$0xf0] }
 0x6b0   : > { %7284 = vmatpush.bf16.msra.mxu2 %v7953_v11  ;;  %v6101_v60 = vmax.f32 %v6029_v7, 0.0  ;;  %v6031_v13 = vadd.f32 %v10406_v21, %v5941_v41  ;;  %v6039_v55 = vadd.f32 %v10406_v21, %v5949_v39  ;;  %v6032_v24 = vadd.f32 %v10417_v51, %v5942_v32  ;;  %v8361_v12 = vld [vmem:[#allocation11 + $0xc4] sm:$0xf]  ;;  %v7886_v41 = vld [vmem:[#allocation11 + $0xc8] sm:$0xf0] }
 0x6b1   : > { %7317 = vmatpush.bf16.msra.mxu3 %v8017_v15  ;;  %v6109_v31 = vmax.f32 %v6037_v45, 0.0  ;;  %v6102_v11 = vmax.f32 %v6030_v29, 0.0  ;;  %v6110_v15 = vmax.f32 %v6038_v16, 0.0  ;;  %v6040_v19 = vadd.f32 %v10417_v51, %v5950_v26  ;;  %v8391_v39 = vld [vmem:[#allocation11 + $0x1b4] sm:$0xf] }
 0x6b2   : > { %v6103_v42 = vmax.f32 %v6031_v13, 0.0  ;;  %v6111_v36 = vmax.f32 %v6039_v55, 0.0  ;;  %v6104_v35 = vmax.f32 %v6032_v24, 0.0  ;;  %v7825_v63 = vor.u32 %v8345_v10, %v7822_v0  ;;  %v8006_v32 = vld [vmem:[#allocation11 + $0x1b8] sm:$0xf0]  ;;  %v5865_v55 = vld [vmem:[#allocation2 + $0x1d8] sm:$0xff] }
 0x6b3   : > { %v10486_v1 = vpack.c.bf16 %v6109_v31, %v6101_v60  ;;  %v10492_v7 = vpack.c.bf16 %v6110_v15, %v6102_v11  ;;  %v6112_v45 = vmax.f32 %v6040_v19, 0.0  ;;  %v7889_v60 = vor.u32 %v8361_v12, %v7886_v41  ;;  %v8343_v29 = vld [vmem:[#allocation11 + $0x34] sm:$0xf]  ;;  %v7814_v13 = vld [vmem:[#allocation11 + $0x38] sm:$0xf0]  ;;  %v5873_v24 = vld [vmem:[#allocation2 + $0x210] sm:$0xff] }
 0x6b4   : > { %v10496_v44 = vpack.c.bf16 %v6111_v36, %v6103_v42  ;;  %v7945_v31 = vor.u32 %v8375_v49, %v7942_v22  ;;  %7218 = vmatpush.bf16.msra.mxu0 %v7825_v63  ;;  %v8009_v16 = vor.u32 %v8391_v39, %v8006_v32  ;;  %v7817_v26 = vor.u32 %v8343_v29, %v7814_v13  ;;  %v5866_v11 = vld [vmem:[#allocation2 + $0x228] sm:$0xff]  ;;  %v5874_v19 = vld [vmem:[#allocation2 + $0x1d0] sm:$0xff]  ;;  %v5868_v63 = vld [vmem:[#allocation2 + $0x200] sm:$0xff] }
 0x6b5   : > { %v10499_v23 = vpack.c.bf16 %v6112_v45, %v6104_v35  ;;  %7251 = vmatpush.bf16.msra.mxu1 %v7889_v60  ;;  %v5955_v15 = vmul.f32 %v10374_v14, %v5865_v55  ;;  %v5963_v42 = vmul.f32 %v10374_v14, %v5873_v24  ;;  %v5956_v36 = vmul.f32 %v10386_v17, %v5866_v11  ;;  %v5867_v35 = vld [vmem:[#allocation2 + $0x218] sm:$0xff]  ;;  %v5875_v45 = vld [vmem:[#allocation2 + $0x168] sm:$0xff]  ;;  %v5876_v41 = vld [vmem:[#allocation2 + $0xc0] sm:$0xff] }
 0x6b6   : > { %7285 = vmatpush.bf16.msra.mxu2 %v7945_v31  ;;  %7318 = vmatpush.bf16.msra.mxu3 %v8009_v16  ;;  %v5964_v10 = vmul.f32 %v10386_v17, %v5874_v19  ;;  %v5957_v0 = vmul.f32 %v10389_v62, %v5867_v35  ;;  %v5965_v12 = vmul.f32 %v10389_v62, %v5875_v45  ;;  %v7878_v35 = vld [vmem:[#allocation11 + $0xb8] sm:$0xf0] }
 0x6b7   : > { %v6045_v49 = vadd.f32 %v10377_v4, %v5955_v15  ;;  %v6053_v22 = vadd.f32 %v10377_v4, %v5963_v42  ;;  %v6046_v60 = vadd.f32 %v10401_v27, %v5956_v36  ;;  %v5958_v31 = vmul.f32 %v10392_v57, %v5868_v63  ;;  %v8359_v36 = vld [vmem:[#allocation11 + $0xb4] sm:$0xf] }
 0x6b8   : > { %7219 = vmatpush.bf16.msra.mxu0 %v7817_v26  ;;  %v6054_v39 = vadd.f32 %v10401_v27, %v5964_v10  ;;  %v6047_v32 = vadd.f32 %v10406_v21, %v5957_v0  ;;  %v6055_v29 = vadd.f32 %v10406_v21, %v5965_v12  ;;  %v5966_v16 = vmul.f32 %v10392_v57, %v5876_v41 }
 0x6b9   : > { %6979 = vmatmul.bf16.gmra.mxu0 %v10438_v34  ;;  %v6117_v13 = vmax.f32 %v6045_v49, 0.0  ;;  %v6125_v26 = vmax.f32 %v6053_v22, 0.0  ;;  %v6118_v55 = vmax.f32 %v6046_v60, 0.0  ;;  %v6048_v24 = vadd.f32 %v10417_v51, %v5958_v31  ;;  %v8373_v49 = vld [vmem:[#allocation11 + $0x124] sm:$0xf] }
 0x6ba   : > { %7012 = vmatmul.bf16.gmra.mxu1 %v10440_v30  ;;  %v6126_v11 = vmax.f32 %v6054_v39, 0.0  ;;  %v6119_v15 = vmax.f32 %v6047_v32, 0.0  ;;  %v6127_v42 = vmax.f32 %v6055_v29, 0.0  ;;  %v6056_v19 = vadd.f32 %v10417_v51, %v5966_v16  ;;  %v7934_v22 = vld [vmem:[#allocation11 + $0x128] sm:$0xf0] }
 0x6bb   : > { %7045 = vmatmul.bf16.gmra.mxu2 %v10442_v33  ;;  %v10518_v45 = vpack.c.bf16 %v6125_v26, %v6117_v13  ;;  %v6120_v10 = vmax.f32 %v6048_v24, 0.0  ;;  %v7881_v0 = vor.u32 %v8359_v36, %v7878_v35  ;;  %v8389_v60 = vld [vmem:[#allocation11 + $0x1a4] sm:$0xf]  ;;  %v7937_v39 = vor.u32 %v8373_v49, %v7934_v22  ;;  %v7998_v32 = vld [vmem:[#allocation11 + $0x1a8] sm:$0xf0] }
 0x6bc   : > { %7078 = vmatmul.bf16.gmra.mxu3 %v10458_v56  ;;  %v10522_v12 = vpack.c.bf16 %v6126_v11, %v6118_v55  ;;  %v10524_v63 = vpack.c.bf16 %v6127_v42, %v6119_v15  ;;  %v6128_v41 = vmax.f32 %v6056_v19, 0.0  ;;  %v8001_v29 = vor.u32 %v8389_v60, %v7998_v32  ;;  %v8341_v16 = vld [vmem:[#allocation11 + $0x24] sm:$0xf]  ;;  %v7806_v13 = vld [vmem:[#allocation11 + $0x28] sm:$0xf0] }
 0x6bd   : > { %7252 = vmatpush.bf16.msra.mxu1 %v7881_v0  ;;  %7286 = vmatpush.bf16.msra.mxu2 %v7937_v39  ;;  %v8357_v26 = vld [vmem:[#allocation11 + $0xa4] sm:$0xf]  ;;  %v7809_v55 = vor.u32 %v8341_v16, %v7806_v13  ;;  %v7870_v24 = vld [vmem:[#allocation11 + $0xa8] sm:$0xf0]  ;;  %v5881_v11 = vld [vmem:[#allocation2 + $0x148] sm:$0x7] }
 0x6be   : > { %v10527_v31 = vpack.c.bf16 %v6128_v41, %v6120_v10  ;;  %7319 = vmatpush.bf16.msra.mxu3 %v8001_v29  ;;  %v5882_v15 = vld [vmem:[#allocation2 + $0xa8] sm:$0x7]  ;;  %v7873_v42 = vor.u32 %v8357_v26, %v7870_v24  ;;  %v5971_v19 = vmul.f32 %v10374_v14, %v5881_v11  ;;  %v5883_v35 = vld [vmem:[#allocation2 + $0x150] sm:$0x7]  ;;  %v5884_v10 = vld [vmem:[#allocation2 + $0xa0] sm:$0x7] }
 0x6bf   : > { %v5972_v36 = vmul.f32 %v10386_v17, %v5882_v15  ;;  %7220 = vmatpush.bf16.msra.mxu0 %v7809_v55  ;;  %v5973_v0 = vmul.f32 %v10389_v62, %v5883_v35  ;;  %v5974_v41 = vmul.f32 %v10392_v57, %v5884_v10  ;;  %v8371_v17 = vld [vmem:[#allocation11 + $0x114] sm:$0xf]  ;;  %v7926_v39 = vld [vmem:[#allocation11 + $0x118] sm:$0xf0]  ;;  %v10549_v26 = vld [vmem:[#allocation12] sm:$0x3] }
 0x6c0   : > { %v10534_v49 = vadd.f32 %v10377_v4, %v5971_v19  ;;  %v8387_v32 = vld [vmem:[#allocation11 + $0x194] sm:$0xf]  ;;  %v7929_v62 = vor.u32 %v8371_v17, %v7926_v39  ;;  %v7990_v57 = vld [vmem:[#allocation11 + $0x198] sm:$0xf0]  ;;  %v8369_v55 = vld [vmem:[#allocation11 + $0x104] sm:$0xf] }
 0x6c1   : > { %7253 = vmatpush.bf16.msra.mxu1 %v7873_v42  ;;  %v10537_v22 = vadd.f32 %v10401_v27, %v5972_v36  ;;  %v10540_v60 = vadd.f32 %v10406_v21, %v5973_v0  ;;  %v10543_v14 = vadd.f32 %v10417_v51, %v5974_v41  ;;  %v8339_v29 = vld [vmem:[#allocation11 + $0x14] sm:$0xf]  ;;  %v7798_v16 = vld [vmem:[#allocation11 + $0x18] sm:$0xf0]  ;;  %v7993_v4 = vor.u32 %v8387_v32, %v7990_v57  ;;  %v7918_v24 = vld [vmem:[#allocation11 + $0x108] sm:$0xf0] }
 0x6c2   : > { %v7801_v27 = vor.u32 %v8339_v29, %v7798_v16  ;;  %7287 = vmatpush.bf16.msra.mxu2 %v7929_v62  ;;  %v8355_v21 = vld [vmem:[#allocation11 + $0x94] sm:$0xf]  ;;  %v7862_v51 = vld [vmem:[#allocation11 + $0x98] sm:$0xf0]  ;;  %v8385_v11 = vld [vmem:[#allocation11 + $0x184] sm:$0xf]  ;;  %v7921_v15 = vor.u32 %v8369_v55, %v7918_v24 }
 0x6c3   : > { %7320 = vmatpush.bf16.msra.mxu3 %v7993_v4  ;;  %v7865_v13 = vor.u32 %v8355_v21, %v7862_v51  ;;  %v7982_v42 = vld [vmem:[#allocation11 + $0x188] sm:$0xf0]  ;;  %v8337_v19 = vld [vmem:[#allocation11 + $0x4] sm:$0xf]  ;;  %v10552_v35 = vperm.slane %v10549_v26, 0 }
 0x6c4   : > { %7221 = vmatpush.bf16.msra.mxu0 %v7801_v27  ;;  %v7790_v36 = vld [vmem:[#allocation11 + $0x8] sm:$0xf0]  ;;  %v7985_v10 = vor.u32 %v8385_v11, %v7982_v42  ;;  %v8353_v41 = vld [vmem:[#allocation11 + $0x84] sm:$0xf]  ;;  %v8447_v16 = vld [vmem:[#allocation11 + $0x374] sm:$0xf] }
 0x6c5   : > { %7254 = vmatpush.bf16.msra.mxu1 %v7865_v13  ;;  %v7793_v0 = vor.u32 %v8337_v19, %v7790_v36  ;;  %v7854_v17 = vld [vmem:[#allocation11 + $0x88] sm:$0xf0]  ;;  %v8230_v4 = vld [vmem:[#allocation11 + $0x378] sm:$0xf0]  ;;  %v8463_v27 = vld [vmem:[#allocation11 + $0x3f4] sm:$0xf] }
 0x6c6   : > { %7288 = vmatpush.bf16.msra.mxu2 %v7921_v15  ;;  %v7857_v32 = vor.u32 %v8353_v41, %v7854_v17  ;;  %v8233_v21 = vor.u32 %v8447_v16, %v8230_v4  ;;  %v8294_v51 = vld [vmem:[#allocation11 + $0x3f8] sm:$0xf0]  ;;  %v6133_v36 = vmax.f32 %v10534_v49, 0.0  ;;  %v6135_v41 = vmax.f32 %v10540_v60, 0.0  ;;  %v8415_v17 = vld [vmem:[#allocation11 + $0x274] sm:$0xf] }
 0x6c7   : > { %7321 = vmatpush.bf16.msra.mxu3 %v7985_v10  ;;  %v8297_v55 = vor.u32 %v8463_v27, %v8294_v51  ;;  %v8445_v16 = vld [vmem:[#allocation11 + $0x364] sm:$0xf]  ;;  %v8222_v27 = vld [vmem:[#allocation11 + $0x368] sm:$0xf0]  ;;  %v6136_v49 = vmax.f32 %v10543_v14, 0.0 }
 0x6c8   : > { %7222 = vmatpush.bf16.msra.mxu0 %v7793_v0  ;;  %v6134_v0 = vmax.f32 %v10537_v22, 0.0  ;;  %v8286_v51 = vld [vmem:[#allocation11 + $0x3e8] sm:$0xf0] }
 0x6c9   : > { %7091 = vmatmul.bf16.vlgmr.msrb.gmra.mxu0 %v10412_v8  ;;  %7255 = vmatpush.bf16.msra.mxu1 %v7857_v32  ;;  %v10573_v14 = vpack.c.bf16 %v6136_v49, %v6136_v49 }
 0x6ca   : > { %7124 = vmatmul.bf16.vlgmr.msrb.gmra.mxu1 %v10426_v40 }
 0x6cb   : > { %7157 = vmatmul.bf16.vlgmr.msrb.gmra.mxu2 %v10431_v53  ;;  %10878 = vst [vmem:[#allocation43_spill] sm:$0xff] %v10573_v14 }
 0x6cc   : > { %7190 = vmatmul.bf16.vlgmr.msrb.gmra.mxu3 %v10434_v25  ;;  %7413 = vmatpush.bf16.msrb.mxu2 %v8233_v21  ;;  %v8461_v21 = vld [vmem:[#allocation11 + $0x3e4] sm:$0xf] }
 0x6cd   : > { %7446 = vmatpush.bf16.msrb.mxu3 %v8297_v55  ;;  %v8289_v55 = vor.u32 %v8461_v21, %v8286_v51 }
 0x6d1   : > { %7447 = vmatpush.bf16.msrb.mxu3 %v8289_v55 }
 0x6d9   : > { %7096 = vmatmul.bf16.gmra.mxu0 %v10460_v20 }
 0x6da   : > { %7129 = vmatmul.bf16.gmra.mxu1 %v10466_v5 }
 0x6db   : > { %7162 = vmatmul.bf16.gmra.mxu2 %v10468_v50 }
 0x6dc   : > { %7195 = vmatmul.bf16.gmra.mxu3 %v10471_v52 }
 0x6e9   : > { %7101 = vmatmul.bf16.gmra.mxu0 %v10486_v1 }
 0x6ea   : > { %7134 = vmatmul.bf16.gmra.mxu1 %v10492_v7 }
 0x6eb   : > { %7167 = vmatmul.bf16.gmra.mxu2 %v10496_v44 }
 0x6ec   : > { %7200 = vmatmul.bf16.gmra.mxu3 %v10499_v23 }
 0x6f6   : > { %v6960_v39 = vpop.f32.mrf.mxu0 }
 0x6f7   : > { %v6961_v62 = vadd.f32 %v6960_v39, %v10552_v35  ;;  %v6993_v57 = vpop.f32.mrf.mxu1  ;;  %v8102_v39 = vld [vmem:[#allocation11 + $0x278] sm:$0xf0] }
 0x6f9   : > { %v6994_v29 = vadd.f32 %v6993_v57, %v6961_v62  ;;  %7106 = vmatmul.bf16.gmra.mxu0 %v10518_v45  ;;  %v8105_v62 = vor.u32 %v8415_v17, %v8102_v39  ;;  %v8431_v57 = vld [vmem:[#allocation11 + $0x2f4] sm:$0xf] }
 0x6fa   : > { %7139 = vmatmul.bf16.gmra.mxu1 %v10522_v12 }
 0x6fb   : > { %7172 = vmatmul.bf16.gmra.mxu2 %v10524_v63  ;;  %7347 = vmatpush.bf16.msrb.mxu0 %v8105_v62 }
 0x6fc   : > { %7205 = vmatmul.bf16.gmra.mxu3 %v10527_v31 }
 0x6fe   : > { %v7026_v13 = vpop.f32.mrf.mxu2  ;;  %v6962_v15 = vpop.f32.mrf.mxu0 }
 0x6ff   : > { %v7027_v24 = vadd.f32 %v7026_v13, %v6994_v29  ;;  %v7059_v11 = vpop.f32.mrf.mxu3  ;;  %v6963_v42 = vadd.f32 %v6962_v15, %v10552_v35  ;;  %v6995_v19 = vpop.f32.mrf.mxu1  ;;  %v8166_v29 = vld [vmem:[#allocation11 + $0x2f8] sm:$0xf0]  ;;  %v8225_v13 = vor.u32 %v8445_v16, %v8222_v27  ;;  %v8429_v16 = vld [vmem:[#allocation11 + $0x2e4] sm:$0xf] }
 0x700   : > { %v8169_v4 = vor.u32 %v8431_v57, %v8166_v29  ;;  %v8094_v29 = vld [vmem:[#allocation11 + $0x268] sm:$0xf0] }
 0x701   : > { %v10561_v10 = vadd.f32 %v7059_v11, %v7027_v24  ;;  %v6996_v32 = vadd.f32 %v6995_v19, %v6963_v42  ;;  %v10566_v24 = vpack.c.bf16 %v6133_v36, %v6133_v36  ;;  %7414 = vmatpush.bf16.msrb.mxu2 %v8225_v13  ;;  %v10568_v42 = vpack.c.bf16 %v6134_v0, %v6134_v0  ;;  %v8413_v36 = vld [vmem:[#allocation11 + $0x264] sm:$0xf] }
 0x702   : > { %7380 = vmatpush.bf16.msrb.mxu1 %v8169_v4  ;;  %v10570_v19 = vpack.c.bf16 %v6135_v41, %v6135_v41  ;;  %v8097_v0 = vor.u32 %v8413_v36, %v8094_v29  ;;  %v8158_v41 = vld [vmem:[#allocation11 + $0x2e8] sm:$0xf0]  ;;  %v8411_v36 = vld [vmem:[#allocation11 + $0x254] sm:$0xf]  ;;  %v8086_v29 = vld [vmem:[#allocation11 + $0x258] sm:$0xf0] }
 0x704   : > { %7348 = vmatpush.bf16.msrb.mxu0 %v8097_v0  ;;  %v8089_v0 = vor.u32 %v8411_v36, %v8086_v29  ;;  %v8270_v36 = vld [vmem:[#allocation11 + $0x3c8] sm:$0xf0]  ;;  %v8409_v29 = vld [vmem:[#allocation11 + $0x244] sm:$0xf] }
 0x706   : > { %v7028_v22 = vpop.f32.mrf.mxu2  ;;  %v6965_v15 = vpop.f32.mrf.mxu0 }
 0x707   : > { %v7029_v60 = vadd.f32 %v7028_v22, %v6996_v32  ;;  %v7061_v11 = vpop.f32.mrf.mxu3  ;;  %v6966_v17 = vadd.f32 %v6965_v15, %v10552_v35  ;;  %v6998_v39 = vpop.f32.mrf.mxu1  ;;  %v8161_v32 = vor.u32 %v8429_v16, %v8158_v41  ;;  %v8443_v22 = vld [vmem:[#allocation11 + $0x354] sm:$0xf] }
 0x708   : > { %v8427_v41 = vld [vmem:[#allocation11 + $0x2d4] sm:$0xf]  ;;  %7349 = vmatpush.bf16.msrb.mxu0 %v8089_v0 }
 0x709   : > { %v10575_v62 = vadd.f32 %v7061_v11, %v7029_v60  ;;  %v6999_v57 = vadd.f32 %v6998_v39, %v6966_v17  ;;  %7111 = vmatmul.bf16.gmra.mxu0 %v10566_v24  ;;  %7381 = vmatpush.bf16.msrb.mxu1 %v8161_v32  ;;  %v8214_v60 = vld [vmem:[#allocation11 + $0x358] sm:$0xf0]  ;;  %v8459_v11 = vld [vmem:[#allocation11 + $0x3d4] sm:$0xf] }
 0x70a   : > { %7144 = vmatmul.bf16.gmra.mxu1 %v10568_v42  ;;  %v8217_v17 = vor.u32 %v8443_v22, %v8214_v60  ;;  %v8278_v39 = vld [vmem:[#allocation11 + $0x3d8] sm:$0xf0]  ;;  %v8441_v60 = vld [vmem:[#allocation11 + $0x344] sm:$0xf] }
 0x70b   : > { %7177 = vmatmul.bf16.gmra.mxu2 %v10570_v19  ;;  %v8281_v16 = vor.u32 %v8459_v11, %v8278_v39  ;;  %v8150_v32 = vld [vmem:[#allocation11 + $0x2d8] sm:$0xf0]  ;;  %v8206_v11 = vld [vmem:[#allocation11 + $0x348] sm:$0xf0]  ;;  %v8457_v39 = vld [vmem:[#allocation11 + $0x3c4] sm:$0xf] }
 0x70c   : > { %7210 = vmatmul.bf16.gmra.mxu3 %v10573_v14  ;;  %7415 = vmatpush.bf16.msrb.mxu2 %v8217_v17  ;;  %v8209_v17 = vor.u32 %v8441_v60, %v8206_v11  ;;  %v8455_v60 = vld [vmem:[#allocation11 + $0x3b4] sm:$0xf]  ;;  %v8262_v11 = vld [vmem:[#allocation11 + $0x3b8] sm:$0xf0] }
 0x70d   : > { %7448 = vmatpush.bf16.msrb.mxu3 %v8281_v16  ;;  %v8078_v16 = vld [vmem:[#allocation11 + $0x248] sm:$0xf0] }
 0x70e   : > { %v7031_v4 = vpop.f32.mrf.mxu2  ;;  %v6967_v51 = vpop.f32.mrf.mxu0  ;;  %v8081_v0 = vor.u32 %v8409_v29, %v8078_v16  ;;  %v8407_v16 = vld [vmem:[#allocation11 + $0x234] sm:$0xf] }
 0x70f   : > { %v7032_v27 = vadd.f32 %v7031_v4, %v6999_v57  ;;  %v7064_v21 = vpop.f32.mrf.mxu3  ;;  %v6968_v49 = vadd.f32 %v6967_v51, %v10552_v35  ;;  %v7000_v13 = vpop.f32.mrf.mxu1  ;;  %v8153_v57 = vor.u32 %v8427_v41, %v8150_v32 }
 0x710   : > { %7416 = vmatpush.bf16.msrb.mxu2 %v8209_v17  ;;  %7350 = vmatpush.bf16.msrb.mxu0 %v8081_v0  ;;  %v8265_v17 = vor.u32 %v8455_v60, %v8262_v11  ;;  %v8070_v0 = vld [vmem:[#allocation11 + $0x238] sm:$0xf0]  ;;  %v8254_v60 = vld [vmem:[#allocation11 + $0x3a8] sm:$0xf0] }
 0x711   : > { %v10582_v55 = vadd.f32 %v7064_v21, %v7032_v27  ;;  %v7001_v15 = vadd.f32 %v7000_v13, %v6968_v49  ;;  %7382 = vmatpush.bf16.msrb.mxu1 %v8153_v57 }
 0x716   : > { %v7033_v4 = vpop.f32.mrf.mxu2  ;;  %v6970_v51 = vpop.f32.mrf.mxu0 }
 0x717   : > { %v7034_v27 = vadd.f32 %v7033_v4, %v7001_v15  ;;  %v7066_v21 = vpop.f32.mrf.mxu3  ;;  %v6971_v14 = vadd.f32 %v6970_v51, %v10552_v35  ;;  %v7003_v49 = vpop.f32.mrf.mxu1  ;;  %v8273_v15 = vor.u32 %v8457_v39, %v8270_v36 }
 0x719   : > { %v10585_v13 = vadd.f32 %v7066_v21, %v7034_v27  ;;  %v7004_v22 = vadd.f32 %v7003_v49, %v6971_v14  ;;  %7223 = vmatmul.bf16.vlgmr.msra.gmra.mxu0 %v10258_v18  ;;  %7449 = vmatpush.bf16.msrb.mxu3 %v8273_v15  ;;  %v8142_v27 = vld [vmem:[#allocation11 + $0x2c8] sm:$0xf0]  ;;  %v8439_v21 = vld [vmem:[#allocation11 + $0x334] sm:$0xf]  ;;  %v8198_v49 = vld [vmem:[#allocation11 + $0x338] sm:$0xf0] }
 0x71a   : > { %7256 = vmatmul.bf16.vlgmr.msra.gmra.mxu1 %v10260_v6  ;;  %v8201_v39 = vor.u32 %v8439_v21, %v8198_v49  ;;  %v8437_v21 = vld [vmem:[#allocation11 + $0x324] sm:$0xf] }
 0x71b   : > { %7289 = vmatmul.bf16.vlgmr.msra.gmra.mxu2 %v10268_v54  ;;  %v8425_v54 = vld [vmem:[#allocation11 + $0x2c4] sm:$0xf] }
 0x71c   : > { %7322 = vmatmul.bf16.vlgmr.msra.gmra.mxu3 %v10274_v37  ;;  %v8145_v51 = vor.u32 %v8425_v54, %v8142_v27  ;;  %7417 = vmatpush.bf16.msrb.mxu2 %v8201_v39  ;;  %v8134_v54 = vld [vmem:[#allocation11 + $0x2b8] sm:$0xf0] }
 0x71d   : > { %7450 = vmatpush.bf16.msrb.mxu3 %v8265_v17 }
 0x71e   : > { %v7036_v41 = vpop.f32.mrf.mxu2  ;;  %v6972_v32 = vpop.f32.mrf.mxu0  ;;  %7383 = vmatpush.bf16.msrb.mxu1 %v8145_v51  ;;  %v8453_v51 = vld [vmem:[#allocation11 + $0x3a4] sm:$0xf] }
 0x71f   : > { %v7037_v14 = vadd.f32 %v7036_v41, %v7004_v22  ;;  %v7069_v18 = vpop.f32.mrf.mxu3  ;;  %v6973_v57 = vadd.f32 %v6972_v32, %v10552_v35  ;;  %v7005_v6 = vpop.f32.mrf.mxu1  ;;  %v8257_v39 = vor.u32 %v8453_v51, %v8254_v60  ;;  %v8182_v60 = vld [vmem:[#allocation11 + $0x318] sm:$0xf0] }
 0x721   : > { %v10592_v4 = vadd.f32 %v7069_v18, %v7037_v14  ;;  %v7006_v37 = vadd.f32 %v7005_v6, %v6973_v57  ;;  %v8073_v18 = vor.u32 %v8407_v16, %v8070_v0  ;;  %v8423_v6 = vld [vmem:[#allocation11 + $0x2b4] sm:$0xf]  ;;  %7451 = vmatpush.bf16.msrb.mxu3 %v8257_v39  ;;  %v8421_v16 = vld [vmem:[#allocation11 + $0x2a4] sm:$0xf] }
 0x722   : > { %v8137_v27 = vor.u32 %v8423_v6, %v8134_v54 }
 0x723   : > { %7351 = vmatpush.bf16.msrb.mxu0 %v8073_v18 }
 0x724   : > { %7384 = vmatpush.bf16.msrb.mxu1 %v8137_v27 }
 0x726   : > { %v7038_v22 = vpop.f32.mrf.mxu2  ;;  %v6975_v29 = vpop.f32.mrf.mxu0 }
 0x727   : > { %v7039_v36 = vadd.f32 %v7038_v22, %v7006_v37  ;;  %v7071_v15 = vpop.f32.mrf.mxu3  ;;  %v6976_v41 = vadd.f32 %v6975_v29, %v10552_v35  ;;  %v7008_v14 = vpop.f32.mrf.mxu1  ;;  %v8190_v37 = vld [vmem:[#allocation11 + $0x328] sm:$0xf0] }
 0x728   : > { %v8193_v49 = vor.u32 %v8437_v21, %v8190_v37  ;;  %v8062_v29 = vld [vmem:[#allocation11 + $0x228] sm:$0xf0] }
 0x729   : > { %v10595_v32 = vadd.f32 %v7071_v15, %v7039_v36  ;;  %v7009_v57 = vadd.f32 %v7008_v14, %v6976_v41  ;;  %7228 = vmatmul.bf16.gmra.mxu0 %v10304_v47  ;;  %v8405_v15 = vld [vmem:[#allocation11 + $0x224] sm:$0xf]  ;;  %v8126_v14 = vld [vmem:[#allocation11 + $0x2a8] sm:$0xf0] }
 0x72a   : > { %7261 = vmatmul.bf16.gmra.mxu1 %v10307_v9  ;;  %7418 = vmatpush.bf16.msrb.mxu2 %v8193_v49  ;;  %v8065_v41 = vor.u32 %v8405_v15, %v8062_v29  ;;  %v8435_v49 = vld [vmem:[#allocation11 + $0x314] sm:$0xf] }
 0x72b   : > { %7294 = vmatmul.bf16.gmra.mxu2 %v10309_v59 }
 0x72c   : > { %7327 = vmatmul.bf16.gmra.mxu3 %v10312_v43  ;;  %7352 = vmatpush.bf16.msrb.mxu0 %v8065_v41  ;;  %v8174_v41 = vld [vmem:[#allocation11 + $0x308] sm:$0xf0] }
 0x72e   : > { %v7041_v11 = vpop.f32.mrf.mxu2  ;;  %v6977_v22 = vpop.f32.mrf.mxu0 }
 0x72f   : > { %v7042_v17 = vadd.f32 %v7041_v11, %v7009_v57  ;;  %v7074_v47 = vpop.f32.mrf.mxu3  ;;  %v6978_v9 = vadd.f32 %v6977_v22, %v10552_v35  ;;  %v7010_v36 = vpop.f32.mrf.mxu1  ;;  %v8129_v57 = vor.u32 %v8421_v16, %v8126_v14  ;;  %v8451_v11 = vld [vmem:[#allocation11 + $0x394] sm:$0xf]  ;;  %v8054_v22 = vld [vmem:[#allocation11 + $0x218] sm:$0xf0]  ;;  %v8449_v14 = vld [vmem:[#allocation11 + $0x384] sm:$0xf] }
 0x730   : > { %v8118_v16 = vld [vmem:[#allocation11 + $0x298] sm:$0xf0] }
 0x731   : > { %v10602_v59 = vadd.f32 %v7074_v47, %v7042_v17  ;;  %v7011_v43 = vadd.f32 %v7010_v36, %v6978_v9  ;;  %7385 = vmatpush.bf16.msrb.mxu1 %v8129_v57  ;;  %v8185_v17 = vor.u32 %v8435_v49, %v8182_v60  ;;  %v8403_v47 = vld [vmem:[#allocation11 + $0x214] sm:$0xf]  ;;  %v8401_v57 = vld [vmem:[#allocation11 + $0x204] sm:$0xf] }
 0x732   : > { %v8057_v29 = vor.u32 %v8403_v47, %v8054_v22 }
 0x733   : > { %7419 = vmatpush.bf16.msrb.mxu2 %v8185_v17 }
 0x734   : > { %7353 = vmatpush.bf16.msrb.mxu0 %v8057_v29 }
 0x736   : > { %v7043_v0 = vpop.f32.mrf.mxu2  ;;  %v6980_v54 = vpop.f32.mrf.mxu0 }
 0x737   : > { %v7044_v18 = vadd.f32 %v7043_v0, %v7011_v43  ;;  %v7076_v6 = vpop.f32.mrf.mxu3  ;;  %v6981_v27 = vadd.f32 %v6980_v54, %v10552_v35  ;;  %v7013_v21 = vpop.f32.mrf.mxu1  ;;  %v8246_v35 = vld [vmem:[#allocation11 + $0x398] sm:$0xf0]  ;;  %v8238_v54 = vld [vmem:[#allocation11 + $0x388] sm:$0xf0] }
 0x738   : > { %v8249_v15 = vor.u32 %v8451_v11, %v8246_v35  ;;  %v8241_v49 = vor.u32 %v8449_v14, %v8238_v54  ;;  %v8417_v11 = vld [vmem:[#allocation11 + $0x284] sm:$0xf] }
 0x739   : > { %v10605_v37 = vadd.f32 %v7076_v6, %v7044_v18  ;;  %v7014_v51 = vadd.f32 %v7013_v21, %v6981_v27  ;;  %7233 = vmatmul.bf16.gmra.mxu0 %v10327_v2  ;;  %v8419_v2 = vld [vmem:[#allocation11 + $0x294] sm:$0xf]  ;;  %v8046_v27 = vld [vmem:[#allocation11 + $0x208] sm:$0xf0] }
 0x73a   : > { %7266 = vmatmul.bf16.gmra.mxu1 %v10331_v48  ;;  %7452 = vmatpush.bf16.msrb.mxu3 %v8249_v15  ;;  %v8049_v60 = vor.u32 %v8401_v57, %v8046_v27 }
 0x73b   : > { %7299 = vmatmul.bf16.gmra.mxu2 %v10333_v28  ;;  %v8121_v28 = vor.u32 %v8419_v2, %v8118_v16 }
 0x73c   : > { %7332 = vmatmul.bf16.gmra.mxu3 %v10335_v58  ;;  %v8433_v58 = vld [vmem:[#allocation11 + $0x304] sm:$0xf]  ;;  %7354 = vmatpush.bf16.msrb.mxu0 %v8049_v60 }
 0x73d   : > { %7386 = vmatpush.bf16.msrb.mxu1 %v8121_v28  ;;  %v8177_v6 = vor.u32 %v8433_v58, %v8174_v41 }
 0x73e   : > { %v7046_v39 = vpop.f32.mrf.mxu2  ;;  %v6982_v43 = vpop.f32.mrf.mxu0  ;;  %7453 = vmatpush.bf16.msrb.mxu3 %v8241_v49 }
 0x73f   : > { %v7047_v9 = vadd.f32 %v7046_v39, %v7014_v51  ;;  %v7079_v36 = vpop.f32.mrf.mxu3  ;;  %v7015_v48 = vpop.f32.mrf.mxu1  ;;  %v8110_v39 = vld [vmem:[#allocation11 + $0x288] sm:$0xf0]  ;;  %7420 = vmatpush.bf16.msrb.mxu2 %v8177_v6 }
 0x740   : > { %v8113_v35 = vor.u32 %v8417_v11, %v8110_v39 }
 0x741   : > { %v10611_v0 = vadd.f32 %v7079_v36, %v7047_v9 }
 0x742   : > { %7387 = vmatpush.bf16.msrb.mxu1 %v8113_v35 }
 0x746   : > { %v7048_v18 = vpop.f32.mrf.mxu2  ;;  %v7092_v51 = vpop.f32.mrf.mxu0 }
 0x747   : > { %v7081_v21 = vpop.f32.mrf.mxu3  ;;  %v7125_v17 = vpop.f32.mrf.mxu1  ;;  %v7093_v47 = vadd.f32 %v7092_v51, %v10561_v10 }
 0x749   : > { %7238 = vmatmul.bf16.gmra.mxu0 %v10379_v38  ;;  %v7126_v22 = vadd.f32 %v7125_v17, %v7093_v47 }
 0x74a   : > { %7271 = vmatmul.bf16.gmra.mxu1 %v10381_v46 }
 0x74b   : > { %7304 = vmatmul.bf16.gmra.mxu2 %v10394_v61 }
 0x74c   : > { %7337 = vmatmul.bf16.gmra.mxu3 %v10419_v3 }
 0x74e   : > { %v7158_v9 = vpop.f32.mrf.mxu2  ;;  %v7094_v15 = vpop.f32.mrf.mxu0 }
 0x74f   : > { %v7159_v36 = vadd.f32 %v7158_v9, %v7126_v22  ;;  %v7191_v43 = vpop.f32.mrf.mxu3  ;;  %v7127_v29 = vpop.f32.mrf.mxu1  ;;  %v7095_v10 = vadd.f32 %v7094_v15, %v10575_v62 }
 0x751   : > { %v7192_v2 = vadd.f32 %v7191_v43, %v7159_v36  ;;  %v7128_v48 = vadd.f32 %v7127_v29, %v7095_v10 }
 0x753   : > { %v7479_v16 = vmax.f32 %v7192_v2, 0.0 }
 0x755   : > { %7497 = vst [vmem:[#allocation14] sm:$0xff] %v7479_v16 }
 0x756   : > { %v7160_v38 = vpop.f32.mrf.mxu2  ;;  %v7097_v46 = vpop.f32.mrf.mxu0 }
 0x757   : > { %v7161_v28 = vadd.f32 %v7160_v38, %v7128_v48  ;;  %v7193_v58 = vpop.f32.mrf.mxu3  ;;  %v7130_v41 = vpop.f32.mrf.mxu1  ;;  %v7098_v3 = vadd.f32 %v7097_v46, %v10582_v55 }
 0x759   : > { %v7194_v61 = vadd.f32 %v7193_v58, %v7161_v28  ;;  %7243 = vmatmul.bf16.gmra.mxu0 %v10438_v34  ;;  %v7131_v62 = vadd.f32 %v7130_v41, %v7098_v3 }
 0x75a   : > { %7276 = vmatmul.bf16.gmra.mxu1 %v10440_v30 }
 0x75b   : > { %v7481_v14 = vmax.f32 %v7194_v61, 0.0  ;;  %7309 = vmatmul.bf16.gmra.mxu2 %v10442_v33 }
 0x75c   : > { %7342 = vmatmul.bf16.gmra.mxu3 %v10458_v56 }
 0x75d   : > { %7499 = vst [vmem:[#allocation14 + $0x10] sm:$0xff] %v7481_v14 }
 0x75e   : > { %v7163_v18 = vpop.f32.mrf.mxu2  ;;  %v7099_v57 = vpop.f32.mrf.mxu0 }
 0x75f   : > { %v7164_v6 = vadd.f32 %v7163_v18, %v7131_v62  ;;  %v7196_v54 = vpop.f32.mrf.mxu3  ;;  %v7132_v27 = vpop.f32.mrf.mxu1  ;;  %v7100_v51 = vadd.f32 %v7099_v57, %v10585_v13 }
 0x761   : > { %v7197_v21 = vadd.f32 %v7196_v54, %v7164_v6  ;;  %v7133_v34 = vadd.f32 %v7132_v27, %v7100_v51 }
 0x763   : > { %v7483_v55 = vmax.f32 %v7197_v21, 0.0 }
 0x765   : > { %7501 = vst [vmem:[#allocation14 + $0x20] sm:$0xff] %v7483_v55 }
 0x766   : > { %v7165_v49 = vpop.f32.mrf.mxu2  ;;  %v7102_v11 = vpop.f32.mrf.mxu0 }
 0x767   : > { %v7166_v60 = vadd.f32 %v7165_v49, %v7133_v34  ;;  %v7198_v30 = vpop.f32.mrf.mxu3  ;;  %v7135_v33 = vpop.f32.mrf.mxu1  ;;  %v7103_v56 = vadd.f32 %v7102_v11, %v10592_v4 }
 0x769   : > { %v7199_v39 = vadd.f32 %v7198_v30, %v7166_v60  ;;  %7355 = vmatmul.bf16.vlgmr.msrb.gmra.mxu0 %v10412_v8  ;;  %v7136_v13 = vadd.f32 %v7135_v33, %v7103_v56 }
 0x76a   : > { %7388 = vmatmul.bf16.vlgmr.msrb.gmra.mxu1 %v10426_v40 }
 0x76b   : > { %v7485_v17 = vmax.f32 %v7199_v39, 0.0  ;;  %7421 = vmatmul.bf16.vlgmr.msrb.gmra.mxu2 %v10431_v53 }
 0x76c   : > { %7454 = vmatmul.bf16.vlgmr.msrb.gmra.mxu3 %v10434_v25 }
 0x76d   : > { %7503 = vst [vmem:[#allocation14 + $0x30] sm:$0xff] %v7485_v17 }
 0x76e   : > { %v7168_v35 = vpop.f32.mrf.mxu2  ;;  %v7104_v9 = vpop.f32.mrf.mxu0 }
 0x76f   : > { %v7169_v47 = vadd.f32 %v7168_v35, %v7136_v13  ;;  %v7201_v22 = vpop.f32.mrf.mxu3  ;;  %v7137_v36 = vpop.f32.mrf.mxu1  ;;  %v7105_v15 = vadd.f32 %v7104_v9, %v10595_v32 }
 0x771   : > { %v7202_v43 = vadd.f32 %v7201_v22, %v7169_v47  ;;  %v7138_v8 = vadd.f32 %v7137_v36, %v7105_v15 }
 0x773   : > { %v7487_v4 = vmax.f32 %v7202_v43, 0.0  ;;  %v10879_v43 = vld [vmem:[#allocation43_spill] sm:$0xff] }
 0x775   : > { %7505 = vst [vmem:[#allocation14 + $0x40] sm:$0xff] %v7487_v4 }
 0x776   : > { %v7170_v29 = vpop.f32.mrf.mxu2  ;;  %v7107_v10 = vpop.f32.mrf.mxu0 }
 0x777   : > { %v7171_v2 = vadd.f32 %v7170_v29, %v7138_v8  ;;  %v7203_v40 = vpop.f32.mrf.mxu3  ;;  %v7140_v53 = vpop.f32.mrf.mxu1  ;;  %v7108_v25 = vadd.f32 %v7107_v10, %v10602_v59 }
 0x779   : > { %v7204_v16 = vadd.f32 %v7203_v40, %v7171_v2  ;;  %7360 = vmatmul.bf16.gmra.mxu0 %v10460_v20  ;;  %v7141_v32 = vadd.f32 %v7140_v53, %v7108_v25 }
 0x77a   : > { %7393 = vmatmul.bf16.gmra.mxu1 %v10466_v5 }
 0x77b   : > { %v7489_v48 = vmax.f32 %v7204_v16, 0.0  ;;  %7426 = vmatmul.bf16.gmra.mxu2 %v10468_v50 }
 0x77c   : > { %7459 = vmatmul.bf16.gmra.mxu3 %v10471_v52 }
 0x77d   : > { %7507 = vst [vmem:[#allocation14 + $0x50] sm:$0xff] %v7489_v48 }
 0x77e   : > { %v7173_v38 = vpop.f32.mrf.mxu2  ;;  %v7109_v46 = vpop.f32.mrf.mxu0 }
 0x77f   : > { %v7174_v28 = vadd.f32 %v7173_v38, %v7141_v32  ;;  %v7206_v58 = vpop.f32.mrf.mxu3  ;;  %v7142_v41 = vpop.f32.mrf.mxu1  ;;  %v7110_v3 = vadd.f32 %v7109_v46, %v10605_v37 }
 0x781   : > { %v7207_v61 = vadd.f32 %v7206_v58, %v7174_v28  ;;  %v7143_v20 = vadd.f32 %v7142_v41, %v7110_v3 }
 0x783   : > { %v7491_v59 = vmax.f32 %v7207_v61, 0.0 }
 0x785   : > { %7509 = vst [vmem:[#allocation14 + $0x60] sm:$0xff] %v7491_v59 }
 0x786   : > { %v7175_v14 = vpop.f32.mrf.mxu2  ;;  %v7112_v18 = vpop.f32.mrf.mxu0 }
 0x787   : > { %v7176_v62 = vadd.f32 %v7175_v14, %v7143_v20  ;;  %v7208_v5 = vpop.f32.mrf.mxu3  ;;  %v7145_v50 = vpop.f32.mrf.mxu1  ;;  %v7113_v52 = vadd.f32 %v7112_v18, %v10611_v0  ;;  %v10643_v0 = vperm.slane %v10549_v26, 1 }
 0x789   : > { %v7209_v6 = vadd.f32 %v7208_v5, %v7176_v62  ;;  %7365 = vmatmul.bf16.gmra.mxu0 %v10486_v1  ;;  %v7146_v37 = vadd.f32 %v7145_v50, %v7113_v52 }
 0x78a   : > { %7398 = vmatmul.bf16.gmra.mxu1 %v10492_v7 }
 0x78b   : > { %v7493_v54 = vmax.f32 %v7209_v6, 0.0  ;;  %7431 = vmatmul.bf16.gmra.mxu2 %v10496_v44 }
 0x78c   : > { %7464 = vmatmul.bf16.gmra.mxu3 %v10499_v23 }
 0x78d   : > { %7511 = vst [vmem:[#allocation14 + $0x70] sm:$0xff] %v7493_v54 }
 0x78e   : > { %v7178_v57 = vpop.f32.mrf.mxu2  ;;  %v7114_v51 = vpop.f32.mrf.mxu0 }
 0x78f   : > { %v7179_v27 = vadd.f32 %v7178_v57, %v7146_v37  ;;  %v7211_v21 = vpop.f32.mrf.mxu3  ;;  %v7147_v55 = vpop.f32.mrf.mxu1 }
 0x791   : > { %v7212_v34 = vadd.f32 %v7211_v21, %v7179_v27 }
 0x793   : > { %v7495_v49 = vmax.f32 %v7212_v34, 0.0 }
 0x795   : > { %7513 = vst [vmem:[#allocation14 + $0x80] sm:$0x7] %v7495_v49 }
 0x796   : > { %v7180_v1 = vpop.f32.mrf.mxu2  ;;  %v7224_v7 = vpop.f32.mrf.mxu0 }
 0x797   : > { %v7213_v60 = vpop.f32.mrf.mxu3  ;;  %v7225_v44 = vadd.f32 %v7224_v7, %v10643_v0  ;;  %v7257_v30 = vpop.f32.mrf.mxu1 }
 0x799   : > { %v7258_v23 = vadd.f32 %v7257_v30, %v7225_v44  ;;  %7370 = vmatmul.bf16.gmra.mxu0 %v10518_v45 }
 0x79a   : > { %7403 = vmatmul.bf16.gmra.mxu1 %v10522_v12 }
 0x79b   : > { %7436 = vmatmul.bf16.gmra.mxu2 %v10524_v63 }
 0x79c   : > { %7469 = vmatmul.bf16.gmra.mxu3 %v10527_v31 }
 0x79e   : > { %v7290_v11 = vpop.f32.mrf.mxu2  ;;  %v7226_v39 = vpop.f32.mrf.mxu0 }
 0x79f   : > { %v7291_v33 = vadd.f32 %v7290_v11, %v7258_v23  ;;  %v7323_v26 = vpop.f32.mrf.mxu3  ;;  %v7227_v56 = vadd.f32 %v7226_v39, %v10643_v0  ;;  %v7259_v17 = vpop.f32.mrf.mxu1 }
 0x7a1   : > { %v10651_v13 = vadd.f32 %v7323_v26, %v7291_v33  ;;  %v7260_v35 = vadd.f32 %v7259_v17, %v7227_v56 }
 0x7a6   : > { %v7292_v47 = vpop.f32.mrf.mxu2  ;;  %v7229_v45 = vpop.f32.mrf.mxu0 }
 0x7a7   : > { %v7293_v22 = vadd.f32 %v7292_v47, %v7260_v35  ;;  %v7325_v9 = vpop.f32.mrf.mxu3  ;;  %v7230_v12 = vadd.f32 %v7229_v45, %v10643_v0  ;;  %v7262_v36 = vpop.f32.mrf.mxu1 }
 0x7a9   : > { %v10654_v63 = vadd.f32 %v7325_v9, %v7293_v22  ;;  %v7263_v31 = vadd.f32 %v7262_v36, %v7230_v12  ;;  %7375 = vmatmul.bf16.gmra.mxu0 %v10566_v24 }
 0x7aa   : > { %7408 = vmatmul.bf16.gmra.mxu1 %v10568_v42 }
 0x7ab   : > { %7441 = vmatmul.bf16.gmra.mxu2 %v10570_v19 }
 0x7ac   : > { %7474 = vmatmul.bf16.gmra.mxu3 %v10879_v43 }
 0x7ae   : > { %v7295_v15 = vpop.f32.mrf.mxu2  ;;  %v7231_v29 = vpop.f32.mrf.mxu0 }
 0x7af   : > { %v7296_v4 = vadd.f32 %v7295_v15, %v7263_v31  ;;  %v7328_v8 = vpop.f32.mrf.mxu3  ;;  %v7232_v2 = vadd.f32 %v7231_v29, %v10643_v0  ;;  %v7264_v40 = vpop.f32.mrf.mxu1 }
 0x7b1   : > { %v10661_v10 = vadd.f32 %v7328_v8, %v7296_v4  ;;  %v7265_v53 = vadd.f32 %v7264_v40, %v7232_v2 }
 0x7b6   : > { %v7297_v16 = vpop.f32.mrf.mxu2  ;;  %v7234_v24 = vpop.f32.mrf.mxu0 }
 0x7b7   : > { %v7298_v25 = vadd.f32 %v7297_v16, %v7265_v53  ;;  %v7330_v48 = vpop.f32.mrf.mxu3  ;;  %v7235_v42 = vadd.f32 %v7234_v24, %v10643_v0  ;;  %v7267_v32 = vpop.f32.mrf.mxu1 }
 0x7b9   : > { %v10664_v19 = vadd.f32 %v7330_v48, %v7298_v25  ;;  %v7268_v38 = vadd.f32 %v7267_v32, %v7235_v42 }
 0x7be   : > { %v7300_v28 = vpop.f32.mrf.mxu2  ;;  %v7236_v41 = vpop.f32.mrf.mxu0 }
 0x7bf   : > { %v7301_v58 = vadd.f32 %v7300_v28, %v7268_v38  ;;  %v7333_v46 = vpop.f32.mrf.mxu3  ;;  %v7237_v61 = vadd.f32 %v7236_v41, %v10643_v0  ;;  %v7269_v3 = vpop.f32.mrf.mxu1 }
 0x7c1   : > { %v10667_v59 = vadd.f32 %v7333_v46, %v7301_v58  ;;  %v7270_v20 = vadd.f32 %v7269_v3, %v7237_v61 }
 0x7c6   : > { %v7302_v14 = vpop.f32.mrf.mxu2  ;;  %v7239_v18 = vpop.f32.mrf.mxu0 }
 0x7c7   : > { %v7303_v62 = vadd.f32 %v7302_v14, %v7270_v20  ;;  %v7335_v5 = vpop.f32.mrf.mxu3  ;;  %v7240_v50 = vadd.f32 %v7239_v18, %v10643_v0  ;;  %v7272_v6 = vpop.f32.mrf.mxu1 }
 0x7c9   : > { %v10670_v52 = vadd.f32 %v7335_v5, %v7303_v62  ;;  %v7273_v54 = vadd.f32 %v7272_v6, %v7240_v50 }
 0x7ce   : > { %v7305_v37 = vpop.f32.mrf.mxu2  ;;  %v7241_v21 = vpop.f32.mrf.mxu0 }
 0x7cf   : > { %v7306_v57 = vadd.f32 %v7305_v37, %v7273_v54  ;;  %v7338_v27 = vpop.f32.mrf.mxu3  ;;  %v7242_v51 = vadd.f32 %v7241_v21, %v10643_v0  ;;  %v7274_v55 = vpop.f32.mrf.mxu1 }
 0x7d1   : > { %v10673_v34 = vadd.f32 %v7338_v27, %v7306_v57  ;;  %v7275_v49 = vadd.f32 %v7274_v55, %v7242_v51 }
 0x7d6   : > { %v7307_v1 = vpop.f32.mrf.mxu2  ;;  %v7244_v44 = vpop.f32.mrf.mxu0 }
 0x7d7   : > { %v7308_v60 = vadd.f32 %v7307_v1, %v7275_v49  ;;  %v7340_v7 = vpop.f32.mrf.mxu3  ;;  %v7245_v30 = vadd.f32 %v7244_v44, %v10643_v0  ;;  %v7277_v23 = vpop.f32.mrf.mxu1 }
 0x7d9   : > { %v10676_v11 = vadd.f32 %v7340_v7, %v7308_v60  ;;  %v7278_v33 = vadd.f32 %v7277_v23, %v7245_v30 }
 0x7de   : > { %v7310_v26 = vpop.f32.mrf.mxu2  ;;  %v7246_v17 = vpop.f32.mrf.mxu0 }
 0x7df   : > { %v7311_v39 = vadd.f32 %v7310_v26, %v7278_v33  ;;  %v7343_v56 = vpop.f32.mrf.mxu3  ;;  %v7279_v35 = vpop.f32.mrf.mxu1 }
 0x7e1   : > { %v10678_v47 = vadd.f32 %v7343_v56, %v7311_v39 }
 0x7e6   : > { %v7312_v22 = vpop.f32.mrf.mxu2  ;;  %v7356_v45 = vpop.f32.mrf.mxu0 }
 0x7e7   : > { %v7345_v9 = vpop.f32.mrf.mxu3  ;;  %v7389_v12 = vpop.f32.mrf.mxu1  ;;  %v7357_v36 = vadd.f32 %v7356_v45, %v10651_v13 }
 0x7e9   : > { %v7390_v31 = vadd.f32 %v7389_v12, %v7357_v36 }
 0x7ee   : > { %v7422_v43 = vpop.f32.mrf.mxu2  ;;  %v7358_v4 = vpop.f32.mrf.mxu0 }
 0x7ef   : > { %v7423_v0 = vadd.f32 %v7422_v43, %v7390_v31  ;;  %v7455_v15 = vpop.f32.mrf.mxu3  ;;  %v7391_v8 = vpop.f32.mrf.mxu1  ;;  %v7359_v2 = vadd.f32 %v7358_v4, %v10654_v63 }
 0x7f1   : > { %v7456_v29 = vadd.f32 %v7455_v15, %v7423_v0  ;;  %v7392_v53 = vadd.f32 %v7391_v8, %v7359_v2 }
 0x7f3   : > { %v7480_v40 = vmax.f32 %v7456_v29, 0.0 }
 0x7f5   : > { %7498 = vst [vmem:[#allocation14 + $0x8] sm:$0xff] %v7480_v40 }
 0x7f6   : > { %v7424_v16 = vpop.f32.mrf.mxu2  ;;  %v7361_v24 = vpop.f32.mrf.mxu0 }
 0x7f7   : > { %v7425_v25 = vadd.f32 %v7424_v16, %v7392_v53  ;;  %v7457_v48 = vpop.f32.mrf.mxu3  ;;  %v7394_v42 = vpop.f32.mrf.mxu1  ;;  %v7362_v13 = vadd.f32 %v7361_v24, %v10661_v10 }
 0x7f9   : > { %v7458_v32 = vadd.f32 %v7457_v48, %v7425_v25  ;;  %v7395_v28 = vadd.f32 %v7394_v42, %v7362_v13 }
 0x7fb   : > { %v7482_v38 = vmax.f32 %v7458_v32, 0.0 }
 0x7fd   : > { %7500 = vst [vmem:[#allocation14 + $0x18] sm:$0xff] %v7482_v38 }
 0x7fe   : > { %v7427_v58 = vpop.f32.mrf.mxu2  ;;  %v7363_v61 = vpop.f32.mrf.mxu0 }
 0x7ff   : > { %v7428_v46 = vadd.f32 %v7427_v58, %v7395_v28  ;;  %v7460_v41 = vpop.f32.mrf.mxu3  ;;  %v7396_v3 = vpop.f32.mrf.mxu1  ;;  %v7364_v20 = vadd.f32 %v7363_v61, %v10664_v19 }
 0x801   : > { %v7461_v63 = vadd.f32 %v7460_v41, %v7428_v46  ;;  %v7397_v62 = vadd.f32 %v7396_v3, %v7364_v20 }
 0x803   : > { %v7484_v14 = vmax.f32 %v7461_v63, 0.0 }
 0x805   : > { %7502 = vst [vmem:[#allocation14 + $0x28] sm:$0xff] %v7484_v14 }
 0x806   : > { %v7429_v5 = vpop.f32.mrf.mxu2  ;;  %v7366_v6 = vpop.f32.mrf.mxu0 }
 0x807   : > { %v7430_v18 = vadd.f32 %v7429_v5, %v7397_v62  ;;  %v7462_v50 = vpop.f32.mrf.mxu3  ;;  %v7399_v54 = vpop.f32.mrf.mxu1  ;;  %v7367_v37 = vadd.f32 %v7366_v6, %v10667_v59 }
 0x809   : > { %v7463_v10 = vadd.f32 %v7462_v50, %v7430_v18  ;;  %v7400_v27 = vadd.f32 %v7399_v54, %v7367_v37 }
 0x80b   : > { %v7486_v57 = vmax.f32 %v7463_v10, 0.0 }
 0x80d   : > { %7504 = vst [vmem:[#allocation14 + $0x38] sm:$0xff] %v7486_v57 }
 0x80e   : > { %v7432_v21 = vpop.f32.mrf.mxu2  ;;  %v7368_v49 = vpop.f32.mrf.mxu0 }
 0x80f   : > { %v7433_v51 = vadd.f32 %v7432_v21, %v7400_v27  ;;  %v7465_v55 = vpop.f32.mrf.mxu3  ;;  %v7401_v1 = vpop.f32.mrf.mxu1  ;;  %v7369_v60 = vadd.f32 %v7368_v49, %v10670_v52 }
 0x811   : > { %v7466_v19 = vadd.f32 %v7465_v55, %v7433_v51  ;;  %v7402_v44 = vadd.f32 %v7401_v1, %v7369_v60 }
 0x813   : > { %v7488_v7 = vmax.f32 %v7466_v19, 0.0 }
 0x815   : > { %7506 = vst [vmem:[#allocation14 + $0x48] sm:$0xff] %v7488_v7 }
 0x816   : > { %v7434_v30 = vpop.f32.mrf.mxu2  ;;  %v7371_v26 = vpop.f32.mrf.mxu0 }
 0x817   : > { %v7435_v23 = vadd.f32 %v7434_v30, %v7402_v44  ;;  %v7467_v33 = vpop.f32.mrf.mxu3  ;;  %v7404_v39 = vpop.f32.mrf.mxu1  ;;  %v7372_v56 = vadd.f32 %v7371_v26, %v10673_v34 }
 0x819   : > { %v7468_v59 = vadd.f32 %v7467_v33, %v7435_v23  ;;  %v7405_v35 = vadd.f32 %v7404_v39, %v7372_v56 }
 0x81b   : > { %v7490_v17 = vmax.f32 %v7468_v59, 0.0 }
 0x81d   : > { %7508 = vst [vmem:[#allocation14 + $0x58] sm:$0xff] %v7490_v17 }
 0x81e   : > { %v7437_v22 = vpop.f32.mrf.mxu2  ;;  %v7373_v12 = vpop.f32.mrf.mxu0 }
 0x81f   : > { %v7438_v9 = vadd.f32 %v7437_v22, %v7405_v35  ;;  %v7470_v45 = vpop.f32.mrf.mxu3  ;;  %v7406_v36 = vpop.f32.mrf.mxu1  ;;  %v7374_v31 = vadd.f32 %v7373_v12, %v10676_v11 }
 0x821   : > { %v7471_v52 = vadd.f32 %v7470_v45, %v7438_v9  ;;  %v7407_v0 = vadd.f32 %v7406_v36, %v7374_v31 }
 0x823   : > { %v7492_v43 = vmax.f32 %v7471_v52, 0.0 }
 0x825   : > { %7510 = vst [vmem:[#allocation14 + $0x68] sm:$0xff] %v7492_v43 }
 0x826   : > { %v7439_v15 = vpop.f32.mrf.mxu2  ;;  %v7376_v29 = vpop.f32.mrf.mxu0 }
 0x827   : > { %v7440_v4 = vadd.f32 %v7439_v15, %v7407_v0  ;;  %v7472_v8 = vpop.f32.mrf.mxu3  ;;  %v7409_v2 = vpop.f32.mrf.mxu1  ;;  %v7377_v40 = vadd.f32 %v7376_v29, %v10678_v47 }
 0x829   : > { %v7473_v34 = vadd.f32 %v7472_v8, %v7440_v4  ;;  %v7410_v16 = vadd.f32 %v7409_v2, %v7377_v40 }
 0x82b   : > { %v7494_v53 = vmax.f32 %v7473_v34, 0.0 }
 0x82d   : > { %7512 = vst [vmem:[#allocation14 + $0x78] sm:$0xff] %v7494_v53 }
 0x82e   : > { %v7442_v25 = vpop.f32.mrf.mxu2  ;;  %v7378_v42 = vpop.f32.mrf.mxu0 }
 0x82f   : > { %v7443_v48 = vadd.f32 %v7442_v25, %v7410_v16  ;;  %v7475_v24 = vpop.f32.mrf.mxu3  ;;  %v7411_v32 = vpop.f32.mrf.mxu1 }
 0x831   : > { %v7476_v11 = vadd.f32 %v7475_v24, %v7443_v48 }
 0x833   : > { %v7496_v13 = vmax.f32 %v7476_v11, 0.0 }
 0x835   : > { %7514 = vst [vmem:[#allocation14 + $0x88] sm:$0x7] %v7496_v13 }
 0x836   : > { %v7444_v38 = vpop.f32.mrf.mxu2 }
 0x837   : > { %v7477_v28 = vpop.f32.mrf.mxu3 }
 0x838 PF: > { %p8520_p4 = scmp.eq.s32.totalorder %s8902_s25, 3  ;;  %s8845_s26 = smov [#allocation14]  }
 0x839   : > { %s7520_s30 = sshll.u32 %s8845_s26, 4  ;;  %s7522_s7 = sshll.u32 %s10712_s6, 4  ;;  %s7521_s30 = int_to_ptr.vmem [resolvable:$true] %s7520_s30  ;;  %s7523_s7 = int_to_ptr.hbm [resolvable:$true] %s7522_s7 }
 0x83a   : > { %s8846_s8 = smov 256   ;;  %s8847_s12 = smov 16  }
 0x83b   : > { %8488 = dma.vmem_to_hbm [thread:$0]  (%p8520_p4), %s7521_s30, 2304, %s7523_s7, [#allocation5], %s8846_s8, %s8846_s8, %s8847_s12  }
 0x83c   : > { %8814 = dma.done.wait (%p8520_p4), [#allocation5], 2304  }
 0x83d   : > { %8816 = vsyncadd (%p8520_p4), [#allocation5], 4294964992 }
 0x83e PF: > { %p22_p5 = scmp.ge.s32.totalorder %s8948_s9, 6   ;;  %s10880_s21 = smov %s8823_s22 }
 0x83f   : > { %s10881_s22 = smov %s8827_s23  ;;  %s10882_s23 = smov %s8961_s14 }
 0x840   : > { %s10883_s24 = smov %s8948_s9  ;;  %24 = sbr.rel (!%p22_p5) target bundleno = 13 (0xd), region = 118 }
 0x845   :  { %7539 = vsyncpa [#allocation4], 1 }
 0x846   :  { %7541 = vsyncpa [#allocation4 + $0x1], 1 }
 0x847   :  { %7542 = vsyncpa [#allocation7], 1 }
 0x848   :  { %7544 = vsyncpa [#allocation7 + $0x1], 1 }
 0x849   :  { %7545 = vsyncpa [#allocation10], 1 }
 0x84a   :  { %7546 = vsyncpa [#allocation13], 1 }
 0x84b   :  { %7547 = vsyncpa [#allocation5], 1 }
 0x84c   :  { %7549 = vsyncpa [#allocation5 + $0x1], 1 }

</bundles_post_ra>
